<compile_context>
chip_gen: v6e
topology: v6e:2x2x1
jax: 0.10.0
libtpu: 0.0.40
codegen_flags: <defaults>
</compile_context>

<pallas_src>
import math
from functools import partial

import jax
import jax.numpy as jnp
from jax.experimental import pallas as pl
from jax.experimental.pallas import tpu as pltpu

LANE = 128  # TPU lane width; all output/channel dims are zero-padded to this.


# --------------- fused conv5x5 + bias + ReLU + 2x2 max-pool -----------------

def _conv_pool_kernel(x_ref, w_ref, b_ref, out_ref, *, wh, oh, ph, pw):
    """One image per grid step.

    x_ref  : (H*wh, 6*Cp)    bf16 parity-shift stack (plane r holds column 2p+r)
    w_ref  : (10, 6*Cp, 128) bf16; taps 0..4 = even output column, 5..9 = odd
    b_ref  : (1, 128)        f32 bias (zero padded)
    out_ref: (ph, wh, 128)   bf16 pooled output (invalid half-columns zeroed)
    """
    ohw = oh * wh
    acc_even = jnp.zeros((ohw, LANE), jnp.float32)   # conv at even output cols
    acc_odd = jnp.zeros((ohw, LANE), jnp.float32)    # conv at odd  output cols
    for ky in range(5):                              # 5 vertical taps, aligned rows
        lhs = x_ref[pl.ds(ky * wh, ohw), :]          # (ohw, 6*Cp) bf16
        acc_even += jnp.dot(lhs, w_ref[ky], preferred_element_type=jnp.float32)
        acc_odd += jnp.dot(lhs, w_ref[5 + ky], preferred_element_type=jnp.float32)

    # Horizontal 2-max (even vs odd column of each pool pair), then bias + ReLU.
    # max / ReLU commute with the per-channel bias add, so this equals
    # maxpool(relu(conv + b)).
    act = jnp.maximum(jnp.maximum(acc_even, acc_odd) + b_ref[...], 0.0)

    # Zero the invalid half-columns p in [pw, wh) so downstream padding stays 0.
    p_idx = jax.lax.broadcasted_iota(jnp.int32, (ohw, LANE), 0) & (wh - 1)
    act = jnp.where(p_idx < pw, act, 0.0)

    # Vertical 2-max: output rows 2p and 2p+1 are two aligned slabs of wh rows.
    for p in range(ph):
        top = act[(2 * p) * wh:(2 * p + 1) * wh, :]
        bot = act[(2 * p + 1) * wh:(2 * p + 2) * wh, :]
        out_ref[p, :, :] = jnp.maximum(top, bot).astype(out_ref.dtype)


def _parity_shift_stack(x):
    """(N, H, Ws, Cp) -> (N, H*Wh, 6*Cp) with plane r holding x[:, h, 2p+r, :]."""
    n, h, ws, cp = x.shape
    wh = ws // 2
    xp = jnp.pad(x, ((0, 0), (0, 0), (0, 4), (0, 0)))          # shift headroom
    planes = [xp[:, :, r:r + ws:2, :] for r in range(6)]        # each (N, H, Wh, Cp)
    x6 = jnp.concatenate(planes, axis=-1)                       # (N, H, Wh, 6*Cp)
    return x6.reshape(n, h * wh, 6 * cp)


def conv5x5_relu_pool2(x, w_taps, b_pad, *, w_valid):
    """x: (N, H, Ws, Cp) bf16 NHWC (channels zero-padded).  Returns
    (N, ph, Ws//2, 128) bf16 pooled activation, zero outside the valid region."""
    n, h_s, w_s, cp = x.shape
    wh = w_s // 2
    oh, ow = h_s - 4, w_valid - 4
    assert wh & (wh - 1) == 0, "half-width must be a power of two"
    assert oh % 2 == 0 and ow % 2 == 0
    ph, pw = oh // 2, ow // 2
    k6 = 6 * cp
    rows = h_s * wh
    assert 4 * wh + oh * wh <= rows        # every in-kernel tap slice is in bounds

    x6 = _parity_shift_stack(x)            # (N, rows, 6*Cp) bf16
    kern = partial(_conv_pool_kernel, wh=wh, oh=oh, ph=ph, pw=pw)
    return pl.pallas_call(
        kern,
        out_shape=jax.ShapeDtypeStruct((n, ph, wh, LANE), jnp.bfloat16),
        grid=(n,),
        in_specs=[
            pl.BlockSpec((None, rows, k6), lambda b: (b, 0, 0)),
            pl.BlockSpec((10, k6, LANE), lambda b: (0, 0, 0)),
            pl.BlockSpec((1, LANE), lambda b: (0, 0)),
        ],
        out_specs=pl.BlockSpec((None, ph, wh, LANE), lambda b: (b, 0, 0, 0)),
        compiler_params=pltpu.CompilerParams(dimension_semantics=("parallel",)),
    )(x6, w_taps, b_pad)


# ----------------------------- fused fc1+fc2+fc3 ----------------------------

def _fc3_kernel(x_ref, w1_ref, b1_ref, w2_ref, b2_ref, w3_ref, b3_ref, out_ref):
    h = jnp.dot(x_ref[...], w1_ref[...], preferred_element_type=jnp.float32)
    h = jnp.maximum(h + b1_ref[...], 0.0).astype(jnp.bfloat16)
    h = jnp.dot(h, w2_ref[...], preferred_element_type=jnp.float32)
    h = jnp.maximum(h + b2_ref[...], 0.0).astype(jnp.bfloat16)
    h = jnp.dot(h, w3_ref[...], preferred_element_type=jnp.float32)
    out_ref[...] = h + b3_ref[...]


def fc_head(xflat, w1, b1, w2, b2, w3, b3):
    n, k = xflat.shape
    tm = min(n, 128)
    return pl.pallas_call(
        _fc3_kernel,
        out_shape=jax.ShapeDtypeStruct((n, LANE), jnp.float32),
        grid=(pl.cdiv(n, tm),),
        in_specs=[
            pl.BlockSpec((tm, k), lambda i: (i, 0)),
            pl.BlockSpec((k, LANE), lambda i: (0, 0)),
            pl.BlockSpec((1, LANE), lambda i: (0, 0)),
            pl.BlockSpec((LANE, LANE), lambda i: (0, 0)),
            pl.BlockSpec((1, LANE), lambda i: (0, 0)),
            pl.BlockSpec((LANE, LANE), lambda i: (0, 0)),
            pl.BlockSpec((1, LANE), lambda i: (0, 0)),
        ],
        out_specs=pl.BlockSpec((tm, LANE), lambda i: (i, 0)),
        compiler_params=pltpu.CompilerParams(dimension_semantics=("parallel",)),
    )(xflat, w1, b1, w2, b2, w3, b3)


# ----------------------------- params / prep --------------------------------

def init_params(key):
    """PyTorch-layout f32 parameters (conv: (OC,C,KH,KW), fc: (out,in))."""
    def uinit(k, shape, fan_in):
        bound = 1.0 / math.sqrt(fan_in)
        return jax.random.uniform(k, shape, jnp.float32, -bound, bound)

    ks = jax.random.split(key, 10)
    return {
        "conv1_w": uinit(ks[0], (6, 3, 5, 5), 3 * 25),
        "conv1_b": uinit(ks[1], (6,), 3 * 25),
        "conv2_w": uinit(ks[2], (16, 6, 5, 5), 6 * 25),
        "conv2_b": uinit(ks[3], (16,), 6 * 25),
        "fc1_w":   uinit(ks[4], (120, 400), 400),
        "fc1_b":   uinit(ks[5], (120,), 400),
        "fc2_w":   uinit(ks[6], (84, 120), 120),
        "fc2_b":   uinit(ks[7], (84,), 120),
        "fc3_w":   uinit(ks[8], (10, 84), 84),
        "fc3_b":   uinit(ks[9], (10,), 84),
    }


def prepare_params(p):
    """Convert PyTorch-layout f32 params into padded bf16 kernel operands."""
    def conv_taps(w, b, cp):
        oc, cin, _, _ = w.shape
        wt = jnp.transpose(w, (2, 3, 1, 0))                                  # (5,5,C,OC)
        wt = jnp.pad(wt, ((0, 0), (0, 0), (0, cp - cin), (0, LANE - oc)))    # (5,5,cp,128)
        wp = jnp.zeros((2, 5, 6, cp, LANE), jnp.float32)
        wp = wp.at[0, :, 0:5].set(wt)   # even output column: plane r = kx
        wp = wp.at[1, :, 1:6].set(wt)   # odd  output column: plane r = kx + 1
        wp = wp.reshape(10, 6 * cp, LANE).astype(jnp.bfloat16)
        bp = jnp.pad(b, (0, LANE - oc)).astype(jnp.float32).reshape(1, LANE)
        return wp, bp

    c1_w, c1_b = conv_taps(p["conv1_w"], p["conv1_b"], 8)
    c2_w, c2_b = conv_taps(p["conv2_w"], p["conv2_b"], LANE)

    # fc1 consumes the padded NHWC flatten of pooled2 (N, 5, 8, 128); PyTorch
    # flattens NCHW (idx = c*25 + h*5 + w), so scatter the 400 real columns.
    w1 = jnp.transpose(p["fc1_w"].reshape(120, 16, 5, 5), (2, 3, 1, 0))      # (h,w,c,out)
    w1e = jnp.zeros((5, 8, LANE, LANE), jnp.float32).at[:, :5, :16, :120].set(w1)
    w1e = w1e.reshape(5 * 8 * LANE, LANE).astype(jnp.bfloat16)
    b1 = jnp.pad(p["fc1_b"], (0, LANE - 120)).astype(jnp.float32).reshape(1, LANE)

    w2 = jnp.zeros((LANE, LANE), jnp.float32).at[:120, :84].set(p["fc2_w"].T)
    b2 = jnp.pad(p["fc2_b"], (0, LANE - 84)).astype(jnp.float32).reshape(1, LANE)
    w3 = jnp.zeros((LANE, LANE), jnp.float32).at[:84, :10].set(p["fc3_w"].T)
    b3 = jnp.pad(p["fc3_b"], (0, LANE - 10)).astype(jnp.float32).reshape(1, LANE)

    return {"c1_w": c1_w, "c1_b": c1_b, "c2_w": c2_w, "c2_b": c2_b,
            "fc1_w": w1e, "fc1_b": b1,
            "fc2_w": w2.astype(jnp.bfloat16), "fc2_b": b2,
            "fc3_w": w3.astype(jnp.bfloat16), "fc3_b": b3}


# --------------------------------- forward ----------------------------------

@jax.jit
def simple_cnn_forward(prepared, x):
    n = x.shape[0]
    # One-time NCHW f32 -> NHWC bf16, channels zero-padded 3 -> 8.
    xh = jnp.transpose(x, (0, 2, 3, 1)).astype(jnp.bfloat16)
    xh = jnp.pad(xh, ((0, 0), (0, 0), (0, 0), (0, 5)))               # (N,32,32,8)
    p1 = conv5x5_relu_pool2(xh, prepared["c1_w"], prepared["c1_b"],
                            w_valid=32)                              # (N,14,16,128)
    p2 = conv5x5_relu_pool2(p1, prepared["c2_w"], prepared["c2_b"],
                            w_valid=14)                              # (N, 5, 8,128)
    xf = p2.reshape(n, 5 * 8 * LANE)                                 # padded flatten (free)
    logits = fc_head(xf, prepared["fc1_w"], prepared["fc1_b"],
                     prepared["fc2_w"], prepared["fc2_b"],
                     prepared["fc3_w"], prepared["fc3_b"])           # (N, 128) f32
    return logits[:, :10]


# ------------------------ pure-JAX (f32) reference ---------------------------

def reference_forward(p, x):
    def conv(h, w, b):
        y = jax.lax.conv_general_dilated(
            h, w, window_strides=(1, 1), padding="VALID",
            dimension_numbers=("NCHW", "OIHW", "NCHW"))
        return y + b[None, :, None, None]

    def pool(h):
        return jax.lax.reduce_window(h, -jnp.inf, jax.lax.max,
                                     (1, 1, 2, 2), (1, 1, 2, 2), "VALID")

    h = pool(jax.nn.relu(conv(x, p["conv1_w"], p["conv1_b"])))
    h = pool(jax.nn.relu(conv(h, p["conv2_w"], p["conv2_b"])))
    h = h.reshape(h.shape[0], -1)                                    # NCHW flatten
    h = jax.nn.relu(h @ p["fc1_w"].T + p["fc1_b"])
    h = jax.nn.relu(h @ p["fc2_w"].T + p["fc2_b"])
    return h @ p["fc3_w"].T + p["fc3_b"]


if __name__ == "__main__":
    key = jax.random.PRNGKey(0)
    k_params, k_x = jax.random.split(key)
    params = init_params(k_params)
    prepared = prepare_params(params)
    # fc1 expecting 16*5*5 features implies a 3x32x32 (CIFAR) input.
    x = jax.random.normal(k_x, (2, 3, 32, 32), dtype=jnp.float32)

    out = jax.block_until_ready(simple_cnn_forward(prepared, x))
    assert out.shape == (2, 10) and out.dtype == jnp.float32
    assert bool(jnp.all(jnp.isfinite(out)))

    # Correctness vs. the f32 PyTorch-semantics reference (kernel uses bf16
    # activations/weights with f32 accumulation, hence the loose tolerance).
    ref = jax.block_until_ready(reference_forward(params, x))
    max_err = float(jnp.max(jnp.abs(out - ref)))
    assert max_err < 5e-2, f"max abs error vs reference too large: {max_err}"

    print("KERNEL_OK")
</pallas_src>

<mosaic_0001>
module attributes {stable_mosaic.version = 11 : i64} {
  func.func @_conv_pool_kernel(%arg0: i32, %arg1: memref<1x512x48xbf16, #tpu.memory_space<vmem>>, %arg2: memref<10x48x128xbf16, #tpu.memory_space<vmem>>, %arg3: memref<1x128xf32, #tpu.memory_space<vmem>>, %arg4: memref<1x14x16x128xbf16, #tpu.memory_space<vmem>>) attributes {dimension_semantics = [#tpu.dimension_semantics<parallel>], iteration_bounds = array<i64: 2>, scalar_prefetch = 0 : i64, scratch_operands = 0 : i64, tpu.core_type = #tpu.core_type<tc>, window_params = [{transform_indices = @transform_0, window_bounds = array<i64: 1, 512, 48>}, {pipeline_mode = #tpu.pipeline_mode<synchronous>, transform_indices = @transform_1, window_bounds = array<i64: 10, 48, 128>}, {pipeline_mode = #tpu.pipeline_mode<synchronous>, transform_indices = @transform_2, window_bounds = array<i64: 1, 128>}, {transform_indices = @transform_3, window_bounds = array<i64: 1, 14, 16, 128>}]} {
    %cst = arith.constant 0.000000e+00 : f32
    %0 = vector.broadcast %cst : f32 to vector<448x128xf32>
    %cst_0 = arith.constant 0.000000e+00 : f32
    %1 = vector.broadcast %cst_0 : f32 to vector<448x128xf32>
    %c0 = arith.constant 0 : index
    %c0_1 = arith.constant 0 : index
    %c0_2 = arith.constant 0 : index
    %2 = vector.load %arg1[%c0, %c0_1, %c0_2] : memref<1x512x48xbf16, #tpu.memory_space<vmem>>, vector<1x448x48xbf16>
    %3 = vector.shape_cast %2 : vector<1x448x48xbf16> to vector<448x48xbf16>
    %c0_3 = arith.constant 0 : index
    %c0_4 = arith.constant 0 : index
    %c0_5 = arith.constant 0 : index
    %4 = vector.load %arg2[%c0_3, %c0_4, %c0_5] : memref<10x48x128xbf16, #tpu.memory_space<vmem>>, vector<1x48x128xbf16>
    %5 = vector.shape_cast %4 : vector<1x48x128xbf16> to vector<48x128xbf16>
    %cst_6 = arith.constant dense<0.000000e+00> : vector<448x128xf32>
    %6 = tpu.matmul %3, %5, %cst_6 {dimension_numbers = #tpu.dot_dimension_numbers<[1], [0], [0], [1], [0, 0, 1, 1], [], []>} : vector<448x48xbf16>, vector<48x128xbf16>, vector<448x128xf32> -> vector<448x128xf32>
    %7 = arith.addf %0, %6 : vector<448x128xf32>
    %c5 = arith.constant 5 : index
    %c0_7 = arith.constant 0 : index
    %c0_8 = arith.constant 0 : index
    %8 = vector.load %arg2[%c5, %c0_7, %c0_8] : memref<10x48x128xbf16, #tpu.memory_space<vmem>>, vector<1x48x128xbf16>
    %9 = vector.shape_cast %8 : vector<1x48x128xbf16> to vector<48x128xbf16>
    %cst_9 = arith.constant dense<0.000000e+00> : vector<448x128xf32>
    %10 = tpu.matmul %3, %9, %cst_9 {dimension_numbers = #tpu.dot_dimension_numbers<[1], [0], [0], [1], [0, 0, 1, 1], [], []>} : vector<448x48xbf16>, vector<48x128xbf16>, vector<448x128xf32> -> vector<448x128xf32>
    %11 = arith.addf %1, %10 : vector<448x128xf32>
    %c0_10 = arith.constant 0 : index
    %c16 = arith.constant 16 : index
    %c0_11 = arith.constant 0 : index
    %12 = vector.load %arg1[%c0_10, %c16, %c0_11] : memref<1x512x48xbf16, #tpu.memory_space<vmem>>, vector<1x448x48xbf16>
    %13 = vector.shape_cast %12 : vector<1x448x48xbf16> to vector<448x48xbf16>
    %c1 = arith.constant 1 : index
    %c0_12 = arith.constant 0 : index
    %c0_13 = arith.constant 0 : index
    %14 = vector.load %arg2[%c1, %c0_12, %c0_13] : memref<10x48x128xbf16, #tpu.memory_space<vmem>>, vector<1x48x128xbf16>
    %15 = vector.shape_cast %14 : vector<1x48x128xbf16> to vector<48x128xbf16>
    %cst_14 = arith.constant dense<0.000000e+00> : vector<448x128xf32>
    %16 = tpu.matmul %13, %15, %cst_14 {dimension_numbers = #tpu.dot_dimension_numbers<[1], [0], [0], [1], [0, 0, 1, 1], [], []>} : vector<448x48xbf16>, vector<48x128xbf16>, vector<448x128xf32> -> vector<448x128xf32>
    %17 = arith.addf %7, %16 : vector<448x128xf32>
    %c6 = arith.constant 6 : index
    %c0_15 = arith.constant 0 : index
    %c0_16 = arith.constant 0 : index
    %18 = vector.load %arg2[%c6, %c0_15, %c0_16] : memref<10x48x128xbf16, #tpu.memory_space<vmem>>, vector<1x48x128xbf16>
    %19 = vector.shape_cast %18 : vector<1x48x128xbf16> to vector<48x128xbf16>
    %cst_17 = arith.constant dense<0.000000e+00> : vector<448x128xf32>
    %20 = tpu.matmul %13, %19, %cst_17 {dimension_numbers = #tpu.dot_dimension_numbers<[1], [0], [0], [1], [0, 0, 1, 1], [], []>} : vector<448x48xbf16>, vector<48x128xbf16>, vector<448x128xf32> -> vector<448x128xf32>
    %21 = arith.addf %11, %20 : vector<448x128xf32>
    %c0_18 = arith.constant 0 : index
    %c32 = arith.constant 32 : index
    %c0_19 = arith.constant 0 : index
    %22 = vector.load %arg1[%c0_18, %c32, %c0_19] : memref<1x512x48xbf16, #tpu.memory_space<vmem>>, vector<1x448x48xbf16>
    %23 = vector.shape_cast %22 : vector<1x448x48xbf16> to vector<448x48xbf16>
    %c2 = arith.constant 2 : index
    %c0_20 = arith.constant 0 : index
    %c0_21 = arith.constant 0 : index
    %24 = vector.load %arg2[%c2, %c0_20, %c0_21] : memref<10x48x128xbf16, #tpu.memory_space<vmem>>, vector<1x48x128xbf16>
    %25 = vector.shape_cast %24 : vector<1x48x128xbf16> to vector<48x128xbf16>
    %cst_22 = arith.constant dense<0.000000e+00> : vector<448x128xf32>
    %26 = tpu.matmul %23, %25, %cst_22 {dimension_numbers = #tpu.dot_dimension_numbers<[1], [0], [0], [1], [0, 0, 1, 1], [], []>} : vector<448x48xbf16>, vector<48x128xbf16>, vector<448x128xf32> -> vector<448x128xf32>
    %27 = arith.addf %17, %26 : vector<448x128xf32>
    %c7 = arith.constant 7 : index
    %c0_23 = arith.constant 0 : index
    %c0_24 = arith.constant 0 : index
    %28 = vector.load %arg2[%c7, %c0_23, %c0_24] : memref<10x48x128xbf16, #tpu.memory_space<vmem>>, vector<1x48x128xbf16>
    %29 = vector.shape_cast %28 : vector<1x48x128xbf16> to vector<48x128xbf16>
    %cst_25 = arith.constant dense<0.000000e+00> : vector<448x128xf32>
    %30 = tpu.matmul %23, %29, %cst_25 {dimension_numbers = #tpu.dot_dimension_numbers<[1], [0], [0], [1], [0, 0, 1, 1], [], []>} : vector<448x48xbf16>, vector<48x128xbf16>, vector<448x128xf32> -> vector<448x128xf32>
    %31 = arith.addf %21, %30 : vector<448x128xf32>
    %c0_26 = arith.constant 0 : index
    %c48 = arith.constant 48 : index
    %c0_27 = arith.constant 0 : index
    %32 = vector.load %arg1[%c0_26, %c48, %c0_27] : memref<1x512x48xbf16, #tpu.memory_space<vmem>>, vector<1x448x48xbf16>
    %33 = vector.shape_cast %32 : vector<1x448x48xbf16> to vector<448x48xbf16>
    %c3 = arith.constant 3 : index
    %c0_28 = arith.constant 0 : index
    %c0_29 = arith.constant 0 : index
    %34 = vector.load %arg2[%c3, %c0_28, %c0_29] : memref<10x48x128xbf16, #tpu.memory_space<vmem>>, vector<1x48x128xbf16>
    %35 = vector.shape_cast %34 : vector<1x48x128xbf16> to vector<48x128xbf16>
    %cst_30 = arith.constant dense<0.000000e+00> : vector<448x128xf32>
    %36 = tpu.matmul %33, %35, %cst_30 {dimension_numbers = #tpu.dot_dimension_numbers<[1], [0], [0], [1], [0, 0, 1, 1], [], []>} : vector<448x48xbf16>, vector<48x128xbf16>, vector<448x128xf32> -> vector<448x128xf32>
    %37 = arith.addf %27, %36 : vector<448x128xf32>
    %c8 = arith.constant 8 : index
    %c0_31 = arith.constant 0 : index
    %c0_32 = arith.constant 0 : index
    %38 = vector.load %arg2[%c8, %c0_31, %c0_32] : memref<10x48x128xbf16, #tpu.memory_space<vmem>>, vector<1x48x128xbf16>
    %39 = vector.shape_cast %38 : vector<1x48x128xbf16> to vector<48x128xbf16>
    %cst_33 = arith.constant dense<0.000000e+00> : vector<448x128xf32>
    %40 = tpu.matmul %33, %39, %cst_33 {dimension_numbers = #tpu.dot_dimension_numbers<[1], [0], [0], [1], [0, 0, 1, 1], [], []>} : vector<448x48xbf16>, vector<48x128xbf16>, vector<448x128xf32> -> vector<448x128xf32>
    %41 = arith.addf %31, %40 : vector<448x128xf32>
    %c0_34 = arith.constant 0 : index
    %c64 = arith.constant 64 : index
    %c0_35 = arith.constant 0 : index
    %42 = vector.load %arg1[%c0_34, %c64, %c0_35] : memref<1x512x48xbf16, #tpu.memory_space<vmem>>, vector<1x448x48xbf16>
    %43 = vector.shape_cast %42 : vector<1x448x48xbf16> to vector<448x48xbf16>
    %c4 = arith.constant 4 : index
    %c0_36 = arith.constant 0 : index
    %c0_37 = arith.constant 0 : index
    %44 = vector.load %arg2[%c4, %c0_36, %c0_37] : memref<10x48x128xbf16, #tpu.memory_space<vmem>>, vector<1x48x128xbf16>
    %45 = vector.shape_cast %44 : vector<1x48x128xbf16> to vector<48x128xbf16>
    %cst_38 = arith.constant dense<0.000000e+00> : vector<448x128xf32>
    %46 = tpu.matmul %43, %45, %cst_38 {dimension_numbers = #tpu.dot_dimension_numbers<[1], [0], [0], [1], [0, 0, 1, 1], [], []>} : vector<448x48xbf16>, vector<48x128xbf16>, vector<448x128xf32> -> vector<448x128xf32>
    %47 = arith.addf %37, %46 : vector<448x128xf32>
    %c9 = arith.constant 9 : index
    %c0_39 = arith.constant 0 : index
    %c0_40 = arith.constant 0 : index
    %48 = vector.load %arg2[%c9, %c0_39, %c0_40] : memref<10x48x128xbf16, #tpu.memory_space<vmem>>, vector<1x48x128xbf16>
    %49 = vector.shape_cast %48 : vector<1x48x128xbf16> to vector<48x128xbf16>
    %cst_41 = arith.constant dense<0.000000e+00> : vector<448x128xf32>
    %50 = tpu.matmul %43, %49, %cst_41 {dimension_numbers = #tpu.dot_dimension_numbers<[1], [0], [0], [1], [0, 0, 1, 1], [], []>} : vector<448x48xbf16>, vector<48x128xbf16>, vector<448x128xf32> -> vector<448x128xf32>
    %51 = arith.addf %41, %50 : vector<448x128xf32>
    %52 = arith.maximumf %47, %51 : vector<448x128xf32>
    %c0_42 = arith.constant 0 : index
    %c0_43 = arith.constant 0 : index
    %53 = vector.load %arg3[%c0_42, %c0_43] : memref<1x128xf32, #tpu.memory_space<vmem>>, vector<1x128xf32>
    %54 = vector.broadcast %53 : vector<1x128xf32> to vector<448x128xf32>
    %55 = arith.addf %52, %54 : vector<448x128xf32>
    %cst_44 = arith.constant 0.000000e+00 : f32
    %56 = vector.broadcast %cst_44 : f32 to vector<448x128xf32>
    %57 = arith.maximumf %55, %56 : vector<448x128xf32>
    %58 = tpu.iota {dimensions = array<i32: 0>} : vector<448x128xi32>
    %c15_i32 = arith.constant 15 : i32
    %59 = vector.broadcast %c15_i32 : i32 to vector<448x128xi32>
    %60 = arith.andi %58, %59 : vector<448x128xi32>
    %c14_i32 = arith.constant 14 : i32
    %61 = vector.broadcast %c14_i32 : i32 to vector<448x128xi32>
    %62 = arith.cmpi slt, %60, %61 : vector<448x128xi32>
    %cst_45 = arith.constant 0.000000e+00 : f32
    %63 = vector.broadcast %cst_45 : f32 to vector<448x128xf32>
    %64 = arith.select %62, %57, %63 : vector<448x128xi1>, vector<448x128xf32>
    %65 = vector.extract_strided_slice %64 {offsets = [0, 0], sizes = [16, 128], strides = [1, 1]} : vector<448x128xf32> to vector<16x128xf32>
    %66 = vector.extract_strided_slice %64 {offsets = [16, 0], sizes = [16, 128], strides = [1, 1]} : vector<448x128xf32> to vector<16x128xf32>
    %67 = arith.maximumf %65, %66 : vector<16x128xf32>
    %68 = arith.truncf %67 : vector<16x128xf32> to vector<16x128xbf16>
    %c0_46 = arith.constant 0 : index
    %c0_47 = arith.constant 0 : index
    %c0_48 = arith.constant 0 : index
    %c0_49 = arith.constant 0 : index
    %69 = vector.load %arg4[%c0_46, %c0_47, %c0_48, %c0_49] : memref<1x14x16x128xbf16, #tpu.memory_space<vmem>>, vector<1x1x16x128xbf16>
    %70 = vector.shape_cast %69 : vector<1x1x16x128xbf16> to vector<16x128xbf16>
    %71 = vector.shape_cast %68 : vector<16x128xbf16> to vector<1x1x16x128xbf16>
    tpu.vector_store %arg4[%c0_46, %c0_47, %c0_48, %c0_49], %71 {strides = array<i32>} : memref<1x14x16x128xbf16, #tpu.memory_space<vmem>>, vector<1x1x16x128xbf16>,
    %72 = vector.extract_strided_slice %64 {offsets = [32, 0], sizes = [16, 128], strides = [1, 1]} : vector<448x128xf32> to vector<16x128xf32>
    %73 = vector.extract_strided_slice %64 {offsets = [48, 0], sizes = [16, 128], strides = [1, 1]} : vector<448x128xf32> to vector<16x128xf32>
    %74 = arith.maximumf %72, %73 : vector<16x128xf32>
    %75 = arith.truncf %74 : vector<16x128xf32> to vector<16x128xbf16>
    %c0_50 = arith.constant 0 : index
    %c1_51 = arith.constant 1 : index
    %c0_52 = arith.constant 0 : index
    %c0_53 = arith.constant 0 : index
    %76 = vector.load %arg4[%c0_50, %c1_51, %c0_52, %c0_53] : memref<1x14x16x128xbf16, #tpu.memory_space<vmem>>, vector<1x1x16x128xbf16>
    %77 = vector.shape_cast %76 : vector<1x1x16x128xbf16> to vector<16x128xbf16>
    %78 = vector.shape_cast %75 : vector<16x128xbf16> to vector<1x1x16x128xbf16>
    tpu.vector_store %arg4[%c0_50, %c1_51, %c0_52, %c0_53], %78 {strides = array<i32>} : memref<1x14x16x128xbf16, #tpu.memory_space<vmem>>, vector<1x1x16x128xbf16>,
    %79 = vector.extract_strided_slice %64 {offsets = [64, 0], sizes = [16, 128], strides = [1, 1]} : vector<448x128xf32> to vector<16x128xf32>
    %80 = vector.extract_strided_slice %64 {offsets = [80, 0], sizes = [16, 128], strides = [1, 1]} : vector<448x128xf32> to vector<16x128xf32>
    %81 = arith.maximumf %79, %80 : vector<16x128xf32>
    %82 = arith.truncf %81 : vector<16x128xf32> to vector<16x128xbf16>
    %c0_54 = arith.constant 0 : index
    %c2_55 = arith.constant 2 : index
    %c0_56 = arith.constant 0 : index
    %c0_57 = arith.constant 0 : index
    %83 = vector.load %arg4[%c0_54, %c2_55, %c0_56, %c0_57] : memref<1x14x16x128xbf16, #tpu.memory_space<vmem>>, vector<1x1x16x128xbf16>
    %84 = vector.shape_cast %83 : vector<1x1x16x128xbf16> to vector<16x128xbf16>
    %85 = vector.shape_cast %82 : vector<16x128xbf16> to vector<1x1x16x128xbf16>
    tpu.vector_store %arg4[%c0_54, %c2_55, %c0_56, %c0_57], %85 {strides = array<i32>} : memref<1x14x16x128xbf16, #tpu.memory_space<vmem>>, vector<1x1x16x128xbf16>,
    %86 = vector.extract_strided_slice %64 {offsets = [96, 0], sizes = [16, 128], strides = [1, 1]} : vector<448x128xf32> to vector<16x128xf32>
    %87 = vector.extract_strided_slice %64 {offsets = [112, 0], sizes = [16, 128], strides = [1, 1]} : vector<448x128xf32> to vector<16x128xf32>
    %88 = arith.maximumf %86, %87 : vector<16x128xf32>
    %89 = arith.truncf %88 : vector<16x128xf32> to vector<16x128xbf16>
    %c0_58 = arith.constant 0 : index
    %c3_59 = arith.constant 3 : index
    %c0_60 = arith.constant 0 : index
    %c0_61 = arith.constant 0 : index
    %90 = vector.load %arg4[%c0_58, %c3_59, %c0_60, %c0_61] : memref<1x14x16x128xbf16, #tpu.memory_space<vmem>>, vector<1x1x16x128xbf16>
    %91 = vector.shape_cast %90 : vector<1x1x16x128xbf16> to vector<16x128xbf16>
    %92 = vector.shape_cast %89 : vector<16x128xbf16> to vector<1x1x16x128xbf16>
    tpu.vector_store %arg4[%c0_58, %c3_59, %c0_60, %c0_61], %92 {strides = array<i32>} : memref<1x14x16x128xbf16, #tpu.memory_space<vmem>>, vector<1x1x16x128xbf16>,
    %93 = vector.extract_strided_slice %64 {offsets = [128, 0], sizes = [16, 128], strides = [1, 1]} : vector<448x128xf32> to vector<16x128xf32>
    %94 = vector.extract_strided_slice %64 {offsets = [144, 0], sizes = [16, 128], strides = [1, 1]} : vector<448x128xf32> to vector<16x128xf32>
    %95 = arith.maximumf %93, %94 : vector<16x128xf32>
    %96 = arith.truncf %95 : vector<16x128xf32> to vector<16x128xbf16>
    %c0_62 = arith.constant 0 : index
    %c4_63 = arith.constant 4 : index
    %c0_64 = arith.constant 0 : index
    %c0_65 = arith.constant 0 : index
    %97 = vector.load %arg4[%c0_62, %c4_63, %c0_64, %c0_65] : memref<1x14x16x128xbf16, #tpu.memory_space<vmem>>, vector<1x1x16x128xbf16>
    %98 = vector.shape_cast %97 : vector<1x1x16x128xbf16> to vector<16x128xbf16>
    %99 = vector.shape_cast %96 : vector<16x128xbf16> to vector<1x1x16x128xbf16>
    tpu.vector_store %arg4[%c0_62, %c4_63, %c0_64, %c0_65], %99 {strides = array<i32>} : memref<1x14x16x128xbf16, #tpu.memory_space<vmem>>, vector<1x1x16x128xbf16>,
    %100 = vector.extract_strided_slice %64 {offsets = [160, 0], sizes = [16, 128], strides = [1, 1]} : vector<448x128xf32> to vector<16x128xf32>
    %101 = vector.extract_strided_slice %64 {offsets = [176, 0], sizes = [16, 128], strides = [1, 1]} : vector<448x128xf32> to vector<16x128xf32>
    %102 = arith.maximumf %100, %101 : vector<16x128xf32>
    %103 = arith.truncf %102 : vector<16x128xf32> to vector<16x128xbf16>
    %c0_66 = arith.constant 0 : index
    %c5_67 = arith.constant 5 : index
    %c0_68 = arith.constant 0 : index
    %c0_69 = arith.constant 0 : index
    %104 = vector.load %arg4[%c0_66, %c5_67, %c0_68, %c0_69] : memref<1x14x16x128xbf16, #tpu.memory_space<vmem>>, vector<1x1x16x128xbf16>
    %105 = vector.shape_cast %104 : vector<1x1x16x128xbf16> to vector<16x128xbf16>
    %106 = vector.shape_cast %103 : vector<16x128xbf16> to vector<1x1x16x128xbf16>
    tpu.vector_store %arg4[%c0_66, %c5_67, %c0_68, %c0_69], %106 {strides = array<i32>} : memref<1x14x16x128xbf16, #tpu.memory_space<vmem>>, vector<1x1x16x128xbf16>,
    %107 = vector.extract_strided_slice %64 {offsets = [192, 0], sizes = [16, 128], strides = [1, 1]} : vector<448x128xf32> to vector<16x128xf32>
    %108 = vector.extract_strided_slice %64 {offsets = [208, 0], sizes = [16, 128], strides = [1, 1]} : vector<448x128xf32> to vector<16x128xf32>
    %109 = arith.maximumf %107, %108 : vector<16x128xf32>
    %110 = arith.truncf %109 : vector<16x128xf32> to vector<16x128xbf16>
    %c0_70 = arith.constant 0 : index
    %c6_71 = arith.constant 6 : index
    %c0_72 = arith.constant 0 : index
    %c0_73 = arith.constant 0 : index
    %111 = vector.load %arg4[%c0_70, %c6_71, %c0_72, %c0_73] : memref<1x14x16x128xbf16, #tpu.memory_space<vmem>>, vector<1x1x16x128xbf16>
    %112 = vector.shape_cast %111 : vector<1x1x16x128xbf16> to vector<16x128xbf16>
    %113 = vector.shape_cast %110 : vector<16x128xbf16> to vector<1x1x16x128xbf16>
    tpu.vector_store %arg4[%c0_70, %c6_71, %c0_72, %c0_73], %113 {strides = array<i32>} : memref<1x14x16x128xbf16, #tpu.memory_space<vmem>>, vector<1x1x16x128xbf16>,
    %114 = vector.extract_strided_slice %64 {offsets = [224, 0], sizes = [16, 128], strides = [1, 1]} : vector<448x128xf32> to vector<16x128xf32>
    %115 = vector.extract_strided_slice %64 {offsets = [240, 0], sizes = [16, 128], strides = [1, 1]} : vector<448x128xf32> to vector<16x128xf32>
    %116 = arith.maximumf %114, %115 : vector<16x128xf32>
    %117 = arith.truncf %116 : vector<16x128xf32> to vector<16x128xbf16>
    %c0_74 = arith.constant 0 : index
    %c7_75 = arith.constant 7 : index
    %c0_76 = arith.constant 0 : index
    %c0_77 = arith.constant 0 : index
    %118 = vector.load %arg4[%c0_74, %c7_75, %c0_76, %c0_77] : memref<1x14x16x128xbf16, #tpu.memory_space<vmem>>, vector<1x1x16x128xbf16>
    %119 = vector.shape_cast %118 : vector<1x1x16x128xbf16> to vector<16x128xbf16>
    %120 = vector.shape_cast %117 : vector<16x128xbf16> to vector<1x1x16x128xbf16>
    tpu.vector_store %arg4[%c0_74, %c7_75, %c0_76, %c0_77], %120 {strides = array<i32>} : memref<1x14x16x128xbf16, #tpu.memory_space<vmem>>, vector<1x1x16x128xbf16>,
    %121 = vector.extract_strided_slice %64 {offsets = [256, 0], sizes = [16, 128], strides = [1, 1]} : vector<448x128xf32> to vector<16x128xf32>
    %122 = vector.extract_strided_slice %64 {offsets = [272, 0], sizes = [16, 128], strides = [1, 1]} : vector<448x128xf32> to vector<16x128xf32>
    %123 = arith.maximumf %121, %122 : vector<16x128xf32>
    %124 = arith.truncf %123 : vector<16x128xf32> to vector<16x128xbf16>
    %c0_78 = arith.constant 0 : index
    %c8_79 = arith.constant 8 : index
    %c0_80 = arith.constant 0 : index
    %c0_81 = arith.constant 0 : index
    %125 = vector.load %arg4[%c0_78, %c8_79, %c0_80, %c0_81] : memref<1x14x16x128xbf16, #tpu.memory_space<vmem>>, vector<1x1x16x128xbf16>
    %126 = vector.shape_cast %125 : vector<1x1x16x128xbf16> to vector<16x128xbf16>
    %127 = vector.shape_cast %124 : vector<16x128xbf16> to vector<1x1x16x128xbf16>
    tpu.vector_store %arg4[%c0_78, %c8_79, %c0_80, %c0_81], %127 {strides = array<i32>} : memref<1x14x16x128xbf16, #tpu.memory_space<vmem>>, vector<1x1x16x128xbf16>,
    %128 = vector.extract_strided_slice %64 {offsets = [288, 0], sizes = [16, 128], strides = [1, 1]} : vector<448x128xf32> to vector<16x128xf32>
    %129 = vector.extract_strided_slice %64 {offsets = [304, 0], sizes = [16, 128], strides = [1, 1]} : vector<448x128xf32> to vector<16x128xf32>
    %130 = arith.maximumf %128, %129 : vector<16x128xf32>
    %131 = arith.truncf %130 : vector<16x128xf32> to vector<16x128xbf16>
    %c0_82 = arith.constant 0 : index
    %c9_83 = arith.constant 9 : index
    %c0_84 = arith.constant 0 : index
    %c0_85 = arith.constant 0 : index
    %132 = vector.load %arg4[%c0_82, %c9_83, %c0_84, %c0_85] : memref<1x14x16x128xbf16, #tpu.memory_space<vmem>>, vector<1x1x16x128xbf16>
    %133 = vector.shape_cast %132 : vector<1x1x16x128xbf16> to vector<16x128xbf16>
    %134 = vector.shape_cast %131 : vector<16x128xbf16> to vector<1x1x16x128xbf16>
    tpu.vector_store %arg4[%c0_82, %c9_83, %c0_84, %c0_85], %134 {strides = array<i32>} : memref<1x14x16x128xbf16, #tpu.memory_space<vmem>>, vector<1x1x16x128xbf16>,
    %135 = vector.extract_strided_slice %64 {offsets = [320, 0], sizes = [16, 128], strides = [1, 1]} : vector<448x128xf32> to vector<16x128xf32>
    %136 = vector.extract_strided_slice %64 {offsets = [336, 0], sizes = [16, 128], strides = [1, 1]} : vector<448x128xf32> to vector<16x128xf32>
    %137 = arith.maximumf %135, %136 : vector<16x128xf32>
    %138 = arith.truncf %137 : vector<16x128xf32> to vector<16x128xbf16>
    %c0_86 = arith.constant 0 : index
    %c10 = arith.constant 10 : index
    %c0_87 = arith.constant 0 : index
    %c0_88 = arith.constant 0 : index
    %139 = vector.load %arg4[%c0_86, %c10, %c0_87, %c0_88] : memref<1x14x16x128xbf16, #tpu.memory_space<vmem>>, vector<1x1x16x128xbf16>
    %140 = vector.shape_cast %139 : vector<1x1x16x128xbf16> to vector<16x128xbf16>
    %141 = vector.shape_cast %138 : vector<16x128xbf16> to vector<1x1x16x128xbf16>
    tpu.vector_store %arg4[%c0_86, %c10, %c0_87, %c0_88], %141 {strides = array<i32>} : memref<1x14x16x128xbf16, #tpu.memory_space<vmem>>, vector<1x1x16x128xbf16>,
    %142 = vector.extract_strided_slice %64 {offsets = [352, 0], sizes = [16, 128], strides = [1, 1]} : vector<448x128xf32> to vector<16x128xf32>
    %143 = vector.extract_strided_slice %64 {offsets = [368, 0], sizes = [16, 128], strides = [1, 1]} : vector<448x128xf32> to vector<16x128xf32>
    %144 = arith.maximumf %142, %143 : vector<16x128xf32>
    %145 = arith.truncf %144 : vector<16x128xf32> to vector<16x128xbf16>
    %c0_89 = arith.constant 0 : index
    %c11 = arith.constant 11 : index
    %c0_90 = arith.constant 0 : index
    %c0_91 = arith.constant 0 : index
    %146 = vector.load %arg4[%c0_89, %c11, %c0_90, %c0_91] : memref<1x14x16x128xbf16, #tpu.memory_space<vmem>>, vector<1x1x16x128xbf16>
    %147 = vector.shape_cast %146 : vector<1x1x16x128xbf16> to vector<16x128xbf16>
    %148 = vector.shape_cast %145 : vector<16x128xbf16> to vector<1x1x16x128xbf16>
    tpu.vector_store %arg4[%c0_89, %c11, %c0_90, %c0_91], %148 {strides = array<i32>} : memref<1x14x16x128xbf16, #tpu.memory_space<vmem>>, vector<1x1x16x128xbf16>,
    %149 = vector.extract_strided_slice %64 {offsets = [384, 0], sizes = [16, 128], strides = [1, 1]} : vector<448x128xf32> to vector<16x128xf32>
    %150 = vector.extract_strided_slice %64 {offsets = [400, 0], sizes = [16, 128], strides = [1, 1]} : vector<448x128xf32> to vector<16x128xf32>
    %151 = arith.maximumf %149, %150 : vector<16x128xf32>
    %152 = arith.truncf %151 : vector<16x128xf32> to vector<16x128xbf16>
    %c0_92 = arith.constant 0 : index
    %c12 = arith.constant 12 : index
    %c0_93 = arith.constant 0 : index
    %c0_94 = arith.constant 0 : index
    %153 = vector.load %arg4[%c0_92, %c12, %c0_93, %c0_94] : memref<1x14x16x128xbf16, #tpu.memory_space<vmem>>, vector<1x1x16x128xbf16>
    %154 = vector.shape_cast %153 : vector<1x1x16x128xbf16> to vector<16x128xbf16>
    %155 = vector.shape_cast %152 : vector<16x128xbf16> to vector<1x1x16x128xbf16>
    tpu.vector_store %arg4[%c0_92, %c12, %c0_93, %c0_94], %155 {strides = array<i32>} : memref<1x14x16x128xbf16, #tpu.memory_space<vmem>>, vector<1x1x16x128xbf16>,
    %156 = vector.extract_strided_slice %64 {offsets = [416, 0], sizes = [16, 128], strides = [1, 1]} : vector<448x128xf32> to vector<16x128xf32>
    %157 = vector.extract_strided_slice %64 {offsets = [432, 0], sizes = [16, 128], strides = [1, 1]} : vector<448x128xf32> to vector<16x128xf32>
    %158 = arith.maximumf %156, %157 : vector<16x128xf32>
    %159 = arith.truncf %158 : vector<16x128xf32> to vector<16x128xbf16>
    %c0_95 = arith.constant 0 : index
    %c13 = arith.constant 13 : index
    %c0_96 = arith.constant 0 : index
    %c0_97 = arith.constant 0 : index
    %160 = vector.load %arg4[%c0_95, %c13, %c0_96, %c0_97] : memref<1x14x16x128xbf16, #tpu.memory_space<vmem>>, vector<1x1x16x128xbf16>
    %161 = vector.shape_cast %160 : vector<1x1x16x128xbf16> to vector<16x128xbf16>
    %162 = vector.shape_cast %159 : vector<16x128xbf16> to vector<1x1x16x128xbf16>
    tpu.vector_store %arg4[%c0_95, %c13, %c0_96, %c0_97], %162 {strides = array<i32>} : memref<1x14x16x128xbf16, #tpu.memory_space<vmem>>, vector<1x1x16x128xbf16>,
    return
  }
  func.func @transform_0(%arg0: i32) -> (i32, i32, i32) {
    %c0_i32 = arith.constant 0 : i32
    %c0_i32_0 = arith.constant 0 : i32
    %c0_i32_1 = arith.constant 0 : i32
    return %arg0, %c0_i32, %c0_i32_0 : i32, i32, i32
  }
  func.func @transform_1(%arg0: i32) -> (i32, i32, i32) {
    %c0_i32 = arith.constant 0 : i32
    %c0_i32_0 = arith.constant 0 : i32
    %c0_i32_1 = arith.constant 0 : i32
    %c0_i32_2 = arith.constant 0 : i32
    return %c0_i32, %c0_i32_0, %c0_i32_1 : i32, i32, i32
  }
  func.func @transform_2(%arg0: i32) -> (i32, i32) {
    %c0_i32 = arith.constant 0 : i32
    %c0_i32_0 = arith.constant 0 : i32
    %c0_i32_1 = arith.constant 0 : i32
    return %c0_i32, %c0_i32_0 : i32, i32
  }
  func.func @transform_3(%arg0: i32) -> (i32, i32, i32, i32) {
    %c0_i32 = arith.constant 0 : i32
    %c0_i32_0 = arith.constant 0 : i32
    %c0_i32_1 = arith.constant 0 : i32
    %c0_i32_2 = arith.constant 0 : i32
    return %arg0, %c0_i32, %c0_i32_0, %c0_i32_1 : i32, i32, i32, i32
  }
}

module attributes {stable_mosaic.version = 11 : i64} {
  func.func @_fc3_kernel(%arg0: i32, %arg1: memref<2x5120xbf16, #tpu.memory_space<vmem>>, %arg2: memref<5120x128xbf16, #tpu.memory_space<vmem>>, %arg3: memref<1x128xf32, #tpu.memory_space<vmem>>, %arg4: memref<128x128xbf16, #tpu.memory_space<vmem>>, %arg5: memref<1x128xf32, #tpu.memory_space<vmem>>, %arg6: memref<128x128xbf16, #tpu.memory_space<vmem>>, %arg7: memref<1x128xf32, #tpu.memory_space<vmem>>, %arg8: memref<2x128xf32, #tpu.memory_space<vmem>>) attributes {dimension_semantics = [#tpu.dimension_semantics<parallel>], iteration_bounds = array<i64: 1>, scalar_prefetch = 0 : i64, scratch_operands = 0 : i64, tpu.core_type = #tpu.core_type<tc>, window_params = [{transform_indices = @transform_0, window_bounds = array<i64: 2, 5120>}, {pipeline_mode = #tpu.pipeline_mode<synchronous>, transform_indices = @transform_1, window_bounds = array<i64: 5120, 128>}, {pipeline_mode = #tpu.pipeline_mode<synchronous>, transform_indices = @transform_2, window_bounds = array<i64: 1, 128>}, {pipeline_mode = #tpu.pipeline_mode<synchronous>, transform_indices = @transform_3, window_bounds = array<i64: 128, 128>}, {pipeline_mode = #tpu.pipeline_mode<synchronous>, transform_indices = @transform_4, window_bounds = array<i64: 1, 128>}, {pipeline_mode = #tpu.pipeline_mode<synchronous>, transform_indices = @transform_5, window_bounds = array<i64: 128, 128>}, {pipeline_mode = #tpu.pipeline_mode<synchronous>, transform_indices = @transform_6, window_bounds = array<i64: 1, 128>}, {transform_indices = @transform_7, window_bounds = array<i64: 2, 128>}]} {
    %c0 = arith.constant 0 : index
    %c0_0 = arith.constant 0 : index
    %0 = vector.load %arg1[%c0, %c0_0] : memref<2x5120xbf16, #tpu.memory_space<vmem>>, vector<2x5120xbf16>
    %c0_1 = arith.constant 0 : index
    %c0_2 = arith.constant 0 : index
    %1 = vector.load %arg2[%c0_1, %c0_2] : memref<5120x128xbf16, #tpu.memory_space<vmem>>, vector<5120x128xbf16>
    %cst = arith.constant dense<0.000000e+00> : vector<2x128xf32>
    %2 = tpu.matmul %0, %1, %cst {dimension_numbers = #tpu.dot_dimension_numbers<[1], [0], [0], [1], [0, 0, 1, 1], [], []>} : vector<2x5120xbf16>, vector<5120x128xbf16>, vector<2x128xf32> -> vector<2x128xf32>
    %c0_3 = arith.constant 0 : index
    %c0_4 = arith.constant 0 : index
    %3 = vector.load %arg3[%c0_3, %c0_4] : memref<1x128xf32, #tpu.memory_space<vmem>>, vector<1x128xf32>
    %4 = vector.broadcast %3 : vector<1x128xf32> to vector<2x128xf32>
    %5 = arith.addf %2, %4 : vector<2x128xf32>
    %cst_5 = arith.constant 0.000000e+00 : f32
    %6 = vector.broadcast %cst_5 : f32 to vector<2x128xf32>
    %7 = arith.maximumf %5, %6 : vector<2x128xf32>
    %8 = arith.truncf %7 : vector<2x128xf32> to vector<2x128xbf16>
    %c0_6 = arith.constant 0 : index
    %c0_7 = arith.constant 0 : index
    %9 = vector.load %arg4[%c0_6, %c0_7] : memref<128x128xbf16, #tpu.memory_space<vmem>>, vector<128x128xbf16>
    %cst_8 = arith.constant dense<0.000000e+00> : vector<2x128xf32>
    %10 = tpu.matmul %8, %9, %cst_8 {dimension_numbers = #tpu.dot_dimension_numbers<[1], [0], [0], [1], [0, 0, 1, 1], [], []>} : vector<2x128xbf16>, vector<128x128xbf16>, vector<2x128xf32> -> vector<2x128xf32>
    %c0_9 = arith.constant 0 : index
    %c0_10 = arith.constant 0 : index
    %11 = vector.load %arg5[%c0_9, %c0_10] : memref<1x128xf32, #tpu.memory_space<vmem>>, vector<1x128xf32>
    %12 = vector.broadcast %11 : vector<1x128xf32> to vector<2x128xf32>
    %13 = arith.addf %10, %12 : vector<2x128xf32>
    %cst_11 = arith.constant 0.000000e+00 : f32
    %14 = vector.broadcast %cst_11 : f32 to vector<2x128xf32>
    %15 = arith.maximumf %13, %14 : vector<2x128xf32>
    %16 = arith.truncf %15 : vector<2x128xf32> to vector<2x128xbf16>
    %c0_12 = arith.constant 0 : index
    %c0_13 = arith.constant 0 : index
    %17 = vector.load %arg6[%c0_12, %c0_13] : memref<128x128xbf16, #tpu.memory_space<vmem>>, vector<128x128xbf16>
    %cst_14 = arith.constant dense<0.000000e+00> : vector<2x128xf32>
    %18 = tpu.matmul %16, %17, %cst_14 {dimension_numbers = #tpu.dot_dimension_numbers<[1], [0], [0], [1], [0, 0, 1, 1], [], []>} : vector<2x128xbf16>, vector<128x128xbf16>, vector<2x128xf32> -> vector<2x128xf32>
    %c0_15 = arith.constant 0 : index
    %c0_16 = arith.constant 0 : index
    %19 = vector.load %arg7[%c0_15, %c0_16] : memref<1x128xf32, #tpu.memory_space<vmem>>, vector<1x128xf32>
    %20 = vector.broadcast %19 : vector<1x128xf32> to vector<2x128xf32>
    %21 = arith.addf %18, %20 : vector<2x128xf32>
    %c0_17 = arith.constant 0 : index
    %c0_18 = arith.constant 0 : index
    %22 = vector.load %arg8[%c0_17, %c0_18] : memref<2x128xf32, #tpu.memory_space<vmem>>, vector<2x128xf32>
    tpu.vector_store %arg8[%c0_17, %c0_18], %21 {strides = array<i32>} : memref<2x128xf32, #tpu.memory_space<vmem>>, vector<2x128xf32>,
    return
  }
  func.func @transform_0(%arg0: i32) -> (i32, i32) {
    %c0_i32 = arith.constant 0 : i32
    %c0_i32_0 = arith.constant 0 : i32
    return %arg0, %c0_i32 : i32, i32
  }
  func.func @transform_1(%arg0: i32) -> (i32, i32) {
    %c0_i32 = arith.constant 0 : i32
    %c0_i32_0 = arith.constant 0 : i32
    %c0_i32_1 = arith.constant 0 : i32
    return %c0_i32, %c0_i32_0 : i32, i32
  }
  func.func @transform_2(%arg0: i32) -> (i32, i32) {
    %c0_i32 = arith.constant 0 : i32
    %c0_i32_0 = arith.constant 0 : i32
    %c0_i32_1 = arith.constant 0 : i32
    return %c0_i32, %c0_i32_0 : i32, i32
  }
  func.func @transform_3(%arg0: i32) -> (i32, i32) {
    %c0_i32 = arith.constant 0 : i32
    %c0_i32_0 = arith.constant 0 : i32
    %c0_i32_1 = arith.constant 0 : i32
    return %c0_i32, %c0_i32_0 : i32, i32
  }
  func.func @transform_4(%arg0: i32) -> (i32, i32) {
    %c0_i32 = arith.constant 0 : i32
    %c0_i32_0 = arith.constant 0 : i32
    %c0_i32_1 = arith.constant 0 : i32
    return %c0_i32, %c0_i32_0 : i32, i32
  }
  func.func @transform_5(%arg0: i32) -> (i32, i32) {
    %c0_i32 = arith.constant 0 : i32
    %c0_i32_0 = arith.constant 0 : i32
    %c0_i32_1 = arith.constant 0 : i32
    return %c0_i32, %c0_i32_0 : i32, i32
  }
  func.func @transform_6(%arg0: i32) -> (i32, i32) {
    %c0_i32 = arith.constant 0 : i32
    %c0_i32_0 = arith.constant 0 : i32
    %c0_i32_1 = arith.constant 0 : i32
    return %c0_i32, %c0_i32_0 : i32, i32
  }
  func.func @transform_7(%arg0: i32) -> (i32, i32) {
    %c0_i32 = arith.constant 0 : i32
    %c0_i32_0 = arith.constant 0 : i32
    return %arg0, %c0_i32 : i32, i32
  }
}

module attributes {stable_mosaic.version = 11 : i64} {
  func.func @_conv_pool_kernel(%arg0: i32, %arg1: memref<1x112x768xbf16, #tpu.memory_space<vmem>>, %arg2: memref<10x768x128xbf16, #tpu.memory_space<vmem>>, %arg3: memref<1x128xf32, #tpu.memory_space<vmem>>, %arg4: memref<1x5x8x128xbf16, #tpu.memory_space<vmem>>) attributes {dimension_semantics = [#tpu.dimension_semantics<parallel>], iteration_bounds = array<i64: 2>, scalar_prefetch = 0 : i64, scratch_operands = 0 : i64, tpu.core_type = #tpu.core_type<tc>, window_params = [{transform_indices = @transform_0, window_bounds = array<i64: 1, 112, 768>}, {pipeline_mode = #tpu.pipeline_mode<synchronous>, transform_indices = @transform_1, window_bounds = array<i64: 10, 768, 128>}, {pipeline_mode = #tpu.pipeline_mode<synchronous>, transform_indices = @transform_2, window_bounds = array<i64: 1, 128>}, {transform_indices = @transform_3, window_bounds = array<i64: 1, 5, 8, 128>}]} {
    %cst = arith.constant 0.000000e+00 : f32
    %0 = vector.broadcast %cst : f32 to vector<80x128xf32>
    %cst_0 = arith.constant 0.000000e+00 : f32
    %1 = vector.broadcast %cst_0 : f32 to vector<80x128xf32>
    %c0 = arith.constant 0 : index
    %c0_1 = arith.constant 0 : index
    %c0_2 = arith.constant 0 : index
    %2 = vector.load %arg1[%c0, %c0_1, %c0_2] : memref<1x112x768xbf16, #tpu.memory_space<vmem>>, vector<1x80x768xbf16>
    %3 = vector.shape_cast %2 : vector<1x80x768xbf16> to vector<80x768xbf16>
    %c0_3 = arith.constant 0 : index
    %c0_4 = arith.constant 0 : index
    %c0_5 = arith.constant 0 : index
    %4 = vector.load %arg2[%c0_3, %c0_4, %c0_5] : memref<10x768x128xbf16, #tpu.memory_space<vmem>>, vector<1x768x128xbf16>
    %5 = vector.shape_cast %4 : vector<1x768x128xbf16> to vector<768x128xbf16>
    %cst_6 = arith.constant dense<0.000000e+00> : vector<80x128xf32>
    %6 = tpu.matmul %3, %5, %cst_6 {dimension_numbers = #tpu.dot_dimension_numbers<[1], [0], [0], [1], [0, 0, 1, 1], [], []>} : vector<80x768xbf16>, vector<768x128xbf16>, vector<80x128xf32> -> vector<80x128xf32>
    %7 = arith.addf %0, %6 : vector<80x128xf32>
    %c5 = arith.constant 5 : index
    %c0_7 = arith.constant 0 : index
    %c0_8 = arith.constant 0 : index
    %8 = vector.load %arg2[%c5, %c0_7, %c0_8] : memref<10x768x128xbf16, #tpu.memory_space<vmem>>, vector<1x768x128xbf16>
    %9 = vector.shape_cast %8 : vector<1x768x128xbf16> to vector<768x128xbf16>
    %cst_9 = arith.constant dense<0.000000e+00> : vector<80x128xf32>
    %10 = tpu.matmul %3, %9, %cst_9 {dimension_numbers = #tpu.dot_dimension_numbers<[1], [0], [0], [1], [0, 0, 1, 1], [], []>} : vector<80x768xbf16>, vector<768x128xbf16>, vector<80x128xf32> -> vector<80x128xf32>
    %11 = arith.addf %1, %10 : vector<80x128xf32>
    %c0_10 = arith.constant 0 : index
    %c8 = arith.constant 8 : index
    %c0_11 = arith.constant 0 : index
    %12 = vector.load %arg1[%c0_10, %c8, %c0_11] : memref<1x112x768xbf16, #tpu.memory_space<vmem>>, vector<1x80x768xbf16>
    %13 = vector.shape_cast %12 : vector<1x80x768xbf16> to vector<80x768xbf16>
    %c1 = arith.constant 1 : index
    %c0_12 = arith.constant 0 : index
    %c0_13 = arith.constant 0 : index
    %14 = vector.load %arg2[%c1, %c0_12, %c0_13] : memref<10x768x128xbf16, #tpu.memory_space<vmem>>, vector<1x768x128xbf16>
    %15 = vector.shape_cast %14 : vector<1x768x128xbf16> to vector<768x128xbf16>
    %cst_14 = arith.constant dense<0.000000e+00> : vector<80x128xf32>
    %16 = tpu.matmul %13, %15, %cst_14 {dimension_numbers = #tpu.dot_dimension_numbers<[1], [0], [0], [1], [0, 0, 1, 1], [], []>} : vector<80x768xbf16>, vector<768x128xbf16>, vector<80x128xf32> -> vector<80x128xf32>
    %17 = arith.addf %7, %16 : vector<80x128xf32>
    %c6 = arith.constant 6 : index
    %c0_15 = arith.constant 0 : index
    %c0_16 = arith.constant 0 : index
    %18 = vector.load %arg2[%c6, %c0_15, %c0_16] : memref<10x768x128xbf16, #tpu.memory_space<vmem>>, vector<1x768x128xbf16>
    %19 = vector.shape_cast %18 : vector<1x768x128xbf16> to vector<768x128xbf16>
    %cst_17 = arith.constant dense<0.000000e+00> : vector<80x128xf32>
    %20 = tpu.matmul %13, %19, %cst_17 {dimension_numbers = #tpu.dot_dimension_numbers<[1], [0], [0], [1], [0, 0, 1, 1], [], []>} : vector<80x768xbf16>, vector<768x128xbf16>, vector<80x128xf32> -> vector<80x128xf32>
    %21 = arith.addf %11, %20 : vector<80x128xf32>
    %c0_18 = arith.constant 0 : index
    %c16 = arith.constant 16 : index
    %c0_19 = arith.constant 0 : index
    %22 = vector.load %arg1[%c0_18, %c16, %c0_19] : memref<1x112x768xbf16, #tpu.memory_space<vmem>>, vector<1x80x768xbf16>
    %23 = vector.shape_cast %22 : vector<1x80x768xbf16> to vector<80x768xbf16>
    %c2 = arith.constant 2 : index
    %c0_20 = arith.constant 0 : index
    %c0_21 = arith.constant 0 : index
    %24 = vector.load %arg2[%c2, %c0_20, %c0_21] : memref<10x768x128xbf16, #tpu.memory_space<vmem>>, vector<1x768x128xbf16>
    %25 = vector.shape_cast %24 : vector<1x768x128xbf16> to vector<768x128xbf16>
    %cst_22 = arith.constant dense<0.000000e+00> : vector<80x128xf32>
    %26 = tpu.matmul %23, %25, %cst_22 {dimension_numbers = #tpu.dot_dimension_numbers<[1], [0], [0], [1], [0, 0, 1, 1], [], []>} : vector<80x768xbf16>, vector<768x128xbf16>, vector<80x128xf32> -> vector<80x128xf32>
    %27 = arith.addf %17, %26 : vector<80x128xf32>
    %c7 = arith.constant 7 : index
    %c0_23 = arith.constant 0 : index
    %c0_24 = arith.constant 0 : index
    %28 = vector.load %arg2[%c7, %c0_23, %c0_24] : memref<10x768x128xbf16, #tpu.memory_space<vmem>>, vector<1x768x128xbf16>
    %29 = vector.shape_cast %28 : vector<1x768x128xbf16> to vector<768x128xbf16>
    %cst_25 = arith.constant dense<0.000000e+00> : vector<80x128xf32>
    %30 = tpu.matmul %23, %29, %cst_25 {dimension_numbers = #tpu.dot_dimension_numbers<[1], [0], [0], [1], [0, 0, 1, 1], [], []>} : vector<80x768xbf16>, vector<768x128xbf16>, vector<80x128xf32> -> vector<80x128xf32>
    %31 = arith.addf %21, %30 : vector<80x128xf32>
    %c0_26 = arith.constant 0 : index
    %c24 = arith.constant 24 : index
    %c0_27 = arith.constant 0 : index
    %32 = vector.load %arg1[%c0_26, %c24, %c0_27] : memref<1x112x768xbf16, #tpu.memory_space<vmem>>, vector<1x80x768xbf16>
    %33 = vector.shape_cast %32 : vector<1x80x768xbf16> to vector<80x768xbf16>
    %c3 = arith.constant 3 : index
    %c0_28 = arith.constant 0 : index
    %c0_29 = arith.constant 0 : index
    %34 = vector.load %arg2[%c3, %c0_28, %c0_29] : memref<10x768x128xbf16, #tpu.memory_space<vmem>>, vector<1x768x128xbf16>
    %35 = vector.shape_cast %34 : vector<1x768x128xbf16> to vector<768x128xbf16>
    %cst_30 = arith.constant dense<0.000000e+00> : vector<80x128xf32>
    %36 = tpu.matmul %33, %35, %cst_30 {dimension_numbers = #tpu.dot_dimension_numbers<[1], [0], [0], [1], [0, 0, 1, 1], [], []>} : vector<80x768xbf16>, vector<768x128xbf16>, vector<80x128xf32> -> vector<80x128xf32>
    %37 = arith.addf %27, %36 : vector<80x128xf32>
    %c8_31 = arith.constant 8 : index
    %c0_32 = arith.constant 0 : index
    %c0_33 = arith.constant 0 : index
    %38 = vector.load %arg2[%c8_31, %c0_32, %c0_33] : memref<10x768x128xbf16, #tpu.memory_space<vmem>>, vector<1x768x128xbf16>
    %39 = vector.shape_cast %38 : vector<1x768x128xbf16> to vector<768x128xbf16>
    %cst_34 = arith.constant dense<0.000000e+00> : vector<80x128xf32>
    %40 = tpu.matmul %33, %39, %cst_34 {dimension_numbers = #tpu.dot_dimension_numbers<[1], [0], [0], [1], [0, 0, 1, 1], [], []>} : vector<80x768xbf16>, vector<768x128xbf16>, vector<80x128xf32> -> vector<80x128xf32>
    %41 = arith.addf %31, %40 : vector<80x128xf32>
    %c0_35 = arith.constant 0 : index
    %c32 = arith.constant 32 : index
    %c0_36 = arith.constant 0 : index
    %42 = vector.load %arg1[%c0_35, %c32, %c0_36] : memref<1x112x768xbf16, #tpu.memory_space<vmem>>, vector<1x80x768xbf16>
    %43 = vector.shape_cast %42 : vector<1x80x768xbf16> to vector<80x768xbf16>
    %c4 = arith.constant 4 : index
    %c0_37 = arith.constant 0 : index
    %c0_38 = arith.constant 0 : index
    %44 = vector.load %arg2[%c4, %c0_37, %c0_38] : memref<10x768x128xbf16, #tpu.memory_space<vmem>>, vector<1x768x128xbf16>
    %45 = vector.shape_cast %44 : vector<1x768x128xbf16> to vector<768x128xbf16>
    %cst_39 = arith.constant dense<0.000000e+00> : vector<80x128xf32>
    %46 = tpu.matmul %43, %45, %cst_39 {dimension_numbers = #tpu.dot_dimension_numbers<[1], [0], [0], [1], [0, 0, 1, 1], [], []>} : vector<80x768xbf16>, vector<768x128xbf16>, vector<80x128xf32> -> vector<80x128xf32>
    %47 = arith.addf %37, %46 : vector<80x128xf32>
    %c9 = arith.constant 9 : index
    %c0_40 = arith.constant 0 : index
    %c0_41 = arith.constant 0 : index
    %48 = vector.load %arg2[%c9, %c0_40, %c0_41] : memref<10x768x128xbf16, #tpu.memory_space<vmem>>, vector<1x768x128xbf16>
    %49 = vector.shape_cast %48 : vector<1x768x128xbf16> to vector<768x128xbf16>
    %cst_42 = arith.constant dense<0.000000e+00> : vector<80x128xf32>
    %50 = tpu.matmul %43, %49, %cst_42 {dimension_numbers = #tpu.dot_dimension_numbers<[1], [0], [0], [1], [0, 0, 1, 1], [], []>} : vector<80x768xbf16>, vector<768x128xbf16>, vector<80x128xf32> -> vector<80x128xf32>
    %51 = arith.addf %41, %50 : vector<80x128xf32>
    %52 = arith.maximumf %47, %51 : vector<80x128xf32>
    %c0_43 = arith.constant 0 : index
    %c0_44 = arith.constant 0 : index
    %53 = vector.load %arg3[%c0_43, %c0_44] : memref<1x128xf32, #tpu.memory_space<vmem>>, vector<1x128xf32>
    %54 = vector.broadcast %53 : vector<1x128xf32> to vector<80x128xf32>
    %55 = arith.addf %52, %54 : vector<80x128xf32>
    %cst_45 = arith.constant 0.000000e+00 : f32
    %56 = vector.broadcast %cst_45 : f32 to vector<80x128xf32>
    %57 = arith.maximumf %55, %56 : vector<80x128xf32>
    %58 = tpu.iota {dimensions = array<i32: 0>} : vector<80x128xi32>
    %c7_i32 = arith.constant 7 : i32
    %59 = vector.broadcast %c7_i32 : i32 to vector<80x128xi32>
    %60 = arith.andi %58, %59 : vector<80x128xi32>
    %c5_i32 = arith.constant 5 : i32
    %61 = vector.broadcast %c5_i32 : i32 to vector<80x128xi32>
    %62 = arith.cmpi slt, %60, %61 : vector<80x128xi32>
    %cst_46 = arith.constant 0.000000e+00 : f32
    %63 = vector.broadcast %cst_46 : f32 to vector<80x128xf32>
    %64 = arith.select %62, %57, %63 : vector<80x128xi1>, vector<80x128xf32>
    %65 = vector.extract_strided_slice %64 {offsets = [0, 0], sizes = [8, 128], strides = [1, 1]} : vector<80x128xf32> to vector<8x128xf32>
    %66 = vector.extract_strided_slice %64 {offsets = [8, 0], sizes = [8, 128], strides = [1, 1]} : vector<80x128xf32> to vector<8x128xf32>
    %67 = arith.maximumf %65, %66 : vector<8x128xf32>
    %68 = arith.truncf %67 : vector<8x128xf32> to vector<8x128xbf16>
    %c0_47 = arith.constant 0 : index
    %c0_48 = arith.constant 0 : index
    %c0_49 = arith.constant 0 : index
    %c0_50 = arith.constant 0 : index
    %69 = vector.load %arg4[%c0_47, %c0_48, %c0_49, %c0_50] : memref<1x5x8x128xbf16, #tpu.memory_space<vmem>>, vector<1x1x8x128xbf16>
    %70 = vector.shape_cast %69 : vector<1x1x8x128xbf16> to vector<8x128xbf16>
    %71 = vector.shape_cast %68 : vector<8x128xbf16> to vector<1x1x8x128xbf16>
    tpu.vector_store %arg4[%c0_47, %c0_48, %c0_49, %c0_50], %71 {strides = array<i32>} : memref<1x5x8x128xbf16, #tpu.memory_space<vmem>>, vector<1x1x8x128xbf16>,
    %72 = vector.extract_strided_slice %64 {offsets = [16, 0], sizes = [8, 128], strides = [1, 1]} : vector<80x128xf32> to vector<8x128xf32>
    %73 = vector.extract_strided_slice %64 {offsets = [24, 0], sizes = [8, 128], strides = [1, 1]} : vector<80x128xf32> to vector<8x128xf32>
    %74 = arith.maximumf %72, %73 : vector<8x128xf32>
    %75 = arith.truncf %74 : vector<8x128xf32> to vector<8x128xbf16>
    %c0_51 = arith.constant 0 : index
    %c1_52 = arith.constant 1 : index
    %c0_53 = arith.constant 0 : index
    %c0_54 = arith.constant 0 : index
    %76 = vector.load %arg4[%c0_51, %c1_52, %c0_53, %c0_54] : memref<1x5x8x128xbf16, #tpu.memory_space<vmem>>, vector<1x1x8x128xbf16>
    %77 = vector.shape_cast %76 : vector<1x1x8x128xbf16> to vector<8x128xbf16>
    %78 = vector.shape_cast %75 : vector<8x128xbf16> to vector<1x1x8x128xbf16>
    tpu.vector_store %arg4[%c0_51, %c1_52, %c0_53, %c0_54], %78 {strides = array<i32>} : memref<1x5x8x128xbf16, #tpu.memory_space<vmem>>, vector<1x1x8x128xbf16>,
    %79 = vector.extract_strided_slice %64 {offsets = [32, 0], sizes = [8, 128], strides = [1, 1]} : vector<80x128xf32> to vector<8x128xf32>
    %80 = vector.extract_strided_slice %64 {offsets = [40, 0], sizes = [8, 128], strides = [1, 1]} : vector<80x128xf32> to vector<8x128xf32>
    %81 = arith.maximumf %79, %80 : vector<8x128xf32>
    %82 = arith.truncf %81 : vector<8x128xf32> to vector<8x128xbf16>
    %c0_55 = arith.constant 0 : index
    %c2_56 = arith.constant 2 : index
    %c0_57 = arith.constant 0 : index
    %c0_58 = arith.constant 0 : index
    %83 = vector.load %arg4[%c0_55, %c2_56, %c0_57, %c0_58] : memref<1x5x8x128xbf16, #tpu.memory_space<vmem>>, vector<1x1x8x128xbf16>
    %84 = vector.shape_cast %83 : vector<1x1x8x128xbf16> to vector<8x128xbf16>
    %85 = vector.shape_cast %82 : vector<8x128xbf16> to vector<1x1x8x128xbf16>
    tpu.vector_store %arg4[%c0_55, %c2_56, %c0_57, %c0_58], %85 {strides = array<i32>} : memref<1x5x8x128xbf16, #tpu.memory_space<vmem>>, vector<1x1x8x128xbf16>,
    %86 = vector.extract_strided_slice %64 {offsets = [48, 0], sizes = [8, 128], strides = [1, 1]} : vector<80x128xf32> to vector<8x128xf32>
    %87 = vector.extract_strided_slice %64 {offsets = [56, 0], sizes = [8, 128], strides = [1, 1]} : vector<80x128xf32> to vector<8x128xf32>
    %88 = arith.maximumf %86, %87 : vector<8x128xf32>
    %89 = arith.truncf %88 : vector<8x128xf32> to vector<8x128xbf16>
    %c0_59 = arith.constant 0 : index
    %c3_60 = arith.constant 3 : index
    %c0_61 = arith.constant 0 : index
    %c0_62 = arith.constant 0 : index
    %90 = vector.load %arg4[%c0_59, %c3_60, %c0_61, %c0_62] : memref<1x5x8x128xbf16, #tpu.memory_space<vmem>>, vector<1x1x8x128xbf16>
    %91 = vector.shape_cast %90 : vector<1x1x8x128xbf16> to vector<8x128xbf16>
    %92 = vector.shape_cast %89 : vector<8x128xbf16> to vector<1x1x8x128xbf16>
    tpu.vector_store %arg4[%c0_59, %c3_60, %c0_61, %c0_62], %92 {strides = array<i32>} : memref<1x5x8x128xbf16, #tpu.memory_space<vmem>>, vector<1x1x8x128xbf16>,
    %93 = vector.extract_strided_slice %64 {offsets = [64, 0], sizes = [8, 128], strides = [1, 1]} : vector<80x128xf32> to vector<8x128xf32>
    %94 = vector.extract_strided_slice %64 {offsets = [72, 0], sizes = [8, 128], strides = [1, 1]} : vector<80x128xf32> to vector<8x128xf32>
    %95 = arith.maximumf %93, %94 : vector<8x128xf32>
    %96 = arith.truncf %95 : vector<8x128xf32> to vector<8x128xbf16>
    %c0_63 = arith.constant 0 : index
    %c4_64 = arith.constant 4 : index
    %c0_65 = arith.constant 0 : index
    %c0_66 = arith.constant 0 : index
    %97 = vector.load %arg4[%c0_63, %c4_64, %c0_65, %c0_66] : memref<1x5x8x128xbf16, #tpu.memory_space<vmem>>, vector<1x1x8x128xbf16>
    %98 = vector.shape_cast %97 : vector<1x1x8x128xbf16> to vector<8x128xbf16>
    %99 = vector.shape_cast %96 : vector<8x128xbf16> to vector<1x1x8x128xbf16>
    tpu.vector_store %arg4[%c0_63, %c4_64, %c0_65, %c0_66], %99 {strides = array<i32>} : memref<1x5x8x128xbf16, #tpu.memory_space<vmem>>, vector<1x1x8x128xbf16>,
    return
  }
  func.func @transform_0(%arg0: i32) -> (i32, i32, i32) {
    %c0_i32 = arith.constant 0 : i32
    %c0_i32_0 = arith.constant 0 : i32
    %c0_i32_1 = arith.constant 0 : i32
    return %arg0, %c0_i32, %c0_i32_0 : i32, i32, i32
  }
  func.func @transform_1(%arg0: i32) -> (i32, i32, i32) {
    %c0_i32 = arith.constant 0 : i32
    %c0_i32_0 = arith.constant 0 : i32
    %c0_i32_1 = arith.constant 0 : i32
    %c0_i32_2 = arith.constant 0 : i32
    return %c0_i32, %c0_i32_0, %c0_i32_1 : i32, i32, i32
  }
  func.func @transform_2(%arg0: i32) -> (i32, i32) {
    %c0_i32 = arith.constant 0 : i32
    %c0_i32_0 = arith.constant 0 : i32
    %c0_i32_1 = arith.constant 0 : i32
    return %c0_i32, %c0_i32_0 : i32, i32
  }
  func.func @transform_3(%arg0: i32) -> (i32, i32, i32, i32) {
    %c0_i32 = arith.constant 0 : i32
    %c0_i32_0 = arith.constant 0 : i32
    %c0_i32_1 = arith.constant 0 : i32
    %c0_i32_2 = arith.constant 0 : i32
    return %arg0, %c0_i32, %c0_i32_0, %c0_i32_1 : i32, i32, i32, i32
  }
}

</mosaic_0001>

<bundles_post_ra>
// kernel: simple_cnn_forward.3
= control target key start
LH: loop header
LB: loop body
LE: loop exit
PB: predicated region body
PF: predicated region fallthrough
CT: control target
= control target key end

     0   :  { %s6859_s12 = smov 0   ;;  %s8786_s0 = inlined_call_operand.vmem [shape: bf16[2,512,48], index: 0, kind: input, shape index: {}]   ;;  %s8787_s1 = inlined_call_operand.vmem [shape: bf16[10,48,128], index: 1, kind: input, shape index: {}]   ;;  %s8788_s2 = inlined_call_operand.vmem [shape: f32[1,128], index: 2, kind: input, shape index: {}]   ;;  %s8789_s3 = inlined_call_operand.vmem [shape: bf16[2,14,16,128], index: 3, kind: output, shape index: {}]  }
   0x1 LB: > { %s5094_s13 = sadd.s32 4294967295, %s6837_s12   ;;  %p5098_p0 = scmp.ge.s32.totalorder %s6837_s12, 1  ;;  %s6837_s12 = sphi %s6859_s12, %s13_s12  }
   0x2   : > { %p137_p1 = scmp.lt.s32.totalorder %s6837_s12, 3 }
   0x4   : > { %p138_p2 = pnand %p5098_p0, %p137_p1 }
   0x6   : > { %141 = sbr.rel (%p138_p2) target bundleno = 789 (0x315), region = 32 }
   0xb   : > { %v6687_v0 = vld [vmem:[%s8787_s1 + $0x28] sm:$0xff]   ;;  %p161_p3 = scmp.lt.s32.totalorder %s5094_s13, 1  ;;  %v6688_v1 = vld [vmem:[%s8787_s1 + $0x10] sm:$0xff]   ;;  %v6689_v2 = vld [vmem:[%s8787_s1 + $0x20] sm:$0xff]   ;;  %vm408_vm0 = vcmask 392192  }
   0xc   : > { %6058 = vmatprep.subr.bf16.mxu0 %v6687_v0  ;;  %6120 = vmatprep.subr.bf16.mxu1 %v6688_v1  ;;  %v6690_v3 = vld [vmem:[%s8787_s1 + $0x8] sm:$0xff]   ;;  %v6691_v4 = vld [vmem:[%s8787_s1 + $0x18] sm:$0xff]   ;;  %v6692_v5 = vld [vmem:[%s8787_s1] sm:$0xff]  }
   0xd   : > { %s9201_s13 = smov (!%p161_p3, %s5094_s13), 1  ;;  %6059 = vmatpush3.bf16.msra.mxu0 %v6687_v0  ;;  %6121 = vmatpush3.bf16.msra.mxu1 %v6688_v1  ;;  %v6696_v9 = vld [vmem:[%s8787_s1 + $0xa0] sm:$0xff]   ;;  %v6697_v10 = vld [vmem:[%s8787_s1 + $0x88] sm:$0xff]   ;;  %v6706_v14 = vld [vmem:[%s8787_s1 + $0x98] sm:$0xff]  }
   0xe   : > { %6060 = vmatprep.subr.bf16.mxu0 %v6689_v2  ;;  %s5636_s24 = sshll.u32 %s9201_s13, 8  ;;  %6122 = vmatprep.subr.bf16.mxu1 %v6690_v3  ;;  %v6707_v15 = vld [vmem:[%s8787_s1 + $0x80] sm:$0xff]   ;;  %v6718_v18 = vld [vmem:[%s8787_s1 + $0x90] sm:$0xff]   ;;  %v6719_v19 = vld [vmem:[%s8787_s1 + $0x78] sm:$0xff]   ;;  %s6678_s4 = smul.u32 112, %s9201_s13 }
   0xf   : > { %s6891_s29 = scalar_lea.vmem %s8786_s0, %s5636_s24  ;;  %v6983_v23 = vld [vmem:[%s8787_s1 + $0x40] sm:$0xff]   ;;  %v6988_v24 = vld [vmem:[%s8787_s1 + $0xb8] sm:$0xff]   ;;  %v6731_v44 = vld [vmem:[%s8787_s1 + $0xb0] sm:$0xff]  }
  0x10   : > { %v6894_v6 = vld [vmem:[%s6891_s29 + $0x8] sm:$0xff]   ;;  %v6897_v7 = vld [vmem:[%s6891_s29] sm:$0xff]   ;;  %v6900_v8 = vld [vmem:[%s6891_s29 + $0x10] sm:$0xff]   ;;  %s8503_s6 = scalar_lea.vmem %s8789_s3, %s6678_s4 }
  0x11   : > { %6061 = vmatpush3.bf16.msra.mxu0 %v6689_v2  ;;  %6123 = vmatpush3.bf16.msra.mxu1 %v6690_v3  ;;  %v6913_v11 = vld [vmem:[%s6891_s29 + $0x18] sm:$0xff]   ;;  %v6924_v12 = vld [vmem:[%s6891_s29 + $0x20] sm:$0xff]   ;;  %v6927_v13 = vld [vmem:[%s6891_s29 + $0x28] sm:$0xff]  }
  0x12   : > { %6062 = vmatprep.subr.bf16.mxu0 %v6691_v4  ;;  %6124 = vmatprep.subr.bf16.mxu1 %v6692_v5  ;;  %v6944_v16 = vld [vmem:[%s6891_s29 + $0x30] sm:$0xff]   ;;  %v6947_v17 = vld [vmem:[%s6891_s29 + $0x38] sm:$0xff]   ;;  %v6964_v20 = vld [vmem:[%s6891_s29 + $0x40] sm:$0xff]  }
  0x13   : > { %6064 = vmatprep.mubr.msk.bf16.mxu0 %vm408_vm0, %v6894_v6  ;;  %6126 = vmatprep.mubr.msk.bf16.mxu1 %vm408_vm0, %v6897_v7  ;;  %v6967_v21 = vld [vmem:[%s6891_s29 + $0x48] sm:$0xff]   ;;  %v6978_v22 = vld [vmem:[%s6891_s29 + $0x50] sm:$0xff]   ;;  %v6991_v25 = vld [vmem:[%s6891_s29 + $0x58] sm:$0xff]  }
  0x14   : > { %v7004_v26 = vld [vmem:[%s6891_s29 + $0x60] sm:$0xff]   ;;  %v7007_v27 = vld [vmem:[%s6891_s29 + $0x68] sm:$0xff]   ;;  %v7018_v28 = vld [vmem:[%s6891_s29 + $0x70] sm:$0xff]  }
  0x15   : > { %6063 = vmatpush3.bf16.msra.mxu0 %v6691_v4  ;;  %6125 = vmatpush3.bf16.msra.mxu1 %v6692_v5  ;;  %v7021_v29 = vld [vmem:[%s6891_s29 + $0x78] sm:$0xff]   ;;  %v7032_v30 = vld [vmem:[%s6891_s29 + $0x80] sm:$0xff]   ;;  %v7035_v31 = vld [vmem:[%s6891_s29 + $0x88] sm:$0xff]  }
  0x16   : > { %6182 = vmatprep.subr.bf16.mxu0 %v6696_v9  ;;  %6244 = vmatprep.subr.bf16.mxu1 %v6697_v10  ;;  %v7046_v32 = vld [vmem:[%s6891_s29 + $0x90] sm:$0xff]   ;;  %v7049_v33 = vld [vmem:[%s6891_s29 + $0x98] sm:$0xff]   ;;  %v7060_v34 = vld [vmem:[%s6891_s29 + $0xa0] sm:$0xff]  }
  0x17   : > { %v7063_v35 = vld [vmem:[%s6891_s29 + $0xa8] sm:$0xff]   ;;  %v7074_v36 = vld [vmem:[%s6891_s29 + $0xb0] sm:$0xff]   ;;  %v7077_v37 = vld [vmem:[%s6891_s29 + $0xb8] sm:$0xff]  }
  0x18   : > { %6065 = vmatmul.mubr.msk.bf16.vlgmr.msra.gmra.mxu0 %vm408_vm0, %v6900_v8  ;;  %6127 = vmatmul.mubr.msk.bf16.vlgmr.msra.gmra.mxu1 %vm408_vm0, %v6894_v6  ;;  %v7088_v38 = vld [vmem:[%s6891_s29 + $0xc0] sm:$0xff]   ;;  %v7091_v39 = vld [vmem:[%s6891_s29 + $0xc8] sm:$0xff]   ;;  %v7102_v40 = vld [vmem:[%s6891_s29 + $0xd0] sm:$0xff]  }
  0x19   : > { %6183 = vmatpush3.bf16.msra.mxu0 %v6696_v9  ;;  %6245 = vmatpush3.bf16.msra.mxu1 %v6697_v10  ;;  %v7105_v41 = vld [vmem:[%s6891_s29 + $0xd8] sm:$0xff]   ;;  %v7116_v42 = vld [vmem:[%s6891_s29 + $0xe0] sm:$0xff]   ;;  %v6732_v45 = vld [vmem:[%s8787_s1 + $0x30] sm:$0xff]  }
  0x1a   : > { %6068 = vmatprep.mubr.msk.bf16.mxu0 %vm408_vm0, %v6913_v11  ;;  %6130 = vmatprep.mubr.msk.bf16.mxu1 %vm408_vm0, %v6900_v8  ;;  %v6730_v43 = vld [vmem:[%s8787_s1 + $0x38] sm:$0xff]   ;;  %v6733_v46 = vld [vmem:[%s8787_s1 + $0xa8] sm:$0xff]   ;;  %v7158_v48 = vld [vmem:[%s8787_s1 + $0xd0] sm:$0xff]  }
  0x1b   : > { %6184 = vmatprep.subr.bf16.mxu0 %v6706_v14  ;;  %6246 = vmatprep.subr.bf16.mxu1 %v6707_v15  ;;  %v7151_v47 = vld [vmem:[%s8787_s1 + $0x58] sm:$0xff]  }
  0x1d   : > { %6185 = vmatpush3.bf16.msra.mxu0 %v6706_v14  ;;  %6247 = vmatpush3.bf16.msra.mxu1 %v6707_v15 }
  0x1e   : > { %6186 = vmatprep.subr.bf16.mxu0 %v6718_v18  ;;  %6248 = vmatprep.subr.bf16.mxu1 %v6719_v19 }
  0x20   : > { %6069 = vmatmul.mubr.msk.bf16.gmra.mxu0 %vm408_vm0, %v6924_v12  ;;  %6131 = vmatmul.mubr.msk.bf16.gmra.mxu1 %vm408_vm0, %v6913_v11 }
  0x21   : > { %6072 = vmatprep.mubr.msk.bf16.mxu0 %vm408_vm0, %v6927_v13  ;;  %6134 = vmatprep.mubr.msk.bf16.mxu1 %vm408_vm0, %v6924_v12 }
  0x22   : > { %6187 = vmatpush3.bf16.msra.mxu0 %v6718_v18  ;;  %6249 = vmatpush3.bf16.msra.mxu1 %v6719_v19 }
  0x23   : > { %6306 = vmatprep.subr.bf16.mxu0 %v6983_v23  ;;  %6368 = vmatprep.subr.bf16.mxu1 %v6988_v24 }
  0x28   : > { %6073 = vmatmul.mubr.msk.bf16.gmra.mxu0 %vm408_vm0, %v6944_v16  ;;  %6135 = vmatmul.mubr.msk.bf16.gmra.mxu1 %vm408_vm0, %v6927_v13 }
  0x29   : > { %6076 = vmatprep.mubr.msk.bf16.mxu0 %vm408_vm0, %v6947_v17  ;;  %6138 = vmatprep.mubr.msk.bf16.mxu1 %vm408_vm0, %v6944_v16 }
  0x30   : > { %6077 = vmatmul.mubr.msk.bf16.gmra.mxu0 %vm408_vm0, %v6964_v20  ;;  %6139 = vmatmul.mubr.msk.bf16.gmra.mxu1 %vm408_vm0, %v6947_v17 }
  0x31   : > { %6080 = vmatprep.mubr.msk.bf16.mxu0 %vm408_vm0, %v6967_v21  ;;  %6142 = vmatprep.mubr.msk.bf16.mxu1 %vm408_vm0, %v6964_v20 }
  0x38   : > { %6081 = vmatmul.mubr.msk.bf16.gmra.mxu0 %vm408_vm0, %v6978_v22  ;;  %6143 = vmatmul.mubr.msk.bf16.gmra.mxu1 %vm408_vm0, %v6967_v21 }
  0x39   : > { %6084 = vmatprep.mubr.msk.bf16.mxu0 %vm408_vm0, %v6991_v25  ;;  %6146 = vmatprep.mubr.msk.bf16.mxu1 %vm408_vm0, %v6978_v22 }
  0x40   : > { %6085 = vmatmul.mubr.msk.bf16.gmra.mxu0 %vm408_vm0, %v7004_v26  ;;  %6147 = vmatmul.mubr.msk.bf16.gmra.mxu1 %vm408_vm0, %v6991_v25 }
  0x41   : > { %6088 = vmatprep.mubr.msk.bf16.mxu0 %vm408_vm0, %v7007_v27  ;;  %6150 = vmatprep.mubr.msk.bf16.mxu1 %vm408_vm0, %v7004_v26 }
  0x48   : > { %6089 = vmatmul.mubr.msk.bf16.gmra.mxu0 %vm408_vm0, %v7018_v28  ;;  %6151 = vmatmul.mubr.msk.bf16.gmra.mxu1 %vm408_vm0, %v7007_v27 }
  0x49   : > { %6092 = vmatprep.mubr.msk.bf16.mxu0 %vm408_vm0, %v7021_v29  ;;  %6154 = vmatprep.mubr.msk.bf16.mxu1 %vm408_vm0, %v7018_v28 }
  0x50   : > { %6093 = vmatmul.mubr.msk.bf16.gmra.mxu0 %vm408_vm0, %v7032_v30  ;;  %6155 = vmatmul.mubr.msk.bf16.gmra.mxu1 %vm408_vm0, %v7021_v29 }
  0x51   : > { %6096 = vmatprep.mubr.msk.bf16.mxu0 %vm408_vm0, %v7035_v31  ;;  %6158 = vmatprep.mubr.msk.bf16.mxu1 %vm408_vm0, %v7032_v30 }
  0x58   : > { %6097 = vmatmul.mubr.msk.bf16.gmra.mxu0 %vm408_vm0, %v7046_v32  ;;  %6159 = vmatmul.mubr.msk.bf16.gmra.mxu1 %vm408_vm0, %v7035_v31 }
  0x59   : > { %6100 = vmatprep.mubr.msk.bf16.mxu0 %vm408_vm0, %v7049_v33  ;;  %6162 = vmatprep.mubr.msk.bf16.mxu1 %vm408_vm0, %v7046_v32 }
  0x60   : > { %6101 = vmatmul.mubr.msk.bf16.gmra.mxu0 %vm408_vm0, %v7060_v34  ;;  %6163 = vmatmul.mubr.msk.bf16.gmra.mxu1 %vm408_vm0, %v7049_v33 }
  0x61   : > { %6104 = vmatprep.mubr.msk.bf16.mxu0 %vm408_vm0, %v7063_v35  ;;  %6166 = vmatprep.mubr.msk.bf16.mxu1 %vm408_vm0, %v7060_v34 }
  0x68   : > { %6105 = vmatmul.mubr.msk.bf16.gmra.mxu0 %vm408_vm0, %v7074_v36  ;;  %6167 = vmatmul.mubr.msk.bf16.gmra.mxu1 %vm408_vm0, %v7063_v35 }
  0x69   : > { %6108 = vmatprep.mubr.msk.bf16.mxu0 %vm408_vm0, %v7077_v37  ;;  %6170 = vmatprep.mubr.msk.bf16.mxu1 %vm408_vm0, %v7074_v36 }
  0x70   : > { %6109 = vmatmul.mubr.msk.bf16.gmra.mxu0 %vm408_vm0, %v7088_v38  ;;  %6171 = vmatmul.mubr.msk.bf16.gmra.mxu1 %vm408_vm0, %v7077_v37 }
  0x71   : > { %6112 = vmatprep.mubr.msk.bf16.mxu0 %vm408_vm0, %v7091_v39  ;;  %6174 = vmatprep.mubr.msk.bf16.mxu1 %vm408_vm0, %v7088_v38 }
  0x78   : > { %6113 = vmatmul.mubr.msk.bf16.gmra.mxu0 %vm408_vm0, %v7102_v40  ;;  %6175 = vmatmul.mubr.msk.bf16.gmra.mxu1 %vm408_vm0, %v7091_v39 }
  0x79   : > { %6116 = vmatprep.mubr.msk.bf16.mxu0 %vm408_vm0, %v7105_v41  ;;  %6178 = vmatprep.mubr.msk.bf16.mxu1 %vm408_vm0, %v7102_v40 }
  0x80   : > { %6117 = vmatmul.mubr.msk.bf16.gmra.mxu0 %vm408_vm0, %v7116_v42  ;;  %6179 = vmatmul.mubr.msk.bf16.gmra.mxu1 %vm408_vm0, %v7105_v41 }
  0x81   : > { %6188 = vmatprep.mubr.msk.bf16.mxu0 %vm408_vm0, %v6894_v6  ;;  %6250 = vmatprep.mubr.msk.bf16.mxu1 %vm408_vm0, %v6897_v7 }
  0x88   : > { %6189 = vmatmul.mubr.msk.bf16.vlgmr.msra.gmra.mxu0 %vm408_vm0, %v6900_v8  ;;  %6251 = vmatmul.mubr.msk.bf16.vlgmr.msra.gmra.mxu1 %vm408_vm0, %v6894_v6 }
  0x89   : > { %6307 = vmatpush3.bf16.msra.mxu0 %v6983_v23  ;;  %6369 = vmatpush3.bf16.msra.mxu1 %v6988_v24 }
  0x8a   : > { %6192 = vmatprep.mubr.msk.bf16.mxu0 %vm408_vm0, %v6913_v11  ;;  %6254 = vmatprep.mubr.msk.bf16.mxu1 %vm408_vm0, %v6900_v8 }
  0x8b   : > { %6308 = vmatprep.subr.bf16.mxu0 %v6730_v43  ;;  %6370 = vmatprep.subr.bf16.mxu1 %v6731_v44 }
  0x8d   : > { %6309 = vmatpush3.bf16.msra.mxu0 %v6730_v43  ;;  %6371 = vmatpush3.bf16.msra.mxu1 %v6731_v44  ;;  %v6759_v44 = vld [vmem:[%s8787_s1 + $0xc0] sm:$0xff]  }
  0x8e   : > { %6310 = vmatprep.subr.bf16.mxu0 %v6732_v45  ;;  %6372 = vmatprep.subr.bf16.mxu1 %v6733_v46 }
  0x90   : > { %6193 = vmatmul.mubr.msk.bf16.gmra.mxu0 %vm408_vm0, %v6924_v12  ;;  %6255 = vmatmul.mubr.msk.bf16.gmra.mxu1 %vm408_vm0, %v6913_v11 }
  0x91   : > { %6196 = vmatprep.mubr.msk.bf16.mxu0 %vm408_vm0, %v6927_v13  ;;  %6258 = vmatprep.mubr.msk.bf16.mxu1 %vm408_vm0, %v6924_v12 }
  0x92   : > { %6311 = vmatpush3.bf16.msra.mxu0 %v6732_v45  ;;  %6373 = vmatpush3.bf16.msra.mxu1 %v6733_v46 }
  0x93   : > { %6430 = vmatprep.subr.bf16.mxu0 %v7151_v47  ;;  %6492 = vmatprep.subr.bf16.mxu1 %v7158_v48 }
  0x98   : > { %6197 = vmatmul.mubr.msk.bf16.gmra.mxu0 %vm408_vm0, %v6944_v16  ;;  %6259 = vmatmul.mubr.msk.bf16.gmra.mxu1 %vm408_vm0, %v6927_v13 }
  0x99   : > { %6200 = vmatprep.mubr.msk.bf16.mxu0 %vm408_vm0, %v6947_v17  ;;  %6262 = vmatprep.mubr.msk.bf16.mxu1 %vm408_vm0, %v6944_v16 }
  0xa0   : > { %6201 = vmatmul.mubr.msk.bf16.gmra.mxu0 %vm408_vm0, %v6964_v20  ;;  %6263 = vmatmul.mubr.msk.bf16.gmra.mxu1 %vm408_vm0, %v6947_v17  ;;  %v6734_v17 = vld [vmem:[%s6891_s29 + $0x10] sm:$0xff]  }
  0xa1   : > { %6204 = vmatprep.mubr.msk.bf16.mxu0 %vm408_vm0, %v6967_v21  ;;  %6266 = vmatprep.mubr.msk.bf16.mxu1 %vm408_vm0, %v6964_v20 }
  0xa8   : > { %6205 = vmatmul.mubr.msk.bf16.gmra.mxu0 %vm408_vm0, %v6978_v22  ;;  %6267 = vmatmul.mubr.msk.bf16.gmra.mxu1 %vm408_vm0, %v6967_v21 }
  0xa9   : > { %6208 = vmatprep.mubr.msk.bf16.mxu0 %vm408_vm0, %v6991_v25  ;;  %6270 = vmatprep.mubr.msk.bf16.mxu1 %vm408_vm0, %v6978_v22 }
  0xb0   : > { %6209 = vmatmul.mubr.msk.bf16.gmra.mxu0 %vm408_vm0, %v7004_v26  ;;  %6271 = vmatmul.mubr.msk.bf16.gmra.mxu1 %vm408_vm0, %v6991_v25 }
  0xb1   : > { %6212 = vmatprep.mubr.msk.bf16.mxu0 %vm408_vm0, %v7007_v27  ;;  %6274 = vmatprep.mubr.msk.bf16.mxu1 %vm408_vm0, %v7004_v26 }
  0xb8   : > { %6213 = vmatmul.mubr.msk.bf16.gmra.mxu0 %vm408_vm0, %v7018_v28  ;;  %6275 = vmatmul.mubr.msk.bf16.gmra.mxu1 %vm408_vm0, %v7007_v27 }
  0xb9   : > { %6216 = vmatprep.mubr.msk.bf16.mxu0 %vm408_vm0, %v7021_v29  ;;  %6278 = vmatprep.mubr.msk.bf16.mxu1 %vm408_vm0, %v7018_v28 }
  0xc0   : > { %6217 = vmatmul.mubr.msk.bf16.gmra.mxu0 %vm408_vm0, %v7032_v30  ;;  %6279 = vmatmul.mubr.msk.bf16.gmra.mxu1 %vm408_vm0, %v7021_v29  ;;  %v6735_v29 = vld [vmem:[%s6891_s29 + $0x18] sm:$0xff]  }
  0xc1   : > { %6220 = vmatprep.mubr.msk.bf16.mxu0 %vm408_vm0, %v7035_v31  ;;  %6282 = vmatprep.mubr.msk.bf16.mxu1 %vm408_vm0, %v7032_v30 }
  0xc8   : > { %6221 = vmatmul.mubr.msk.bf16.gmra.mxu0 %vm408_vm0, %v7046_v32  ;;  %6283 = vmatmul.mubr.msk.bf16.gmra.mxu1 %vm408_vm0, %v7035_v31 }
  0xc9   : > { %6224 = vmatprep.mubr.msk.bf16.mxu0 %vm408_vm0, %v7049_v33  ;;  %6286 = vmatprep.mubr.msk.bf16.mxu1 %vm408_vm0, %v7046_v32 }
  0xd0   : > { %6225 = vmatmul.mubr.msk.bf16.gmra.mxu0 %vm408_vm0, %v7060_v34  ;;  %6287 = vmatmul.mubr.msk.bf16.gmra.mxu1 %vm408_vm0, %v7049_v33  ;;  %v6738_v33 = vld [vmem:[%s6891_s29 + $0x20] sm:$0xff]  }
  0xd1   : > { %6228 = vmatprep.mubr.msk.bf16.mxu0 %vm408_vm0, %v7063_v35  ;;  %6290 = vmatprep.mubr.msk.bf16.mxu1 %vm408_vm0, %v7060_v34 }
  0xd8   : > { %v6066_v49 = vpop.f32.mrf.mxu0  ;;  %6229 = vmatmul.mubr.msk.bf16.gmra.mxu0 %vm408_vm0, %v7074_v36  ;;  %v6128_v50 = vpop.f32.mrf.mxu1  ;;  %6291 = vmatmul.mubr.msk.bf16.gmra.mxu1 %vm408_vm0, %v7063_v35  ;;  %v6746_v35 = vld [vmem:[%s8787_s1 + $0x50] sm:$0xff]  }
  0xd9   : > { %6232 = vmatprep.mubr.msk.bf16.mxu0 %vm408_vm0, %v7077_v37  ;;  %v7238_v51 = vadd.f32 %v6128_v50, %v6066_v49  ;;  %6294 = vmatprep.mubr.msk.bf16.mxu1 %vm408_vm0, %v7074_v36  ;;  %v6740_v49 = vld [vmem:[%s6891_s29 + $0x30] sm:$0xff]  }
  0xda   : > { %v527_v52 = vpop.f32.mrf.mxu0  ;;  %v810_v53 = vpop.f32.mrf.mxu1 }
  0xdb   : > { %v7242_v54 = vadd.f32 %v810_v53, %v527_v52 }
  0xdc   : > { %v6067_v55 = vpop.f32.mrf.mxu0  ;;  %v6129_v56 = vpop.f32.mrf.mxu1 }
  0xdd   : > { %v7244_v57 = vadd.f32 %v6129_v56, %v6067_v55  ;;  %v7326_v55 = vld [vmem:[%s8787_s1 + $0x70] sm:$0xff]  }
  0xde   : > { %v530_v58 = vpop.f32.mrf.mxu0  ;;  %v813_v59 = vpop.f32.mrf.mxu1 }
  0xdf   : > { %v7246_v60 = vadd.f32 %v813_v59, %v530_v58  ;;  %v7334_v59 = vld [vmem:[%s8787_s1 + $0xe8] sm:$0xff]  }
  0xe0   : > { %v6070_v61 = vpop.f32.mrf.mxu0  ;;  %6233 = vmatmul.mubr.msk.bf16.gmra.mxu0 %vm408_vm0, %v7088_v38  ;;  %v6132_v62 = vpop.f32.mrf.mxu1  ;;  %6295 = vmatmul.mubr.msk.bf16.gmra.mxu1 %vm408_vm0, %v7077_v37 }
  0xe1   : > { %6236 = vmatprep.mubr.msk.bf16.mxu0 %vm408_vm0, %v7091_v39  ;;  %v7254_v63 = vadd.f32 %v6132_v62, %v6070_v61  ;;  %6298 = vmatprep.mubr.msk.bf16.mxu1 %vm408_vm0, %v7088_v38  ;;  %v6747_v38 = vld [vmem:[%s8787_s1 + $0xc8] sm:$0xff]  }
  0xe2   : > { %v543_v0 = vpop.f32.mrf.mxu0  ;;  %v826_v1 = vpop.f32.mrf.mxu1 }
  0xe3   : > { %v7258_v2 = vadd.f32 %v826_v1, %v543_v0 }
  0xe4   : > { %v6071_v3 = vpop.f32.mrf.mxu0  ;;  %v6133_v4 = vpop.f32.mrf.mxu1 }
  0xe5   : > { %v7260_v5 = vadd.f32 %v6133_v4, %v6071_v3 }
  0xe6   : > { %v546_v6 = vpop.f32.mrf.mxu0  ;;  %v829_v7 = vpop.f32.mrf.mxu1 }
  0xe7   : > { %v7262_v8 = vadd.f32 %v829_v7, %v546_v6  ;;  %v6741_v6 = vld [vmem:[%s6891_s29 + $0x38] sm:$0xff]  }
  0xe8   : > { %v6074_v9 = vpop.f32.mrf.mxu0  ;;  %6237 = vmatmul.mubr.msk.bf16.gmra.mxu0 %vm408_vm0, %v7102_v40  ;;  %v6136_v10 = vpop.f32.mrf.mxu1  ;;  %6299 = vmatmul.mubr.msk.bf16.gmra.mxu1 %vm408_vm0, %v7091_v39 }
  0xe9   : > { %6240 = vmatprep.mubr.msk.bf16.mxu0 %vm408_vm0, %v7105_v41  ;;  %v7270_v11 = vadd.f32 %v6136_v10, %v6074_v9  ;;  %6302 = vmatprep.mubr.msk.bf16.mxu1 %vm408_vm0, %v7102_v40  ;;  %v6742_v9 = vld [vmem:[%s6891_s29 + $0x40] sm:$0xff]  }
  0xea   : > { %v559_v12 = vpop.f32.mrf.mxu0  ;;  %v842_v13 = vpop.f32.mrf.mxu1 }
  0xeb   : > { %v7274_v14 = vadd.f32 %v842_v13, %v559_v12 }
  0xec   : > { %v6075_v15 = vpop.f32.mrf.mxu0  ;;  %v6137_v16 = vpop.f32.mrf.mxu1 }
  0xed   : > { %v7277_v18 = vadd.f32 %v6137_v16, %v6075_v15 }
  0xee   : > { %v562_v19 = vpop.f32.mrf.mxu0  ;;  %v845_v20 = vpop.f32.mrf.mxu1 }
  0xef   : > { %v7279_v21 = vadd.f32 %v845_v20, %v562_v19 }
  0xf0   : > { %v6078_v22 = vpop.f32.mrf.mxu0  ;;  %6241 = vmatmul.mubr.msk.bf16.gmra.mxu0 %vm408_vm0, %v7116_v42  ;;  %v6140_v23 = vpop.f32.mrf.mxu1  ;;  %6303 = vmatmul.mubr.msk.bf16.gmra.mxu1 %vm408_vm0, %v7105_v41  ;;  %v6758_v42 = vld [vmem:[%s8787_s1 + $0x48] sm:$0xff]  }
  0xf1   : > { %6312 = vmatprep.mubr.msk.bf16.mxu0 %vm408_vm0, %v6734_v17  ;;  %v7286_v24 = vadd.f32 %v6140_v23, %v6078_v22  ;;  %6374 = vmatprep.mubr.msk.bf16.mxu1 %vm408_vm0, %v6734_v17 }
  0xf2   : > { %v575_v25 = vpop.f32.mrf.mxu0  ;;  %v858_v26 = vpop.f32.mrf.mxu1 }
  0xf3   : > { %v7289_v27 = vadd.f32 %v858_v26, %v575_v25  ;;  %v6743_v26 = vld [vmem:[%s6891_s29 + $0x48] sm:$0xff]  }
  0xf4   : > { %v6079_v28 = vpop.f32.mrf.mxu0  ;;  %v6141_v30 = vpop.f32.mrf.mxu1 }
  0xf5   : > { %v7292_v31 = vadd.f32 %v6141_v30, %v6079_v28 }
  0xf6   : > { %v578_v32 = vpop.f32.mrf.mxu0  ;;  %v861_v34 = vpop.f32.mrf.mxu1 }
  0xf7   : > { %v7298_v36 = vadd.f32 %v861_v34, %v578_v32 }
  0xf8   : > { %v6082_v37 = vpop.f32.mrf.mxu0  ;;  %6313 = vmatmul.mubr.msk.bf16.vlgmr.msra.gmra.mxu0 %vm408_vm0, %v6735_v29  ;;  %v6144_v39 = vpop.f32.mrf.mxu1  ;;  %6375 = vmatmul.mubr.msk.bf16.vlgmr.msra.gmra.mxu1 %vm408_vm0, %v6735_v29  ;;  %v6744_v29 = vld [vmem:[%s6891_s29 + $0x50] sm:$0xff]  }
  0xf9   : > { %6431 = vmatpush3.bf16.msra.mxu0 %v7151_v47  ;;  %v7306_v40 = vadd.f32 %v6144_v39, %v6082_v37  ;;  %6493 = vmatpush3.bf16.msra.mxu1 %v7158_v48  ;;  %v6739_v47 = vld [vmem:[%s6891_s29 + $0x28] sm:$0xff]  }
  0xfa   : > { %v591_v41 = vpop.f32.mrf.mxu0  ;;  %6316 = vmatprep.mubr.msk.bf16.mxu0 %vm408_vm0, %v6738_v33  ;;  %v874_v43 = vpop.f32.mrf.mxu1  ;;  %6378 = vmatprep.mubr.msk.bf16.mxu1 %vm408_vm0, %v6738_v33 }
  0xfb   : > { %6432 = vmatprep.subr.bf16.mxu0 %v6746_v35  ;;  %v7317_v45 = vadd.f32 %v874_v43, %v591_v41  ;;  %6494 = vmatprep.subr.bf16.mxu1 %v6747_v38 }
  0xfc   : > { %v6083_v46 = vpop.f32.mrf.mxu0  ;;  %v6145_v48 = vpop.f32.mrf.mxu1 }
  0xfd   : > { %6433 = vmatpush3.bf16.msra.mxu0 %v6746_v35  ;;  %v7321_v50 = vadd.f32 %v6145_v48, %v6083_v46  ;;  %6495 = vmatpush3.bf16.msra.mxu1 %v6747_v38 }
  0xfe   : > { %v594_v52 = vpop.f32.mrf.mxu0  ;;  %6434 = vmatprep.subr.bf16.mxu0 %v6758_v42  ;;  %v877_v53 = vpop.f32.mrf.mxu1  ;;  %6496 = vmatprep.subr.bf16.mxu1 %v6759_v44 }
  0xff   : > { %v7328_v56 = vadd.f32 %v877_v53, %v594_v52 }
 0x100   : > { %v6086_v58 = vpop.f32.mrf.mxu0  ;;  %6317 = vmatmul.mubr.msk.bf16.gmra.mxu0 %vm408_vm0, %v6739_v47  ;;  %v6148_v61 = vpop.f32.mrf.mxu1  ;;  %6379 = vmatmul.mubr.msk.bf16.gmra.mxu1 %vm408_vm0, %v6739_v47  ;;  %v6748_v47 = vld [vmem:[%s6891_s29 + $0x60] sm:$0xff]  }
 0x101   : > { %6320 = vmatprep.mubr.msk.bf16.mxu0 %vm408_vm0, %v6740_v49  ;;  %v7338_v62 = vadd.f32 %v6148_v61, %v6086_v58  ;;  %6382 = vmatprep.mubr.msk.bf16.mxu1 %vm408_vm0, %v6740_v49 }
 0x102   : > { %v607_v0 = vpop.f32.mrf.mxu0  ;;  %6435 = vmatpush3.bf16.msra.mxu0 %v6758_v42  ;;  %v890_v1 = vpop.f32.mrf.mxu1  ;;  %6497 = vmatpush3.bf16.msra.mxu1 %v6759_v44  ;;  %v6745_v44 = vld [vmem:[%s6891_s29 + $0x58] sm:$0xff]  }
 0x103   : > { %6554 = vmatprep.subr.bf16.mxu0 %v7326_v55  ;;  %v7342_v3 = vadd.f32 %v890_v1, %v607_v0  ;;  %6616 = vmatprep.subr.bf16.mxu1 %v7334_v59 }
 0x104   : > { %v6087_v4 = vpop.f32.mrf.mxu0  ;;  %v6149_v7 = vpop.f32.mrf.mxu1 }
 0x105   : > { %v7347_v10 = vadd.f32 %v6149_v7, %v6087_v4 }
 0x106   : > { %v610_v12 = vpop.f32.mrf.mxu0  ;;  %v893_v13 = vpop.f32.mrf.mxu1 }
 0x107   : > { %v7349_v15 = vadd.f32 %v893_v13, %v610_v12  ;;  %v6750_v13 = vld [vmem:[%s6891_s29 + $0x70] sm:$0xff]  }
 0x108   : > { %v6090_v16 = vpop.f32.mrf.mxu0  ;;  %6321 = vmatmul.mubr.msk.bf16.gmra.mxu0 %vm408_vm0, %v6741_v6  ;;  %v6152_v17 = vpop.f32.mrf.mxu1  ;;  %6383 = vmatmul.mubr.msk.bf16.gmra.mxu1 %vm408_vm0, %v6741_v6 }
 0x109   : > { %6324 = vmatprep.mubr.msk.bf16.mxu0 %vm408_vm0, %v6742_v9  ;;  %v7354_v19 = vadd.f32 %v6152_v17, %v6090_v16  ;;  %6386 = vmatprep.mubr.msk.bf16.mxu1 %vm408_vm0, %v6742_v9  ;;  %v6749_v9 = vld [vmem:[%s6891_s29 + $0x68] sm:$0xff]  }
 0x10a   : > { %v623_v20 = vpop.f32.mrf.mxu0  ;;  %v906_v22 = vpop.f32.mrf.mxu1 }
 0x10b   : > { %8790 = vst [vmem:[#allocation2_spill] sm:$0xff] %v7354_v19  ;;  %v7357_v23 = vadd.f32 %v906_v22, %v623_v20 }
 0x10c   : > { %v6091_v25 = vpop.f32.mrf.mxu0  ;;  %v6153_v28 = vpop.f32.mrf.mxu1 }
 0x10d   : > { %8791 = vst [vmem:[#allocation3_spill] sm:$0xff] %v7357_v23  ;;  %v7361_v30 = vadd.f32 %v6153_v28, %v6091_v25 }
 0x10e   : > { %v626_v32 = vpop.f32.mrf.mxu0  ;;  %v909_v33 = vpop.f32.mrf.mxu1 }
 0x10f   : > { %8792 = vst [vmem:[#allocation4_spill] sm:$0xff] %v7361_v30  ;;  %v7363_v34 = vadd.f32 %v909_v33, %v626_v32 }
 0x110   : > { %v6094_v35 = vpop.f32.mrf.mxu0  ;;  %6325 = vmatmul.mubr.msk.bf16.gmra.mxu0 %vm408_vm0, %v6743_v26  ;;  %v6156_v37 = vpop.f32.mrf.mxu1  ;;  %6387 = vmatmul.mubr.msk.bf16.gmra.mxu1 %vm408_vm0, %v6743_v26 }
 0x111   : > { %8793 = vst [vmem:[#allocation5_spill] sm:$0xff] %v7363_v34  ;;  %6328 = vmatprep.mubr.msk.bf16.mxu0 %vm408_vm0, %v6744_v29  ;;  %v7368_v38 = vadd.f32 %v6156_v37, %v6094_v35  ;;  %6390 = vmatprep.mubr.msk.bf16.mxu1 %vm408_vm0, %v6744_v29  ;;  %v6751_v37 = vld [vmem:[%s6891_s29 + $0x78] sm:$0xff]  }
 0x112   : > { %v639_v39 = vpop.f32.mrf.mxu0  ;;  %v922_v41 = vpop.f32.mrf.mxu1 }
 0x113   : > { %8794 = vst [vmem:[#allocation6_spill] sm:$0xff] %v7368_v38  ;;  %v7371_v42 = vadd.f32 %v922_v41, %v639_v39  ;;  %v6752_v41 = vld [vmem:[%s6891_s29 + $0x80] sm:$0xff]  }
 0x114   : > { %v6095_v43 = vpop.f32.mrf.mxu0  ;;  %v6157_v46 = vpop.f32.mrf.mxu1 }
 0x115   : > { %8795 = vst [vmem:[#allocation7_spill] sm:$0xff] %v7371_v42  ;;  %v7375_v48 = vadd.f32 %v6157_v46, %v6095_v43 }
 0x116   : > { %v642_v49 = vpop.f32.mrf.mxu0  ;;  %v925_v52 = vpop.f32.mrf.mxu1 }
 0x117   : > { %8796 = vst [vmem:[#allocation8_spill] sm:$0xff] %v7375_v48  ;;  %v7377_v53 = vadd.f32 %v925_v52, %v642_v49  ;;  %v6776_v48 = vld [vmem:[%s6891_s29 + $0x48] sm:$0xff]  }
 0x118   : > { %v6098_v58 = vpop.f32.mrf.mxu0  ;;  %6329 = vmatmul.mubr.msk.bf16.gmra.mxu0 %vm408_vm0, %v6745_v44  ;;  %v6160_v61 = vpop.f32.mrf.mxu1  ;;  %6391 = vmatmul.mubr.msk.bf16.gmra.mxu1 %vm408_vm0, %v6745_v44 }
 0x119   : > { %8797 = vst [vmem:[#allocation9_spill] sm:$0xff] %v7377_v53  ;;  %6332 = vmatprep.mubr.msk.bf16.mxu0 %vm408_vm0, %v6748_v47  ;;  %v7382_v0 = vadd.f32 %v6160_v61, %v6098_v58  ;;  %6394 = vmatprep.mubr.msk.bf16.mxu1 %vm408_vm0, %v6748_v47 }
 0x11a   : > { %v655_v1 = vpop.f32.mrf.mxu0  ;;  %v938_v4 = vpop.f32.mrf.mxu1 }
 0x11b   : > { %8798 = vst [vmem:[#allocation10_spill] sm:$0xff] %v7382_v0  ;;  %v7385_v6 = vadd.f32 %v938_v4, %v655_v1 }
 0x11c   : > { %v6099_v7 = vpop.f32.mrf.mxu0  ;;  %v6161_v12 = vpop.f32.mrf.mxu1 }
 0x11d   : > { %8799 = vst [vmem:[#allocation11_spill] sm:$0xff] %v7385_v6  ;;  %v7389_v16 = vadd.f32 %v6161_v12, %v6099_v7 }
 0x11e   : > { %v658_v17 = vpop.f32.mrf.mxu0  ;;  %v941_v20 = vpop.f32.mrf.mxu1 }
 0x11f   : > { %8800 = vst [vmem:[#allocation12_spill] sm:$0xff] %v7389_v16  ;;  %v7391_v22 = vadd.f32 %v941_v20, %v658_v17 }
 0x120   : > { %v6102_v25 = vpop.f32.mrf.mxu0  ;;  %6333 = vmatmul.mubr.msk.bf16.gmra.mxu0 %vm408_vm0, %v6749_v9  ;;  %v6164_v26 = vpop.f32.mrf.mxu1  ;;  %6395 = vmatmul.mubr.msk.bf16.gmra.mxu1 %vm408_vm0, %v6749_v9  ;;  %v6753_v9 = vld [vmem:[%s6891_s29 + $0x88] sm:$0xff]  }
 0x121   : > { %8801 = vst [vmem:[#allocation13_spill] sm:$0xff] %v7391_v22  ;;  %6336 = vmatprep.mubr.msk.bf16.mxu0 %vm408_vm0, %v6750_v13  ;;  %v7396_v28 = vadd.f32 %v6164_v26, %v6102_v25  ;;  %6398 = vmatprep.mubr.msk.bf16.mxu1 %vm408_vm0, %v6750_v13  ;;  %v6754_v13 = vld [vmem:[%s6891_s29 + $0x90] sm:$0xff]  }
 0x122   : > { %v671_v29 = vpop.f32.mrf.mxu0  ;;  %v954_v32 = vpop.f32.mrf.mxu1 }
 0x123   : > { %8802 = vst [vmem:[#allocation14_spill] sm:$0xff] %v7396_v28  ;;  %v7399_v33 = vadd.f32 %v954_v32, %v671_v29  ;;  %v6772_v28 = vld [vmem:[%s6891_s29 + $0x28] sm:$0xff]  }
 0x124   : > { %v6103_v35 = vpop.f32.mrf.mxu0  ;;  %v6165_v39 = vpop.f32.mrf.mxu1 }
 0x125   : > { %8803 = vst [vmem:[#allocation15_spill] sm:$0xff] %v7399_v33  ;;  %v7403_v43 = vadd.f32 %v6165_v39, %v6103_v35 }
 0x126   : > { %v674_v44 = vpop.f32.mrf.mxu0  ;;  %v957_v46 = vpop.f32.mrf.mxu1 }
 0x127   : > { %8804 = vst [vmem:[#allocation16_spill] sm:$0xff] %v7403_v43  ;;  %v7405_v47 = vadd.f32 %v957_v46, %v674_v44  ;;  %v6755_v46 = vld [vmem:[%s6891_s29 + $0x98] sm:$0xff]  }
 0x128   : > { %v6106_v49 = vpop.f32.mrf.mxu0  ;;  %6337 = vmatmul.mubr.msk.bf16.gmra.mxu0 %vm408_vm0, %v6751_v37  ;;  %v6168_v52 = vpop.f32.mrf.mxu1  ;;  %6399 = vmatmul.mubr.msk.bf16.gmra.mxu1 %vm408_vm0, %v6751_v37 }
 0x129   : > { %8805 = vst [vmem:[#allocation17_spill] sm:$0xff] %v7405_v47  ;;  %6340 = vmatprep.mubr.msk.bf16.mxu0 %vm408_vm0, %v6752_v41  ;;  %v7410_v58 = vadd.f32 %v6168_v52, %v6106_v49  ;;  %6402 = vmatprep.mubr.msk.bf16.mxu1 %vm408_vm0, %v6752_v41  ;;  %v6756_v52 = vld [vmem:[%s6891_s29 + $0xa0] sm:$0xff]  }
 0x12a   : > { %v687_v61 = vpop.f32.mrf.mxu0  ;;  %v970_v1 = vpop.f32.mrf.mxu1 }
 0x12b   : > { %8806 = vst [vmem:[#allocation18_spill] sm:$0xff] %v7410_v58  ;;  %v7413_v4 = vadd.f32 %v970_v1, %v687_v61 }
 0x12c   : > { %v6107_v7 = vpop.f32.mrf.mxu0  ;;  %v6169_v12 = vpop.f32.mrf.mxu1 }
 0x12d   : > { %8807 = vst [vmem:[#allocation19_spill] sm:$0xff] %v7413_v4  ;;  %v7417_v17 = vadd.f32 %v6169_v12, %v6107_v7 }
 0x12e   : > { %v690_v20 = vpop.f32.mrf.mxu0  ;;  %v973_v25 = vpop.f32.mrf.mxu1 }
 0x12f   : > { %8808 = vst [vmem:[#allocation20_spill] sm:$0xff] %v7417_v17  ;;  %v7419_v26 = vadd.f32 %v973_v25, %v690_v20  ;;  %v6767_v17 = vld [vmem:[%s6891_s29 + $0xe8] sm:$0xff]  }
 0x130   : > { %v6110_v29 = vpop.f32.mrf.mxu0  ;;  %6341 = vmatmul.mubr.msk.bf16.gmra.mxu0 %vm408_vm0, %v6753_v9  ;;  %v6172_v32 = vpop.f32.mrf.mxu1  ;;  %6403 = vmatmul.mubr.msk.bf16.gmra.mxu1 %vm408_vm0, %v6753_v9 }
 0x131   : > { %8809 = vst [vmem:[#allocation21_spill] sm:$0xff] %v7419_v26  ;;  %6344 = vmatprep.mubr.msk.bf16.mxu0 %vm408_vm0, %v6754_v13  ;;  %v7424_v35 = vadd.f32 %v6172_v32, %v6110_v29  ;;  %6406 = vmatprep.mubr.msk.bf16.mxu1 %vm408_vm0, %v6754_v13 }
 0x132   : > { %v703_v37 = vpop.f32.mrf.mxu0  ;;  %v986_v39 = vpop.f32.mrf.mxu1 }
 0x133   : > { %8810 = vst [vmem:[#allocation22_spill] sm:$0xff] %v7424_v35  ;;  %v7427_v41 = vadd.f32 %v986_v39, %v703_v37  ;;  %v6757_v39 = vld [vmem:[%s6891_s29 + $0xa8] sm:$0xff]  }
 0x134   : > { %v6111_v44 = vpop.f32.mrf.mxu0  ;;  %v6173_v49 = vpop.f32.mrf.mxu1 }
 0x135   : > { %8811 = vst [vmem:[#allocation23_spill] sm:$0xff] %v7427_v41  ;;  %v7431_v61 = vadd.f32 %v6173_v49, %v6111_v44  ;;  %v6760_v49 = vld [vmem:[%s6891_s29 + $0xb0] sm:$0xff]  }
 0x136   : > { %v706_v1 = vpop.f32.mrf.mxu0  ;;  %v989_v7 = vpop.f32.mrf.mxu1 }
 0x137   : > { %8812 = vst [vmem:[#allocation24_spill] sm:$0xff] %v7431_v61  ;;  %v7433_v9 = vadd.f32 %v989_v7, %v706_v1  ;;  %v6765_v61 = vld [vmem:[%s6891_s29 + $0xd8] sm:$0xff]  }
 0x138   : > { %v6114_v12 = vpop.f32.mrf.mxu0  ;;  %6345 = vmatmul.mubr.msk.bf16.gmra.mxu0 %vm408_vm0, %v6755_v46  ;;  %v6176_v20 = vpop.f32.mrf.mxu1  ;;  %6407 = vmatmul.mubr.msk.bf16.gmra.mxu1 %vm408_vm0, %v6755_v46 }
 0x139   : > { %8813 = vst [vmem:[#allocation25_spill] sm:$0xff] %v7433_v9  ;;  %6348 = vmatprep.mubr.msk.bf16.mxu0 %vm408_vm0, %v6756_v52  ;;  %v7438_v13 = vadd.f32 %v6176_v20, %v6114_v12  ;;  %6410 = vmatprep.mubr.msk.bf16.mxu1 %vm408_vm0, %v6756_v52 }
 0x13a   : > { %v719_v25 = vpop.f32.mrf.mxu0  ;;  %v1002_v29 = vpop.f32.mrf.mxu1 }
 0x13b   : > { %8814 = vst [vmem:[#allocation26_spill] sm:$0xff] %v7438_v13  ;;  %v7441_v32 = vadd.f32 %v1002_v29, %v719_v25 }
 0x13c   : > { %v6115_v37 = vpop.f32.mrf.mxu0  ;;  %v6177_v44 = vpop.f32.mrf.mxu1 }
 0x13d   : > { %8815 = vst [vmem:[#allocation27_spill] sm:$0xff] %v7441_v32  ;;  %v7445_v1 = vadd.f32 %v6177_v44, %v6115_v37 }
 0x13e   : > { %v722_v7 = vpop.f32.mrf.mxu0  ;;  %v1005_v46 = vpop.f32.mrf.mxu1 }
 0x13f   : > { %8816 = vst [vmem:[#allocation28_spill] sm:$0xff] %v7445_v1  ;;  %v7447_v9 = vadd.f32 %v1005_v46, %v722_v7  ;;  %v6761_v1 = vld [vmem:[%s6891_s29 + $0xb8] sm:$0xff]   ;;  %v6762_v46 = vld [vmem:[%s6891_s29 + $0xc0] sm:$0xff]  }
 0x140   : > { %v6118_v12 = vpop.f32.mrf.mxu0  ;;  %6349 = vmatmul.mubr.msk.bf16.gmra.mxu0 %vm408_vm0, %v6757_v39  ;;  %v6180_v20 = vpop.f32.mrf.mxu1  ;;  %6411 = vmatmul.mubr.msk.bf16.gmra.mxu1 %vm408_vm0, %v6757_v39 }
 0x141   : > { %8817 = vst [vmem:[#allocation29_spill] sm:$0xff] %v7447_v9  ;;  %6352 = vmatprep.mubr.msk.bf16.mxu0 %vm408_vm0, %v6760_v49  ;;  %v7452_v52 = vadd.f32 %v6180_v20, %v6118_v12  ;;  %6414 = vmatprep.mubr.msk.bf16.mxu1 %vm408_vm0, %v6760_v49 }
 0x142   : > { %v735_v25 = vpop.f32.mrf.mxu0  ;;  %v1018_v29 = vpop.f32.mrf.mxu1 }
 0x143   : > { %8818 = vst [vmem:[#allocation30_spill] sm:$0xff] %v7452_v52  ;;  %v7455_v37 = vadd.f32 %v1018_v29, %v735_v25 }
 0x144   : > { %v6119_v44 = vpop.f32.mrf.mxu0  ;;  %v6181_v7 = vpop.f32.mrf.mxu1 }
 0x145   : > { %8819 = vst [vmem:[#allocation31_spill] sm:$0xff] %v7455_v37  ;;  %v7459_v9 = vadd.f32 %v6181_v7, %v6119_v44 }
 0x146   : > { %v738_v32 = vpop.f32.mrf.mxu0  ;;  %v1021_v39 = vpop.f32.mrf.mxu1 }
 0x147   : > { %8820 = vst [vmem:[#allocation32_spill] sm:$0xff] %v7459_v9  ;;  %v7461_v13 = vadd.f32 %v1021_v39, %v738_v32  ;;  %v6763_v9 = vld [vmem:[%s6891_s29 + $0xc8] sm:$0xff]   ;;  %v6764_v39 = vld [vmem:[%s6891_s29 + $0xd0] sm:$0xff]  }
 0x148   : > { %v6190_v12 = vpop.f32.mrf.mxu0  ;;  %6353 = vmatmul.mubr.msk.bf16.gmra.mxu0 %vm408_vm0, %v6761_v1  ;;  %v6252_v20 = vpop.f32.mrf.mxu1  ;;  %6415 = vmatmul.mubr.msk.bf16.gmra.mxu1 %vm408_vm0, %v6761_v1 }
 0x149   : > { %8821 = vst [vmem:[#allocation33_spill] sm:$0xff] %v7461_v13  ;;  %6356 = vmatprep.mubr.msk.bf16.mxu0 %vm408_vm0, %v6762_v46  ;;  %v7466_v49 = vadd.f32 %v6252_v20, %v6190_v12  ;;  %6418 = vmatprep.mubr.msk.bf16.mxu1 %vm408_vm0, %v6762_v46 }
 0x14a   : > { %v1092_v25 = vpop.f32.mrf.mxu0  ;;  %v1367_v29 = vpop.f32.mrf.mxu1 }
 0x14b   : > { %v7469_v44 = vadd.f32 %v1367_v29, %v1092_v25 }
 0x14c   : > { %v6191_v7 = vpop.f32.mrf.mxu0  ;;  %v6253_v32 = vpop.f32.mrf.mxu1 }
 0x14d   : > { %v7473_v13 = vadd.f32 %v6253_v32, %v6191_v7 }
 0x14e   : > { %v1095_v37 = vpop.f32.mrf.mxu0  ;;  %v1370_v1 = vpop.f32.mrf.mxu1 }
 0x14f   : > { %v7475_v52 = vadd.f32 %v1370_v1, %v1095_v37  ;;  %v6766_v1 = vld [vmem:[%s6891_s29 + $0xe0] sm:$0xff]  }
 0x150   : > { %v6194_v12 = vpop.f32.mrf.mxu0  ;;  %6357 = vmatmul.mubr.msk.bf16.gmra.mxu0 %vm408_vm0, %v6763_v9  ;;  %v6256_v20 = vpop.f32.mrf.mxu1  ;;  %6419 = vmatmul.mubr.msk.bf16.gmra.mxu1 %vm408_vm0, %v6763_v9 }
 0x151   : > { %6360 = vmatprep.mubr.msk.bf16.mxu0 %vm408_vm0, %v6764_v39  ;;  %v7480_v46 = vadd.f32 %v6256_v20, %v6194_v12  ;;  %6422 = vmatprep.mubr.msk.bf16.mxu1 %vm408_vm0, %v6764_v39 }
 0x152   : > { %v1108_v25 = vpop.f32.mrf.mxu0  ;;  %v1383_v29 = vpop.f32.mrf.mxu1 }
 0x153   : > { %v7483_v7 = vadd.f32 %v1383_v29, %v1108_v25 }
 0x154   : > { %v6195_v32 = vpop.f32.mrf.mxu0  ;;  %v6257_v37 = vpop.f32.mrf.mxu1 }
 0x155   : > { %v7487_v41 = vadd.f32 %v6257_v37, %v6195_v32 }
 0x156   : > { %v1111_v35 = vpop.f32.mrf.mxu0  ;;  %v1386_v9 = vpop.f32.mrf.mxu1 }
 0x157   : > { %v7489_v26 = vadd.f32 %v1386_v9, %v1111_v35  ;;  %v6768_v9 = vld [vmem:[%s6891_s29 + $0x18] sm:$0xff]  }
 0x158   : > { %v6198_v12 = vpop.f32.mrf.mxu0  ;;  %6361 = vmatmul.mubr.msk.bf16.gmra.mxu0 %vm408_vm0, %v6765_v61  ;;  %v6260_v20 = vpop.f32.mrf.mxu1  ;;  %6423 = vmatmul.mubr.msk.bf16.gmra.mxu1 %vm408_vm0, %v6765_v61 }
 0x159   : > { %6364 = vmatprep.mubr.msk.bf16.mxu0 %vm408_vm0, %v6766_v1  ;;  %v7494_v39 = vadd.f32 %v6260_v20, %v6198_v12  ;;  %6426 = vmatprep.mubr.msk.bf16.mxu1 %vm408_vm0, %v6766_v1 }
 0x15a   : > { %v1124_v25 = vpop.f32.mrf.mxu0  ;;  %v1399_v29 = vpop.f32.mrf.mxu1 }
 0x15b   : > { %v7497_v32 = vadd.f32 %v1399_v29, %v1124_v25 }
 0x15c   : > { %v6199_v37 = vpop.f32.mrf.mxu0  ;;  %v6261_v35 = vpop.f32.mrf.mxu1 }
 0x15d   : > { %v7501_v4 = vadd.f32 %v6261_v35, %v6199_v37 }
 0x15e   : > { %v1127_v58 = vpop.f32.mrf.mxu0  ;;  %v1402_v47 = vpop.f32.mrf.mxu1 }
 0x15f   : > { %v7503_v61 = vadd.f32 %v1402_v47, %v1127_v58  ;;  %v6769_v47 = vld [vmem:[%s6891_s29 + $0x20] sm:$0xff]  }
 0x160   : > { %v6202_v12 = vpop.f32.mrf.mxu0  ;;  %6365 = vmatmul.mubr.msk.bf16.gmra.mxu0 %vm408_vm0, %v6767_v17  ;;  %v6264_v20 = vpop.f32.mrf.mxu1  ;;  %6427 = vmatmul.mubr.msk.bf16.gmra.mxu1 %vm408_vm0, %v6767_v17  ;;  %v6780_v17 = vld [vmem:[%s8787_s1 + $0x68] sm:$0xff]  }
 0x161   : > { %6436 = vmatprep.mubr.msk.bf16.mxu0 %vm408_vm0, %v6768_v9  ;;  %v7508_v1 = vadd.f32 %v6264_v20, %v6202_v12  ;;  %6498 = vmatprep.mubr.msk.bf16.mxu1 %vm408_vm0, %v6768_v9  ;;  %v6781_v9 = vld [vmem:[%s8787_s1 + $0xe0] sm:$0xff]  }
 0x162   : > { %v1140_v25 = vpop.f32.mrf.mxu0  ;;  %v1415_v29 = vpop.f32.mrf.mxu1 }
 0x163   : > { %v7511_v37 = vadd.f32 %v1415_v29, %v1140_v25 }
 0x164   : > { %v6203_v35 = vpop.f32.mrf.mxu0  ;;  %v6265_v58 = vpop.f32.mrf.mxu1 }
 0x165   : > { %v7514_v43 = vadd.f32 %v6265_v58, %v6203_v35 }
 0x166   : > { %v1143_v33 = vpop.f32.mrf.mxu0  ;;  %v1418_v22 = vpop.f32.mrf.mxu1 }
 0x167   : > { %v7520_v12 = vadd.f32 %v1418_v22, %v1143_v33  ;;  %v6792_v33 = vld [vmem:[%s8787_s1 + $0x60] sm:$0xff]  }
 0x168   : > { %v6206_v20 = vpop.f32.mrf.mxu0  ;;  %6437 = vmatmul.mubr.msk.bf16.vlgmr.msra.gmra.mxu0 %vm408_vm0, %v6769_v47  ;;  %v6268_v25 = vpop.f32.mrf.mxu1  ;;  %6499 = vmatmul.mubr.msk.bf16.vlgmr.msra.gmra.mxu1 %vm408_vm0, %v6769_v47  ;;  %v6793_v47 = vld [vmem:[%s8787_s1 + $0xd8] sm:$0xff]  }
 0x169   : > { %6555 = vmatpush3.bf16.msra.mxu0 %v7326_v55  ;;  %v7528_v29 = vadd.f32 %v6268_v25, %v6206_v20  ;;  %6617 = vmatpush3.bf16.msra.mxu1 %v7334_v59  ;;  %v6773_v20 = vld [vmem:[%s6891_s29 + $0x30] sm:$0xff]   ;;  %v6774_v25 = vld [vmem:[%s6891_s29 + $0x38] sm:$0xff]  }
 0x16a   : > { %v1156_v22 = vpop.f32.mrf.mxu0  ;;  %6440 = vmatprep.mubr.msk.bf16.mxu0 %vm408_vm0, %v6772_v28  ;;  %v1431_v35 = vpop.f32.mrf.mxu1  ;;  %6502 = vmatprep.mubr.msk.bf16.mxu1 %vm408_vm0, %v6772_v28 }
 0x16b   : > { %6556 = vmatprep.subr.bf16.mxu0 %v6780_v17  ;;  %v7539_v55 = vadd.f32 %v1431_v35, %v1156_v22  ;;  %6618 = vmatprep.subr.bf16.mxu1 %v6781_v9 }
 0x16c   : > { %v6207_v58 = vpop.f32.mrf.mxu0  ;;  %v6269_v59 = vpop.f32.mrf.mxu1 }
 0x16d   : > { %6557 = vmatpush3.bf16.msra.mxu0 %v6780_v17  ;;  %v7543_v16 = vadd.f32 %v6269_v59, %v6207_v58  ;;  %6619 = vmatpush3.bf16.msra.mxu1 %v6781_v9 }
 0x16e   : > { %v1159_v6 = vpop.f32.mrf.mxu0  ;;  %6558 = vmatprep.subr.bf16.mxu0 %v6792_v33  ;;  %v1434_v0 = vpop.f32.mrf.mxu1  ;;  %6620 = vmatprep.subr.bf16.mxu1 %v6793_v47 }
 0x16f   : > { %v7545_v28 = vadd.f32 %v1434_v0, %v1159_v6  ;;  %v6775_v6 = vld [vmem:[%s6891_s29 + $0x40] sm:$0xff]  }
 0x170   : > { %v6210_v53 = vpop.f32.mrf.mxu0  ;;  %6441 = vmatmul.mubr.msk.bf16.gmra.mxu0 %vm408_vm0, %v6773_v20  ;;  %v6272_v22 = vpop.f32.mrf.mxu1  ;;  %6503 = vmatmul.mubr.msk.bf16.gmra.mxu1 %vm408_vm0, %v6773_v20 }
 0x171   : > { %6444 = vmatprep.mubr.msk.bf16.mxu0 %vm408_vm0, %v6774_v25  ;;  %v7550_v17 = vadd.f32 %v6272_v22, %v6210_v53  ;;  %6506 = vmatprep.mubr.msk.bf16.mxu1 %vm408_vm0, %v6774_v25 }
 0x172   : > { %v1172_v35 = vpop.f32.mrf.mxu0  ;;  %6559 = vmatpush3.bf16.msra.mxu0 %v6792_v33  ;;  %v1447_v9 = vpop.f32.mrf.mxu1  ;;  %6621 = vmatpush3.bf16.msra.mxu1 %v6793_v47 }
 0x173   : > { %v7553_v58 = vadd.f32 %v1447_v9, %v1172_v35 }
 0x174   : > { %v6211_v0 = vpop.f32.mrf.mxu0  ;;  %v6273_v59 = vpop.f32.mrf.mxu1 }
 0x175   : > { %v7557_v42 = vadd.f32 %v6273_v59, %v6211_v0  ;;  %v6777_v59 = vld [vmem:[%s6891_s29 + $0x50] sm:$0xff]  }
 0x176   : > { %v1175_v20 = vpop.f32.mrf.mxu0  ;;  %v1450_v38 = vpop.f32.mrf.mxu1 }
 0x177   : > { %v7559_v53 = vadd.f32 %v1450_v38, %v1175_v20  ;;  %v6778_v20 = vld [vmem:[%s6891_s29 + $0x58] sm:$0xff]  }
 0x178   : > { %v6214_v22 = vpop.f32.mrf.mxu0  ;;  %6445 = vmatmul.mubr.msk.bf16.gmra.mxu0 %vm408_vm0, %v6775_v6  ;;  %v6276_v33 = vpop.f32.mrf.mxu1  ;;  %6507 = vmatmul.mubr.msk.bf16.gmra.mxu1 %vm408_vm0, %v6775_v6 }
 0x179   : > { %6448 = vmatprep.mubr.msk.bf16.mxu0 %vm408_vm0, %v6776_v48  ;;  %v7564_v47 = vadd.f32 %v6276_v33, %v6214_v22  ;;  %6510 = vmatprep.mubr.msk.bf16.mxu1 %vm408_vm0, %v6776_v48 }
 0x17a   : > { %v1188_v25 = vpop.f32.mrf.mxu0  ;;  %v1463_v35 = vpop.f32.mrf.mxu1 }
 0x17b   : > { %8822 = vst [vmem:[#allocation34_spill] sm:$0xff] %v7564_v47  ;;  %v7567_v9 = vadd.f32 %v1463_v35, %v1188_v25 }
 0x17c   : > { %v6215_v0 = vpop.f32.mrf.mxu0  ;;  %v6277_v38 = vpop.f32.mrf.mxu1 }
 0x17d   : > { %8823 = vst [vmem:[#allocation35_spill] sm:$0xff] %v7567_v9  ;;  %v7571_v34 = vadd.f32 %v6277_v38, %v6215_v0 }
 0x17e   : > { %v1191_v30 = vpop.f32.mrf.mxu0  ;;  %v1466_v6 = vpop.f32.mrf.mxu1 }
 0x17f   : > { %8824 = vst [vmem:[#allocation36_spill] sm:$0xff] %v7571_v34  ;;  %v7573_v23 = vadd.f32 %v1466_v6, %v1191_v30  ;;  %v6779_v34 = vld [vmem:[%s6891_s29 + $0x60] sm:$0xff]   ;;  %v6782_v6 = vld [vmem:[%s6891_s29 + $0x68] sm:$0xff]  }
 0x180   : > { %v6218_v22 = vpop.f32.mrf.mxu0  ;;  %6449 = vmatmul.mubr.msk.bf16.gmra.mxu0 %vm408_vm0, %v6777_v59  ;;  %v6280_v33 = vpop.f32.mrf.mxu1  ;;  %6511 = vmatmul.mubr.msk.bf16.gmra.mxu1 %vm408_vm0, %v6777_v59 }
 0x181   : > { %8825 = vst [vmem:[#allocation37_spill] sm:$0xff] %v7573_v23  ;;  %6452 = vmatprep.mubr.msk.bf16.mxu0 %vm408_vm0, %v6778_v20  ;;  %v7578_v48 = vadd.f32 %v6280_v33, %v6218_v22  ;;  %6514 = vmatprep.mubr.msk.bf16.mxu1 %vm408_vm0, %v6778_v20 }
 0x182   : > { %v1204_v25 = vpop.f32.mrf.mxu0  ;;  %v1479_v35 = vpop.f32.mrf.mxu1 }
 0x183   : > { %8826 = vst [vmem:[#allocation38_spill] sm:$0xff] %v7578_v48  ;;  %v7581_v0 = vadd.f32 %v1479_v35, %v1204_v25 }
 0x184   : > { %v6219_v38 = vpop.f32.mrf.mxu0  ;;  %v6281_v30 = vpop.f32.mrf.mxu1 }
 0x185   : > { %8827 = vst [vmem:[#allocation39_spill] sm:$0xff] %v7581_v0  ;;  %v7585_v23 = vadd.f32 %v6281_v30, %v6219_v38 }
 0x186   : > { %v1207_v9 = vpop.f32.mrf.mxu0  ;;  %v1482_v59 = vpop.f32.mrf.mxu1 }
 0x187   : > { %8828 = vst [vmem:[#allocation40_spill] sm:$0xff] %v7585_v23  ;;  %v7587_v47 = vadd.f32 %v1482_v59, %v1207_v9  ;;  %v6783_v23 = vld [vmem:[%s6891_s29 + $0x70] sm:$0xff]   ;;  %v6784_v59 = vld [vmem:[%s6891_s29 + $0x78] sm:$0xff]  }
 0x188   : > { %v6222_v22 = vpop.f32.mrf.mxu0  ;;  %6453 = vmatmul.mubr.msk.bf16.gmra.mxu0 %vm408_vm0, %v6779_v34  ;;  %v6284_v33 = vpop.f32.mrf.mxu1  ;;  %6515 = vmatmul.mubr.msk.bf16.gmra.mxu1 %vm408_vm0, %v6779_v34 }
 0x189   : > { %8829 = vst [vmem:[#allocation41_spill] sm:$0xff] %v7587_v47  ;;  %6456 = vmatprep.mubr.msk.bf16.mxu0 %vm408_vm0, %v6782_v6  ;;  %v7592_v20 = vadd.f32 %v6284_v33, %v6222_v22  ;;  %6518 = vmatprep.mubr.msk.bf16.mxu1 %vm408_vm0, %v6782_v6 }
 0x18a   : > { %v1220_v25 = vpop.f32.mrf.mxu0  ;;  %v1495_v35 = vpop.f32.mrf.mxu1 }
 0x18b   : > { %8830 = vst [vmem:[#allocation42_spill] sm:$0xff] %v7592_v20  ;;  %v7595_v38 = vadd.f32 %v1495_v35, %v1220_v25 }
 0x18c   : > { %v6223_v30 = vpop.f32.mrf.mxu0  ;;  %v6285_v9 = vpop.f32.mrf.mxu1 }
 0x18d   : > { %8831 = vst [vmem:[#allocation43_spill] sm:$0xff] %v7595_v38  ;;  %v7599_v47 = vadd.f32 %v6285_v9, %v6223_v30 }
 0x18e   : > { %v1223_v0 = vpop.f32.mrf.mxu0  ;;  %v1498_v34 = vpop.f32.mrf.mxu1 }
 0x18f   : > { %8832 = vst [vmem:[#allocation44_spill] sm:$0xff] %v7599_v47  ;;  %v7601_v48 = vadd.f32 %v1498_v34, %v1223_v0  ;;  %v6785_v47 = vld [vmem:[%s6891_s29 + $0x80] sm:$0xff]   ;;  %v6786_v34 = vld [vmem:[%s6891_s29 + $0x88] sm:$0xff]  }
 0x190   : > { %v6226_v22 = vpop.f32.mrf.mxu0  ;;  %6457 = vmatmul.mubr.msk.bf16.gmra.mxu0 %vm408_vm0, %v6783_v23  ;;  %v6288_v33 = vpop.f32.mrf.mxu1  ;;  %6519 = vmatmul.mubr.msk.bf16.gmra.mxu1 %vm408_vm0, %v6783_v23 }
 0x191   : > { %8833 = vst [vmem:[#allocation45_spill] sm:$0xff] %v7601_v48  ;;  %6460 = vmatprep.mubr.msk.bf16.mxu0 %vm408_vm0, %v6784_v59  ;;  %v7606_v6 = vadd.f32 %v6288_v33, %v6226_v22  ;;  %6522 = vmatprep.mubr.msk.bf16.mxu1 %vm408_vm0, %v6784_v59 }
 0x192   : > { %v1236_v25 = vpop.f32.mrf.mxu0  ;;  %v1511_v35 = vpop.f32.mrf.mxu1 }
 0x193   : > { %8834 = vst [vmem:[#allocation46_spill] sm:$0xff] %v7606_v6  ;;  %v7609_v30 = vadd.f32 %v1511_v35, %v1236_v25 }
 0x194   : > { %v6227_v9 = vpop.f32.mrf.mxu0  ;;  %v6289_v0 = vpop.f32.mrf.mxu1 }
 0x195   : > { %8835 = vst [vmem:[#allocation47_spill] sm:$0xff] %v7609_v30  ;;  %v7613_v48 = vadd.f32 %v6289_v0, %v6227_v9 }
 0x196   : > { %v1239_v38 = vpop.f32.mrf.mxu0  ;;  %v1514_v23 = vpop.f32.mrf.mxu1 }
 0x197   : > { %8836 = vst [vmem:[#allocation48_spill] sm:$0xff] %v7613_v48  ;;  %v7615_v20 = vadd.f32 %v1514_v23, %v1239_v38  ;;  %v6787_v48 = vld [vmem:[%s6891_s29 + $0x90] sm:$0xff]   ;;  %v6788_v23 = vld [vmem:[%s6891_s29 + $0x98] sm:$0xff]  }
 0x198   : > { %v6230_v22 = vpop.f32.mrf.mxu0  ;;  %6461 = vmatmul.mubr.msk.bf16.gmra.mxu0 %vm408_vm0, %v6785_v47  ;;  %v6292_v33 = vpop.f32.mrf.mxu1  ;;  %6523 = vmatmul.mubr.msk.bf16.gmra.mxu1 %vm408_vm0, %v6785_v47 }
 0x199   : > { %8837 = vst [vmem:[#allocation49_spill] sm:$0xff] %v7615_v20  ;;  %6464 = vmatprep.mubr.msk.bf16.mxu0 %vm408_vm0, %v6786_v34  ;;  %v7620_v59 = vadd.f32 %v6292_v33, %v6230_v22  ;;  %6526 = vmatprep.mubr.msk.bf16.mxu1 %vm408_vm0, %v6786_v34 }
 0x19a   : > { %v1252_v25 = vpop.f32.mrf.mxu0  ;;  %v1527_v35 = vpop.f32.mrf.mxu1 }
 0x19b   : > { %8838 = vst [vmem:[#allocation50_spill] sm:$0xff] %v7620_v59  ;;  %v7623_v9 = vadd.f32 %v1527_v35, %v1252_v25 }
 0x19c   : > { %v6231_v0 = vpop.f32.mrf.mxu0  ;;  %v6293_v38 = vpop.f32.mrf.mxu1 }
 0x19d   : > { %8839 = vst [vmem:[#allocation51_spill] sm:$0xff] %v7623_v9  ;;  %v7627_v20 = vadd.f32 %v6293_v38, %v6231_v0 }
 0x19e   : > { %v1255_v30 = vpop.f32.mrf.mxu0  ;;  %v1530_v47 = vpop.f32.mrf.mxu1 }
 0x19f   : > { %8840 = vst [vmem:[#allocation52_spill] sm:$0xff] %v7627_v20  ;;  %v7629_v6 = vadd.f32 %v1530_v47, %v1255_v30  ;;  %v6789_v20 = vld [vmem:[%s6891_s29 + $0xa0] sm:$0xff]   ;;  %v6790_v47 = vld [vmem:[%s6891_s29 + $0xa8] sm:$0xff]  }
 0x1a0   : > { %v6234_v22 = vpop.f32.mrf.mxu0  ;;  %6465 = vmatmul.mubr.msk.bf16.gmra.mxu0 %vm408_vm0, %v6787_v48  ;;  %v6296_v33 = vpop.f32.mrf.mxu1  ;;  %6527 = vmatmul.mubr.msk.bf16.gmra.mxu1 %vm408_vm0, %v6787_v48 }
 0x1a1   : > { %8841 = vst [vmem:[#allocation53_spill] sm:$0xff] %v7629_v6  ;;  %6468 = vmatprep.mubr.msk.bf16.mxu0 %vm408_vm0, %v6788_v23  ;;  %v7634_v34 = vadd.f32 %v6296_v33, %v6234_v22  ;;  %6530 = vmatprep.mubr.msk.bf16.mxu1 %vm408_vm0, %v6788_v23 }
 0x1a2   : > { %v1268_v25 = vpop.f32.mrf.mxu0  ;;  %v1543_v35 = vpop.f32.mrf.mxu1 }
 0x1a3   : > { %8842 = vst [vmem:[#allocation54_spill] sm:$0xff] %v7634_v34  ;;  %v7637_v0 = vadd.f32 %v1543_v35, %v1268_v25 }
 0x1a4   : > { %v6235_v38 = vpop.f32.mrf.mxu0  ;;  %v6297_v30 = vpop.f32.mrf.mxu1 }
 0x1a5   : > { %8843 = vst [vmem:[#allocation55_spill] sm:$0xff] %v7637_v0  ;;  %v7641_v6 = vadd.f32 %v6297_v30, %v6235_v38 }
 0x1a6   : > { %v1271_v9 = vpop.f32.mrf.mxu0  ;;  %v1546_v48 = vpop.f32.mrf.mxu1 }
 0x1a7   : > { %8844 = vst [vmem:[#allocation56_spill] sm:$0xff] %v7641_v6  ;;  %v7643_v59 = vadd.f32 %v1546_v48, %v1271_v9  ;;  %v6791_v6 = vld [vmem:[%s6891_s29 + $0xb0] sm:$0xff]   ;;  %v6794_v48 = vld [vmem:[%s6891_s29 + $0xb8] sm:$0xff]  }
 0x1a8   : > { %v6238_v22 = vpop.f32.mrf.mxu0  ;;  %6469 = vmatmul.mubr.msk.bf16.gmra.mxu0 %vm408_vm0, %v6789_v20  ;;  %v6300_v33 = vpop.f32.mrf.mxu1  ;;  %6531 = vmatmul.mubr.msk.bf16.gmra.mxu1 %vm408_vm0, %v6789_v20 }
 0x1a9   : > { %8845 = vst [vmem:[#allocation57_spill] sm:$0xff] %v7643_v59  ;;  %6472 = vmatprep.mubr.msk.bf16.mxu0 %vm408_vm0, %v6790_v47  ;;  %v7648_v23 = vadd.f32 %v6300_v33, %v6238_v22  ;;  %6534 = vmatprep.mubr.msk.bf16.mxu1 %vm408_vm0, %v6790_v47 }
 0x1aa   : > { %v1284_v25 = vpop.f32.mrf.mxu0  ;;  %v1559_v35 = vpop.f32.mrf.mxu1 }
 0x1ab   : > { %8846 = vst [vmem:[#allocation58_spill] sm:$0xff] %v7648_v23  ;;  %v7651_v38 = vadd.f32 %v1559_v35, %v1284_v25 }
 0x1ac   : > { %v6239_v30 = vpop.f32.mrf.mxu0  ;;  %v6301_v9 = vpop.f32.mrf.mxu1 }
 0x1ad   : > { %8847 = vst [vmem:[#allocation59_spill] sm:$0xff] %v7651_v38  ;;  %v7655_v59 = vadd.f32 %v6301_v9, %v6239_v30 }
 0x1ae   : > { %v1287_v0 = vpop.f32.mrf.mxu0  ;;  %v1562_v20 = vpop.f32.mrf.mxu1 }
 0x1af   : > { %8848 = vst [vmem:[#allocation60_spill] sm:$0xff] %v7655_v59  ;;  %v7657_v34 = vadd.f32 %v1562_v20, %v1287_v0  ;;  %v6795_v59 = vld [vmem:[%s6891_s29 + $0xc0] sm:$0xff]   ;;  %v6796_v20 = vld [vmem:[%s6891_s29 + $0xc8] sm:$0xff]  }
 0x1b0   : > { %v6242_v22 = vpop.f32.mrf.mxu0  ;;  %6473 = vmatmul.mubr.msk.bf16.gmra.mxu0 %vm408_vm0, %v6791_v6  ;;  %v6304_v33 = vpop.f32.mrf.mxu1  ;;  %6535 = vmatmul.mubr.msk.bf16.gmra.mxu1 %vm408_vm0, %v6791_v6 }
 0x1b1   : > { %8849 = vst [vmem:[#allocation61_spill] sm:$0xff] %v7657_v34  ;;  %6476 = vmatprep.mubr.msk.bf16.mxu0 %vm408_vm0, %v6794_v48  ;;  %v7662_v47 = vadd.f32 %v6304_v33, %v6242_v22  ;;  %6538 = vmatprep.mubr.msk.bf16.mxu1 %vm408_vm0, %v6794_v48 }
 0x1b2   : > { %v1300_v25 = vpop.f32.mrf.mxu0  ;;  %v1575_v35 = vpop.f32.mrf.mxu1 }
 0x1b3   : > { %v7665_v30 = vadd.f32 %v1575_v35, %v1300_v25 }
 0x1b4   : > { %v6243_v9 = vpop.f32.mrf.mxu0  ;;  %v6305_v0 = vpop.f32.mrf.mxu1 }
 0x1b5   : > { %v7669_v34 = vadd.f32 %v6305_v0, %v6243_v9  ;;  %v6798_v0 = vld [vmem:[%s6891_s29 + $0xd8] sm:$0xff]  }
 0x1b6   : > { %v1303_v38 = vpop.f32.mrf.mxu0  ;;  %v1578_v23 = vpop.f32.mrf.mxu1 }
 0x1b7   : > { %v7671_v6 = vadd.f32 %v1578_v23, %v1303_v38 }
 0x1b8   : > { %v6314_v19 = vpop.f32.mrf.mxu0  ;;  %6477 = vmatmul.mubr.msk.bf16.gmra.mxu0 %vm408_vm0, %v6795_v59  ;;  %v6376_v22 = vpop.f32.mrf.mxu1  ;;  %6539 = vmatmul.mubr.msk.bf16.gmra.mxu1 %vm408_vm0, %v6795_v59 }
 0x1b9   : > { %v7675_v48 = vadd.f32 %v6314_v19, %v7238_v51  ;;  %6480 = vmatprep.mubr.msk.bf16.mxu0 %vm408_vm0, %v6796_v20  ;;  %v7680_v33 = vadd.f32 %v6376_v22, %v7466_v49  ;;  %6542 = vmatprep.mubr.msk.bf16.mxu1 %vm408_vm0, %v6796_v20  ;;  %v6797_v19 = vld [vmem:[%s6891_s29 + $0xd0] sm:$0xff]  }
 0x1ba   : > { %v1929_v25 = vpop.f32.mrf.mxu0  ;;  %v2267_v38 = vpop.f32.mrf.mxu1 }
 0x1bb   : > { %v7684_v23 = vadd.f32 %v1929_v25, %v7242_v54  ;;  %v7687_v35 = vadd.f32 %v2267_v38, %v7469_v44 }
 0x1bc   : > { %v6315_v51 = vpop.f32.mrf.mxu0  ;;  %v6377_v59 = vpop.f32.mrf.mxu1 }
 0x1bd   : > { %v7691_v9 = vadd.f32 %v6315_v51, %v7244_v57  ;;  %v7695_v49 = vadd.f32 %v6377_v59, %v7473_v13 }
 0x1be   : > { %v1932_v22 = vpop.f32.mrf.mxu0  ;;  %v2270_v54 = vpop.f32.mrf.mxu1 }
 0x1bf   : > { %v7698_v20 = vadd.f32 %v1932_v22, %v7246_v60  ;;  %v7701_v25 = vadd.f32 %v2270_v54, %v7475_v52  ;;  %v6799_v22 = vld [vmem:[%s6891_s29 + $0xe0] sm:$0xff]  }
 0x1c0   : > { %v6318_v44 = vpop.f32.mrf.mxu0  ;;  %6481 = vmatmul.mubr.msk.bf16.gmra.mxu0 %vm408_vm0, %v6797_v19  ;;  %v6380_v38 = vpop.f32.mrf.mxu1  ;;  %6543 = vmatmul.mubr.msk.bf16.gmra.mxu1 %vm408_vm0, %v6797_v19 }
 0x1c1   : > { %v7705_v57 = vadd.f32 %v6318_v44, %v7254_v63  ;;  %6484 = vmatprep.mubr.msk.bf16.mxu0 %vm408_vm0, %v6798_v0  ;;  %v7710_v60 = vadd.f32 %v6380_v38, %v7480_v46  ;;  %6546 = vmatprep.mubr.msk.bf16.mxu1 %vm408_vm0, %v6798_v0  ;;  %v6800_v44 = vld [vmem:[%s6891_s29 + $0xe8] sm:$0xff]  }
 0x1c2   : > { %v1945_v13 = vpop.f32.mrf.mxu0  ;;  %v2283_v51 = vpop.f32.mrf.mxu1 }
 0x1c3   : > { %v7714_v52 = vadd.f32 %v1945_v13, %v7258_v2  ;;  %v7717_v59 = vadd.f32 %v2283_v51, %v7483_v7 }
 0x1c4   : > { %v6319_v63 = vpop.f32.mrf.mxu0  ;;  %v6381_v19 = vpop.f32.mrf.mxu1 }
 0x1c5   : > { %v7721_v54 = vadd.f32 %v6319_v63, %v7260_v5  ;;  %v7725_v46 = vadd.f32 %v6381_v19, %v7487_v41 }
 0x1c6   : > { %v1948_v38 = vpop.f32.mrf.mxu0  ;;  %v2286_v2 = vpop.f32.mrf.mxu1 }
 0x1c7   : > { %v7728_v0 = vadd.f32 %v1948_v38, %v7262_v8  ;;  %v7731_v13 = vadd.f32 %v2286_v2, %v7489_v26  ;;  %v6801_v38 = vld [vmem:[%s6891_s29 + $0xf0] sm:$0xff]  }
 0x1c8   : > { %v6322_v7 = vpop.f32.mrf.mxu0  ;;  %6485 = vmatmul.mubr.msk.bf16.gmra.mxu0 %vm408_vm0, %v6799_v22  ;;  %v6384_v51 = vpop.f32.mrf.mxu1  ;;  %6547 = vmatmul.mubr.msk.bf16.gmra.mxu1 %vm408_vm0, %v6799_v22 }
 0x1c9   : > { %v7735_v5 = vadd.f32 %v6322_v7, %v7270_v11  ;;  %6488 = vmatprep.mubr.msk.bf16.mxu0 %vm408_vm0, %v6800_v44  ;;  %v7740_v8 = vadd.f32 %v6384_v51, %v7494_v39  ;;  %6550 = vmatprep.mubr.msk.bf16.mxu1 %vm408_vm0, %v6800_v44  ;;  %v6802_v7 = vld [vmem:[%s6891_s29 + $0x20] sm:$0xff]  }
 0x1ca   : > { %v1961_v41 = vpop.f32.mrf.mxu0  ;;  %v2299_v63 = vpop.f32.mrf.mxu1 }
 0x1cb   : > { %v7744_v26 = vadd.f32 %v1961_v41, %v7274_v14  ;;  %v7747_v19 = vadd.f32 %v2299_v63, %v7497_v32 }
 0x1cc   : > { %v6323_v11 = vpop.f32.mrf.mxu0  ;;  %v6385_v22 = vpop.f32.mrf.mxu1 }
 0x1cd   : > { %v7751_v2 = vadd.f32 %v6323_v11, %v7277_v18  ;;  %v7755_v39 = vadd.f32 %v6385_v22, %v7501_v4 }
 0x1ce   : > { %v1964_v51 = vpop.f32.mrf.mxu0  ;;  %v2302_v14 = vpop.f32.mrf.mxu1 }
 0x1cf   : > { %v7758_v44 = vadd.f32 %v1964_v51, %v7279_v21  ;;  %v7761_v41 = vadd.f32 %v2302_v14, %v7503_v61  ;;  %v6803_v51 = vld [vmem:[%s6891_s29 + $0x28] sm:$0xff]  }
 0x1d0   : > { %v6326_v32 = vpop.f32.mrf.mxu0  ;;  %6489 = vmatmul.mubr.msk.bf16.gmra.mxu0 %vm408_vm0, %v6801_v38  ;;  %v6388_v63 = vpop.f32.mrf.mxu1  ;;  %6551 = vmatmul.mubr.msk.bf16.gmra.mxu1 %vm408_vm0, %v6801_v38 }
 0x1d1   : > { %v7765_v18 = vadd.f32 %v6326_v32, %v7286_v24  ;;  %6560 = vmatprep.mubr.msk.bf16.mxu0 %vm408_vm0, %v6802_v7  ;;  %v7770_v21 = vadd.f32 %v6388_v63, %v7508_v1  ;;  %6622 = vmatprep.mubr.msk.bf16.mxu1 %vm408_vm0, %v6802_v7  ;;  %v6804_v32 = vld [vmem:[%s6891_s29 + $0x30] sm:$0xff]  }
 0x1d2   : > { %v1977_v4 = vpop.f32.mrf.mxu0  ;;  %v2315_v11 = vpop.f32.mrf.mxu1 }
 0x1d3   : > { %v7774_v61 = vadd.f32 %v1977_v4, %v7289_v27  ;;  %v7777_v22 = vadd.f32 %v2315_v11, %v7511_v37 }
 0x1d4   : > { %v6327_v24 = vpop.f32.mrf.mxu0  ;;  %v6389_v38 = vpop.f32.mrf.mxu1 }
 0x1d5   : > { %v7781_v14 = vadd.f32 %v6327_v24, %v7292_v31  ;;  %v7785_v1 = vadd.f32 %v6389_v38, %v7514_v43 }
 0x1d6   : > { %v1980_v63 = vpop.f32.mrf.mxu0  ;;  %v2318_v27 = vpop.f32.mrf.mxu1 }
 0x1d7   : > { %v7788_v7 = vadd.f32 %v1980_v63, %v7298_v36  ;;  %v7791_v4 = vadd.f32 %v2318_v27, %v7520_v12  ;;  %v6805_v63 = vld [vmem:[%s6891_s29 + $0x38] sm:$0xff]  }
 0x1d8   : > { %v6330_v37 = vpop.f32.mrf.mxu0  ;;  %6561 = vmatmul.mubr.msk.bf16.vlgmr.msra.gmra.mxu0 %vm408_vm0, %v6803_v51  ;;  %v6392_v11 = vpop.f32.mrf.mxu1  ;;  %6623 = vmatmul.mubr.msk.bf16.vlgmr.msra.gmra.mxu1 %vm408_vm0, %v6803_v51 }
 0x1d9   : > { %v7795_v31 = vadd.f32 %v6330_v37, %v7306_v40  ;;  %6564 = vmatprep.mubr.msk.bf16.mxu0 %vm408_vm0, %v6804_v32  ;;  %v7800_v36 = vadd.f32 %v6392_v11, %v7528_v29  ;;  %6626 = vmatprep.mubr.msk.bf16.mxu1 %vm408_vm0, %v6804_v32  ;;  %v6806_v37 = vld [vmem:[%s6891_s29 + $0x40] sm:$0xff]  }
 0x1da   : > { %v1993_v43 = vpop.f32.mrf.mxu0  ;;  %v2331_v24 = vpop.f32.mrf.mxu1 }
 0x1db   : > { %v7804_v12 = vadd.f32 %v1993_v43, %v7317_v45  ;;  %v7807_v38 = vadd.f32 %v2331_v24, %v7539_v55 }
 0x1dc   : > { %v6331_v40 = vpop.f32.mrf.mxu0  ;;  %v6393_v51 = vpop.f32.mrf.mxu1 }
 0x1dd   : > { %v7811_v27 = vadd.f32 %v6331_v40, %v7321_v50  ;;  %v7815_v29 = vadd.f32 %v6393_v51, %v7543_v16 }
 0x1de   : > { %v1996_v11 = vpop.f32.mrf.mxu0  ;;  %v2334_v45 = vpop.f32.mrf.mxu1 }
 0x1df   : > { %v7818_v32 = vadd.f32 %v1996_v11, %v7328_v56  ;;  %v7821_v43 = vadd.f32 %v2334_v45, %v7545_v28  ;;  %v6807_v11 = vld [vmem:[%s6891_s29 + $0x48] sm:$0xff]  }
 0x1e0   : > { %v6334_v55 = vpop.f32.mrf.mxu0  ;;  %6565 = vmatmul.mubr.msk.bf16.gmra.mxu0 %vm408_vm0, %v6805_v63  ;;  %v6396_v24 = vpop.f32.mrf.mxu1  ;;  %6627 = vmatmul.mubr.msk.bf16.gmra.mxu1 %vm408_vm0, %v6805_v63 }
 0x1e1   : > { %v7825_v50 = vadd.f32 %v6334_v55, %v7338_v62  ;;  %6568 = vmatprep.mubr.msk.bf16.mxu0 %vm408_vm0, %v6806_v37  ;;  %v7830_v56 = vadd.f32 %v6396_v24, %v7550_v17  ;;  %6630 = vmatprep.mubr.msk.bf16.mxu1 %vm408_vm0, %v6806_v37  ;;  %v6808_v55 = vld [vmem:[%s6891_s29 + $0x50] sm:$0xff]  }
 0x1e2   : > { %v2009_v16 = vpop.f32.mrf.mxu0  ;;  %v2347_v40 = vpop.f32.mrf.mxu1 }
 0x1e3   : > { %v7834_v28 = vadd.f32 %v2009_v16, %v7342_v3  ;;  %v7837_v51 = vadd.f32 %v2347_v40, %v7553_v58 }
 0x1e4   : > { %v6335_v62 = vpop.f32.mrf.mxu0  ;;  %v6397_v63 = vpop.f32.mrf.mxu1 }
 0x1e5   : > { %8850 = vst [vmem:[#allocation62_spill] sm:$0xff] %v7837_v51  ;;  %v7841_v45 = vadd.f32 %v6335_v62, %v7347_v10  ;;  %v7845_v17 = vadd.f32 %v6397_v63, %v7557_v42  ;;  %v8855_v10 = vld [vmem:[#allocation2_spill] sm:$0xff]  ;;  %v8865_v51 = vld [vmem:[#allocation36_spill] sm:$0xff] }
 0x1e6   : > { %v2012_v24 = vpop.f32.mrf.mxu0  ;;  %v2350_v3 = vpop.f32.mrf.mxu1  ;;  %v8857_v42 = vld [vmem:[#allocation34_spill] sm:$0xff] }
 0x1e7   : > { %8851 = vst [vmem:[#allocation63_spill] sm:$0xff] %v7841_v45  ;;  %8852 = vst [vmem:[#allocation64_spill] sm:$0xff] %v7845_v17  ;;  %v7848_v37 = vadd.f32 %v2012_v24, %v7349_v15  ;;  %v7851_v16 = vadd.f32 %v2350_v3, %v7559_v53  ;;  %v8859_v53 = vld [vmem:[#allocation3_spill] sm:$0xff]  ;;  %v6810_v45 = vld [vmem:[%s6891_s29 + $0x60] sm:$0xff]  }
 0x1e8   : > { %v6338_v58 = vpop.f32.mrf.mxu0  ;;  %6569 = vmatmul.mubr.msk.bf16.gmra.mxu0 %vm408_vm0, %v6807_v11  ;;  %v6400_v62 = vpop.f32.mrf.mxu1  ;;  %6631 = vmatmul.mubr.msk.bf16.gmra.mxu1 %vm408_vm0, %v6807_v11 }
 0x1e9   : > { %8853 = vst [vmem:[#allocation65_spill] sm:$0xff] %v7848_v37  ;;  %8854 = vst [vmem:[#allocation66_spill] sm:$0xff] %v7851_v16  ;;  %v7855_v40 = vadd.f32 %v6338_v58, %v8855_v10  ;;  %6572 = vmatprep.mubr.msk.bf16.mxu0 %vm408_vm0, %v6808_v55  ;;  %v7860_v15 = vadd.f32 %v6400_v62, %v8857_v42  ;;  %6634 = vmatprep.mubr.msk.bf16.mxu1 %vm408_vm0, %v6808_v55  ;;  %v8861_v16 = vld [vmem:[#allocation35_spill] sm:$0xff]  ;;  %v6809_v10 = vld [vmem:[%s6891_s29 + $0x58] sm:$0xff]  }
 0x1ea   : > { %v2025_v63 = vpop.f32.mrf.mxu0  ;;  %v2363_v3 = vpop.f32.mrf.mxu1 }
 0x1eb   : > { %8856 = vst [vmem:[#allocation2_spill] sm:$0xff] %v7855_v40  ;;  %8858 = vst [vmem:[#allocation34_spill] sm:$0xff] %v7860_v15  ;;  %v7864_v24 = vadd.f32 %v2025_v63, %v8859_v53  ;;  %v7867_v37 = vadd.f32 %v2363_v3, %v8861_v16  ;;  %v8863_v40 = vld [vmem:[#allocation4_spill] sm:$0xff]  ;;  %v8867_v15 = vld [vmem:[#allocation5_spill] sm:$0xff] }
 0x1ec   : > { %v6339_v58 = vpop.f32.mrf.mxu0  ;;  %v6401_v11 = vpop.f32.mrf.mxu1  ;;  %v8869_v53 = vld [vmem:[#allocation37_spill] sm:$0xff] }
 0x1ed   : > { %8860 = vst [vmem:[#allocation3_spill] sm:$0xff] %v7864_v24  ;;  %8862 = vst [vmem:[#allocation35_spill] sm:$0xff] %v7867_v37  ;;  %v7871_v17 = vadd.f32 %v6339_v58, %v8863_v40  ;;  %v7875_v62 = vadd.f32 %v6401_v11, %v8865_v51  ;;  %v8871_v40 = vld [vmem:[#allocation6_spill] sm:$0xff]  ;;  %v8881_v37 = vld [vmem:[#allocation40_spill] sm:$0xff] }
 0x1ee   : > { %v2028_v42 = vpop.f32.mrf.mxu0  ;;  %v2366_v63 = vpop.f32.mrf.mxu1  ;;  %v8873_v51 = vld [vmem:[#allocation38_spill] sm:$0xff] }
 0x1ef   : > { %8864 = vst [vmem:[#allocation4_spill] sm:$0xff] %v7871_v17  ;;  %8866 = vst [vmem:[#allocation36_spill] sm:$0xff] %v7875_v62  ;;  %v7878_v55 = vadd.f32 %v2028_v42, %v8867_v15  ;;  %v7881_v24 = vadd.f32 %v2366_v63, %v8869_v53  ;;  %v8875_v42 = vld [vmem:[#allocation7_spill] sm:$0xff]  ;;  %v6812_v17 = vld [vmem:[%s6891_s29 + $0x70] sm:$0xff]  }
 0x1f0   : > { %v6342_v16 = vpop.f32.mrf.mxu0  ;;  %6573 = vmatmul.mubr.msk.bf16.gmra.mxu0 %vm408_vm0, %v6809_v10  ;;  %v6404_v58 = vpop.f32.mrf.mxu1  ;;  %6635 = vmatmul.mubr.msk.bf16.gmra.mxu1 %vm408_vm0, %v6809_v10 }
 0x1f1   : > { %8868 = vst [vmem:[#allocation5_spill] sm:$0xff] %v7878_v55  ;;  %8870 = vst [vmem:[#allocation37_spill] sm:$0xff] %v7881_v24  ;;  %v7885_v3 = vadd.f32 %v6342_v16, %v8871_v40  ;;  %6576 = vmatprep.mubr.msk.bf16.mxu0 %vm408_vm0, %v6810_v45  ;;  %v7890_v15 = vadd.f32 %v6404_v58, %v8873_v51  ;;  %6638 = vmatprep.mubr.msk.bf16.mxu1 %vm408_vm0, %v6810_v45  ;;  %v8877_v24 = vld [vmem:[#allocation39_spill] sm:$0xff] }
 0x1f2   : > { %v2041_v11 = vpop.f32.mrf.mxu0  ;;  %v2379_v53 = vpop.f32.mrf.mxu1  ;;  %v6811_v40 = vld [vmem:[%s6891_s29 + $0x68] sm:$0xff]  }
 0x1f3   : > { %8872 = vst [vmem:[#allocation6_spill] sm:$0xff] %v7885_v3  ;;  %8874 = vst [vmem:[#allocation38_spill] sm:$0xff] %v7890_v15  ;;  %v7894_v63 = vadd.f32 %v2041_v11, %v8875_v42  ;;  %v7897_v55 = vadd.f32 %v2379_v53, %v8877_v24  ;;  %v8879_v3 = vld [vmem:[#allocation8_spill] sm:$0xff]  ;;  %v8883_v15 = vld [vmem:[#allocation9_spill] sm:$0xff] }
 0x1f4   : > { %v6343_v16 = vpop.f32.mrf.mxu0  ;;  %v6405_v10 = vpop.f32.mrf.mxu1  ;;  %v8885_v42 = vld [vmem:[#allocation41_spill] sm:$0xff] }
 0x1f5   : > { %8876 = vst [vmem:[#allocation7_spill] sm:$0xff] %v7894_v63  ;;  %8878 = vst [vmem:[#allocation39_spill] sm:$0xff] %v7897_v55  ;;  %v7901_v62 = vadd.f32 %v6343_v16, %v8879_v3  ;;  %v7905_v58 = vadd.f32 %v6405_v10, %v8881_v37  ;;  %v8887_v3 = vld [vmem:[#allocation10_spill] sm:$0xff]  ;;  %v8897_v55 = vld [vmem:[#allocation44_spill] sm:$0xff] }
 0x1f6   : > { %v2044_v51 = vpop.f32.mrf.mxu0  ;;  %v2382_v11 = vpop.f32.mrf.mxu1  ;;  %v8889_v37 = vld [vmem:[#allocation42_spill] sm:$0xff] }
 0x1f7   : > { %8880 = vst [vmem:[#allocation8_spill] sm:$0xff] %v7901_v62  ;;  %8882 = vst [vmem:[#allocation40_spill] sm:$0xff] %v7905_v58  ;;  %v7908_v45 = vadd.f32 %v2044_v51, %v8883_v15  ;;  %v7911_v63 = vadd.f32 %v2382_v11, %v8885_v42  ;;  %v8891_v51 = vld [vmem:[#allocation11_spill] sm:$0xff]  ;;  %v6814_v62 = vld [vmem:[%s6891_s29 + $0x80] sm:$0xff]  }
 0x1f8   : > { %v6346_v24 = vpop.f32.mrf.mxu0  ;;  %6577 = vmatmul.mubr.msk.bf16.gmra.mxu0 %vm408_vm0, %v6811_v40  ;;  %v6408_v16 = vpop.f32.mrf.mxu1  ;;  %6639 = vmatmul.mubr.msk.bf16.gmra.mxu1 %vm408_vm0, %v6811_v40 }
 0x1f9   : > { %8884 = vst [vmem:[#allocation9_spill] sm:$0xff] %v7908_v45  ;;  %8886 = vst [vmem:[#allocation41_spill] sm:$0xff] %v7911_v63  ;;  %v7915_v53 = vadd.f32 %v6346_v24, %v8887_v3  ;;  %6580 = vmatprep.mubr.msk.bf16.mxu0 %vm408_vm0, %v6812_v17  ;;  %v7920_v15 = vadd.f32 %v6408_v16, %v8889_v37  ;;  %6642 = vmatprep.mubr.msk.bf16.mxu1 %vm408_vm0, %v6812_v17  ;;  %v8893_v63 = vld [vmem:[#allocation43_spill] sm:$0xff]  ;;  %v6813_v3 = vld [vmem:[%s6891_s29 + $0x78] sm:$0xff]  }
 0x1fa   : > { %v2057_v10 = vpop.f32.mrf.mxu0  ;;  %v2395_v42 = vpop.f32.mrf.mxu1 }
 0x1fb   : > { %8888 = vst [vmem:[#allocation10_spill] sm:$0xff] %v7915_v53  ;;  %8890 = vst [vmem:[#allocation42_spill] sm:$0xff] %v7920_v15  ;;  %v7924_v11 = vadd.f32 %v2057_v10, %v8891_v51  ;;  %v7927_v45 = vadd.f32 %v2395_v42, %v8893_v63  ;;  %v8895_v53 = vld [vmem:[#allocation12_spill] sm:$0xff]  ;;  %v8899_v15 = vld [vmem:[#allocation13_spill] sm:$0xff] }
 0x1fc   : > { %v6347_v24 = vpop.f32.mrf.mxu0  ;;  %v6409_v40 = vpop.f32.mrf.mxu1  ;;  %v8901_v51 = vld [vmem:[#allocation45_spill] sm:$0xff] }
 0x1fd   : > { %8892 = vst [vmem:[#allocation11_spill] sm:$0xff] %v7924_v11  ;;  %8894 = vst [vmem:[#allocation43_spill] sm:$0xff] %v7927_v45  ;;  %v7931_v58 = vadd.f32 %v6347_v24, %v8895_v53  ;;  %v7935_v16 = vadd.f32 %v6409_v40, %v8897_v55  ;;  %v8903_v53 = vld [vmem:[#allocation14_spill] sm:$0xff]  ;;  %v8913_v45 = vld [vmem:[#allocation48_spill] sm:$0xff] }
 0x1fe   : > { %v2060_v37 = vpop.f32.mrf.mxu0  ;;  %v2398_v10 = vpop.f32.mrf.mxu1  ;;  %v8905_v55 = vld [vmem:[#allocation46_spill] sm:$0xff] }
 0x1ff   : > { %8896 = vst [vmem:[#allocation12_spill] sm:$0xff] %v7931_v58  ;;  %8898 = vst [vmem:[#allocation44_spill] sm:$0xff] %v7935_v16  ;;  %v7938_v17 = vadd.f32 %v2060_v37, %v8899_v15  ;;  %v7941_v11 = vadd.f32 %v2398_v10, %v8901_v51  ;;  %v8907_v37 = vld [vmem:[#allocation15_spill] sm:$0xff]  ;;  %v6816_v58 = vld [vmem:[%s6891_s29 + $0x90] sm:$0xff]  }
 0x200   : > { %v6350_v63 = vpop.f32.mrf.mxu0  ;;  %6581 = vmatmul.mubr.msk.bf16.gmra.mxu0 %vm408_vm0, %v6813_v3  ;;  %v6412_v24 = vpop.f32.mrf.mxu1  ;;  %6643 = vmatmul.mubr.msk.bf16.gmra.mxu1 %vm408_vm0, %v6813_v3 }
 0x201   : > { %8900 = vst [vmem:[#allocation13_spill] sm:$0xff] %v7938_v17  ;;  %8902 = vst [vmem:[#allocation45_spill] sm:$0xff] %v7941_v11  ;;  %v7945_v42 = vadd.f32 %v6350_v63, %v8903_v53  ;;  %6584 = vmatprep.mubr.msk.bf16.mxu0 %vm408_vm0, %v6814_v62  ;;  %v7950_v15 = vadd.f32 %v6412_v24, %v8905_v55  ;;  %6646 = vmatprep.mubr.msk.bf16.mxu1 %vm408_vm0, %v6814_v62  ;;  %v8909_v11 = vld [vmem:[#allocation47_spill] sm:$0xff] }
 0x202   : > { %v2073_v40 = vpop.f32.mrf.mxu0  ;;  %v2411_v51 = vpop.f32.mrf.mxu1  ;;  %v6815_v53 = vld [vmem:[%s6891_s29 + $0x88] sm:$0xff]  }
 0x203   : > { %8904 = vst [vmem:[#allocation14_spill] sm:$0xff] %v7945_v42  ;;  %8906 = vst [vmem:[#allocation46_spill] sm:$0xff] %v7950_v15  ;;  %v7954_v10 = vadd.f32 %v2073_v40, %v8907_v37  ;;  %v7957_v17 = vadd.f32 %v2411_v51, %v8909_v11  ;;  %v8911_v42 = vld [vmem:[#allocation16_spill] sm:$0xff]  ;;  %v8915_v15 = vld [vmem:[#allocation17_spill] sm:$0xff] }
 0x204   : > { %v6351_v63 = vpop.f32.mrf.mxu0  ;;  %v6413_v3 = vpop.f32.mrf.mxu1  ;;  %v8917_v37 = vld [vmem:[#allocation49_spill] sm:$0xff] }
 0x205   : > { %8908 = vst [vmem:[#allocation15_spill] sm:$0xff] %v7954_v10  ;;  %8910 = vst [vmem:[#allocation47_spill] sm:$0xff] %v7957_v17  ;;  %v7961_v16 = vadd.f32 %v6351_v63, %v8911_v42  ;;  %v7965_v24 = vadd.f32 %v6413_v3, %v8913_v45  ;;  %v8919_v42 = vld [vmem:[#allocation18_spill] sm:$0xff]  ;;  %v8929_v17 = vld [vmem:[#allocation52_spill] sm:$0xff] }
 0x206   : > { %v2076_v55 = vpop.f32.mrf.mxu0  ;;  %v2414_v40 = vpop.f32.mrf.mxu1  ;;  %v8921_v45 = vld [vmem:[#allocation50_spill] sm:$0xff] }
 0x207   : > { %8912 = vst [vmem:[#allocation16_spill] sm:$0xff] %v7961_v16  ;;  %8914 = vst [vmem:[#allocation48_spill] sm:$0xff] %v7965_v24  ;;  %v7968_v62 = vadd.f32 %v2076_v55, %v8915_v15  ;;  %v7971_v10 = vadd.f32 %v2414_v40, %v8917_v37  ;;  %v8923_v55 = vld [vmem:[#allocation19_spill] sm:$0xff]  ;;  %v6818_v16 = vld [vmem:[%s6891_s29 + $0xa0] sm:$0xff]  }
 0x208   : > { %v6354_v11 = vpop.f32.mrf.mxu0  ;;  %6585 = vmatmul.mubr.msk.bf16.gmra.mxu0 %vm408_vm0, %v6815_v53  ;;  %v6416_v63 = vpop.f32.mrf.mxu1  ;;  %6647 = vmatmul.mubr.msk.bf16.gmra.mxu1 %vm408_vm0, %v6815_v53 }
 0x209   : > { %8916 = vst [vmem:[#allocation17_spill] sm:$0xff] %v7968_v62  ;;  %8918 = vst [vmem:[#allocation49_spill] sm:$0xff] %v7971_v10  ;;  %v7975_v51 = vadd.f32 %v6354_v11, %v8919_v42  ;;  %6588 = vmatprep.mubr.msk.bf16.mxu0 %vm408_vm0, %v6816_v58  ;;  %v7980_v15 = vadd.f32 %v6416_v63, %v8921_v45  ;;  %6650 = vmatprep.mubr.msk.bf16.mxu1 %vm408_vm0, %v6816_v58  ;;  %v8925_v10 = vld [vmem:[#allocation51_spill] sm:$0xff]  ;;  %v6817_v42 = vld [vmem:[%s6891_s29 + $0x98] sm:$0xff]  }
 0x20a   : > { %v2089_v3 = vpop.f32.mrf.mxu0  ;;  %v2427_v37 = vpop.f32.mrf.mxu1 }
 0x20b   : > { %8920 = vst [vmem:[#allocation18_spill] sm:$0xff] %v7975_v51  ;;  %8922 = vst [vmem:[#allocation50_spill] sm:$0xff] %v7980_v15  ;;  %v7984_v40 = vadd.f32 %v2089_v3, %v8923_v55  ;;  %v7987_v62 = vadd.f32 %v2427_v37, %v8925_v10  ;;  %v8927_v51 = vld [vmem:[#allocation20_spill] sm:$0xff]  ;;  %v8931_v15 = vld [vmem:[#allocation21_spill] sm:$0xff] }
 0x20c   : > { %v6355_v11 = vpop.f32.mrf.mxu0  ;;  %v6417_v53 = vpop.f32.mrf.mxu1  ;;  %v8933_v55 = vld [vmem:[#allocation53_spill] sm:$0xff] }
 0x20d   : > { %8924 = vst [vmem:[#allocation19_spill] sm:$0xff] %v7984_v40  ;;  %8926 = vst [vmem:[#allocation51_spill] sm:$0xff] %v7987_v62  ;;  %v7991_v24 = vadd.f32 %v6355_v11, %v8927_v51  ;;  %v7995_v63 = vadd.f32 %v6417_v53, %v8929_v17  ;;  %v8935_v51 = vld [vmem:[#allocation22_spill] sm:$0xff]  ;;  %v8945_v62 = vld [vmem:[#allocation56_spill] sm:$0xff] }
 0x20e   : > { %v2092_v45 = vpop.f32.mrf.mxu0  ;;  %v2430_v3 = vpop.f32.mrf.mxu1  ;;  %v8937_v17 = vld [vmem:[#allocation54_spill] sm:$0xff] }
 0x20f   : > { %8928 = vst [vmem:[#allocation20_spill] sm:$0xff] %v7991_v24  ;;  %8930 = vst [vmem:[#allocation52_spill] sm:$0xff] %v7995_v63  ;;  %v7998_v58 = vadd.f32 %v2092_v45, %v8931_v15  ;;  %v8001_v40 = vadd.f32 %v2430_v3, %v8933_v55  ;;  %v8939_v45 = vld [vmem:[#allocation23_spill] sm:$0xff]  ;;  %v6820_v24 = vld [vmem:[%s6891_s29 + $0xb0] sm:$0xff]  }
 0x210   : > { %v6358_v10 = vpop.f32.mrf.mxu0  ;;  %6589 = vmatmul.mubr.msk.bf16.gmra.mxu0 %vm408_vm0, %v6817_v42  ;;  %v6420_v11 = vpop.f32.mrf.mxu1  ;;  %6651 = vmatmul.mubr.msk.bf16.gmra.mxu1 %vm408_vm0, %v6817_v42 }
 0x211   : > { %8932 = vst [vmem:[#allocation21_spill] sm:$0xff] %v7998_v58  ;;  %8934 = vst [vmem:[#allocation53_spill] sm:$0xff] %v8001_v40  ;;  %v8005_v37 = vadd.f32 %v6358_v10, %v8935_v51  ;;  %6592 = vmatprep.mubr.msk.bf16.mxu0 %vm408_vm0, %v6818_v16  ;;  %v8010_v15 = vadd.f32 %v6420_v11, %v8937_v17  ;;  %6654 = vmatprep.mubr.msk.bf16.mxu1 %vm408_vm0, %v6818_v16  ;;  %v8941_v40 = vld [vmem:[#allocation55_spill] sm:$0xff] }
 0x212   : > { %v2105_v53 = vpop.f32.mrf.mxu0  ;;  %v2443_v55 = vpop.f32.mrf.mxu1  ;;  %v6819_v51 = vld [vmem:[%s6891_s29 + $0xa8] sm:$0xff]  }
 0x213   : > { %8936 = vst [vmem:[#allocation22_spill] sm:$0xff] %v8005_v37  ;;  %8938 = vst [vmem:[#allocation54_spill] sm:$0xff] %v8010_v15  ;;  %v8014_v3 = vadd.f32 %v2105_v53, %v8939_v45  ;;  %v8017_v58 = vadd.f32 %v2443_v55, %v8941_v40  ;;  %v8943_v37 = vld [vmem:[#allocation24_spill] sm:$0xff]  ;;  %v8947_v15 = vld [vmem:[#allocation25_spill] sm:$0xff] }
 0x214   : > { %v6359_v10 = vpop.f32.mrf.mxu0  ;;  %v6421_v42 = vpop.f32.mrf.mxu1  ;;  %v8949_v45 = vld [vmem:[#allocation57_spill] sm:$0xff] }
 0x215   : > { %8940 = vst [vmem:[#allocation23_spill] sm:$0xff] %v8014_v3  ;;  %8942 = vst [vmem:[#allocation55_spill] sm:$0xff] %v8017_v58  ;;  %v8021_v63 = vadd.f32 %v6359_v10, %v8943_v37  ;;  %v8025_v11 = vadd.f32 %v6421_v42, %v8945_v62  ;;  %v8951_v37 = vld [vmem:[#allocation26_spill] sm:$0xff]  ;;  %v8959_v58 = vld [vmem:[#allocation60_spill] sm:$0xff] }
 0x216   : > { %v2108_v17 = vpop.f32.mrf.mxu0  ;;  %v2446_v53 = vpop.f32.mrf.mxu1  ;;  %v8953_v62 = vld [vmem:[#allocation58_spill] sm:$0xff] }
 0x217   : > { %8944 = vst [vmem:[#allocation24_spill] sm:$0xff] %v8021_v63  ;;  %8946 = vst [vmem:[#allocation56_spill] sm:$0xff] %v8025_v11  ;;  %v8028_v16 = vadd.f32 %v2108_v17, %v8947_v15  ;;  %v8031_v3 = vadd.f32 %v2446_v53, %v8949_v45  ;;  %v8955_v17 = vld [vmem:[#allocation27_spill] sm:$0xff]  ;;  %v6822_v63 = vld [vmem:[%s6891_s29 + $0xc0] sm:$0xff]  }
 0x218   : > { %v6362_v40 = vpop.f32.mrf.mxu0  ;;  %6593 = vmatmul.mubr.msk.bf16.gmra.mxu0 %vm408_vm0, %v6819_v51  ;;  %v6424_v10 = vpop.f32.mrf.mxu1  ;;  %6655 = vmatmul.mubr.msk.bf16.gmra.mxu1 %vm408_vm0, %v6819_v51 }
 0x219   : > { %8948 = vst [vmem:[#allocation25_spill] sm:$0xff] %v8028_v16  ;;  %8950 = vst [vmem:[#allocation57_spill] sm:$0xff] %v8031_v3  ;;  %v8035_v55 = vadd.f32 %v6362_v40, %v8951_v37  ;;  %6596 = vmatprep.mubr.msk.bf16.mxu0 %vm408_vm0, %v6820_v24  ;;  %v8040_v15 = vadd.f32 %v6424_v10, %v8953_v62  ;;  %6658 = vmatprep.mubr.msk.bf16.mxu1 %vm408_vm0, %v6820_v24  ;;  %v8957_v3 = vld [vmem:[#allocation59_spill] sm:$0xff]  ;;  %v6821_v37 = vld [vmem:[%s6891_s29 + $0xb8] sm:$0xff]  }
 0x21a   : > { %v2121_v42 = vpop.f32.mrf.mxu0  ;;  %v2459_v45 = vpop.f32.mrf.mxu1 }
 0x21b   : > { %8952 = vst [vmem:[#allocation26_spill] sm:$0xff] %v8035_v55  ;;  %8954 = vst [vmem:[#allocation58_spill] sm:$0xff] %v8040_v15  ;;  %v8044_v53 = vadd.f32 %v2121_v42, %v8955_v17  ;;  %v8047_v16 = vadd.f32 %v2459_v45, %v8957_v3  ;;  %v8958_v55 = vld [vmem:[#allocation28_spill] sm:$0xff]  ;;  %v8960_v15 = vld [vmem:[#allocation29_spill] sm:$0xff] }
 0x21c   : > { %v6363_v40 = vpop.f32.mrf.mxu0  ;;  %v6425_v51 = vpop.f32.mrf.mxu1  ;;  %v8962_v17 = vld [vmem:[#allocation61_spill] sm:$0xff] }
 0x21d   : > { %8956 = vst [vmem:[#allocation27_spill] sm:$0xff] %v8044_v53  ;;  %v8051_v11 = vadd.f32 %v6363_v40, %v8958_v55  ;;  %v8055_v10 = vadd.f32 %v6425_v51, %v8959_v58  ;;  %v8964_v55 = vld [vmem:[#allocation30_spill] sm:$0xff]  ;;  %v8967_v51 = vld [vmem:[#allocation31_spill] sm:$0xff] }
 0x21e   : > { %v2124_v62 = vpop.f32.mrf.mxu0  ;;  %v2462_v42 = vpop.f32.mrf.mxu1 }
 0x21f   : > { %v8058_v24 = vadd.f32 %v2124_v62, %v8960_v15  ;;  %v8061_v53 = vadd.f32 %v2462_v42, %v8962_v17 }
 0x220   : > { %v6366_v3 = vpop.f32.mrf.mxu0  ;;  %6597 = vmatmul.mubr.msk.bf16.gmra.mxu0 %vm408_vm0, %v6821_v37  ;;  %v6428_v40 = vpop.f32.mrf.mxu1  ;;  %6659 = vmatmul.mubr.msk.bf16.gmra.mxu1 %vm408_vm0, %v6821_v37 }
 0x221   : > { %8961 = vst [vmem:[#allocation59_spill] sm:$0xff] %v8058_v24  ;;  %8963 = vst [vmem:[#allocation28_spill] sm:$0xff] %v8061_v53  ;;  %v8065_v45 = vadd.f32 %v6366_v3, %v8964_v55  ;;  %6600 = vmatprep.mubr.msk.bf16.mxu0 %vm408_vm0, %v6822_v63  ;;  %v8070_v58 = vadd.f32 %v6428_v40, %v7662_v47  ;;  %6662 = vmatprep.mubr.msk.bf16.mxu1 %vm408_vm0, %v6822_v63  ;;  %v6823_v55 = vld [vmem:[%s6891_s29 + $0xc8] sm:$0xff]   ;;  %v6824_v24 = vld [vmem:[%s6891_s29 + $0xd0] sm:$0xff]  }
 0x222   : > { %v2137_v15 = vpop.f32.mrf.mxu0  ;;  %v2475_v42 = vpop.f32.mrf.mxu1 }
 0x223   : > { %8965 = vst [vmem:[#allocation60_spill] sm:$0xff] %v8065_v45  ;;  %8966 = vst [vmem:[#allocation29_spill] sm:$0xff] %v8070_v58  ;;  %v8074_v62 = vadd.f32 %v2137_v15, %v8967_v51  ;;  %v8077_v17 = vadd.f32 %v2475_v42, %v7665_v30  ;;  %v8968_v45 = vld [vmem:[#allocation32_spill] sm:$0xff]  ;;  %v8969_v58 = vld [vmem:[#allocation33_spill] sm:$0xff] }
 0x224   : > { %v6367_v3 = vpop.f32.mrf.mxu0  ;;  %v6429_v37 = vpop.f32.mrf.mxu1 }
 0x225   : > { %v8081_v53 = vadd.f32 %v6367_v3, %v8968_v45  ;;  %v8085_v47 = vadd.f32 %v6429_v37, %v7669_v34 }
 0x226   : > { %v2140_v40 = vpop.f32.mrf.mxu0  ;;  %v2478_v15 = vpop.f32.mrf.mxu1 }
 0x227   : > { %v8088_v63 = vadd.f32 %v2140_v40, %v8969_v58  ;;  %v8091_v51 = vadd.f32 %v2478_v15, %v7671_v6  ;;  %v6825_v40 = vld [vmem:[%s6891_s29 + $0xd8] sm:$0xff]  }
 0x228   : > { %v6438_v30 = vpop.f32.mrf.mxu0  ;;  %6601 = vmatmul.mubr.msk.bf16.gmra.mxu0 %vm408_vm0, %v6823_v55  ;;  %v6500_v42 = vpop.f32.mrf.mxu1  ;;  %6663 = vmatmul.mubr.msk.bf16.gmra.mxu1 %vm408_vm0, %v6823_v55 }
 0x229   : > { %v8095_v45 = vadd.f32 %v6438_v30, %v7675_v48  ;;  %6604 = vmatprep.mubr.msk.bf16.mxu0 %vm408_vm0, %v6824_v24  ;;  %v8100_v34 = vadd.f32 %v6500_v42, %v7680_v33  ;;  %6666 = vmatprep.mubr.msk.bf16.mxu1 %vm408_vm0, %v6824_v24  ;;  %v6826_v30 = vld [vmem:[%s6891_s29 + $0xe0] sm:$0xff]  }
 0x22a   : > { %v2885_v58 = vpop.f32.mrf.mxu0  ;;  %v3223_v3 = vpop.f32.mrf.mxu1 }
 0x22b   : > { %v8104_v6 = vadd.f32 %v2885_v58, %v7684_v23  ;;  %v8107_v37 = vadd.f32 %v3223_v3, %v7687_v35 }
 0x22c   : > { %v6439_v48 = vpop.f32.mrf.mxu0  ;;  %v6501_v55 = vpop.f32.mrf.mxu1 }
 0x22d   : > { %v8111_v15 = vadd.f32 %v6439_v48, %v7691_v9  ;;  %v8115_v33 = vadd.f32 %v6501_v55, %v7695_v49 }
 0x22e   : > { %v2888_v42 = vpop.f32.mrf.mxu0  ;;  %v3226_v23 = vpop.f32.mrf.mxu1 }
 0x22f   : > { %v8118_v24 = vadd.f32 %v2888_v42, %v7698_v20  ;;  %v8121_v58 = vadd.f32 %v3226_v23, %v7701_v25  ;;  %v6827_v42 = vld [vmem:[%s6891_s29 + $0xe8] sm:$0xff]  }
 0x230   : > { %v6442_v35 = vpop.f32.mrf.mxu0  ;;  %6605 = vmatmul.mubr.msk.bf16.gmra.mxu0 %vm408_vm0, %v6825_v40  ;;  %v6504_v3 = vpop.f32.mrf.mxu1  ;;  %6667 = vmatmul.mubr.msk.bf16.gmra.mxu1 %vm408_vm0, %v6825_v40 }
 0x231   : > { %v8125_v9 = vadd.f32 %v6442_v35, %v7705_v57  ;;  %6608 = vmatprep.mubr.msk.bf16.mxu0 %vm408_vm0, %v6826_v30  ;;  %v8130_v49 = vadd.f32 %v6504_v3, %v7710_v60  ;;  %6670 = vmatprep.mubr.msk.bf16.mxu1 %vm408_vm0, %v6826_v30  ;;  %v6828_v35 = vld [vmem:[%s6891_s29 + $0xf0] sm:$0xff]  }
 0x232   : > { %v2901_v20 = vpop.f32.mrf.mxu0  ;;  %v3239_v48 = vpop.f32.mrf.mxu1 }
 0x233   : > { %v8134_v25 = vadd.f32 %v2901_v20, %v7714_v52  ;;  %v8137_v55 = vadd.f32 %v3239_v48, %v7717_v59 }
 0x234   : > { %v6443_v57 = vpop.f32.mrf.mxu0  ;;  %v6505_v40 = vpop.f32.mrf.mxu1 }
 0x235   : > { %v8141_v23 = vadd.f32 %v6443_v57, %v7721_v54  ;;  %v8145_v60 = vadd.f32 %v6505_v40, %v7725_v46 }
 0x236   : > { %v2904_v3 = vpop.f32.mrf.mxu0  ;;  %v3242_v52 = vpop.f32.mrf.mxu1 }
 0x237   : > { %v8148_v30 = vadd.f32 %v2904_v3, %v7728_v0  ;;  %v8151_v20 = vadd.f32 %v3242_v52, %v7731_v13  ;;  %v6829_v3 = vld [vmem:[%s6891_s29 + $0xf8] sm:$0xff]  }
 0x238   : > { %v6446_v59 = vpop.f32.mrf.mxu0  ;;  %6609 = vmatmul.mubr.msk.bf16.gmra.mxu0 %vm408_vm0, %v6827_v42  ;;  %v6508_v48 = vpop.f32.mrf.mxu1  ;;  %6671 = vmatmul.mubr.msk.bf16.gmra.mxu1 %vm408_vm0, %v6827_v42 }
 0x239   : > { %v8155_v54 = vadd.f32 %v6446_v59, %v7735_v5  ;;  %6612 = vmatprep.mubr.msk.bf16.mxu0 %vm408_vm0, %v6828_v35  ;;  %v8160_v46 = vadd.f32 %v6508_v48, %v7740_v8  ;;  %6674 = vmatprep.mubr.msk.bf16.mxu1 %vm408_vm0, %v6828_v35 }
 0x23a   : > { %v2917_v0 = vpop.f32.mrf.mxu0  ;;  %v3255_v57 = vpop.f32.mrf.mxu1 }
 0x23b   : > { %v8164_v13 = vadd.f32 %v2917_v0, %v7744_v26  ;;  %v8167_v40 = vadd.f32 %v3255_v57, %v7747_v19 }
 0x23c   : > { %v6447_v5 = vpop.f32.mrf.mxu0  ;;  %v6509_v42 = vpop.f32.mrf.mxu1 }
 0x23d   : > { %v8171_v52 = vadd.f32 %v6447_v5, %v7751_v2  ;;  %v8174_v59 = vadd.f32 %v6509_v42, %v7755_v39 }
 0x23e   : > { %v2920_v8 = vpop.f32.mrf.mxu0  ;;  %v3258_v35 = vpop.f32.mrf.mxu1 }
 0x23f   : > { %v8177_v48 = vadd.f32 %v2920_v8, %v7758_v44  ;;  %v8180_v26 = vadd.f32 %v3258_v35, %v7761_v41 }
 0x240   : > { %v6450_v0 = vpop.f32.mrf.mxu0  ;;  %6613 = vmatmul.mubr.msk.bf16.gmra.mxu0 %vm408_vm0, %v6829_v3  ;;  %v6512_v2 = vpop.f32.mrf.mxu1  ;;  %6675 = vmatmul.mubr.msk.bf16.gmra.mxu1 %vm408_vm0, %v6829_v3 }
 0x241   : > { %v8184_v19 = vadd.f32 %v6450_v0, %v7765_v18  ;;  %v8188_v39 = vadd.f32 %v6512_v2, %v7770_v21 }
 0x242   : > { %v2933_v57 = vpop.f32.mrf.mxu0  ;;  %v3271_v5 = vpop.f32.mrf.mxu1 }
 0x243   : > { %v8191_v44 = vadd.f32 %v2933_v57, %v7774_v61  ;;  %v8194_v41 = vadd.f32 %v3271_v5, %v7777_v22 }
 0x244   : > { %v6451_v42 = vpop.f32.mrf.mxu0  ;;  %v6513_v18 = vpop.f32.mrf.mxu1 }
 0x245   : > { %v8197_v8 = vadd.f32 %v6451_v42, %v7781_v14  ;;  %v8200_v35 = vadd.f32 %v6513_v18, %v7785_v1 }
 0x246   : > { %v2936_v3 = vpop.f32.mrf.mxu0  ;;  %v3274_v0 = vpop.f32.mrf.mxu1 }
 0x247   : > { %v8203_v21 = vadd.f32 %v2936_v3, %v7788_v7  ;;  %v8206_v61 = vadd.f32 %v3274_v0, %v7791_v4 }
 0x248   : > { %v6454_v2 = vpop.f32.mrf.mxu0  ;;  %v6516_v57 = vpop.f32.mrf.mxu1 }
 0x249   : > { %v8209_v22 = vadd.f32 %v6454_v2, %v7795_v31  ;;  %v8212_v14 = vadd.f32 %v6516_v57, %v7800_v36 }
 0x24a   : > { %v2949_v5 = vpop.f32.mrf.mxu0  ;;  %v3287_v42 = vpop.f32.mrf.mxu1 }
 0x24b   : > { %v8215_v1 = vadd.f32 %v2949_v5, %v7804_v12  ;;  %v8218_v7 = vadd.f32 %v3287_v42, %v7807_v38 }
 0x24c   : > { %v6455_v18 = vpop.f32.mrf.mxu0  ;;  %v6517_v3 = vpop.f32.mrf.mxu1 }
 0x24d   : > { %v8221_v4 = vadd.f32 %v6455_v18, %v7811_v27  ;;  %v8224_v31 = vadd.f32 %v6517_v3, %v7815_v29  ;;  %v8975_v3 = vld [vmem:[#allocation62_spill] sm:$0xff] }
 0x24e   : > { %v2952_v0 = vpop.f32.mrf.mxu0  ;;  %v3290_v2 = vpop.f32.mrf.mxu1 }
 0x24f   : > { %v8227_v36 = vadd.f32 %v2952_v0, %v7818_v32  ;;  %v8230_v12 = vadd.f32 %v3290_v2, %v7821_v43 }
 0x250   : > { %v6458_v57 = vpop.f32.mrf.mxu0  ;;  %v6520_v5 = vpop.f32.mrf.mxu1 }
 0x251   : > { %8970 = vst [vmem:[#allocation61_spill] sm:$0xff] %v8227_v36  ;;  %8971 = vst [vmem:[#allocation30_spill] sm:$0xff] %v8230_v12  ;;  %v8233_v38 = vadd.f32 %v6458_v57, %v7825_v50  ;;  %v8236_v27 = vadd.f32 %v6520_v5, %v7830_v56  ;;  %v8977_v36 = vld [vmem:[#allocation63_spill] sm:$0xff]  ;;  %v8979_v12 = vld [vmem:[#allocation64_spill] sm:$0xff] }
 0x252   : > { %v2965_v42 = vpop.f32.mrf.mxu0  ;;  %v3303_v18 = vpop.f32.mrf.mxu1 }
 0x253   : > { %8972 = vst [vmem:[#allocation31_spill] sm:$0xff] %v8233_v38  ;;  %8973 = vst [vmem:[#allocation32_spill] sm:$0xff] %v8236_v27  ;;  %v8239_v29 = vadd.f32 %v2965_v42, %v7834_v28  ;;  %v8242_v32 = vadd.f32 %v3303_v18, %v8975_v3  ;;  %v8981_v38 = vld [vmem:[#allocation65_spill] sm:$0xff]  ;;  %v8983_v27 = vld [vmem:[#allocation66_spill] sm:$0xff] }
 0x254   : > { %v6459_v0 = vpop.f32.mrf.mxu0  ;;  %v6521_v2 = vpop.f32.mrf.mxu1 }
 0x255   : > { %8974 = vst [vmem:[#allocation33_spill] sm:$0xff] %v8239_v29  ;;  %8976 = vst [vmem:[#allocation62_spill] sm:$0xff] %v8242_v32  ;;  %v8245_v43 = vadd.f32 %v6459_v0, %v8977_v36  ;;  %v8248_v50 = vadd.f32 %v6521_v2, %v8979_v12  ;;  %v8985_v29 = vld [vmem:[#allocation2_spill] sm:$0xff] }
 0x256   : > { %v2968_v57 = vpop.f32.mrf.mxu0  ;;  %v3306_v5 = vpop.f32.mrf.mxu1  ;;  %v8987_v32 = vld [vmem:[#allocation34_spill] sm:$0xff] }
 0x257   : > { %8978 = vst [vmem:[#allocation63_spill] sm:$0xff] %v8245_v43  ;;  %8980 = vst [vmem:[#allocation64_spill] sm:$0xff] %v8248_v50  ;;  %v8251_v56 = vadd.f32 %v2968_v57, %v8981_v38  ;;  %v8254_v28 = vadd.f32 %v3306_v5, %v8983_v27  ;;  %v8989_v43 = vld [vmem:[#allocation3_spill] sm:$0xff] }
 0x258   : > { %v6462_v42 = vpop.f32.mrf.mxu0  ;;  %v6524_v3 = vpop.f32.mrf.mxu1  ;;  %v8991_v50 = vld [vmem:[#allocation35_spill] sm:$0xff] }
 0x259   : > { %8982 = vst [vmem:[#allocation65_spill] sm:$0xff] %v8251_v56  ;;  %8984 = vst [vmem:[#allocation66_spill] sm:$0xff] %v8254_v28  ;;  %v8257_v18 = vadd.f32 %v6462_v42, %v8985_v29  ;;  %v8260_v36 = vadd.f32 %v6524_v3, %v8987_v32  ;;  %v8993_v56 = vld [vmem:[#allocation4_spill] sm:$0xff] }
 0x25a   : > { %v2981_v0 = vpop.f32.mrf.mxu0  ;;  %v3319_v2 = vpop.f32.mrf.mxu1  ;;  %v8995_v28 = vld [vmem:[#allocation36_spill] sm:$0xff] }
 0x25b   : > { %8986 = vst [vmem:[#allocation2_spill] sm:$0xff] %v8257_v18  ;;  %8988 = vst [vmem:[#allocation34_spill] sm:$0xff] %v8260_v36  ;;  %v8263_v12 = vadd.f32 %v2981_v0, %v8989_v43  ;;  %v8266_v38 = vadd.f32 %v3319_v2, %v8991_v50  ;;  %v8997_v18 = vld [vmem:[#allocation5_spill] sm:$0xff] }
 0x25c   : > { %v6463_v57 = vpop.f32.mrf.mxu0  ;;  %v6525_v5 = vpop.f32.mrf.mxu1  ;;  %v8999_v36 = vld [vmem:[#allocation37_spill] sm:$0xff] }
 0x25d   : > { %8990 = vst [vmem:[#allocation3_spill] sm:$0xff] %v8263_v12  ;;  %8992 = vst [vmem:[#allocation35_spill] sm:$0xff] %v8266_v38  ;;  %v8269_v27 = vadd.f32 %v6463_v57, %v8993_v56  ;;  %v8272_v29 = vadd.f32 %v6525_v5, %v8995_v28  ;;  %v9001_v12 = vld [vmem:[#allocation6_spill] sm:$0xff] }
 0x25e   : > { %v2984_v42 = vpop.f32.mrf.mxu0  ;;  %v3322_v3 = vpop.f32.mrf.mxu1  ;;  %v9003_v38 = vld [vmem:[#allocation38_spill] sm:$0xff] }
 0x25f   : > { %8994 = vst [vmem:[#allocation4_spill] sm:$0xff] %v8269_v27  ;;  %8996 = vst [vmem:[#allocation36_spill] sm:$0xff] %v8272_v29  ;;  %v8275_v32 = vadd.f32 %v2984_v42, %v8997_v18  ;;  %v8278_v43 = vadd.f32 %v3322_v3, %v8999_v36  ;;  %v9005_v27 = vld [vmem:[#allocation7_spill] sm:$0xff] }
 0x260   : > { %v6466_v0 = vpop.f32.mrf.mxu0  ;;  %v6528_v2 = vpop.f32.mrf.mxu1  ;;  %v9007_v29 = vld [vmem:[#allocation39_spill] sm:$0xff] }
 0x261   : > { %8998 = vst [vmem:[#allocation5_spill] sm:$0xff] %v8275_v32  ;;  %9000 = vst [vmem:[#allocation37_spill] sm:$0xff] %v8278_v43  ;;  %v8281_v50 = vadd.f32 %v6466_v0, %v9001_v12  ;;  %v8284_v56 = vadd.f32 %v6528_v2, %v9003_v38  ;;  %v9009_v32 = vld [vmem:[#allocation8_spill] sm:$0xff] }
 0x262   : > { %v2997_v57 = vpop.f32.mrf.mxu0  ;;  %v3335_v5 = vpop.f32.mrf.mxu1  ;;  %v9011_v43 = vld [vmem:[#allocation40_spill] sm:$0xff] }
 0x263   : > { %9002 = vst [vmem:[#allocation6_spill] sm:$0xff] %v8281_v50  ;;  %9004 = vst [vmem:[#allocation38_spill] sm:$0xff] %v8284_v56  ;;  %v8287_v28 = vadd.f32 %v2997_v57, %v9005_v27  ;;  %v8290_v18 = vadd.f32 %v3335_v5, %v9007_v29  ;;  %v9013_v50 = vld [vmem:[#allocation9_spill] sm:$0xff] }
 0x264   : > { %v6467_v42 = vpop.f32.mrf.mxu0  ;;  %v6529_v3 = vpop.f32.mrf.mxu1  ;;  %v9015_v56 = vld [vmem:[#allocation41_spill] sm:$0xff] }
 0x265   : > { %9006 = vst [vmem:[#allocation7_spill] sm:$0xff] %v8287_v28  ;;  %9008 = vst [vmem:[#allocation39_spill] sm:$0xff] %v8290_v18  ;;  %v8293_v36 = vadd.f32 %v6467_v42, %v9009_v32  ;;  %v8296_v12 = vadd.f32 %v6529_v3, %v9011_v43  ;;  %v9017_v28 = vld [vmem:[#allocation10_spill] sm:$0xff] }
 0x266   : > { %v3000_v0 = vpop.f32.mrf.mxu0  ;;  %v3338_v2 = vpop.f32.mrf.mxu1  ;;  %v9019_v18 = vld [vmem:[#allocation42_spill] sm:$0xff] }
 0x267   : > { %9010 = vst [vmem:[#allocation8_spill] sm:$0xff] %v8293_v36  ;;  %9012 = vst [vmem:[#allocation40_spill] sm:$0xff] %v8296_v12  ;;  %v8299_v38 = vadd.f32 %v3000_v0, %v9013_v50  ;;  %v8302_v27 = vadd.f32 %v3338_v2, %v9015_v56  ;;  %v9021_v36 = vld [vmem:[#allocation11_spill] sm:$0xff] }
 0x268   : > { %v6470_v57 = vpop.f32.mrf.mxu0  ;;  %v6532_v5 = vpop.f32.mrf.mxu1  ;;  %v9023_v12 = vld [vmem:[#allocation43_spill] sm:$0xff] }
 0x269   : > { %9014 = vst [vmem:[#allocation9_spill] sm:$0xff] %v8299_v38  ;;  %9016 = vst [vmem:[#allocation41_spill] sm:$0xff] %v8302_v27  ;;  %v8305_v29 = vadd.f32 %v6470_v57, %v9017_v28  ;;  %v8308_v32 = vadd.f32 %v6532_v5, %v9019_v18  ;;  %v9025_v38 = vld [vmem:[#allocation12_spill] sm:$0xff] }
 0x26a   : > { %v3013_v42 = vpop.f32.mrf.mxu0  ;;  %v3351_v3 = vpop.f32.mrf.mxu1  ;;  %v9027_v27 = vld [vmem:[#allocation44_spill] sm:$0xff] }
 0x26b   : > { %9018 = vst [vmem:[#allocation10_spill] sm:$0xff] %v8305_v29  ;;  %9020 = vst [vmem:[#allocation42_spill] sm:$0xff] %v8308_v32  ;;  %v8311_v43 = vadd.f32 %v3013_v42, %v9021_v36  ;;  %v8314_v50 = vadd.f32 %v3351_v3, %v9023_v12  ;;  %v9029_v29 = vld [vmem:[#allocation13_spill] sm:$0xff] }
 0x26c   : > { %v6471_v0 = vpop.f32.mrf.mxu0  ;;  %v6533_v2 = vpop.f32.mrf.mxu1  ;;  %v9031_v32 = vld [vmem:[#allocation45_spill] sm:$0xff] }
 0x26d   : > { %9022 = vst [vmem:[#allocation11_spill] sm:$0xff] %v8311_v43  ;;  %9024 = vst [vmem:[#allocation43_spill] sm:$0xff] %v8314_v50  ;;  %v8317_v56 = vadd.f32 %v6471_v0, %v9025_v38  ;;  %v8320_v28 = vadd.f32 %v6533_v2, %v9027_v27  ;;  %v9033_v43 = vld [vmem:[#allocation14_spill] sm:$0xff] }
 0x26e   : > { %v3016_v57 = vpop.f32.mrf.mxu0  ;;  %v3354_v5 = vpop.f32.mrf.mxu1  ;;  %v9035_v50 = vld [vmem:[#allocation46_spill] sm:$0xff] }
 0x26f   : > { %9026 = vst [vmem:[#allocation12_spill] sm:$0xff] %v8317_v56  ;;  %9028 = vst [vmem:[#allocation44_spill] sm:$0xff] %v8320_v28  ;;  %v8323_v18 = vadd.f32 %v3016_v57, %v9029_v29  ;;  %v8326_v36 = vadd.f32 %v3354_v5, %v9031_v32  ;;  %v9037_v56 = vld [vmem:[#allocation15_spill] sm:$0xff] }
 0x270   : > { %v6474_v42 = vpop.f32.mrf.mxu0  ;;  %v6536_v3 = vpop.f32.mrf.mxu1  ;;  %v9039_v28 = vld [vmem:[#allocation47_spill] sm:$0xff] }
 0x271   : > { %9030 = vst [vmem:[#allocation13_spill] sm:$0xff] %v8323_v18  ;;  %9032 = vst [vmem:[#allocation45_spill] sm:$0xff] %v8326_v36  ;;  %v8329_v12 = vadd.f32 %v6474_v42, %v9033_v43  ;;  %v8332_v38 = vadd.f32 %v6536_v3, %v9035_v50  ;;  %v9041_v18 = vld [vmem:[#allocation16_spill] sm:$0xff] }
 0x272   : > { %v3029_v0 = vpop.f32.mrf.mxu0  ;;  %v3367_v2 = vpop.f32.mrf.mxu1  ;;  %v9043_v36 = vld [vmem:[#allocation48_spill] sm:$0xff] }
 0x273   : > { %9034 = vst [vmem:[#allocation14_spill] sm:$0xff] %v8329_v12  ;;  %9036 = vst [vmem:[#allocation46_spill] sm:$0xff] %v8332_v38  ;;  %v8335_v27 = vadd.f32 %v3029_v0, %v9037_v56  ;;  %v8338_v29 = vadd.f32 %v3367_v2, %v9039_v28  ;;  %v9045_v12 = vld [vmem:[#allocation17_spill] sm:$0xff] }
 0x274   : > { %v6475_v57 = vpop.f32.mrf.mxu0  ;;  %v6537_v5 = vpop.f32.mrf.mxu1  ;;  %v9047_v38 = vld [vmem:[#allocation49_spill] sm:$0xff] }
 0x275   : > { %9038 = vst [vmem:[#allocation15_spill] sm:$0xff] %v8335_v27  ;;  %9040 = vst [vmem:[#allocation47_spill] sm:$0xff] %v8338_v29  ;;  %v8341_v32 = vadd.f32 %v6475_v57, %v9041_v18  ;;  %v8344_v43 = vadd.f32 %v6537_v5, %v9043_v36  ;;  %v9049_v27 = vld [vmem:[#allocation18_spill] sm:$0xff] }
 0x276   : > { %v3032_v42 = vpop.f32.mrf.mxu0  ;;  %v3370_v3 = vpop.f32.mrf.mxu1  ;;  %v9051_v29 = vld [vmem:[#allocation50_spill] sm:$0xff] }
 0x277   : > { %9042 = vst [vmem:[#allocation16_spill] sm:$0xff] %v8341_v32  ;;  %9044 = vst [vmem:[#allocation48_spill] sm:$0xff] %v8344_v43  ;;  %v8347_v50 = vadd.f32 %v3032_v42, %v9045_v12  ;;  %v8350_v56 = vadd.f32 %v3370_v3, %v9047_v38  ;;  %v9053_v32 = vld [vmem:[#allocation19_spill] sm:$0xff] }
 0x278   : > { %v6478_v0 = vpop.f32.mrf.mxu0  ;;  %v6540_v2 = vpop.f32.mrf.mxu1  ;;  %v9055_v43 = vld [vmem:[#allocation51_spill] sm:$0xff] }
 0x279   : > { %9046 = vst [vmem:[#allocation17_spill] sm:$0xff] %v8347_v50  ;;  %9048 = vst [vmem:[#allocation49_spill] sm:$0xff] %v8350_v56  ;;  %v8353_v28 = vadd.f32 %v6478_v0, %v9049_v27  ;;  %v8356_v18 = vadd.f32 %v6540_v2, %v9051_v29  ;;  %v9057_v50 = vld [vmem:[#allocation20_spill] sm:$0xff] }
 0x27a   : > { %v3045_v57 = vpop.f32.mrf.mxu0  ;;  %v3383_v5 = vpop.f32.mrf.mxu1  ;;  %v9059_v56 = vld [vmem:[#allocation52_spill] sm:$0xff] }
 0x27b   : > { %9050 = vst [vmem:[#allocation18_spill] sm:$0xff] %v8353_v28  ;;  %9052 = vst [vmem:[#allocation50_spill] sm:$0xff] %v8356_v18  ;;  %v8359_v36 = vadd.f32 %v3045_v57, %v9053_v32  ;;  %v8362_v12 = vadd.f32 %v3383_v5, %v9055_v43  ;;  %v9061_v28 = vld [vmem:[#allocation21_spill] sm:$0xff] }
 0x27c   : > { %v6479_v42 = vpop.f32.mrf.mxu0  ;;  %v6541_v3 = vpop.f32.mrf.mxu1  ;;  %v9063_v18 = vld [vmem:[#allocation53_spill] sm:$0xff] }
 0x27d   : > { %9054 = vst [vmem:[#allocation19_spill] sm:$0xff] %v8359_v36  ;;  %9056 = vst [vmem:[#allocation51_spill] sm:$0xff] %v8362_v12  ;;  %v8365_v38 = vadd.f32 %v6479_v42, %v9057_v50  ;;  %v8368_v27 = vadd.f32 %v6541_v3, %v9059_v56  ;;  %v9065_v36 = vld [vmem:[#allocation22_spill] sm:$0xff] }
 0x27e   : > { %v3048_v0 = vpop.f32.mrf.mxu0  ;;  %v3386_v2 = vpop.f32.mrf.mxu1  ;;  %v9067_v12 = vld [vmem:[#allocation54_spill] sm:$0xff] }
 0x27f   : > { %9058 = vst [vmem:[#allocation20_spill] sm:$0xff] %v8365_v38  ;;  %9060 = vst [vmem:[#allocation52_spill] sm:$0xff] %v8368_v27  ;;  %v8371_v29 = vadd.f32 %v3048_v0, %v9061_v28  ;;  %v8374_v32 = vadd.f32 %v3386_v2, %v9063_v18  ;;  %v9069_v38 = vld [vmem:[#allocation23_spill] sm:$0xff] }
 0x280   : > { %v6482_v57 = vpop.f32.mrf.mxu0  ;;  %v6544_v5 = vpop.f32.mrf.mxu1  ;;  %v9071_v27 = vld [vmem:[#allocation55_spill] sm:$0xff] }
 0x281   : > { %9062 = vst [vmem:[#allocation21_spill] sm:$0xff] %v8371_v29  ;;  %9064 = vst [vmem:[#allocation53_spill] sm:$0xff] %v8374_v32  ;;  %v8377_v43 = vadd.f32 %v6482_v57, %v9065_v36  ;;  %v8380_v50 = vadd.f32 %v6544_v5, %v9067_v12  ;;  %v9073_v29 = vld [vmem:[#allocation24_spill] sm:$0xff] }
 0x282   : > { %v3061_v42 = vpop.f32.mrf.mxu0  ;;  %v3399_v3 = vpop.f32.mrf.mxu1  ;;  %v9075_v32 = vld [vmem:[#allocation56_spill] sm:$0xff] }
 0x283   : > { %9066 = vst [vmem:[#allocation22_spill] sm:$0xff] %v8377_v43  ;;  %9068 = vst [vmem:[#allocation54_spill] sm:$0xff] %v8380_v50  ;;  %v8383_v56 = vadd.f32 %v3061_v42, %v9069_v38  ;;  %v8386_v28 = vadd.f32 %v3399_v3, %v9071_v27  ;;  %v9076_v43 = vld [vmem:[#allocation25_spill] sm:$0xff] }
 0x284   : > { %v6483_v0 = vpop.f32.mrf.mxu0  ;;  %v6545_v2 = vpop.f32.mrf.mxu1  ;;  %v9077_v50 = vld [vmem:[#allocation57_spill] sm:$0xff] }
 0x285   : > { %9070 = vst [vmem:[#allocation23_spill] sm:$0xff] %v8383_v56  ;;  %9072 = vst [vmem:[#allocation55_spill] sm:$0xff] %v8386_v28  ;;  %v8389_v18 = vadd.f32 %v6483_v0, %v9073_v29  ;;  %v8392_v36 = vadd.f32 %v6545_v2, %v9075_v32  ;;  %v9078_v56 = vld [vmem:[#allocation26_spill] sm:$0xff] }
 0x286   : > { %v3064_v57 = vpop.f32.mrf.mxu0  ;;  %v3402_v5 = vpop.f32.mrf.mxu1  ;;  %v9080_v28 = vld [vmem:[#allocation58_spill] sm:$0xff] }
 0x287   : > { %9074 = vst [vmem:[#allocation24_spill] sm:$0xff] %v8389_v18  ;;  %v8395_v12 = vadd.f32 %v3064_v57, %v9076_v43  ;;  %v8398_v38 = vadd.f32 %v3402_v5, %v9077_v50  ;;  %v9082_v18 = vld [vmem:[#allocation27_spill] sm:$0xff] }
 0x288   : > { %v6486_v42 = vpop.f32.mrf.mxu0  ;;  %v6548_v3 = vpop.f32.mrf.mxu1 }
 0x289   : > { %v8401_v27 = vadd.f32 %v6486_v42, %v9078_v56  ;;  %v8404_v29 = vadd.f32 %v6548_v3, %v9080_v28 }
 0x28a   : > { %v3077_v0 = vpop.f32.mrf.mxu0  ;;  %v3415_v2 = vpop.f32.mrf.mxu1 }
 0x28b   : > { %9079 = vst [vmem:[#allocation56_spill] sm:$0xff] %v8401_v27  ;;  %9081 = vst [vmem:[#allocation25_spill] sm:$0xff] %v8404_v29  ;;  %v8407_v32 = vadd.f32 %v3077_v0, %v9082_v18  ;;  %v8410_v43 = vadd.f32 %v3415_v2, %v8047_v16  ;;  %v9086_v27 = vld [vmem:[#allocation59_spill] sm:$0xff]  ;;  %v9087_v29 = vld [vmem:[#allocation28_spill] sm:$0xff] }
 0x28c   : > { %v6487_v57 = vpop.f32.mrf.mxu0  ;;  %v6549_v5 = vpop.f32.mrf.mxu1 }
 0x28d   : > { %9083 = vst [vmem:[#allocation57_spill] sm:$0xff] %v8407_v32  ;;  %9084 = vst [vmem:[#allocation26_spill] sm:$0xff] %v8410_v43  ;;  %v8413_v50 = vadd.f32 %v6487_v57, %v8051_v11  ;;  %v8416_v56 = vadd.f32 %v6549_v5, %v8055_v10  ;;  %v9088_v32 = vld [vmem:[#allocation60_spill] sm:$0xff]  ;;  %v9089_v43 = vld [vmem:[#allocation29_spill] sm:$0xff] }
 0x28e   : > { %v3080_v42 = vpop.f32.mrf.mxu0  ;;  %v3418_v3 = vpop.f32.mrf.mxu1 }
 0x28f   : > { %9085 = vst [vmem:[#allocation58_spill] sm:$0xff] %v8416_v56  ;;  %v8419_v28 = vadd.f32 %v3080_v42, %v9086_v27  ;;  %v8422_v18 = vadd.f32 %v3418_v3, %v9087_v29  ;;  %v4633_v56 = vlaneseq }
 0x290   : > { %v6490_v0 = vpop.f32.mrf.mxu0  ;;  %v6552_v2 = vpop.f32.mrf.mxu1 }
 0x291   : > { %v8425_v16 = vadd.f32 %v6490_v0, %v9088_v32  ;;  %v8428_v11 = vadd.f32 %v6552_v2, %v9089_v43 }
 0x292   : > { %v3093_v57 = vpop.f32.mrf.mxu0  ;;  %v3431_v5 = vpop.f32.mrf.mxu1 }
 0x293   : > { %v8431_v10 = vadd.f32 %v3093_v57, %v8074_v62  ;;  %v8434_v27 = vadd.f32 %v3431_v5, %v8077_v17  ;;  %v8445_v62 = vshrl.u32 %v4633_v56, 7 }
 0x294   : > { %v6491_v42 = vpop.f32.mrf.mxu0  ;;  %v6553_v3 = vpop.f32.mrf.mxu1 }
 0x295   : > { %9090 = vst [vmem:[#allocation27_spill] sm:$0xff] %v8431_v10  ;;  %9091 = vst [vmem:[#allocation59_spill] sm:$0xff] %v8434_v27  ;;  %v8437_v29 = vadd.f32 %v6491_v42, %v8081_v53  ;;  %v8440_v32 = vadd.f32 %v6553_v3, %v8085_v47  ;;  %v8455_v47 = vld [vmem:[%s8788_s2] ss:$0 sm:$0xff]  ;;  %v4637_v56 = vadd.s32 24, %v8445_v62 }
 0x296   : > { %v3096_v0 = vpop.f32.mrf.mxu0  ;;  %v3434_v2 = vpop.f32.mrf.mxu1 }
 0x297   : > { %9092 = vst [vmem:[#allocation28_spill] sm:$0xff] %v8437_v29  ;;  %9093 = vst [vmem:[#allocation60_spill] sm:$0xff] %v8440_v32  ;;  %v8443_v43 = vadd.f32 %v3096_v0, %v8088_v63  ;;  %v8448_v57 = vadd.f32 %v3434_v2, %v8091_v51  ;;  %v4693_v29 = vand.u32 15, %v4637_v56 }
 0x298   : > { %v6562_v17 = vpop.f32.mrf.mxu0  ;;  %v6624_v27 = vpop.f32.mrf.mxu1 }
 0x299   : > { %9094 = vst [vmem:[#allocation29_spill] sm:$0xff] %v8443_v43  ;;  %9095 = vst [vmem:[#allocation67_spill] sm:$0xff] %v8448_v57  ;;  %v4066_v5 = vadd.f32 %v6562_v17, %v8095_v45  ;;  %v4404_v53 = vadd.f32 %v6624_v27, %v8100_v34  ;;  %v4635_v34 = vadd.s32 8, %v8445_v62  ;;  %vm8471_vm1 = vcmp.lt.s32.totalorder %v4693_v29, 14 }
 0x29a   : > { %v3841_v42 = vpop.f32.mrf.mxu0  ;;  %v4179_v3 = vpop.f32.mrf.mxu1 }
 0x29b   : > { %v4064_v63 = vadd.f32 %v3841_v42, %v8104_v6  ;;  %v4460_v0 = vmax.f32 %v4066_v5, %v4404_v53  ;;  %v4402_v51 = vadd.f32 %v4179_v3, %v8107_v37  ;;  %v4641_v5 = vadd.s32 56, %v8445_v62 }
 0x29c   : > { %v6563_v2 = vpop.f32.mrf.mxu0  ;;  %v6625_v17 = vpop.f32.mrf.mxu1  ;;  %v4691_v10 = vand.u32 15, %v4635_v34 }
 0x29d   : > { %v4067_v45 = vadd.f32 %v6563_v2, %v8111_v15  ;;  %v4523_v27 = vadd.f32 %v8455_v47, %v4460_v0  ;;  %v4458_v57 = vmax.f32 %v4064_v63, %v4402_v51  ;;  %v4405_v43 = vadd.f32 %v6625_v17, %v8115_v33 }
 0x29e   : > { %v3844_v32 = vpop.f32.mrf.mxu0  ;;  %v4182_v42 = vpop.f32.mrf.mxu1  ;;  %vm8477_vm2 = vcmp.lt.s32.totalorder %v4691_v10, 14 }
 0x29f   : > { %v4065_v6 = vadd.f32 %v3844_v32, %v8118_v24  ;;  %v4521_v37 = vadd.f32 %v8455_v47, %v4458_v57  ;;  %v4461_v53 = vmax.f32 %v4067_v45, %v4405_v43  ;;  %v4403_v15 = vadd.f32 %v4182_v42, %v8121_v58 }
 0x2a0   : > { %v6566_v3 = vpop.f32.mrf.mxu0  ;;  %v4579_v2 = vmax.f32 %v4523_v27, 0.0  ;;  %v6628_v63 = vpop.f32.mrf.mxu1  ;;  %v4697_v57 = vand.u32 15, %v4641_v5 }
 0x2a1   : > { %v4070_v0 = vadd.f32 %v6566_v3, %v8125_v9  ;;  %v4577_v51 = vmax.f32 %v4521_v37, 0.0  ;;  %v4524_v33 = vadd.f32 %v8455_v47, %v4461_v53  ;;  %v4459_v56 = vmax.f32 %v4065_v6, %v4403_v15 }
 0x2a2   : > { %v4408_v24 = vadd.f32 %v6628_v63, %v8130_v49  ;;  %v3857_v32 = vpop.f32.mrf.mxu0  ;;  %v4195_v43 = vpop.f32.mrf.mxu1  ;;  %v4639_v53 = vadd.s32 40, %v8445_v62  ;;  %v4645_v3 = vadd.s32 88, %v8445_v62  ;;  %vm8488_vm3 = vcmp.lt.s32.totalorder %v4697_v57, 14 }
 0x2a3   : > { %v4068_v58 = vadd.f32 %v3857_v32, %v8134_v25  ;;  %v4858_v45 = vmax.f32 %v4577_v51, %v4579_v2  ;;  %v4580_v34 = vmax.f32 %v4524_v33, 0.0  ;;  %v4522_v9 = vadd.f32 %v8455_v47, %v4459_v56 }
 0x2a4   : > { %v4464_v27 = vmax.f32 %v4070_v0, %v4408_v24  ;;  %v6567_v42 = vpop.f32.mrf.mxu0  ;;  %v4406_v49 = vadd.f32 %v4195_v43, %v8137_v55  ;;  %v6629_v37 = vpop.f32.mrf.mxu1 }
 0x2a5   : > { %v4071_v29 = vadd.f32 %v6567_v42, %v8141_v23  ;;  %v4578_v25 = vmax.f32 %v4522_v9, 0.0  ;;  %v4409_v5 = vadd.f32 %v6629_v37, %v8145_v60  ;;  %v4805_v63 = vsel %vm8471_vm1, %v4580_v34, 0.0 }
 0x2a6   : > { %v3860_v15 = vpop.f32.mrf.mxu0  ;;  %v4527_v2 = vadd.f32 %v8455_v47, %v4464_v27  ;;  %v4462_v10 = vmax.f32 %v4068_v58, %v4406_v49  ;;  %v4198_v23 = vpop.f32.mrf.mxu1  ;;  %v4695_v58 = vand.u32 15, %v4639_v53  ;;  %v4701_v9 = vand.u32 15, %v4645_v3 }
 0x2a7   : > { %v4069_v55 = vadd.f32 %v3860_v15, %v8148_v30  ;;  %v4803_v51 = vsel %vm8477_vm2, %v4578_v25, 0.0  ;;  %v4465_v60 = vmax.f32 %v4071_v29, %v4409_v5  ;;  %v4407_v33 = vadd.f32 %v4198_v23, %v8151_v20 }
 0x2a8   : > { %v6570_v56 = vpop.f32.mrf.mxu0  ;;  %v4859_v24 = vmax.f32 %v4803_v51, %v4805_v63  ;;  %v4525_v32 = vadd.f32 %v8455_v47, %v4462_v10  ;;  %v6632_v57 = vpop.f32.mrf.mxu1  ;;  %v4583_v42 = vmax.f32 %v4527_v2, 0.0  ;;  %vm4751_vm4 = vcmp.lt.s32.totalorder %v4695_v58, 14 }
 0x2a9   : > { %v4074_v43 = vadd.f32 %v6570_v56, %v8155_v54  ;;  %v4528_v30 = vadd.f32 %v8455_v47, %v4465_v60  ;;  %v4463_v17 = vmax.f32 %v4069_v55, %v4407_v33  ;;  %v4412_v34 = vadd.f32 %v6632_v57, %v8160_v46 }
 0x2aa   : > { %v3873_v20 = vpop.f32.mrf.mxu0  ;;  %v5668_v27 = vpack.c.bf16 %v4859_v24, %v4858_v45  ;;  %v4581_v6 = vmax.f32 %v4525_v32, 0.0  ;;  %v4211_v54 = vpop.f32.mrf.mxu1  ;;  %v4643_v45 = vadd.s32 72, %v8445_v62  ;;  %vm8515_vm5 = vcmp.lt.s32.totalorder %v4701_v9, 14 }
 0x2ab   : > { %v4072_v49 = vadd.f32 %v3873_v20, %v8164_v13  ;;  %v4584_v29 = vmax.f32 %v4528_v30, 0.0  ;;  %v4526_v37 = vadd.f32 %v8455_v47, %v4463_v17  ;;  %v4468_v53 = vmax.f32 %v4074_v43, %v4412_v34 }
 0x2ac   : > { %v4410_v25 = vadd.f32 %v4211_v54, %v8167_v40  ;;  %v6571_v5 = vpop.f32.mrf.mxu0  ;;  %5669 = vst [vmem:[%s8503_s6] sm:$0xff] %v5668_v27   ;;  %v4870_v15 = vmax.f32 %v4581_v6, %v4583_v42  ;;  %v6633_v10 = vpop.f32.mrf.mxu1  ;;  %v4699_v43 = vand.u32 15, %v4643_v45  ;;  %v4649_v42 = vadd.s32 120, %v8445_v62 }
 0x2ad   : > { %v4075_v46 = vadd.f32 %v6571_v5, %v8171_v52  ;;  %v4582_v3 = vmax.f32 %v4526_v37, 0.0  ;;  %v4531_v2 = vadd.f32 %v8455_v47, %v4468_v53  ;;  %v4413_v23 = vadd.f32 %v6633_v10, %v8174_v59 }
 0x2ae   : > { %v4466_v13 = vmax.f32 %v4072_v49, %v4410_v25  ;;  %v3876_v55 = vpop.f32.mrf.mxu0  ;;  %v4214_v51 = vpop.f32.mrf.mxu1  ;;  %v4809_v52 = vsel %vm8488_vm3, %v4584_v29, 0.0  ;;  %vm4755_vm6 = vcmp.lt.s32.totalorder %v4699_v43, 14  ;;  %v4647_v25 = vadd.s32 104, %v8445_v62 }
 0x2af   : > { %v4073_v40 = vadd.f32 %v3876_v55, %v8177_v48  ;;  %v4807_v60 = vsel %vm4751_vm4, %v4582_v3, 0.0  ;;  %v4411_v56 = vadd.f32 %v4214_v51, %v8180_v26  ;;  %v4469_v58 = vmax.f32 %v4075_v46, %v4413_v23 }
 0x2b0   : > { %v4529_v33 = vadd.f32 %v8455_v47, %v4466_v13  ;;  %v6574_v24 = vpop.f32.mrf.mxu0  ;;  %v4871_v32 = vmax.f32 %v4807_v60, %v4809_v52  ;;  %v6636_v57 = vpop.f32.mrf.mxu1  ;;  %v4587_v30 = vmax.f32 %v4531_v2, 0.0  ;;  %v4705_v45 = vand.u32 15, %v4649_v42 }
 0x2b1   : > { %v4078_v59 = vadd.f32 %v6574_v24, %v8184_v19  ;;  %v4467_v48 = vmax.f32 %v4073_v40, %v4411_v56  ;;  %v4416_v34 = vadd.f32 %v6636_v57, %v8188_v39  ;;  %v4532_v9 = vadd.f32 %v8455_v47, %v4469_v58 }
 0x2b2   : > { %v4585_v17 = vmax.f32 %v4529_v33, 0.0  ;;  %v3889_v0 = vpop.f32.mrf.mxu0  ;;  %v5673_v20 = vpack.c.bf16 %v4871_v32, %v4870_v15  ;;  %v4227_v26 = vpop.f32.mrf.mxu1  ;;  %v4653_v2 = vadd.s32 152, %v8445_v62  ;;  %v4703_v60 = vand.u32 15, %v4647_v25  ;;  %v9125_v25 = vld [vmem:[#allocation34_spill] sm:$0xff] }
 0x2b3   : > { %v4076_v27 = vadd.f32 %v3889_v0, %v8191_v44  ;;  %v4530_v49 = vadd.f32 %v8455_v47, %v4467_v48  ;;  %v4472_v19 = vmax.f32 %v4078_v59, %v4416_v34  ;;  %v4414_v54 = vadd.f32 %v4227_v26, %v8194_v41 }
 0x2b4   : > { %v4883_v6 = vmax.f32 %v4585_v17, %v4587_v30  ;;  %v6575_v29 = vpop.f32.mrf.mxu0  ;;  %5735 = vst [vmem:[%s8503_s6 + $0x8] sm:$0xff] %v5673_v20   ;;  %v4588_v37 = vmax.f32 %v4532_v9, 0.0  ;;  %v6637_v53 = vpop.f32.mrf.mxu1  ;;  %v4651_v30 = vadd.s32 136, %v8445_v62  ;;  %v4709_v34 = vand.u32 15, %v4653_v2 }
 0x2b5   : > { %v4079_v39 = vadd.f32 %v6575_v29, %v8197_v8  ;;  %v4586_v5 = vmax.f32 %v4530_v49, 0.0  ;;  %v4535_v44 = vadd.f32 %v8455_v47, %v4472_v19  ;;  %v4470_v15 = vmax.f32 %v4076_v27, %v4414_v54  ;;  %v9108_v19 = vld [vmem:[#allocation61_spill] sm:$0xff] }
 0x2b6   : > { %v4417_v46 = vadd.f32 %v6637_v53, %v8200_v35  ;;  %v3892_v10 = vpop.f32.mrf.mxu0  ;;  %v4230_v41 = vpop.f32.mrf.mxu1  ;;  %v4813_v13 = vsel %vm8515_vm5, %v4588_v37, 0.0  ;;  %vm8549_vm7 = vcmp.lt.s32.totalorder %v4705_v45, 14  ;;  %vm8555_vm8 = vcmp.lt.s32.totalorder %v4703_v60, 14  ;;  %v9112_v45 = vld [vmem:[#allocation31_spill] sm:$0xff]  ;;  %v9116_v60 = vld [vmem:[#allocation33_spill] sm:$0xff] }
 0x2b7   : > { %v4077_v3 = vadd.f32 %v3892_v10, %v8203_v21  ;;  %v4811_v8 = vsel %vm4755_vm6, %v4586_v5, 0.0  ;;  %v4533_v55 = vadd.f32 %v8455_v47, %v4470_v15  ;;  %v4415_v52 = vadd.f32 %v4230_v41, %v8206_v61  ;;  %v9111_v5 = vld [vmem:[#allocation30_spill] sm:$0xff] }
 0x2b8   : > { %v4473_v23 = vmax.f32 %v4079_v39, %v4417_v46  ;;  %v6578_v40 = vpop.f32.mrf.mxu0  ;;  %v4884_v51 = vmax.f32 %v4811_v8, %v4813_v13  ;;  %v6640_v33 = vpop.f32.mrf.mxu1  ;;  %v4591_v21 = vmax.f32 %v4535_v44, 0.0  ;;  %v4707_v37 = vand.u32 15, %v4651_v30  ;;  %v9118_v30 = vld [vmem:[#allocation63_spill] sm:$0xff] }
 0x2b9   : > { %v4082_v35 = vadd.f32 %v6578_v40, %v8209_v22  ;;  %v4589_v56 = vmax.f32 %v4533_v55, 0.0  ;;  %v4420_v63 = vadd.f32 %v6640_v33, %v8212_v14  ;;  %v4471_v43 = vmax.f32 %v4077_v3, %v4415_v52 }
 0x2ba   : > { %v4536_v24 = vadd.f32 %v8455_v47, %v4473_v23  ;;  %v3905_v32 = vpop.f32.mrf.mxu0  ;;  %v5678_v58 = vpack.c.bf16 %v4884_v51, %v4883_v6  ;;  %v4243_v57 = vpop.f32.mrf.mxu1  ;;  %v4657_v39 = vadd.s32 184, %v8445_v62  ;;  %vm8564_vm9 = vcmp.lt.s32.totalorder %v4709_v34, 14  ;;  %v9115_v51 = vld [vmem:[#allocation32_spill] sm:$0xff] }
 0x2bb   : > { %v4080_v59 = vadd.f32 %v3905_v32, %v8215_v1  ;;  %v4896_v61 = vmax.f32 %v4589_v56, %v4591_v21  ;;  %v4476_v17 = vmax.f32 %v4082_v35, %v4420_v63  ;;  %v4418_v22 = vadd.f32 %v4243_v57, %v8218_v7 }
 0x2bc   : > { %v6579_v48 = vpop.f32.mrf.mxu0  ;;  %5736 = vst [vmem:[%s8503_s6 + $0x10] sm:$0xff] %v5678_v58   ;;  %v4592_v0 = vmax.f32 %v4536_v24, 0.0  ;;  %v4534_v14 = vadd.f32 %v8455_v47, %v4471_v43  ;;  %v6641_v1 = vpop.f32.mrf.mxu1  ;;  %vm8575_vm10 = vcmp.lt.s32.totalorder %v4707_v37, 14  ;;  %v4713_v21 = vand.u32 15, %v4657_v39 }
 0x2bd   : > { %v4083_v9 = vadd.f32 %v6579_v48, %v8221_v4  ;;  %v4539_v26 = vadd.f32 %v8455_v47, %v4476_v17  ;;  %v4474_v7 = vmax.f32 %v4080_v59, %v4418_v22  ;;  %v4421_v42 = vadd.f32 %v6641_v1, %v8224_v31  ;;  %v9117_v59 = vld [vmem:[#allocation62_spill] sm:$0xff] }
 0x2be   : > { %v3908_v6 = vpop.f32.mrf.mxu0  ;;  %v4590_v49 = vmax.f32 %v4534_v14, 0.0  ;;  %v4246_v29 = vpop.f32.mrf.mxu1  ;;  %v4817_v31 = vsel %vm8549_vm7, %v4592_v0, 0.0  ;;  %v4655_v48 = vadd.s32 168, %v8445_v62  ;;  %v9119_v0 = vld [vmem:[#allocation64_spill] sm:$0xff]  ;;  %vm8589_vm11 = vcmp.lt.s32.totalorder %v4713_v21, 14 }
 0x2bf   : > { %v4081_v54 = vadd.f32 %v3908_v6, %v9108_v19  ;;  %v4537_v4 = vadd.f32 %v8455_v47, %v4474_v7  ;;  %v4477_v53 = vmax.f32 %v4083_v9, %v4421_v42  ;;  %v4419_v44 = vadd.f32 %v4246_v29, %v9111_v5  ;;  %v9124_v5 = vld [vmem:[#allocation2_spill] sm:$0xff] }
 0x2c0   : > { %v6582_v15 = vpop.f32.mrf.mxu0  ;;  %v4815_v46 = vsel %vm8555_vm8, %v4590_v49, 0.0  ;;  %v4595_v10 = vmax.f32 %v4539_v26, 0.0  ;;  %v6644_v41 = vpop.f32.mrf.mxu1  ;;  %v9122_v26 = vld [vmem:[#allocation65_spill] sm:$0xff] }
 0x2c1   : > { %v4086_v3 = vadd.f32 %v6582_v15, %v9112_v45  ;;  %v4897_v2 = vmax.f32 %v4815_v46, %v4817_v31  ;;  %v4593_v13 = vmax.f32 %v4537_v4, 0.0  ;;  %v4540_v8 = vadd.f32 %v8455_v47, %v4477_v53 }
 0x2c2   : > { %v4475_v55 = vmax.f32 %v4081_v54, %v4419_v44  ;;  %v3921_v23 = vpop.f32.mrf.mxu0  ;;  %v4424_v52 = vadd.f32 %v6644_v41, %v9115_v51  ;;  %v4259_v33 = vpop.f32.mrf.mxu1  ;;  %v9123_v54 = vld [vmem:[#allocation66_spill] sm:$0xff]  ;;  %v4711_v53 = vand.u32 15, %v4655_v48  ;;  %v9132_v48 = vld [vmem:[#allocation5_spill] sm:$0xff] }
 0x2c3   : > { %v4084_v35 = vadd.f32 %v3921_v23, %v9116_v60  ;;  %v5683_v56 = vpack.c.bf16 %v4897_v2, %v4896_v61  ;;  %v4909_v24 = vmax.f32 %v4593_v13, %v4595_v10  ;;  %v4596_v63 = vmax.f32 %v4540_v8, 0.0  ;;  %v9126_v8 = vld [vmem:[#allocation3_spill] sm:$0xff] }
 0x2c4   : > { %v4538_v32 = vadd.f32 %v8455_v47, %v4475_v55  ;;  %v6583_v58 = vpop.f32.mrf.mxu0  ;;  %v4480_v43 = vmax.f32 %v4086_v3, %v4424_v52  ;;  %v4422_v57 = vadd.f32 %v4259_v33, %v9117_v59  ;;  %v6645_v22 = vpop.f32.mrf.mxu1  ;;  %v4661_v61 = vadd.s32 216, %v8445_v62  ;;  %v9127_v60 = vld [vmem:[#allocation35_spill] sm:$0xff] }
 0x2c5   : > { %v4087_v17 = vadd.f32 %v6583_v58, %v9118_v30  ;;  %5737 = vst [vmem:[%s8503_s6 + $0x18] sm:$0xff] %v5683_v56   ;;  %v4425_v20 = vadd.f32 %v6645_v22, %v9119_v0  ;;  %v4821_v6 = vsel %vm8564_vm9, %v4596_v63, 0.0  ;;  %vm4767_vm12 = vcmp.lt.s32.totalorder %v4711_v53, 14  ;;  %v9128_v56 = vld [vmem:[#allocation4_spill] sm:$0xff] }
 0x2c6   : > { %v4594_v34 = vmax.f32 %v4538_v32, 0.0  ;;  %v3924_v14 = vpop.f32.mrf.mxu0  ;;  %v4543_v9 = vadd.f32 %v8455_v47, %v4480_v43  ;;  %v4478_v1 = vmax.f32 %v4084_v35, %v4422_v57  ;;  %v4262_v42 = vpop.f32.mrf.mxu1  ;;  %v4717_v3 = vand.u32 15, %v4661_v61  ;;  %v9129_v30 = vld [vmem:[#allocation36_spill] sm:$0xff] }
 0x2c7   : > { %v4085_v7 = vadd.f32 %v3924_v14, %v9122_v26  ;;  %v4481_v19 = vmax.f32 %v4087_v17, %v4425_v20  ;;  %v4423_v29 = vadd.f32 %v4262_v42, %v9123_v54 }
 0x2c8   : > { %v4819_v49 = vsel %vm8575_vm10, %v4594_v34, 0.0  ;;  %v6586_v37 = vpop.f32.mrf.mxu0  ;;  %v4541_v4 = vadd.f32 %v8455_v47, %v4478_v1  ;;  %v6648_v15 = vpop.f32.mrf.mxu1  ;;  %v4599_v2 = vmax.f32 %v4543_v9, 0.0  ;;  %vm8611_vm13 = vcmp.lt.s32.totalorder %v4717_v3, 14  ;;  %v9133_v9 = vld [vmem:[#allocation37_spill] sm:$0xff] }
 0x2c9   : > { %v4910_v39 = vmax.f32 %v4819_v49, %v4821_v6  ;;  %v4090_v44 = vadd.f32 %v6586_v37, %v9124_v5  ;;  %v4544_v31 = vadd.f32 %v8455_v47, %v4481_v19  ;;  %v4479_v46 = vmax.f32 %v4085_v7, %v4423_v29  ;;  %v9134_v49 = vld [vmem:[#allocation6_spill] sm:$0xff] }
 0x2ca   : > { %v4428_v10 = vadd.f32 %v6648_v15, %v9125_v25  ;;  %v3937_v45 = vpop.f32.mrf.mxu0  ;;  %v4597_v13 = vmax.f32 %v4541_v4, 0.0  ;;  %v4275_v23 = vpop.f32.mrf.mxu1  ;;  %v9135_v4 = vld [vmem:[#allocation38_spill] sm:$0xff]  ;;  %v9136_v15 = vld [vmem:[#allocation7_spill] sm:$0xff]  ;;  %v4665_v25 = vadd.s32 248, %v8445_v62 }
 0x2cb   : > { %v5688_v41 = vpack.c.bf16 %v4910_v39, %v4909_v24  ;;  %v4088_v55 = vadd.f32 %v3937_v45, %v9126_v8  ;;  %v4600_v40 = vmax.f32 %v4544_v31, 0.0  ;;  %v4542_v51 = vadd.f32 %v8455_v47, %v4479_v46 }
 0x2cc   : > { %v4484_v52 = vmax.f32 %v4090_v44, %v4428_v10  ;;  %v4426_v35 = vadd.f32 %v4275_v23, %v9127_v60  ;;  %v6587_v33 = vpop.f32.mrf.mxu0  ;;  %v4922_v21 = vmax.f32 %v4597_v13, %v4599_v2  ;;  %v6649_v32 = vpop.f32.mrf.mxu1  ;;  %v4659_v24 = vadd.s32 200, %v8445_v62 }
 0x2cd   : > { %5738 = vst [vmem:[%s8503_s6 + $0x20] sm:$0xff] %v5688_v41   ;;  %v4091_v63 = vadd.f32 %v6587_v33, %v9128_v56  ;;  %v4598_v58 = vmax.f32 %v4542_v51, 0.0  ;;  %v4429_v17 = vadd.f32 %v6649_v32, %v9129_v30  ;;  %v4825_v20 = vsel %vm8589_vm11, %v4600_v40, 0.0  ;;  %v9137_v41 = vld [vmem:[#allocation39_spill] sm:$0xff]  ;;  %v9139_v33 = vld [vmem:[#allocation40_spill] sm:$0xff]  ;;  %v9140_v32 = vld [vmem:[#allocation9_spill] sm:$0xff] }
 0x2ce   : > { %v4547_v43 = vadd.f32 %v8455_v47, %v4484_v52  ;;  %v4482_v59 = vmax.f32 %v4088_v55, %v4426_v35  ;;  %v3940_v57 = vpop.f32.mrf.mxu0  ;;  %v4278_v0 = vpop.f32.mrf.mxu1  ;;  %v4715_v6 = vand.u32 15, %v4659_v24  ;;  %v9138_v55 = vld [vmem:[#allocation8_spill] sm:$0xff]  ;;  %v4663_v51 = vadd.s32 232, %v8445_v62 }
 0x2cf   : > { %v4089_v34 = vadd.f32 %v3940_v57, %v9132_v48  ;;  %v4823_v14 = vsel %vm4767_vm12, %v4598_v58, 0.0  ;;  %v4427_v1 = vadd.f32 %v4278_v0, %v9133_v9  ;;  %v4485_v42 = vmax.f32 %v4091_v63, %v4429_v17  ;;  %v9141_v0 = vld [vmem:[#allocation41_spill] sm:$0xff] }
 0x2d0   : > { %v4545_v61 = vadd.f32 %v8455_v47, %v4482_v59  ;;  %v6590_v26 = vpop.f32.mrf.mxu0  ;;  %v4923_v7 = vmax.f32 %v4823_v14, %v4825_v20  ;;  %v6652_v54 = vpop.f32.mrf.mxu1  ;;  %v4603_v29 = vmax.f32 %v4547_v43, 0.0  ;;  %vm4771_vm14 = vcmp.lt.s32.totalorder %v4715_v6, 14  ;;  %v9143_v6 = vld [vmem:[#allocation42_spill] sm:$0xff] }
 0x2d1   : > { %v4094_v19 = vadd.f32 %v6590_v26, %v9134_v49  ;;  %v4483_v39 = vmax.f32 %v4089_v34, %v4427_v1  ;;  %v4432_v53 = vadd.f32 %v6652_v54, %v9135_v4  ;;  %v4548_v44 = vadd.f32 %v8455_v47, %v4485_v42 }
 0x2d2   : > { %v4601_v37 = vmax.f32 %v4545_v61, 0.0  ;;  %v3953_v27 = vpop.f32.mrf.mxu0  ;;  %v5693_v5 = vpack.c.bf16 %v4923_v7, %v4922_v21  ;;  %v4291_v46 = vpop.f32.mrf.mxu1  ;;  %v4721_v63 = vand.u32 15, %v4665_v25  ;;  %v4669_v43 = vadd.s32 280, %v8445_v62  ;;  %v9142_v61 = vld [vmem:[#allocation10_spill] sm:$0xff] }
 0x2d3   : > { %v4092_v31 = vadd.f32 %v3953_v27, %v9136_v15  ;;  %v4546_v45 = vadd.f32 %v8455_v47, %v4483_v39  ;;  %v4488_v3 = vmax.f32 %v4094_v19, %v4432_v53  ;;  %v4430_v2 = vadd.f32 %v4291_v46, %v9137_v41 }
 0x2d4   : > { %v4935_v10 = vmax.f32 %v4601_v37, %v4603_v29  ;;  %v6591_v13 = vpop.f32.mrf.mxu0  ;;  %5739 = vst [vmem:[%s8503_s6 + $0x28] sm:$0xff] %v5693_v5   ;;  %v4604_v8 = vmax.f32 %v4548_v44, 0.0  ;;  %v6653_v40 = vpop.f32.mrf.mxu1  ;;  %v4719_v14 = vand.u32 15, %v4663_v51  ;;  %v9144_v29 = vld [vmem:[#allocation11_spill] sm:$0xff]  ;;  %v4667_v4 = vadd.s32 264, %v8445_v62 }
 0x2d5   : > { %v4095_v23 = vadd.f32 %v6591_v13, %v9138_v55  ;;  %v4602_v52 = vmax.f32 %v4546_v45, 0.0  ;;  %v4551_v60 = vadd.f32 %v8455_v47, %v4488_v3  ;;  %v4486_v35 = vmax.f32 %v4092_v31, %v4430_v2  ;;  %v9145_v5 = vld [vmem:[#allocation43_spill] sm:$0xff]  ;;  %v9148_v45 = vld [vmem:[#allocation12_spill] sm:$0xff] }
 0x2d6   : > { %v4433_v21 = vadd.f32 %v6653_v40, %v9139_v33  ;;  %v3956_v56 = vpop.f32.mrf.mxu0  ;;  %v4294_v58 = vpop.f32.mrf.mxu1  ;;  %v4829_v59 = vsel %vm8611_vm13, %v4604_v8, 0.0  ;;  %v4725_v31 = vand.u32 15, %v4669_v43  ;;  %vm8645_vm15 = vcmp.lt.s32.totalorder %v4721_v63, 14  ;;  %v9151_v55 = vld [vmem:[#allocation44_spill] sm:$0xff] }
 0x2d7   : > { %v4093_v24 = vadd.f32 %v3956_v56, %v9140_v32  ;;  %v4827_v57 = vsel %vm4771_vm14, %v4602_v52, 0.0  ;;  %v4549_v30 = vadd.f32 %v8455_v47, %v4486_v35  ;;  %v4431_v20 = vadd.f32 %v4294_v58, %v9141_v0  ;;  %v9152_v52 = vld [vmem:[#allocation13_spill] sm:$0xff]  ;;  %v9169_v32 = vld [vmem:[#allocation50_spill] sm:$0xff] }
 0x2d8   : > { %v4489_v17 = vmax.f32 %v4095_v23, %v4433_v21  ;;  %v6594_v48 = vpop.f32.mrf.mxu0  ;;  %v4936_v34 = vmax.f32 %v4827_v57, %v4829_v59  ;;  %v6656_v1 = vpop.f32.mrf.mxu1  ;;  %v4607_v26 = vmax.f32 %v4551_v60, 0.0  ;;  %vm8651_vm0 = vcmp.lt.s32.totalorder %v4719_v14, 14 }
 0x2d9   : > { %v4098_v9 = vadd.f32 %v6594_v48, %v9142_v61  ;;  %v4605_v7 = vmax.f32 %v4549_v30, 0.0  ;;  %v4436_v22 = vadd.f32 %v6656_v1, %v9143_v6  ;;  %v4487_v54 = vmax.f32 %v4093_v24, %v4431_v20  ;;  %v9155_v24 = vld [vmem:[#allocation45_spill] sm:$0xff] }
 0x2da   : > { %v4552_v42 = vadd.f32 %v8455_v47, %v4489_v17  ;;  %v3969_v49 = vpop.f32.mrf.mxu0  ;;  %v5698_v19 = vpack.c.bf16 %v4936_v34, %v4935_v10  ;;  %v4307_v39 = vpop.f32.mrf.mxu1  ;;  %v4723_v33 = vand.u32 15, %v4667_v4  ;;  %v4673_v21 = vadd.s32 312, %v8445_v62  ;;  %v9156_v17 = vld [vmem:[#allocation14_spill] sm:$0xff] }
 0x2db   : > { %v4096_v37 = vadd.f32 %v3969_v49, %v9144_v29  ;;  %v4948_v53 = vmax.f32 %v4605_v7, %v4607_v26  ;;  %v4492_v27 = vmax.f32 %v4098_v9, %v4436_v22  ;;  %v4434_v44 = vadd.f32 %v4307_v39, %v9145_v5  ;;  %v9159_v26 = vld [vmem:[#allocation46_spill] sm:$0xff] }
 0x2dc   : > { %v6595_v15 = vpop.f32.mrf.mxu0  ;;  %5740 = vst [vmem:[%s8503_s6 + $0x30] sm:$0xff] %v5698_v19   ;;  %v4608_v46 = vmax.f32 %v4552_v42, 0.0  ;;  %v4550_v10 = vadd.f32 %v8455_v47, %v4487_v54  ;;  %v6657_v41 = vpop.f32.mrf.mxu1  ;;  %vm8660_vm1 = vcmp.lt.s32.totalorder %v4725_v31, 14  ;;  %vm8671_vm2 = vcmp.lt.s32.totalorder %v4723_v33, 14  ;;  %v9160_v42 = vld [vmem:[#allocation15_spill] sm:$0xff] }
 0x2dd   : > { %v4099_v3 = vadd.f32 %v6595_v15, %v9148_v45  ;;  %v4555_v13 = vadd.f32 %v8455_v47, %v4492_v27  ;;  %v4490_v8 = vmax.f32 %v4096_v37, %v4434_v44  ;;  %v4437_v23 = vadd.f32 %v6657_v41, %v9151_v55  ;;  %v9161_v27 = vld [vmem:[#allocation47_spill] sm:$0xff]  ;;  %v9162_v44 = vld [vmem:[#allocation16_spill] sm:$0xff] }
 0x2de   : > { %v3972_v40 = vpop.f32.mrf.mxu0  ;;  %v4606_v51 = vmax.f32 %v4550_v10, 0.0  ;;  %v4310_v35 = vpop.f32.mrf.mxu1  ;;  %v4833_v59 = vsel %vm8645_vm15, %v4608_v46, 0.0  ;;  %v4729_v49 = vand.u32 15, %v4673_v21  ;;  %v4671_v46 = vadd.s32 296, %v8445_v62  ;;  %v9163_v10 = vld [vmem:[#allocation48_spill] sm:$0xff] }
 0x2df   : > { %v4097_v60 = vadd.f32 %v3972_v40, %v9152_v52  ;;  %v4553_v56 = vadd.f32 %v8455_v47, %v4490_v8  ;;  %v4493_v63 = vmax.f32 %v4099_v3, %v4437_v23  ;;  %v4435_v58 = vadd.f32 %v4310_v35, %v9155_v24  ;;  %v9166_v8 = vld [vmem:[#allocation17_spill] sm:$0xff]  ;;  %v9168_v24 = vld [vmem:[#allocation18_spill] sm:$0xff] }
 0x2e0   : > { %v6598_v43 = vpop.f32.mrf.mxu0  ;;  %v4831_v57 = vsel %vm8651_vm0, %v4606_v51, 0.0  ;;  %v4611_v30 = vmax.f32 %v4555_v13, 0.0  ;;  %v6660_v34 = vpop.f32.mrf.mxu1  ;;  %vm8685_vm3 = vcmp.lt.s32.totalorder %v4729_v49, 14 }
 0x2e1   : > { %v4102_v48 = vadd.f32 %v6598_v43, %v9156_v17  ;;  %v4949_v0 = vmax.f32 %v4831_v57, %v4833_v59  ;;  %v4609_v20 = vmax.f32 %v4553_v56, 0.0  ;;  %v4556_v14 = vadd.f32 %v8455_v47, %v4493_v63 }
 0x2e2   : > { %v4491_v61 = vmax.f32 %v4097_v60, %v4435_v58  ;;  %v3985_v9 = vpop.f32.mrf.mxu0  ;;  %v4440_v7 = vadd.f32 %v6660_v34, %v9159_v26  ;;  %v4323_v22 = vpop.f32.mrf.mxu1  ;;  %v9167_v60 = vld [vmem:[#allocation49_spill] sm:$0xff]  ;;  %v4727_v63 = vand.u32 15, %v4671_v46 }
 0x2e3   : > { %v4100_v6 = vadd.f32 %v3985_v9, %v9160_v42  ;;  %v5703_v19 = vpack.c.bf16 %v4949_v0, %v4948_v53  ;;  %v4961_v54 = vmax.f32 %v4609_v20, %v4611_v30  ;;  %v4612_v29 = vmax.f32 %v4556_v14, 0.0  ;;  %v9170_v14 = vld [vmem:[#allocation19_spill] sm:$0xff]  ;;  %v9176_v46 = vld [vmem:[#allocation21_spill] sm:$0xff] }
 0x2e4   : > { %v4554_v37 = vadd.f32 %v8455_v47, %v4491_v61  ;;  %v6599_v39 = vpop.f32.mrf.mxu0  ;;  %v4496_v4 = vmax.f32 %v4102_v48, %v4440_v7  ;;  %v4438_v5 = vadd.f32 %v4323_v22, %v9161_v27  ;;  %v6661_v31 = vpop.f32.mrf.mxu1  ;;  %v4677_v53 = vadd.s32 344, %v8445_v62  ;;  %v9171_v42 = vld [vmem:[#allocation51_spill] sm:$0xff] }
 0x2e5   : > { %v4103_v15 = vadd.f32 %v6599_v39, %v9162_v44  ;;  %5741 = vst [vmem:[%s8503_s6 + $0x38] sm:$0xff] %v5703_v19   ;;  %v4441_v45 = vadd.f32 %v6661_v31, %v9163_v10  ;;  %v4837_v40 = vsel %vm8660_vm1, %v4612_v29, 0.0  ;;  %vm4783_vm4 = vcmp.lt.s32.totalorder %v4727_v63, 14  ;;  %v9172_v19 = vld [vmem:[#allocation20_spill] sm:$0xff] }
 0x2e6   : > { %v4610_v25 = vmax.f32 %v4554_v37, 0.0  ;;  %v3988_v3 = vpop.f32.mrf.mxu0  ;;  %v4559_v41 = vadd.f32 %v8455_v47, %v4496_v4  ;;  %v4494_v2 = vmax.f32 %v4100_v6, %v4438_v5  ;;  %v4326_v23 = vpop.f32.mrf.mxu1  ;;  %v4733_v48 = vand.u32 15, %v4677_v53  ;;  %v9173_v44 = vld [vmem:[#allocation52_spill] sm:$0xff] }
 0x2e7   : > { %v4101_v55 = vadd.f32 %v3988_v3, %v9166_v8  ;;  %v4497_v52 = vmax.f32 %v4103_v15, %v4441_v45  ;;  %v4439_v35 = vadd.f32 %v4326_v23, %v9167_v60 }
 0x2e8   : > { %v4835_v51 = vsel %vm8671_vm2, %v4610_v25, 0.0  ;;  %v6602_v33 = vpop.f32.mrf.mxu0  ;;  %v4557_v56 = vadd.f32 %v8455_v47, %v4494_v2  ;;  %v6664_v43 = vpop.f32.mrf.mxu1  ;;  %v4615_v0 = vmax.f32 %v4559_v41, 0.0  ;;  %vm8707_vm5 = vcmp.lt.s32.totalorder %v4733_v48, 14  ;;  %v9177_v41 = vld [vmem:[#allocation53_spill] sm:$0xff] }
 0x2e9   : > { %v4962_v21 = vmax.f32 %v4835_v51, %v4837_v40  ;;  %v4106_v58 = vadd.f32 %v6602_v33, %v9168_v24  ;;  %v4560_v59 = vadd.f32 %v8455_v47, %v4497_v52  ;;  %v4495_v57 = vmax.f32 %v4101_v55, %v4439_v35  ;;  %v9178_v51 = vld [vmem:[#allocation22_spill] sm:$0xff] }
 0x2ea   : > { %v4444_v30 = vadd.f32 %v6664_v43, %v9169_v32  ;;  %v4001_v17 = vpop.f32.mrf.mxu0  ;;  %v4613_v20 = vmax.f32 %v4557_v56, 0.0  ;;  %v4339_v9 = vpop.f32.mrf.mxu1  ;;  %v9179_v56 = vld [vmem:[#allocation54_spill] sm:$0xff]  ;;  %v9180_v43 = vld [vmem:[#allocation23_spill] sm:$0xff]  ;;  %v4681_v32 = vadd.s32 376, %v8445_v62 }
 0x2eb   : > { %v5708_v34 = vpack.c.bf16 %v4962_v21, %v4961_v54  ;;  %v4104_v61 = vadd.f32 %v4001_v17, %v9170_v14  ;;  %v4616_v1 = vmax.f32 %v4560_v59, 0.0  ;;  %v4558_v26 = vadd.f32 %v8455_v47, %v4495_v57 }
 0x2ec   : > { %v4500_v7 = vmax.f32 %v4106_v58, %v4444_v30  ;;  %v4442_v6 = vadd.f32 %v4339_v9, %v9171_v42  ;;  %v6603_v22 = vpop.f32.mrf.mxu0  ;;  %v4974_v49 = vmax.f32 %v4613_v20, %v4615_v0  ;;  %v6665_v37 = vpop.f32.mrf.mxu1  ;;  %v4675_v54 = vadd.s32 328, %v8445_v62 }
 0x2ed   : > { %5742 = vst [vmem:[%s8503_s6 + $0x40] sm:$0xff] %v5708_v34   ;;  %v4107_v29 = vadd.f32 %v6603_v22, %v9172_v19  ;;  %v4614_v39 = vmax.f32 %v4558_v26, 0.0  ;;  %v4445_v15 = vadd.f32 %v6665_v37, %v9173_v44  ;;  %v4841_v45 = vsel %vm8685_vm3, %v4616_v1, 0.0  ;;  %v9181_v34 = vld [vmem:[#allocation55_spill] sm:$0xff] }
 0x2ee   : > { %v4563_v4 = vadd.f32 %v8455_v47, %v4500_v7  ;;  %v4498_v27 = vmax.f32 %v4104_v61, %v4442_v6  ;;  %v4004_v5 = vpop.f32.mrf.mxu0  ;;  %v4342_v10 = vpop.f32.mrf.mxu1  ;;  %v4731_v40 = vand.u32 15, %v4675_v54  ;;  %v9182_v61 = vld [vmem:[#allocation24_spill] sm:$0xff]  ;;  %v4679_v26 = vadd.s32 360, %v8445_v62 }
 0x2ef   : > { %v4105_v25 = vadd.f32 %v4004_v5, %v9176_v46  ;;  %v4839_v3 = vsel %vm4783_vm4, %v4614_v39, 0.0  ;;  %v4443_v2 = vadd.f32 %v4342_v10, %v9177_v41  ;;  %v4501_v23 = vmax.f32 %v4107_v29, %v4445_v15  ;;  %v9184_v41 = vld [vmem:[#allocation25_spill] sm:$0xff] }
 0x2f0   : > { %v4561_v53 = vadd.f32 %v8455_v47, %v4498_v27  ;;  %v6606_v8 = vpop.f32.mrf.mxu0  ;;  %v4975_v55 = vmax.f32 %v4839_v3, %v4841_v45  ;;  %v6668_v60 = vpop.f32.mrf.mxu1  ;;  %v4619_v35 = vmax.f32 %v4563_v4, 0.0  ;;  %vm4787_vm6 = vcmp.lt.s32.totalorder %v4731_v40, 14 }
 0x2f1   : > { %v4110_v52 = vadd.f32 %v6606_v8, %v9178_v51  ;;  %v4499_v21 = vmax.f32 %v4105_v25, %v4443_v2  ;;  %v4448_v63 = vadd.f32 %v6668_v60, %v9179_v56  ;;  %v4564_v58 = vadd.f32 %v8455_v47, %v4501_v23  ;;  %v9185_v23 = vld [vmem:[#allocation57_spill] sm:$0xff] }
 0x2f2   : > { %v4617_v33 = vmax.f32 %v4561_v53, 0.0  ;;  %v4017_v13 = vpop.f32.mrf.mxu0  ;;  %v5713_v24 = vpack.c.bf16 %v4975_v55, %v4974_v49  ;;  %v4355_v57 = vpop.f32.mrf.mxu1  ;;  %v4737_v19 = vand.u32 15, %v4681_v32  ;;  %v4685_v54 = vadd.s32 408, %v8445_v62  ;;  %v9189_v32 = vld [vmem:[#allocation58_spill] sm:$0xff] }
 0x2f3   : > { %v4108_v59 = vadd.f32 %v4017_v13, %v9180_v43  ;;  %v4562_v17 = vadd.f32 %v8455_v47, %v4499_v21  ;;  %v4504_v48 = vmax.f32 %v4110_v52, %v4448_v63  ;;  %v4446_v0 = vadd.f32 %v4355_v57, %v9181_v34 }
 0x2f4   : > { %v4987_v30 = vmax.f32 %v4617_v33, %v4619_v35  ;;  %v6607_v20 = vpop.f32.mrf.mxu0  ;;  %5743 = vst [vmem:[%s8503_s6 + $0x48] sm:$0xff] %v5713_v24   ;;  %v4620_v14 = vmax.f32 %v4564_v58, 0.0  ;;  %v6669_v1 = vpop.f32.mrf.mxu1  ;;  %v4735_v25 = vand.u32 15, %v4679_v26  ;;  %v4683_v52 = vadd.s32 392, %v8445_v62  ;;  %v9186_v35 = vld [vmem:[#allocation26_spill] sm:$0xff] }
 0x2f5   : > { %v4111_v9 = vadd.f32 %v6607_v20, %v9182_v61  ;;  %v4618_v7 = vmax.f32 %v4562_v17, 0.0  ;;  %v4567_v42 = vadd.f32 %v8455_v47, %v4504_v48  ;;  %v4502_v6 = vmax.f32 %v4108_v59, %v4446_v0 }
 0x2f6   : > { %v4449_v22 = vadd.f32 %v6669_v1, %v8392_v36  ;;  %v4020_v49 = vpop.f32.mrf.mxu0  ;;  %v4358_v37 = vpop.f32.mrf.mxu1  ;;  %v4845_v39 = vsel %vm8707_vm5, %v4620_v14, 0.0  ;;  %v9183_v36 = vld [vmem:[#allocation56_spill] sm:$0xff]  ;;  %v4741_v56 = vand.u32 15, %v4685_v54  ;;  %vm8741_vm7 = vcmp.lt.s32.totalorder %v4737_v19, 14 }
 0x2f7   : > { %v4109_v29 = vadd.f32 %v4020_v49, %v8395_v12  ;;  %v4843_v4 = vsel %vm4787_vm6, %v4618_v7, 0.0  ;;  %v4565_v27 = vadd.f32 %v8455_v47, %v4502_v6  ;;  %v4447_v46 = vadd.f32 %v4358_v37, %v8398_v38 }
 0x2f8   : > { %v4505_v5 = vmax.f32 %v4111_v9, %v4449_v22  ;;  %v6610_v44 = vpop.f32.mrf.mxu0  ;;  %v4988_v15 = vmax.f32 %v4843_v4, %v4845_v39  ;;  %v6672_v45 = vpop.f32.mrf.mxu1  ;;  %v4623_v12 = vmax.f32 %v4567_v42, 0.0  ;;  %vm4791_vm8 = vcmp.lt.s32.totalorder %v4735_v25, 14  ;;  %v9194_v39 = vld [vmem:[#allocation27_spill] sm:$0xff] }
 0x2f9   : > { %v4114_v10 = vadd.f32 %v6610_v44, %v9183_v36  ;;  %v4621_v3 = vmax.f32 %v4565_v27, 0.0  ;;  %v4452_v31 = vadd.f32 %v6672_v45, %v9184_v41  ;;  %v4503_v55 = vmax.f32 %v4109_v29, %v4447_v46 }
 0x2fa   : > { %v4568_v53 = vadd.f32 %v8455_v47, %v4505_v5  ;;  %v4033_v2 = vpop.f32.mrf.mxu0  ;;  %v5718_v8 = vpack.c.bf16 %v4988_v15, %v4987_v30  ;;  %v4371_v51 = vpop.f32.mrf.mxu1  ;;  %v4739_v20 = vand.u32 15, %v4683_v52  ;;  %vm8751_vm9 = vcmp.lt.s32.totalorder %v4741_v56, 14 }
 0x2fb   : > { %v4112_v40 = vadd.f32 %v4033_v2, %v9185_v23  ;;  %v5000_v38 = vmax.f32 %v4621_v3, %v4623_v12  ;;  %v4508_v60 = vmax.f32 %v4114_v10, %v4452_v31  ;;  %v4450_v33 = vadd.f32 %v4371_v51, %v9186_v35  ;;  %v9195_v10 = vld [vmem:[#allocation59_spill] sm:$0xff]  ;;  %v9196_v12 = vld [vmem:[#allocation28_spill] sm:$0xff] }
 0x2fc   : > { %v6611_v21 = vpop.f32.mrf.mxu0  ;;  %5744 = vst [vmem:[%s8503_s6 + $0x50] sm:$0xff] %v5718_v8   ;;  %v4624_v63 = vmax.f32 %v4568_v53, 0.0  ;;  %v4566_v24 = vadd.f32 %v8455_v47, %v4503_v55  ;;  %v6673_v43 = vpop.f32.mrf.mxu1  ;;  %vm8760_vm10 = vcmp.lt.s32.totalorder %v4739_v20, 14  ;;  %v4689_v5 = vadd.s32 440, %v8445_v62  ;;  %v9197_v31 = vld [vmem:[#allocation60_spill] sm:$0xff] }
 0x2fd   : > { %v4115_v58 = vadd.f32 %v6611_v21, %v8413_v50  ;;  %v4571_v59 = vadd.f32 %v8455_v47, %v4508_v60  ;;  %v4506_v57 = vmax.f32 %v4112_v40, %v4450_v33  ;;  %v4453_v30 = vadd.f32 %v6673_v43, %v9189_v32  ;;  %v9198_v40 = vld [vmem:[#allocation29_spill] sm:$0xff]  ;;  %v9199_v33 = vld [vmem:[#allocation67_spill] sm:$0xff] }
 0x2fe   : > { %v4036_v17 = vpop.f32.mrf.mxu0  ;;  %v4622_v48 = vmax.f32 %v4566_v24, 0.0  ;;  %v4374_v0 = vpop.f32.mrf.mxu1  ;;  %v4849_v26 = vsel %vm8741_vm7, %v4624_v63, 0.0  ;;  %v4687_v53 = vadd.s32 424, %v8445_v62  ;;  %v4745_v63 = vand.u32 15, %v4689_v5 }
 0x2ff   : > { %v4113_v34 = vadd.f32 %v4036_v17, %v8419_v28  ;;  %v4569_v14 = vadd.f32 %v8455_v47, %v4506_v57  ;;  %v4509_v61 = vmax.f32 %v4115_v58, %v4453_v30  ;;  %v4451_v50 = vadd.f32 %v4374_v0, %v8422_v18 }
 0x300   : > { %v6614_v1 = vpop.f32.mrf.mxu0  ;;  %v4847_v7 = vsel %vm4791_vm8, %v4622_v48, 0.0  ;;  %v4627_v42 = vmax.f32 %v4571_v59, 0.0  ;;  %v6676_v28 = vpop.f32.mrf.mxu1  ;;  %v4743_v13 = vand.u32 15, %v4687_v53  ;;  %vm4801_vm11 = vcmp.lt.s32.totalorder %v4745_v63, 14 }
 0x301   : > { %v4118_v6 = vadd.f32 %v6614_v1, %v8425_v16  ;;  %v5001_v22 = vmax.f32 %v4847_v7, %v4849_v26  ;;  %v4625_v49 = vmax.f32 %v4569_v14, 0.0  ;;  %v4572_v19 = vadd.f32 %v8455_v47, %v4509_v61  ;;  %v6830_v47 = vld [vmem:[%s8788_s2] ss:$0 sm:$0xff] }
 0x302   : > { %v4507_v29 = vmax.f32 %v4113_v34, %v4451_v50  ;;  %v4049_v37 = vpop.f32.mrf.mxu0  ;;  %v4456_v18 = vadd.f32 %v6676_v28, %v8428_v11  ;;  %v4387_v27 = vpop.f32.mrf.mxu1  ;;  %vm4799_vm12 = vcmp.lt.s32.totalorder %v4743_v13, 14 }
 0x303   : > { %v4116_v4 = vadd.f32 %v4049_v37, %v9194_v39  ;;  %v5723_v16 = vpack.c.bf16 %v5001_v22, %v5000_v38  ;;  %v5013_v44 = vmax.f32 %v4625_v49, %v4627_v42  ;;  %v4628_v15 = vmax.f32 %v4572_v19, 0.0 }
 0x304   : > { %v4570_v46 = vadd.f32 %v6830_v47, %v4507_v29  ;;  %v6615_v25 = vpop.f32.mrf.mxu0  ;;  %v4512_v36 = vmax.f32 %v4118_v6, %v4456_v18  ;;  %v4454_v45 = vadd.f32 %v4387_v27, %v9195_v10  ;;  %v6677_v11 = vpop.f32.mrf.mxu1 }
 0x305   : > { %v4119_v3 = vadd.f32 %v6615_v25, %v9196_v12  ;;  %5745 = vst [vmem:[%s8503_s6 + $0x58] sm:$0xff] %v5723_v16   ;;  %v4457_v2 = vadd.f32 %v6677_v11, %v9197_v31  ;;  %v4853_v38 = vsel %vm8751_vm9, %v4628_v15, 0.0 }
 0x306   : > { %v4626_v41 = vmax.f32 %v4570_v46, 0.0  ;;  %v4052_v8 = vpop.f32.mrf.mxu0  ;;  %v4575_v55 = vadd.f32 %v6830_v47, %v4512_v36  ;;  %v4510_v23 = vmax.f32 %v4116_v4, %v4454_v45  ;;  %v4390_v52 = vpop.f32.mrf.mxu1 }
 0x307   : > { %v4117_v51 = vadd.f32 %v4052_v8, %v9198_v40  ;;  %v4513_v35 = vmax.f32 %v4119_v3, %v4457_v2  ;;  %v4455_v62 = vadd.f32 %v4390_v52, %v9199_v33 }
 0x308   : > { %v4851_v60 = vsel %vm8760_vm10, %v4626_v41, 0.0  ;;  %v4573_v56 = vadd.f32 %v6830_v47, %v4510_v23  ;;  %v4631_v59 = vmax.f32 %v4575_v55, 0.0 }
 0x309   : > { %v5014_v21 = vmax.f32 %v4851_v60, %v4853_v38  ;;  %v4576_v24 = vadd.f32 %v6830_v47, %v4513_v35  ;;  %v4511_v58 = vmax.f32 %v4117_v51, %v4455_v62 }
 0x30a   : > { %v4629_v57 = vmax.f32 %v4573_v56, 0.0 }
 0x30b   : > { %v5728_v43 = vpack.c.bf16 %v5014_v21, %v5013_v44  ;;  %v4632_v32 = vmax.f32 %v4576_v24, 0.0  ;;  %v4574_v30 = vadd.f32 %v6830_v47, %v4511_v58 }
 0x30c   : > { %v5026_v17 = vmax.f32 %v4629_v57, %v4631_v59 }
 0x30d   : > { %5746 = vst [vmem:[%s8503_s6 + $0x60] sm:$0xff] %v5728_v43   ;;  %v4630_v48 = vmax.f32 %v4574_v30, 0.0  ;;  %v4857_v34 = vsel %vm4801_vm11, %v4632_v32, 0.0 }
 0x30f   : > { %v4855_v0 = vsel %vm4799_vm12, %v4630_v48, 0.0 }
 0x310   : > { %v5027_v20 = vmax.f32 %v4855_v0, %v4857_v34 }
 0x312   : > { %v5733_v14 = vpack.c.bf16 %v5027_v20, %v5026_v17 }
 0x314   : > { %5747 = vst [vmem:[%s8503_s6 + $0x68] sm:$0xff] %v5733_v14  }
 0x315 PF: > { %s13_s12 = sadd.s32 1, %s6837_s12  }
 0x316   : > { %p10_p4 = scmp.ge.s32.totalorder %s13_s12, 4  }
 0x318   :  { %12 = sbr.rel (!%p10_p4) target bundleno = 1 (0x1), region = 84 }

// kernel: simple_cnn_forward.5
= control target key start
LH: loop header
LB: loop body
LE: loop exit
PB: predicated region body
PF: predicated region fallthrough
CT: control target
= control target key end

     0   :  { %v689_v28 = vlaneseq  ;;  %v5135_v36 = vmov 1966171168   ;;  %s6295_s0 = inlined_call_operand.vmem [shape: bf16[2,5120], index: 0, kind: input, shape index: {}]   ;;  %s6296_s1 = inlined_call_operand.vmem [shape: bf16[5120,128], index: 1, kind: input, shape index: {}]   ;;  %s6297_s2 = inlined_call_operand.vmem [shape: f32[1,128], index: 2, kind: input, shape index: {}]   ;;  %s6298_s3 = inlined_call_operand.vmem [shape: bf16[128,128], index: 3, kind: input, shape index: {}]   ;;  %s6299_s4 = inlined_call_operand.vmem [shape: f32[1,128], index: 4, kind: input, shape index: {}]   ;;  %s6300_s5 = inlined_call_operand.vmem [shape: bf16[128,128], index: 5, kind: input, shape index: {}]   ;;  %s6301_s6 = inlined_call_operand.vmem [shape: f32[1,128], index: 6, kind: input, shape index: {}]   ;;  %s6302_s7 = inlined_call_operand.hbm [shape: f32[2,128], index: 7, kind: output, shape index: {}]  }
   0x1   :  { %v4772_v0 = vld [vmem:[%s6296_s1 + $0x78] sm:$0xff]   ;;  %v4776_v4 = vld [vmem:[%s6296_s1 + $0x70] sm:$0xff]   ;;  %v4780_v8 = vld [vmem:[%s6296_s1 + $0x68] sm:$0xff]   ;;  %v687_v37 = vunpack.c.l.s4 %v5135_v36 }
   0x2   :  { %v4773_v1 = vld [vmem:[%s6296_s1 + $0xf8] sm:$0xff]   ;;  %4270 = vmatprep.subr.bf16.mxu0 %v4772_v0  ;;  %v4777_v5 = vld [vmem:[%s6296_s1 + $0xf0] sm:$0xff]   ;;  %v4781_v9 = vld [vmem:[%s6296_s1 + $0xe8] sm:$0xff]   ;;  %v690_v33 = vshrl.u32 %v689_v28, 7 }
   0x3   :  { %v4774_v2 = vld [vmem:[%s6296_s1 + $0x38] sm:$0xff]   ;;  %4292 = vmatprep.subr.bf16.mxu1 %v4773_v1  ;;  %v4778_v6 = vld [vmem:[%s6296_s1 + $0x30] sm:$0xff]   ;;  %v4782_v10 = vld [vmem:[%s6296_s1 + $0x28] sm:$0xff]   ;;  %v688_v40 = vunpack.c.0.s8 %v687_v37 }
   0x4   :  { %v4775_v3 = vld [vmem:[%s6296_s1 + $0xb8] sm:$0xff]   ;;  %4271 = vmatpush3.bf16.msra.mxu0 %v4774_v2  ;;  %v4779_v7 = vld [vmem:[%s6296_s1 + $0xb0] sm:$0xff]   ;;  %v4783_v11 = vld [vmem:[%s6296_s1 + $0xa8] sm:$0xff]  }
   0x5   :  { %4293 = vmatpush3.bf16.msra.mxu1 %v4775_v3  ;;  %4272 = vmatprep.subr.bf16.mxu0 %v4776_v4  ;;  %v4784_v12 = vld [vmem:[%s6296_s1 + $0x60] sm:$0xff]   ;;  %v4788_v16 = vld [vmem:[%s6296_s1 + $0x58] sm:$0xff]   ;;  %v4792_v20 = vld [vmem:[%s6296_s1 + $0x50] sm:$0xff]   ;;  %v5284_v41 = vsub.s32 %v688_v40, %v690_v33 }
   0x6   :  { %4294 = vmatprep.subr.bf16.mxu1 %v4777_v5  ;;  %v4785_v13 = vld [vmem:[%s6296_s1 + $0xe0] sm:$0xff]   ;;  %v4789_v17 = vld [vmem:[%s6296_s1 + $0xd8] sm:$0xff]   ;;  %v4793_v21 = vld [vmem:[%s6296_s1 + $0xd0] sm:$0xff]  }
   0x7   :  { %v4786_v14 = vld [vmem:[%s6296_s1 + $0x20] sm:$0xff]   ;;  %v4790_v18 = vld [vmem:[%s6296_s1 + $0x18] sm:$0xff]   ;;  %v4794_v22 = vld [vmem:[%s6296_s1 + $0x10] sm:$0xff]  }
   0x8   :  { %4273 = vmatpush3.bf16.msra.mxu0 %v4778_v6  ;;  %v4787_v15 = vld [vmem:[%s6296_s1 + $0xa0] sm:$0xff]   ;;  %v4791_v19 = vld [vmem:[%s6296_s1 + $0x98] sm:$0xff]   ;;  %v4795_v23 = vld [vmem:[%s6296_s1 + $0x90] sm:$0xff]  }
   0x9   :  { %4295 = vmatpush3.bf16.msra.mxu1 %v4779_v7  ;;  %4274 = vmatprep.subr.bf16.mxu0 %v4780_v8  ;;  %v4796_v24 = vld [vmem:[%s6296_s1 + $0x48] sm:$0xff]   ;;  %v4800_v29 = vld [vmem:[%s6296_s1 + $0x40] sm:$0xff]   ;;  %v4805_v35 = vld [vmem:[%s6296_s1 + $0x178] sm:$0xff]  }
   0xa   :  { %4296 = vmatprep.subr.bf16.mxu1 %v4781_v9  ;;  %v4797_v25 = vld [vmem:[%s6296_s1 + $0xc8] sm:$0xff]   ;;  %v4801_v30 = vld [vmem:[%s6296_s1 + $0xc0] sm:$0xff]   ;;  %v4806_v38 = vld [vmem:[%s6296_s1 + $0x1f8] sm:$0xff]  }
   0xb   :  { %v4798_v26 = vld [vmem:[%s6296_s1 + $0x8] sm:$0xff]   ;;  %v4802_v31 = vld [vmem:[%s6296_s1] sm:$0xff]   ;;  %v4807_v47 = vld [vmem:[%s6296_s1 + $0x138] sm:$0xff]  }
   0xc   :  { %4275 = vmatpush3.bf16.msra.mxu0 %v4782_v10  ;;  %v4799_v27 = vld [vmem:[%s6296_s1 + $0x88] sm:$0xff]   ;;  %v4803_v32 = vld [vmem:[%s6296_s1 + $0x80] sm:$0xff]   ;;  %v4808_v49 = vld [vmem:[%s6296_s1 + $0x1b8] sm:$0xff]  }
   0xd   :  { %4297 = vmatpush3.bf16.msra.mxu1 %v4783_v11  ;;  %4276 = vmatprep.subr.bf16.mxu0 %v4784_v12  ;;  %v28_v34 = vld [vmem:[%s6295_s0] sm:$0xff]  ;;  %v4809_v52 = vld [vmem:[%s6296_s1 + $0x170] sm:$0xff]   ;;  %v4813_v58 = vld [vmem:[%s6296_s1 + $0x168] sm:$0xff]  }
   0xe   :  { %4298 = vmatprep.subr.bf16.mxu1 %v4785_v13  ;;  %v685_v39 = vcombine.high %v28_v34, %v28_v34  ;;  %v692_v42 = vrot.slane %v28_v34, %v5284_v41  ;;  %v4810_v54 = vld [vmem:[%s6296_s1 + $0x1f0] sm:$0xff]   ;;  %v4814_v59 = vld [vmem:[%s6296_s1 + $0x1e8] sm:$0xff]   ;;  %v4817_v62 = vld [vmem:[%s6296_s1 + $0x160] sm:$0xff]  }
   0xf   :  { %v4811_v55 = vld [vmem:[%s6296_s1 + $0x130] sm:$0xff]   ;;  %v4815_v60 = vld [vmem:[%s6296_s1 + $0x128] sm:$0xff]   ;;  %v4818_v63 = vld [vmem:[%s6296_s1 + $0x1e0] sm:$0xff]  }
  0x10   :  { %4277 = vmatpush3.bf16.msra.mxu0 %v4786_v14  ;;  %v5288_v43 = vrot.slane %v685_v39, %v5284_v41  ;;  %v700_v44 = vcombine.high %v692_v42, %v692_v42  ;;  %v708_v45 = vrot.slane %v692_v42, %v5284_v41  ;;  %v4812_v57 = vld [vmem:[%s6296_s1 + $0x1b0] sm:$0xff]   ;;  %v4816_v61 = vld [vmem:[%s6296_s1 + $0x1a8] sm:$0xff]   ;;  %v4819_v0 = vld [vmem:[%s6296_s1 + $0x120] sm:$0xff]  }
  0x11   :  { %4299 = vmatpush3.bf16.msra.mxu1 %v4787_v15  ;;  %4278 = vmatprep.subr.bf16.mxu0 %v4788_v16  ;;  %v4820_v1 = vld [vmem:[%s6296_s1 + $0x1a0] sm:$0xff]   ;;  %v4821_v2 = vld [vmem:[%s6296_s1 + $0x158] sm:$0xff]   ;;  %v4825_v6 = vld [vmem:[%s6296_s1 + $0x150] sm:$0xff]  }
  0x12   :  { %4300 = vmatprep.subr.bf16.mxu1 %v4789_v17  ;;  %v701_v46 = vcombine.high %v5288_v43, %v5288_v43  ;;  %v722_v48 = vrot.slane %v700_v44, %v5284_v41  ;;  %v730_v51 = vcombine.high %v708_v45, %v708_v45  ;;  %v4822_v3 = vld [vmem:[%s6296_s1 + $0x1d8] sm:$0xff]   ;;  %v4826_v7 = vld [vmem:[%s6296_s1 + $0x1d0] sm:$0xff]   ;;  %v4829_v10 = vld [vmem:[%s6296_s1 + $0x148] sm:$0xff]  }
  0x13   :  { %v4823_v4 = vld [vmem:[%s6296_s1 + $0x118] sm:$0xff]   ;;  %v4827_v8 = vld [vmem:[%s6296_s1 + $0x110] sm:$0xff]   ;;  %v4830_v11 = vld [vmem:[%s6296_s1 + $0x1c8] sm:$0xff]  }
  0x14   :  { %4279 = vmatpush3.bf16.msra.mxu0 %v4790_v18  ;;  %v729_v50 = vrot.slane %v701_v46, %v5284_v41  ;;  %2922 = vmatprep.mubr.bf16.mxu0 %v722_v48  ;;  %v732_v53 = vcombine.high %v722_v48, %v722_v48  ;;  %v4824_v5 = vld [vmem:[%s6296_s1 + $0x198] sm:$0xff]   ;;  %v4828_v9 = vld [vmem:[%s6296_s1 + $0x190] sm:$0xff]   ;;  %v4831_v12 = vld [vmem:[%s6296_s1 + $0x108] sm:$0xff]   ;;  %v715_v18 = vrot.slane %v5288_v43, %v5284_v41 }
  0x15   :  { %4301 = vmatpush3.bf16.msra.mxu1 %v4791_v19  ;;  %4280 = vmatprep.subr.bf16.mxu0 %v4792_v20  ;;  %v4832_v13 = vld [vmem:[%s6296_s1 + $0x188] sm:$0xff]   ;;  %v4833_v14 = vld [vmem:[%s6296_s1 + $0x140] sm:$0xff]   ;;  %v4837_v19 = vld [vmem:[%s6296_s1 + $0x278] sm:$0xff]  }
  0x16   :  { %4302 = vmatprep.subr.bf16.mxu1 %v4793_v21  ;;  %v733_v56 = vcombine.high %v729_v50, %v729_v50  ;;  %2962 = vmatprep.mubr.bf16.mxu1 %v732_v53  ;;  %v4834_v15 = vld [vmem:[%s6296_s1 + $0x1c0] sm:$0xff]   ;;  %v4838_v20 = vld [vmem:[%s6296_s1 + $0x2f8] sm:$0xff]   ;;  %v4845_v28 = vld [vmem:[%s6296_s1 + $0x268] sm:$0xff]  }
  0x17   :  { %v4835_v16 = vld [vmem:[%s6296_s1 + $0x100] sm:$0xff]   ;;  %v4839_v21 = vld [vmem:[%s6296_s1 + $0x238] sm:$0xff]   ;;  %v4857_v40 = vld [vmem:[%s6296_s1 + $0x250] sm:$0xff]  }
  0x18   :  { %4281 = vmatpush3.bf16.msra.mxu0 %v4794_v22  ;;  %v4836_v17 = vld [vmem:[%s6296_s1 + $0x180] sm:$0xff]   ;;  %v4840_v22 = vld [vmem:[%s6296_s1 + $0x2b8] sm:$0xff]   ;;  %v4858_v42 = vld [vmem:[%s6296_s1 + $0x2d0] sm:$0xff]  }
  0x19   :  { %4303 = vmatpush3.bf16.msra.mxu1 %v4795_v23  ;;  %4282 = vmatprep.subr.bf16.mxu0 %v4796_v24  ;;  %v731_v23 = vcombine.high %v715_v18, %v715_v18  ;;  %v4841_v24 = vld [vmem:[%s6296_s1 + $0x270] sm:$0xff]   ;;  %v4850_v33 = vld [vmem:[%s6296_s1 + $0x2e0] sm:$0xff]   ;;  %v4853_v36 = vld [vmem:[%s6296_s1 + $0x258] sm:$0xff]  }
  0x1a   :  { %4304 = vmatprep.subr.bf16.mxu1 %v4797_v25  ;;  %v4842_v25 = vld [vmem:[%s6296_s1 + $0x2f0] sm:$0xff]   ;;  %v4851_v34 = vld [vmem:[%s6296_s1 + $0x220] sm:$0xff]   ;;  %v4854_v37 = vld [vmem:[%s6296_s1 + $0x2d8] sm:$0xff]  }
  0x1b   :  { %v4856_v39 = vld [vmem:[%s6296_s1 + $0x298] sm:$0xff]   ;;  %v4859_v43 = vld [vmem:[%s6296_s1 + $0x210] sm:$0xff]   ;;  %v29_v46 = vld [vmem:[%s6295_s0 + $0x8] sm:$0xff] }
  0x1c   :  { %4283 = vmatpush3.bf16.msra.mxu0 %v4798_v26  ;;  %v4843_v26 = vld [vmem:[%s6296_s1 + $0x230] sm:$0xff]   ;;  %v741_v48 = vrot.slane %v29_v46, %v5284_v41 }
  0x1d   :  { %4305 = vmatpush3.bf16.msra.mxu1 %v4799_v27  ;;  %4284 = vmatprep.subr.bf16.mxu0 %v4800_v29  ;;  %v4844_v27 = vld [vmem:[%s6296_s1 + $0x2b0] sm:$0xff]   ;;  %v4846_v29 = vld [vmem:[%s6296_s1 + $0x2e8] sm:$0xff]  }
  0x1e   :  { %4306 = vmatprep.subr.bf16.mxu1 %v4801_v30  ;;  %v4847_v30 = vld [vmem:[%s6296_s1 + $0x228] sm:$0xff]   ;;  %v4860_v44 = vld [vmem:[%s6296_s1 + $0x290] sm:$0xff]  }
  0x20   :  { %4285 = vmatpush3.bf16.msra.mxu0 %v4802_v31  ;;  %v4848_v31 = vld [vmem:[%s6296_s1 + $0x2a8] sm:$0xff]  }
  0x21   :  { %4307 = vmatpush3.bf16.msra.mxu1 %v4803_v32  ;;  %4314 = vmatprep.subr.bf16.mxu0 %v4805_v35  ;;  %v4849_v32 = vld [vmem:[%s6296_s1 + $0x260] sm:$0xff]  }
  0x22   :  { %4336 = vmatprep.subr.bf16.mxu1 %v4806_v38  ;;  %v4852_v35 = vld [vmem:[%s6296_s1 + $0x2a0] sm:$0xff]   ;;  %v4855_v38 = vld [vmem:[%s6296_s1 + $0x218] sm:$0xff]  }
  0x23   :  { %2923 = vmatmul.mubr.bf16.vlgmr.msra.gmra.mxu0 %v708_v45  ;;  %v4861_v45 = vld [vmem:[%s6296_s1 + $0x248] sm:$0xff]  }
  0x24   :  { %4315 = vmatpush3.bf16.msra.mxu0 %v4807_v47  ;;  %2963 = vmatmul.mubr.bf16.vlgmr.msra.gmra.mxu1 %v730_v51  ;;  %v4862_v47 = vld [vmem:[%s6296_s1 + $0x2c8] sm:$0xff]  }
  0x25   :  { %4316 = vmatprep.subr.bf16.mxu0 %v4809_v52  ;;  %4337 = vmatpush3.bf16.msra.mxu1 %v4808_v49  ;;  %v734_v49 = vcombine.high %v29_v46, %v29_v46  ;;  %v4864_v51 = vld [vmem:[%s6296_s1 + $0x288] sm:$0xff]   ;;  %v749_v52 = vcombine.high %v741_v48, %v741_v48 }
  0x26   :  { %3002 = vmatprep.mubr.bf16.mxu0 %v729_v50  ;;  %4338 = vmatprep.subr.bf16.mxu1 %v4810_v54  ;;  %v4863_v50 = vld [vmem:[%s6296_s1 + $0x208] sm:$0xff]   ;;  %v4865_v54 = vld [vmem:[%s6296_s1 + $0x240] sm:$0xff]  }
  0x27   :  { %3042 = vmatprep.mubr.bf16.mxu1 %v733_v56  ;;  %v5476_v53 = vrot.slane %v734_v49, %v5284_v41  ;;  %v771_v56 = vrot.slane %v749_v52, %v5284_v41  ;;  %v4912_v46 = vld [vmem:[%s6296_s1 + $0x428] sm:$0xff]   ;;  %v4915_v49 = vld [vmem:[%s6296_s1 + $0x4e0] sm:$0xff]   ;;  %v4918_v52 = vld [vmem:[%s6296_s1 + $0x458] sm:$0xff]  }
  0x28   :  { %4317 = vmatpush3.bf16.msra.mxu0 %v4811_v55  ;;  %v4866_v55 = vld [vmem:[%s6296_s1 + $0x2c0] sm:$0xff]  }
  0x29   :  { %4318 = vmatprep.subr.bf16.mxu0 %v4813_v58  ;;  %4339 = vmatpush3.bf16.msra.mxu1 %v4812_v57  ;;  %v750_v57 = vcombine.high %v5476_v53, %v5476_v53  ;;  %v4867_v58 = vld [vmem:[%s6296_s1 + $0x200] sm:$0xff]  }
  0x2a   :  { %4340 = vmatprep.subr.bf16.mxu1 %v4814_v59  ;;  %v4868_v59 = vld [vmem:[%s6296_s1 + $0x280] sm:$0xff]  }
  0x2c   :  { %4319 = vmatpush3.bf16.msra.mxu0 %v4815_v60  ;;  %v781_v60 = vcombine.high %v771_v56, %v771_v56 }
  0x2d   :  { %4320 = vmatprep.subr.bf16.mxu0 %v4817_v62  ;;  %4341 = vmatpush3.bf16.msra.mxu1 %v4816_v61  ;;  %v757_v61 = vrot.slane %v741_v48, %v5284_v41  ;;  %v4869_v62 = vld [vmem:[%s6296_s1 + $0x378] sm:$0xff]   ;;  %v4914_v48 = vld [vmem:[%s6296_s1 + $0x460] sm:$0xff]  }
  0x2e   :  { %4342 = vmatprep.subr.bf16.mxu1 %v4818_v63  ;;  %v4870_v63 = vld [vmem:[%s6296_s1 + $0x3f8] sm:$0xff]  }
  0x30   :  { %4321 = vmatpush3.bf16.msra.mxu0 %v4819_v0  ;;  %v778_v0 = vrot.slane %v750_v57, %v5284_v41  ;;  %v4923_v57 = vld [vmem:[%s6296_s1 + $0x4d0] sm:$0xff]  }
  0x31   :  { %4322 = vmatprep.subr.bf16.mxu0 %v4821_v2  ;;  %4343 = vmatpush3.bf16.msra.mxu1 %v4820_v1  ;;  %v4871_v1 = vld [vmem:[%s6296_s1 + $0x338] sm:$0xff]  }
  0x32   :  { %4344 = vmatprep.subr.bf16.mxu1 %v4822_v3  ;;  %v4872_v2 = vld [vmem:[%s6296_s1 + $0x3b8] sm:$0xff]   ;;  %v779_v3 = vcombine.high %v757_v61, %v757_v61 }
  0x34   :  { %4323 = vmatpush3.bf16.msra.mxu0 %v4823_v4  ;;  %v4873_v4 = vld [vmem:[%s6296_s1 + $0x370] sm:$0xff]  }
  0x35   :  { %4324 = vmatprep.subr.bf16.mxu0 %v4825_v6  ;;  %4345 = vmatpush3.bf16.msra.mxu1 %v4824_v5  ;;  %v4874_v5 = vld [vmem:[%s6296_s1 + $0x3f0] sm:$0xff]   ;;  %v782_v6 = vcombine.high %v778_v0, %v778_v0 }
  0x36   :  { %4346 = vmatprep.subr.bf16.mxu1 %v4826_v7  ;;  %v4875_v7 = vld [vmem:[%s6296_s1 + $0x330] sm:$0xff]  }
  0x38   :  { %4325 = vmatpush3.bf16.msra.mxu0 %v4827_v8  ;;  %v4876_v8 = vld [vmem:[%s6296_s1 + $0x3b0] sm:$0xff]  }
  0x39   :  { %4326 = vmatprep.subr.bf16.mxu0 %v4829_v10  ;;  %4347 = vmatpush3.bf16.msra.mxu1 %v4828_v9  ;;  %v4877_v9 = vld [vmem:[%s6296_s1 + $0x368] sm:$0xff]  }
  0x3a   :  { %4348 = vmatprep.subr.bf16.mxu1 %v4830_v11  ;;  %v4878_v10 = vld [vmem:[%s6296_s1 + $0x3e8] sm:$0xff]  }
  0x3b   :  { %v4879_v11 = vld [vmem:[%s6296_s1 + $0x328] sm:$0xff]  }
  0x3c   :  { %4327 = vmatpush3.bf16.msra.mxu0 %v4831_v12  ;;  %v4880_v12 = vld [vmem:[%s6296_s1 + $0x3a8] sm:$0xff]  }
  0x3d   :  { %4328 = vmatprep.subr.bf16.mxu0 %v4833_v14  ;;  %4349 = vmatpush3.bf16.msra.mxu1 %v4832_v13  ;;  %v4881_v13 = vld [vmem:[%s6296_s1 + $0x360] sm:$0xff]  }
  0x3e   :  { %4350 = vmatprep.subr.bf16.mxu1 %v4834_v15  ;;  %v4882_v14 = vld [vmem:[%s6296_s1 + $0x3e0] sm:$0xff]  }
  0x3f   :  { %v4883_v15 = vld [vmem:[%s6296_s1 + $0x320] sm:$0xff]  }
  0x40   :  { %4329 = vmatpush3.bf16.msra.mxu0 %v4835_v16  ;;  %v4884_v16 = vld [vmem:[%s6296_s1 + $0x3a0] sm:$0xff]  }
  0x41   :  { %4358 = vmatprep.subr.bf16.mxu0 %v4837_v19  ;;  %4351 = vmatpush3.bf16.msra.mxu1 %v4836_v17  ;;  %v4885_v17 = vld [vmem:[%s6296_s1 + $0x358] sm:$0xff]  }
  0x42   :  { %4380 = vmatprep.subr.bf16.mxu1 %v4838_v20  ;;  %v4887_v19 = vld [vmem:[%s6296_s1 + $0x318] sm:$0xff]  }
  0x43   :  { %3003 = vmatmul.mubr.bf16.vlgmr.msra.gmra.mxu0 %v715_v18  ;;  %v4886_v18 = vld [vmem:[%s6296_s1 + $0x3d8] sm:$0xff]  }
  0x44   :  { %4359 = vmatpush3.bf16.msra.mxu0 %v4839_v21  ;;  %3043 = vmatmul.mubr.bf16.vlgmr.msra.gmra.mxu1 %v731_v23  ;;  %v4888_v20 = vld [vmem:[%s6296_s1 + $0x398] sm:$0xff]   ;;  %v4889_v21 = vld [vmem:[%s6296_s1 + $0x350] sm:$0xff]  }
  0x45   :  { %4360 = vmatprep.subr.bf16.mxu0 %v4841_v24  ;;  %4381 = vmatpush3.bf16.msra.mxu1 %v4840_v22  ;;  %v4890_v22 = vld [vmem:[%s6296_s1 + $0x3d0] sm:$0xff]  }
  0x46   :  { %4382 = vmatprep.subr.bf16.mxu1 %v4842_v25  ;;  %3082 = vmatprep.mubr.bf16.mxu0 %v771_v56  ;;  %v4891_v23 = vld [vmem:[%s6296_s1 + $0x310] sm:$0xff]   ;;  %v4893_v25 = vld [vmem:[%s6296_s1 + $0x348] sm:$0xff]  }
  0x47   :  { %3122 = vmatprep.mubr.bf16.mxu1 %v781_v60  ;;  %v4892_v24 = vld [vmem:[%s6296_s1 + $0x390] sm:$0xff]   ;;  %v4926_v60 = vld [vmem:[%s6296_s1 + $0x448] sm:$0xff]  }
  0x48   :  { %4361 = vmatpush3.bf16.msra.mxu0 %v4843_v26  ;;  %v4894_v26 = vld [vmem:[%s6296_s1 + $0x3c8] sm:$0xff]   ;;  %v4922_v56 = vld [vmem:[%s6296_s1 + $0x450] sm:$0xff]  }
  0x49   :  { %4362 = vmatprep.subr.bf16.mxu0 %v4845_v28  ;;  %4383 = vmatpush3.bf16.msra.mxu1 %v4844_v27  ;;  %v4895_v27 = vld [vmem:[%s6296_s1 + $0x308] sm:$0xff]  }
  0x4a   :  { %4384 = vmatprep.subr.bf16.mxu1 %v4846_v29  ;;  %v4896_v28 = vld [vmem:[%s6296_s1 + $0x388] sm:$0xff]   ;;  %v4897_v29 = vld [vmem:[%s6296_s1 + $0x340] sm:$0xff]  }
  0x4c   :  { %4363 = vmatpush3.bf16.msra.mxu0 %v4847_v30  ;;  %v4898_v30 = vld [vmem:[%s6296_s1 + $0x3c0] sm:$0xff]  }
  0x4d   :  { %4364 = vmatprep.subr.bf16.mxu0 %v4849_v32  ;;  %4385 = vmatpush3.bf16.msra.mxu1 %v4848_v31  ;;  %v4899_v31 = vld [vmem:[%s6296_s1 + $0x300] sm:$0xff]  }
  0x4e   :  { %4386 = vmatprep.subr.bf16.mxu1 %v4850_v33  ;;  %v4900_v32 = vld [vmem:[%s6296_s1 + $0x380] sm:$0xff]   ;;  %v764_v33 = vrot.slane %v5476_v53, %v5284_v41  ;;  %v4919_v53 = vld [vmem:[%s6296_s1 + $0x4d8] sm:$0xff]  }
  0x50   :  { %4365 = vmatpush3.bf16.msra.mxu0 %v4851_v34  ;;  %v4902_v34 = vld [vmem:[%s6296_s1 + $0x478] sm:$0xff]  }
  0x51   :  { %4366 = vmatprep.subr.bf16.mxu0 %v4853_v36  ;;  %4387 = vmatpush3.bf16.msra.mxu1 %v4852_v35  ;;  %v4903_v35 = vld [vmem:[%s6296_s1 + $0x4f8] sm:$0xff]  }
  0x52   :  { %4388 = vmatprep.subr.bf16.mxu1 %v4854_v37  ;;  %v4904_v36 = vld [vmem:[%s6296_s1 + $0x438] sm:$0xff]  }
  0x53   :  { %v4905_v37 = vld [vmem:[%s6296_s1 + $0x4b8] sm:$0xff]  }
  0x54   :  { %4367 = vmatpush3.bf16.msra.mxu0 %v4855_v38  ;;  %v780_v38 = vcombine.high %v764_v33, %v764_v33 }
  0x55   :  { %4368 = vmatprep.subr.bf16.mxu0 %v4857_v40  ;;  %4389 = vmatpush3.bf16.msra.mxu1 %v4856_v39  ;;  %v4906_v39 = vld [vmem:[%s6296_s1 + $0x470] sm:$0xff]  }
  0x56   :  { %4390 = vmatprep.subr.bf16.mxu1 %v4858_v42  ;;  %v4907_v40 = vld [vmem:[%s6296_s1 + $0x4f0] sm:$0xff]  }
  0x57   :  { %v4908_v42 = vld [vmem:[%s6296_s1 + $0x430] sm:$0xff]  }
  0x58   :  { %4369 = vmatpush3.bf16.msra.mxu0 %v4859_v43  ;;  %v4909_v43 = vld [vmem:[%s6296_s1 + $0x4b0] sm:$0xff]  }
  0x59   :  { %4370 = vmatprep.subr.bf16.mxu0 %v4861_v45  ;;  %4391 = vmatpush3.bf16.msra.mxu1 %v4860_v44  ;;  %v4910_v44 = vld [vmem:[%s6296_s1 + $0x468] sm:$0xff]  }
  0x5a   :  { %4392 = vmatprep.subr.bf16.mxu1 %v4862_v47  ;;  %v4911_v45 = vld [vmem:[%s6296_s1 + $0x4e8] sm:$0xff]  }
  0x5b   :  { %v4913_v47 = vld [vmem:[%s6296_s1 + $0x4a8] sm:$0xff]  }
  0x5c   :  { %4371 = vmatpush3.bf16.msra.mxu0 %v4863_v50  ;;  %v4916_v50 = vld [vmem:[%s6296_s1 + $0x420] sm:$0xff]  }
  0x5d   :  { %4372 = vmatprep.subr.bf16.mxu0 %v4865_v54  ;;  %4393 = vmatpush3.bf16.msra.mxu1 %v4864_v51  ;;  %v4917_v51 = vld [vmem:[%s6296_s1 + $0x4a0] sm:$0xff]   ;;  %v4920_v54 = vld [vmem:[%s6296_s1 + $0x418] sm:$0xff]  }
  0x5e   :  { %4394 = vmatprep.subr.bf16.mxu1 %v4866_v55  ;;  %v4921_v55 = vld [vmem:[%s6296_s1 + $0x498] sm:$0xff]  }
  0x60   :  { %4373 = vmatpush3.bf16.msra.mxu0 %v4867_v58  ;;  %v4924_v58 = vld [vmem:[%s6296_s1 + $0x410] sm:$0xff]  }
  0x61   :  { %4402 = vmatprep.subr.bf16.mxu0 %v4869_v62  ;;  %4395 = vmatpush3.bf16.msra.mxu1 %v4868_v59  ;;  %v4925_v59 = vld [vmem:[%s6296_s1 + $0x490] sm:$0xff]   ;;  %v4927_v62 = vld [vmem:[%s6296_s1 + $0x4c8] sm:$0xff]  }
  0x62   :  { %4424 = vmatprep.subr.bf16.mxu1 %v4870_v63 }
  0x63   :  { %3083 = vmatmul.mubr.bf16.vlgmr.msra.gmra.mxu0 %v757_v61  ;;  %v30_v61 = vld [vmem:[%s6295_s0 + $0x10] sm:$0xff] }
  0x64   :  { %4403 = vmatpush3.bf16.msra.mxu0 %v4871_v1  ;;  %3162 = vmatprep.mubr.bf16.mxu0 %v778_v0  ;;  %v790_v63 = vrot.slane %v30_v61, %v5284_v41  ;;  %v783_v0 = vcombine.high %v30_v61, %v30_v61  ;;  %v4928_v1 = vld [vmem:[%s6296_s1 + $0x408] sm:$0xff]  }
  0x65   :  { %3123 = vmatmul.mubr.bf16.vlgmr.msra.gmra.mxu1 %v779_v3  ;;  %4404 = vmatprep.subr.bf16.mxu0 %v4873_v4  ;;  %v4977_v61 = vld [vmem:[%s6296_s1 + $0x628] sm:$0xff]  }
  0x66   :  { %4425 = vmatpush3.bf16.msra.mxu1 %v4872_v2  ;;  %3202 = vmatprep.mubr.bf16.mxu1 %v782_v6  ;;  %v4929_v2 = vld [vmem:[%s6296_s1 + $0x488] sm:$0xff]   ;;  %v798_v3 = vcombine.high %v790_v63, %v790_v63  ;;  %v5682_v4 = vrot.slane %v783_v0, %v5284_v41  ;;  %v4931_v6 = vld [vmem:[%s6296_s1 + $0x4c0] sm:$0xff]  }
  0x67   :  { %4426 = vmatprep.subr.bf16.mxu1 %v4874_v5  ;;  %v4930_v5 = vld [vmem:[%s6296_s1 + $0x440] sm:$0xff]  }
  0x68   :  { %4405 = vmatpush3.bf16.msra.mxu0 %v4875_v7  ;;  %v820_v7 = vrot.slane %v798_v3, %v5284_v41  ;;  %v4980_v0 = vld [vmem:[%s6296_s1 + $0x6e0] sm:$0xff]   ;;  %v4983_v3 = vld [vmem:[%s6296_s1 + $0x658] sm:$0xff]  }
  0x69   :  { %4406 = vmatprep.subr.bf16.mxu0 %v4877_v9  ;;  %v4932_v9 = vld [vmem:[%s6296_s1 + $0x400] sm:$0xff]  }
  0x6a   :  { %4427 = vmatpush3.bf16.msra.mxu1 %v4876_v8  ;;  %v799_v8 = vcombine.high %v5682_v4, %v5682_v4 }
  0x6b   :  { %4428 = vmatprep.subr.bf16.mxu1 %v4878_v10  ;;  %v4933_v10 = vld [vmem:[%s6296_s1 + $0x480] sm:$0xff]  }
  0x6c   :  { %4407 = vmatpush3.bf16.msra.mxu0 %v4879_v11  ;;  %v830_v11 = vcombine.high %v820_v7, %v820_v7 }
  0x6d   :  { %4408 = vmatprep.subr.bf16.mxu0 %v4881_v13  ;;  %v4934_v13 = vld [vmem:[%s6296_s1 + $0x578] sm:$0xff]  }
  0x6e   :  { %4429 = vmatpush3.bf16.msra.mxu1 %v4880_v12  ;;  %v806_v12 = vrot.slane %v790_v63, %v5284_v41  ;;  %v4979_v63 = vld [vmem:[%s6296_s1 + $0x660] sm:$0xff]  }
  0x6f   :  { %4430 = vmatprep.subr.bf16.mxu1 %v4882_v14  ;;  %v4935_v14 = vld [vmem:[%s6296_s1 + $0x5f8] sm:$0xff]  }
  0x70   :  { %4409 = vmatpush3.bf16.msra.mxu0 %v4883_v15  ;;  %v827_v15 = vrot.slane %v799_v8, %v5284_v41  ;;  %v4988_v8 = vld [vmem:[%s6296_s1 + $0x6d0] sm:$0xff]  }
  0x71   :  { %4410 = vmatprep.subr.bf16.mxu0 %v4885_v17  ;;  %v4937_v17 = vld [vmem:[%s6296_s1 + $0x5b8] sm:$0xff]  }
  0x72   :  { %4431 = vmatpush3.bf16.msra.mxu1 %v4884_v16  ;;  %v4936_v16 = vld [vmem:[%s6296_s1 + $0x538] sm:$0xff]  }
  0x73   :  { %4432 = vmatprep.subr.bf16.mxu1 %v4886_v18  ;;  %v828_v18 = vcombine.high %v806_v12, %v806_v12 }
  0x74   :  { %4411 = vmatpush3.bf16.msra.mxu0 %v4887_v19  ;;  %v4938_v19 = vld [vmem:[%s6296_s1 + $0x570] sm:$0xff]  }
  0x75   :  { %4412 = vmatprep.subr.bf16.mxu0 %v4889_v21  ;;  %v831_v21 = vcombine.high %v827_v15, %v827_v15 }
  0x76   :  { %4433 = vmatpush3.bf16.msra.mxu1 %v4888_v20  ;;  %v4939_v20 = vld [vmem:[%s6296_s1 + $0x5f0] sm:$0xff]  }
  0x77   :  { %4434 = vmatprep.subr.bf16.mxu1 %v4890_v22  ;;  %v4940_v22 = vld [vmem:[%s6296_s1 + $0x530] sm:$0xff]  }
  0x78   :  { %4413 = vmatpush3.bf16.msra.mxu0 %v4891_v23  ;;  %v4941_v23 = vld [vmem:[%s6296_s1 + $0x5b0] sm:$0xff]  }
  0x79   :  { %4414 = vmatprep.subr.bf16.mxu0 %v4893_v25  ;;  %v4943_v25 = vld [vmem:[%s6296_s1 + $0x5e8] sm:$0xff]  }
  0x7a   :  { %4435 = vmatpush3.bf16.msra.mxu1 %v4892_v24  ;;  %v4942_v24 = vld [vmem:[%s6296_s1 + $0x568] sm:$0xff]  }
  0x7b   :  { %4436 = vmatprep.subr.bf16.mxu1 %v4894_v26  ;;  %v4944_v26 = vld [vmem:[%s6296_s1 + $0x528] sm:$0xff]  }
  0x7c   :  { %4415 = vmatpush3.bf16.msra.mxu0 %v4895_v27  ;;  %v4945_v27 = vld [vmem:[%s6296_s1 + $0x5a8] sm:$0xff]  }
  0x7d   :  { %4416 = vmatprep.subr.bf16.mxu0 %v4897_v29  ;;  %v4947_v29 = vld [vmem:[%s6296_s1 + $0x5e0] sm:$0xff]  }
  0x7e   :  { %4437 = vmatpush3.bf16.msra.mxu1 %v4896_v28  ;;  %v4946_v28 = vld [vmem:[%s6296_s1 + $0x560] sm:$0xff]  }
  0x7f   :  { %4438 = vmatprep.subr.bf16.mxu1 %v4898_v30  ;;  %v4948_v30 = vld [vmem:[%s6296_s1 + $0x520] sm:$0xff]  }
  0x80   :  { %4417 = vmatpush3.bf16.msra.mxu0 %v4899_v31  ;;  %v4949_v31 = vld [vmem:[%s6296_s1 + $0x5a0] sm:$0xff]  }
  0x81   :  { %4446 = vmatprep.subr.bf16.mxu0 %v4902_v34  ;;  %v4952_v34 = vld [vmem:[%s6296_s1 + $0x518] sm:$0xff]  }
  0x82   :  { %4439 = vmatpush3.bf16.msra.mxu1 %v4900_v32  ;;  %v4950_v32 = vld [vmem:[%s6296_s1 + $0x558] sm:$0xff]  }
  0x83   :  { %3163 = vmatmul.mubr.bf16.vlgmr.msra.gmra.mxu0 %v764_v33  ;;  %4468 = vmatprep.subr.bf16.mxu1 %v4903_v35  ;;  %v4951_v33 = vld [vmem:[%s6296_s1 + $0x5d8] sm:$0xff]  }
  0x84   :  { %4447 = vmatpush3.bf16.msra.mxu0 %v4904_v36  ;;  %3242 = vmatprep.mubr.bf16.mxu0 %v820_v7  ;;  %v4953_v35 = vld [vmem:[%s6296_s1 + $0x598] sm:$0xff]   ;;  %v4954_v36 = vld [vmem:[%s6296_s1 + $0x550] sm:$0xff]  }
  0x85   :  { %3203 = vmatmul.mubr.bf16.vlgmr.msra.gmra.mxu1 %v780_v38  ;;  %4448 = vmatprep.subr.bf16.mxu0 %v4906_v39  ;;  %v4956_v38 = vld [vmem:[%s6296_s1 + $0x510] sm:$0xff]  }
  0x86   :  { %4469 = vmatpush3.bf16.msra.mxu1 %v4905_v37  ;;  %3282 = vmatprep.mubr.bf16.mxu1 %v830_v11  ;;  %v4955_v37 = vld [vmem:[%s6296_s1 + $0x5d0] sm:$0xff]   ;;  %v4991_v11 = vld [vmem:[%s6296_s1 + $0x648] sm:$0xff]  }
  0x87   :  { %4470 = vmatprep.subr.bf16.mxu1 %v4907_v40  ;;  %v4957_v39 = vld [vmem:[%s6296_s1 + $0x590] sm:$0xff]   ;;  %v4958_v40 = vld [vmem:[%s6296_s1 + $0x548] sm:$0xff]  }
  0x88   :  { %4449 = vmatpush3.bf16.msra.mxu0 %v4908_v42  ;;  %v4959_v42 = vld [vmem:[%s6296_s1 + $0x5c8] sm:$0xff]   ;;  %v4987_v7 = vld [vmem:[%s6296_s1 + $0x650] sm:$0xff]  }
  0x89   :  { %4450 = vmatprep.subr.bf16.mxu0 %v4910_v44  ;;  %v4961_v44 = vld [vmem:[%s6296_s1 + $0x588] sm:$0xff]  }
  0x8a   :  { %4471 = vmatpush3.bf16.msra.mxu1 %v4909_v43  ;;  %v4960_v43 = vld [vmem:[%s6296_s1 + $0x508] sm:$0xff]  }
  0x8b   :  { %4472 = vmatprep.subr.bf16.mxu1 %v4911_v45  ;;  %v4962_v45 = vld [vmem:[%s6296_s1 + $0x540] sm:$0xff]  }
  0x8c   :  { %4451 = vmatpush3.bf16.msra.mxu0 %v4912_v46  ;;  %v4963_v46 = vld [vmem:[%s6296_s1 + $0x5c0] sm:$0xff]  }
  0x8d   :  { %4452 = vmatprep.subr.bf16.mxu0 %v4914_v48  ;;  %v4965_v48 = vld [vmem:[%s6296_s1 + $0x580] sm:$0xff]  }
  0x8e   :  { %4473 = vmatpush3.bf16.msra.mxu1 %v4913_v47  ;;  %v4964_v47 = vld [vmem:[%s6296_s1 + $0x500] sm:$0xff]  }
  0x8f   :  { %4474 = vmatprep.subr.bf16.mxu1 %v4915_v49  ;;  %v813_v49 = vrot.slane %v5682_v4, %v5284_v41  ;;  %v4984_v4 = vld [vmem:[%s6296_s1 + $0x6d8] sm:$0xff]  }
  0x90   :  { %4453 = vmatpush3.bf16.msra.mxu0 %v4916_v50  ;;  %v4967_v50 = vld [vmem:[%s6296_s1 + $0x678] sm:$0xff]  }
  0x91   :  { %4454 = vmatprep.subr.bf16.mxu0 %v4918_v52  ;;  %v4969_v52 = vld [vmem:[%s6296_s1 + $0x638] sm:$0xff]  }
  0x92   :  { %4475 = vmatpush3.bf16.msra.mxu1 %v4917_v51  ;;  %v4968_v51 = vld [vmem:[%s6296_s1 + $0x6f8] sm:$0xff]  }
  0x93   :  { %4476 = vmatprep.subr.bf16.mxu1 %v4919_v53  ;;  %v4970_v53 = vld [vmem:[%s6296_s1 + $0x6b8] sm:$0xff]  }
  0x94   :  { %4455 = vmatpush3.bf16.msra.mxu0 %v4920_v54  ;;  %v829_v54 = vcombine.high %v813_v49, %v813_v49 }
  0x95   :  { %4456 = vmatprep.subr.bf16.mxu0 %v4922_v56  ;;  %v4972_v56 = vld [vmem:[%s6296_s1 + $0x6f0] sm:$0xff]  }
  0x96   :  { %4477 = vmatpush3.bf16.msra.mxu1 %v4921_v55  ;;  %v4971_v55 = vld [vmem:[%s6296_s1 + $0x670] sm:$0xff]  }
  0x97   :  { %4478 = vmatprep.subr.bf16.mxu1 %v4923_v57  ;;  %v4973_v57 = vld [vmem:[%s6296_s1 + $0x630] sm:$0xff]  }
  0x98   :  { %4457 = vmatpush3.bf16.msra.mxu0 %v4924_v58  ;;  %v4974_v58 = vld [vmem:[%s6296_s1 + $0x6b0] sm:$0xff]  }
  0x99   :  { %4458 = vmatprep.subr.bf16.mxu0 %v4926_v60  ;;  %v4976_v60 = vld [vmem:[%s6296_s1 + $0x6e8] sm:$0xff]  }
  0x9a   :  { %4479 = vmatpush3.bf16.msra.mxu1 %v4925_v59  ;;  %v4975_v59 = vld [vmem:[%s6296_s1 + $0x668] sm:$0xff]  }
  0x9b   :  { %4480 = vmatprep.subr.bf16.mxu1 %v4927_v62  ;;  %v4978_v62 = vld [vmem:[%s6296_s1 + $0x6a8] sm:$0xff]  }
  0x9c   :  { %4459 = vmatpush3.bf16.msra.mxu0 %v4928_v1  ;;  %v4981_v1 = vld [vmem:[%s6296_s1 + $0x620] sm:$0xff]  }
  0x9d   :  { %4460 = vmatprep.subr.bf16.mxu0 %v4930_v5  ;;  %v4985_v5 = vld [vmem:[%s6296_s1 + $0x618] sm:$0xff]  }
  0x9e   :  { %4481 = vmatpush3.bf16.msra.mxu1 %v4929_v2  ;;  %v4982_v2 = vld [vmem:[%s6296_s1 + $0x6a0] sm:$0xff]  }
  0x9f   :  { %4482 = vmatprep.subr.bf16.mxu1 %v4931_v6  ;;  %v4986_v6 = vld [vmem:[%s6296_s1 + $0x698] sm:$0xff]  }
  0xa0   :  { %4461 = vmatpush3.bf16.msra.mxu0 %v4932_v9  ;;  %v4989_v9 = vld [vmem:[%s6296_s1 + $0x610] sm:$0xff]  }
  0xa1   :  { %4490 = vmatprep.subr.bf16.mxu0 %v4934_v13  ;;  %v4992_v13 = vld [vmem:[%s6296_s1 + $0x6c8] sm:$0xff]  }
  0xa2   :  { %4483 = vmatpush3.bf16.msra.mxu1 %v4933_v10  ;;  %v4990_v10 = vld [vmem:[%s6296_s1 + $0x690] sm:$0xff]  }
  0xa3   :  { %3243 = vmatmul.mubr.bf16.vlgmr.msra.gmra.mxu0 %v806_v12  ;;  %4512 = vmatprep.subr.bf16.mxu1 %v4935_v14  ;;  %v31_v12 = vld [vmem:[%s6295_s0 + $0x18] sm:$0xff] }
  0xa4   :  { %4491 = vmatpush3.bf16.msra.mxu0 %v4936_v16  ;;  %3322 = vmatprep.mubr.bf16.mxu0 %v827_v15  ;;  %v839_v14 = vrot.slane %v31_v12, %v5284_v41  ;;  %v832_v15 = vcombine.high %v31_v12, %v31_v12  ;;  %v4993_v16 = vld [vmem:[%s6296_s1 + $0x608] sm:$0xff]   ;;  %v5030_v12 = vld [vmem:[%s6296_s1 + $0x780] sm:$0xff]  }
  0xa5   :  { %3283 = vmatmul.mubr.bf16.vlgmr.msra.gmra.mxu1 %v828_v18  ;;  %4492 = vmatprep.subr.bf16.mxu0 %v4938_v19 }
  0xa6   :  { %4513 = vmatpush3.bf16.msra.mxu1 %v4937_v17  ;;  %3362 = vmatprep.mubr.bf16.mxu1 %v831_v21  ;;  %v4995_v17 = vld [vmem:[%s6296_s1 + $0x640] sm:$0xff]   ;;  %v847_v18 = vcombine.high %v839_v14, %v839_v14  ;;  %v5888_v19 = vrot.slane %v832_v15, %v5284_v41  ;;  %v5033_v15 = vld [vmem:[%s6296_s1 + $0x8f8] sm:$0xff]  }
  0xa7   :  { %4514 = vmatprep.subr.bf16.mxu1 %v4939_v20  ;;  %v4994_v20 = vld [vmem:[%s6296_s1 + $0x688] sm:$0xff]   ;;  %v4996_v21 = vld [vmem:[%s6296_s1 + $0x6c0] sm:$0xff]  }
  0xa8   :  { %4493 = vmatpush3.bf16.msra.mxu0 %v4940_v22  ;;  %v4997_v22 = vld [vmem:[%s6296_s1 + $0x600] sm:$0xff]  }
  0xa9   :  { %4494 = vmatprep.subr.bf16.mxu0 %v4942_v24  ;;  %v848_v24 = vcombine.high %v5888_v19, %v5888_v19 }
  0xaa   :  { %4515 = vmatpush3.bf16.msra.mxu1 %v4941_v23  ;;  %v869_v23 = vrot.slane %v847_v18, %v5284_v41 }
  0xab   :  { %4516 = vmatprep.subr.bf16.mxu1 %v4943_v25  ;;  %v4998_v25 = vld [vmem:[%s6296_s1 + $0x680] sm:$0xff]  }
  0xac   :  { %4495 = vmatpush3.bf16.msra.mxu0 %v4944_v26  ;;  %v879_v26 = vcombine.high %v869_v23, %v869_v23 }
  0xad   :  { %4496 = vmatprep.subr.bf16.mxu0 %v4946_v28  ;;  %v4999_v28 = vld [vmem:[%s6296_s1 + $0x778] sm:$0xff]  }
  0xae   :  { %4517 = vmatpush3.bf16.msra.mxu1 %v4945_v27  ;;  %v855_v27 = vrot.slane %v839_v14, %v5284_v41  ;;  %v5032_v14 = vld [vmem:[%s6296_s1 + $0x878] sm:$0xff]  }
  0xaf   :  { %4518 = vmatprep.subr.bf16.mxu1 %v4947_v29  ;;  %v5000_v29 = vld [vmem:[%s6296_s1 + $0x7f8] sm:$0xff]  }
  0xb0   :  { %4497 = vmatpush3.bf16.msra.mxu0 %v4948_v30  ;;  %v876_v30 = vrot.slane %v848_v24, %v5284_v41 }
  0xb1   :  { %4498 = vmatprep.subr.bf16.mxu0 %v4950_v32  ;;  %v5002_v32 = vld [vmem:[%s6296_s1 + $0x7b8] sm:$0xff]  }
  0xb2   :  { %4519 = vmatpush3.bf16.msra.mxu1 %v4949_v31  ;;  %v5001_v31 = vld [vmem:[%s6296_s1 + $0x738] sm:$0xff]  }
  0xb3   :  { %4520 = vmatprep.subr.bf16.mxu1 %v4951_v33  ;;  %v877_v33 = vcombine.high %v855_v27, %v855_v27 }
  0xb4   :  { %4499 = vmatpush3.bf16.msra.mxu0 %v4952_v34  ;;  %v5003_v34 = vld [vmem:[%s6296_s1 + $0x770] sm:$0xff]  }
  0xb5   :  { %4500 = vmatprep.subr.bf16.mxu0 %v4954_v36  ;;  %v880_v36 = vcombine.high %v876_v30, %v876_v30 }
  0xb6   :  { %4521 = vmatpush3.bf16.msra.mxu1 %v4953_v35  ;;  %v5004_v35 = vld [vmem:[%s6296_s1 + $0x7f0] sm:$0xff]  }
  0xb7   :  { %4522 = vmatprep.subr.bf16.mxu1 %v4955_v37 }
  0xb8   :  { %4501 = vmatpush3.bf16.msra.mxu0 %v4956_v38  ;;  %v3931_v38 = vld [vmem:[%s6297_s2] ss:$0 sm:$0xff] }
  0xb9   :  { %4502 = vmatprep.subr.bf16.mxu0 %v4958_v40  ;;  %v5006_v40 = vld [vmem:[%s6296_s1 + $0x7b0] sm:$0xff]  }
  0xba   :  { %4523 = vmatpush3.bf16.msra.mxu1 %v4957_v39  ;;  %v5005_v39 = vld [vmem:[%s6296_s1 + $0x730] sm:$0xff]  }
  0xbb   :  { %4524 = vmatprep.subr.bf16.mxu1 %v4959_v42 }
  0xbc   :  { %4503 = vmatpush3.bf16.msra.mxu0 %v4960_v43 }
  0xbd   :  { %4504 = vmatprep.subr.bf16.mxu0 %v4962_v45 }
  0xbe   :  { %4525 = vmatpush3.bf16.msra.mxu1 %v4961_v44  ;;  %v5007_v44 = vld [vmem:[%s6296_s1 + $0x768] sm:$0xff]  }
  0xbf   :  { %4526 = vmatprep.subr.bf16.mxu1 %v4963_v46  ;;  %v5008_v46 = vld [vmem:[%s6296_s1 + $0x7e8] sm:$0xff]  }
  0xc0   :  { %4505 = vmatpush3.bf16.msra.mxu0 %v4964_v47 }
  0xc1   :  { %4534 = vmatprep.subr.bf16.mxu0 %v4967_v50 }
  0xc2   :  { %4527 = vmatpush3.bf16.msra.mxu1 %v4965_v48 }
  0xc3   :  { %3323 = vmatmul.mubr.bf16.vlgmr.msra.gmra.mxu0 %v813_v49  ;;  %4556 = vmatprep.subr.bf16.mxu1 %v4968_v51  ;;  %v5009_v49 = vld [vmem:[%s6296_s1 + $0x728] sm:$0xff]  }
  0xc4   :  { %4535 = vmatpush3.bf16.msra.mxu0 %v4969_v52  ;;  %3402 = vmatprep.mubr.bf16.mxu0 %v869_v23  ;;  %v5010_v52 = vld [vmem:[%s6296_s1 + $0x7a8] sm:$0xff]   ;;  %v5039_v23 = vld [vmem:[%s6296_s1 + $0x8b0] sm:$0xff]  }
  0xc5   :  { %3363 = vmatmul.mubr.bf16.vlgmr.msra.gmra.mxu1 %v829_v54  ;;  %4536 = vmatprep.subr.bf16.mxu0 %v4971_v55  ;;  %v5011_v55 = vld [vmem:[%s6296_s1 + $0x760] sm:$0xff]  }
  0xc6   :  { %4557 = vmatpush3.bf16.msra.mxu1 %v4970_v53  ;;  %3442 = vmatprep.mubr.bf16.mxu1 %v879_v26  ;;  %v5040_v26 = vld [vmem:[%s6296_s1 + $0x868] sm:$0xff]  }
  0xc7   :  { %4558 = vmatprep.subr.bf16.mxu1 %v4972_v56 }
  0xc8   :  { %4537 = vmatpush3.bf16.msra.mxu0 %v4973_v57  ;;  %v5012_v57 = vld [vmem:[%s6296_s1 + $0x7e0] sm:$0xff]  }
  0xc9   :  { %4538 = vmatprep.subr.bf16.mxu0 %v4975_v59  ;;  %v5013_v59 = vld [vmem:[%s6296_s1 + $0x720] sm:$0xff]  }
  0xca   :  { %4559 = vmatpush3.bf16.msra.mxu1 %v4974_v58 }
  0xcb   :  { %4560 = vmatprep.subr.bf16.mxu1 %v4976_v60  ;;  %v5014_v60 = vld [vmem:[%s6296_s1 + $0x7a0] sm:$0xff]  }
  0xcc   :  { %4539 = vmatpush3.bf16.msra.mxu0 %v4977_v61  ;;  %v5015_v61 = vld [vmem:[%s6296_s1 + $0x758] sm:$0xff]  }
  0xcd   :  { %4540 = vmatprep.subr.bf16.mxu0 %v4979_v63  ;;  %v5017_v63 = vld [vmem:[%s6296_s1 + $0x718] sm:$0xff]  }
  0xce   :  { %4561 = vmatpush3.bf16.msra.mxu1 %v4978_v62  ;;  %v5016_v62 = vld [vmem:[%s6296_s1 + $0x7d8] sm:$0xff]  }
  0xcf   :  { %4562 = vmatprep.subr.bf16.mxu1 %v4980_v0  ;;  %v5018_v0 = vld [vmem:[%s6296_s1 + $0x798] sm:$0xff]  }
  0xd0   :  { %4541 = vmatpush3.bf16.msra.mxu0 %v4981_v1  ;;  %v5019_v1 = vld [vmem:[%s6296_s1 + $0x750] sm:$0xff]  }
  0xd1   :  { %4542 = vmatprep.subr.bf16.mxu0 %v4983_v3  ;;  %v5021_v3 = vld [vmem:[%s6296_s1 + $0x710] sm:$0xff]  }
  0xd2   :  { %4563 = vmatpush3.bf16.msra.mxu1 %v4982_v2  ;;  %v5020_v2 = vld [vmem:[%s6296_s1 + $0x7d0] sm:$0xff]  }
  0xd3   :  { %4564 = vmatprep.subr.bf16.mxu1 %v4984_v4  ;;  %v5022_v4 = vld [vmem:[%s6296_s1 + $0x790] sm:$0xff]  }
  0xd4   :  { %4543 = vmatpush3.bf16.msra.mxu0 %v4985_v5  ;;  %v5023_v5 = vld [vmem:[%s6296_s1 + $0x748] sm:$0xff]  }
  0xd5   :  { %4544 = vmatprep.subr.bf16.mxu0 %v4987_v7  ;;  %v5025_v7 = vld [vmem:[%s6296_s1 + $0x708] sm:$0xff]  }
  0xd6   :  { %4565 = vmatpush3.bf16.msra.mxu1 %v4986_v6  ;;  %v5024_v6 = vld [vmem:[%s6296_s1 + $0x7c8] sm:$0xff]  }
  0xd7   :  { %4566 = vmatprep.subr.bf16.mxu1 %v4988_v8  ;;  %v5026_v8 = vld [vmem:[%s6296_s1 + $0x788] sm:$0xff]  }
  0xd8   :  { %4545 = vmatpush3.bf16.msra.mxu0 %v4989_v9  ;;  %v5027_v9 = vld [vmem:[%s6296_s1 + $0x740] sm:$0xff]  }
  0xd9   :  { %4546 = vmatprep.subr.bf16.mxu0 %v4991_v11  ;;  %v5029_v11 = vld [vmem:[%s6296_s1 + $0x700] sm:$0xff]  }
  0xda   :  { %4567 = vmatpush3.bf16.msra.mxu1 %v4990_v10  ;;  %v5028_v10 = vld [vmem:[%s6296_s1 + $0x7c0] sm:$0xff]  }
  0xdb   :  { %4568 = vmatprep.subr.bf16.mxu1 %v4992_v13  ;;  %v862_v13 = vrot.slane %v5888_v19, %v5284_v41  ;;  %v5036_v19 = vld [vmem:[%s6296_s1 + $0x870] sm:$0xff]  }
  0xdc   :  { %4547 = vmatpush3.bf16.msra.mxu0 %v4993_v16  ;;  %v5034_v16 = vld [vmem:[%s6296_s1 + $0x838] sm:$0xff]  }
  0xdd   :  { %4548 = vmatprep.subr.bf16.mxu0 %v4995_v17  ;;  %v5035_v17 = vld [vmem:[%s6296_s1 + $0x8b8] sm:$0xff]   ;;  %v878_v18 = vcombine.high %v862_v13, %v862_v13 }
  0xde   :  { %4569 = vmatpush3.bf16.msra.mxu1 %v4994_v20  ;;  %v5037_v20 = vld [vmem:[%s6296_s1 + $0x8f0] sm:$0xff]  }
  0xdf   :  { %4570 = vmatprep.subr.bf16.mxu1 %v4996_v21 }
  0xe0   :  { %4549 = vmatpush3.bf16.msra.mxu0 %v4997_v22  ;;  %v5038_v22 = vld [vmem:[%s6296_s1 + $0x830] sm:$0xff]  }
  0xe1   :  { %4578 = vmatprep.subr.bf16.mxu0 %v4999_v28  ;;  %v5041_v28 = vld [vmem:[%s6296_s1 + $0x8e8] sm:$0xff]  }
  0xe2   :  { %4571 = vmatpush3.bf16.msra.mxu1 %v4998_v25 }
  0xe3   :  { %v4286_v37 = vpop.f32.mrf.mxu0  ;;  %3403 = vmatmul.mubr.bf16.vlgmr.msra.gmra.mxu0 %v855_v27  ;;  %4600 = vmatprep.subr.bf16.mxu1 %v5000_v29 }
  0xe4   :  { %4579 = vmatpush3.bf16.msra.mxu0 %v5001_v31  ;;  %3482 = vmatprep.mubr.bf16.mxu0 %v876_v30  ;;  %v4308_v42 = vpop.f32.mrf.mxu1  ;;  %v5042_v31 = vld [vmem:[%s6296_s1 + $0x828] sm:$0xff]  }
  0xe5   :  { %3443 = vmatmul.mubr.bf16.vlgmr.msra.gmra.mxu1 %v877_v33  ;;  %v4287_v43 = vpop.f32.mrf.mxu0  ;;  %4580 = vmatprep.subr.bf16.mxu0 %v5003_v34  ;;  %v5043_v34 = vld [vmem:[%s6296_s1 + $0x8a8] sm:$0xff]  }
  0xe6   :  { %4601 = vmatpush3.bf16.msra.mxu1 %v5002_v32  ;;  %v4288_v45 = vadd.f32 %v4287_v43, %v4286_v37  ;;  %3522 = vmatprep.mubr.bf16.mxu1 %v880_v36  ;;  %v4309_v47 = vpop.f32.mrf.mxu1  ;;  %v5044_v37 = vld [vmem:[%s6296_s1 + $0x860] sm:$0xff]  }
  0xe7   :  { %v4289_v48 = vpop.f32.mrf.mxu0  ;;  %4602 = vmatprep.subr.bf16.mxu1 %v5004_v35  ;;  %v4310_v51 = vadd.f32 %v4309_v47, %v4308_v42  ;;  %v5046_v42 = vld [vmem:[%s6296_s1 + $0x820] sm:$0xff]   ;;  %v5051_v47 = vld [vmem:[%s6296_s1 + $0x898] sm:$0xff]  }
  0xe8   :  { %v2925_v50 = vadd.f32 %v4288_v45, %v3931_v38  ;;  %4581 = vmatpush3.bf16.msra.mxu0 %v5005_v39  ;;  %v4311_v53 = vpop.f32.mrf.mxu1  ;;  %v5045_v39 = vld [vmem:[%s6296_s1 + $0x8e0] sm:$0xff]   ;;  %v5049_v45 = vld [vmem:[%s6296_s1 + $0x8d8] sm:$0xff]   ;;  %v5052_v48 = vld [vmem:[%s6296_s1 + $0x850] sm:$0xff]  }
  0xe9   :  { %v4290_v54 = vpop.f32.mrf.mxu0  ;;  %4582 = vmatprep.subr.bf16.mxu0 %v5007_v44  ;;  %v5047_v43 = vld [vmem:[%s6296_s1 + $0x8a0] sm:$0xff]   ;;  %v5048_v44 = vld [vmem:[%s6296_s1 + $0x858] sm:$0xff]   ;;  %v5057_v53 = vld [vmem:[%s6296_s1 + $0x8c8] sm:$0xff]  }
  0xea   :  { %v5949_v56 = vadd.f32 %v4310_v51, %v2925_v50  ;;  %4603 = vmatpush3.bf16.msra.mxu1 %v5006_v40  ;;  %v4312_v58 = vpop.f32.mrf.mxu1  ;;  %v5054_v50 = vld [vmem:[%s6296_s1 + $0x810] sm:$0xff]   ;;  %v32_v54 = vld [vmem:[%s6295_s0 + $0x20] sm:$0xff] }
  0xeb   :  { %4604 = vmatprep.subr.bf16.mxu1 %v5008_v46  ;;  %v5050_v46 = vld [vmem:[%s6296_s1 + $0x818] sm:$0xff]   ;;  %v5055_v51 = vld [vmem:[%s6296_s1 + $0x890] sm:$0xff]   ;;  %v5059_v58 = vld [vmem:[%s6296_s1 + $0x888] sm:$0xff]  }
  0xec   :  { %4583 = vmatpush3.bf16.msra.mxu0 %v5009_v49  ;;  %v5053_v49 = vld [vmem:[%s6296_s1 + $0x8d0] sm:$0xff]  }
  0xed   :  { %4584 = vmatprep.subr.bf16.mxu0 %v5011_v55  ;;  %v5058_v55 = vld [vmem:[%s6296_s1 + $0x808] sm:$0xff]  }
  0xee   :  { %4605 = vmatpush3.bf16.msra.mxu1 %v5010_v52  ;;  %v5056_v52 = vld [vmem:[%s6296_s1 + $0x848] sm:$0xff]  }
  0xef   :  { %4606 = vmatprep.subr.bf16.mxu1 %v5012_v57  ;;  %v881_v57 = vcombine.high %v32_v54, %v32_v54 }
  0xf0   :  { %4585 = vmatpush3.bf16.msra.mxu0 %v5013_v59  ;;  %v5060_v59 = vld [vmem:[%s6296_s1 + $0x840] sm:$0xff]  }
  0xf1   :  { %4586 = vmatprep.subr.bf16.mxu0 %v5015_v61  ;;  %v6105_v61 = vrot.slane %v881_v57, %v5284_v41 }
  0xf2   :  { %4607 = vmatpush3.bf16.msra.mxu1 %v5014_v60 }
  0xf3   :  { %4608 = vmatprep.subr.bf16.mxu1 %v5016_v62  ;;  %v5061_v62 = vld [vmem:[%s6296_s1 + $0x8c0] sm:$0xff]  }
  0xf4   :  { %4587 = vmatpush3.bf16.msra.mxu0 %v5017_v63  ;;  %v5062_v63 = vld [vmem:[%s6296_s1 + $0x800] sm:$0xff]  }
  0xf5   :  { %4588 = vmatprep.subr.bf16.mxu0 %v5019_v1  ;;  %v897_v1 = vcombine.high %v6105_v61, %v6105_v61 }
  0xf6   :  { %4609 = vmatpush3.bf16.msra.mxu1 %v5018_v0 }
  0xf7   :  { %4610 = vmatprep.subr.bf16.mxu1 %v5020_v2  ;;  %v5063_v2 = vld [vmem:[%s6296_s1 + $0x880] sm:$0xff]  }
  0xf8   :  { %4589 = vmatpush3.bf16.msra.mxu0 %v5021_v3 }
  0xf9   :  { %4590 = vmatprep.subr.bf16.mxu0 %v5023_v5  ;;  %v5064_v5 = vld [vmem:[%s6296_s1 + $0x978] sm:$0xff]  }
  0xfa   :  { %4611 = vmatpush3.bf16.msra.mxu1 %v5022_v4 }
  0xfb   :  { %4612 = vmatprep.subr.bf16.mxu1 %v5024_v6  ;;  %v5065_v6 = vld [vmem:[%s6296_s1 + $0x9f8] sm:$0xff]  }
  0xfc   :  { %4591 = vmatpush3.bf16.msra.mxu0 %v5025_v7  ;;  %v925_v7 = vrot.slane %v897_v1, %v5284_v41 }
  0xfd   :  { %4592 = vmatprep.subr.bf16.mxu0 %v5027_v9  ;;  %v5067_v9 = vld [vmem:[%s6296_s1 + $0x9b8] sm:$0xff]  }
  0xfe   :  { %4613 = vmatpush3.bf16.msra.mxu1 %v5026_v8  ;;  %v5066_v8 = vld [vmem:[%s6296_s1 + $0x938] sm:$0xff]  }
  0xff   :  { %4614 = vmatprep.subr.bf16.mxu1 %v5028_v10 }
 0x100   :  { %4593 = vmatpush3.bf16.msra.mxu0 %v5029_v11  ;;  %v5068_v11 = vld [vmem:[%s6296_s1 + $0x970] sm:$0xff]  }
 0x101   :  { %4622 = vmatprep.subr.bf16.mxu0 %v5032_v14 }
 0x102   :  { %4615 = vmatpush3.bf16.msra.mxu1 %v5030_v12  ;;  %v5069_v12 = vld [vmem:[%s6296_s1 + $0x9f0] sm:$0xff]  }
 0x103   :  { %v4330_v21 = vpop.f32.mrf.mxu0  ;;  %3483 = vmatmul.mubr.bf16.vlgmr.msra.gmra.mxu0 %v862_v13  ;;  %4644 = vmatprep.subr.bf16.mxu1 %v5033_v15  ;;  %v929_v13 = vcombine.high %v925_v7, %v925_v7  ;;  %v5070_v15 = vld [vmem:[%s6296_s1 + $0x930] sm:$0xff]  }
 0x104   :  { %4623 = vmatpush3.bf16.msra.mxu0 %v5034_v16  ;;  %v4352_v24 = vpop.f32.mrf.mxu1  ;;  %v5071_v16 = vld [vmem:[%s6296_s1 + $0x9b0] sm:$0xff]  }
 0x105   :  { %3523 = vmatmul.mubr.bf16.vlgmr.msra.gmra.mxu1 %v878_v18  ;;  %v4331_v25 = vpop.f32.mrf.mxu0  ;;  %4624 = vmatprep.subr.bf16.mxu0 %v5036_v19  ;;  %v5072_v19 = vld [vmem:[%s6296_s1 + $0x968] sm:$0xff]  }
 0x106   :  { %4645 = vmatpush3.bf16.msra.mxu1 %v5035_v17  ;;  %v4332_v27 = vadd.f32 %v4331_v25, %v4330_v21  ;;  %v4353_v29 = vpop.f32.mrf.mxu1  ;;  %v5073_v21 = vld [vmem:[%s6296_s1 + $0x9e8] sm:$0xff]  }
 0x107   :  { %v4333_v30 = vpop.f32.mrf.mxu0  ;;  %4646 = vmatprep.subr.bf16.mxu1 %v5037_v20  ;;  %v4354_v33 = vadd.f32 %v4353_v29, %v4352_v24  ;;  %v5074_v24 = vld [vmem:[%s6296_s1 + $0x928] sm:$0xff]  }
 0x108   :  { %v3005_v32 = vadd.f32 %v4332_v27, %v5949_v56  ;;  %4625 = vmatpush3.bf16.msra.mxu0 %v5038_v22  ;;  %v4355_v35 = vpop.f32.mrf.mxu1  ;;  %v888_v56 = vrot.slane %v32_v54, %v5284_v41  ;;  %v5075_v27 = vld [vmem:[%s6296_s1 + $0x9a8] sm:$0xff]   ;;  %v5076_v30 = vld [vmem:[%s6296_s1 + $0x960] sm:$0xff]  }
 0x109   :  { %v4334_v36 = vpop.f32.mrf.mxu0  ;;  %4626 = vmatprep.subr.bf16.mxu0 %v5040_v26  ;;  %v5079_v35 = vld [vmem:[%s6296_s1 + $0x9a0] sm:$0xff]  }
 0x10a   :  { %v6050_v38 = vadd.f32 %v4354_v33, %v3005_v32  ;;  %4647 = vmatpush3.bf16.msra.mxu1 %v5039_v23  ;;  %v4356_v40 = vpop.f32.mrf.mxu1  ;;  %v896_v60 = vcombine.high %v888_v56, %v888_v56  ;;  %v904_v4 = vrot.slane %v888_v56, %v5284_v41  ;;  %v5077_v32 = vld [vmem:[%s6296_s1 + $0x9e0] sm:$0xff]   ;;  %v5080_v36 = vld [vmem:[%s6296_s1 + $0x958] sm:$0xff]  }
 0x10b   :  { %4648 = vmatprep.subr.bf16.mxu1 %v5041_v28  ;;  %v5084_v40 = vld [vmem:[%s6296_s1 + $0x950] sm:$0xff]  }
 0x10c   :  { %4627 = vmatpush3.bf16.msra.mxu0 %v5042_v31  ;;  %v918_v0 = vrot.slane %v896_v60, %v5284_v41  ;;  %v926_v10 = vcombine.high %v904_v4, %v904_v4 }
 0x10d   :  { %4628 = vmatprep.subr.bf16.mxu0 %v5044_v37  ;;  %v5081_v37 = vld [vmem:[%s6296_s1 + $0x9d8] sm:$0xff]  }
 0x10e   :  { %4649 = vmatpush3.bf16.msra.mxu1 %v5043_v34  ;;  %3562 = vmatprep.mubr.bf16.mxu0 %v918_v0  ;;  %v928_v3 = vcombine.high %v918_v0, %v918_v0  ;;  %v5078_v34 = vld [vmem:[%s6296_s1 + $0x920] sm:$0xff]  }
 0x10f   :  { %4650 = vmatprep.subr.bf16.mxu1 %v5045_v39  ;;  %v5083_v39 = vld [vmem:[%s6296_s1 + $0x998] sm:$0xff]  }
 0x110   :  { %4629 = vmatpush3.bf16.msra.mxu0 %v5046_v42  ;;  %3602 = vmatprep.mubr.bf16.mxu1 %v928_v3  ;;  %v5085_v42 = vld [vmem:[%s6296_s1 + $0x9d0] sm:$0xff]  }
 0x111   :  { %4630 = vmatprep.subr.bf16.mxu0 %v5048_v44  ;;  %v5087_v44 = vld [vmem:[%s6296_s1 + $0x990] sm:$0xff]  }
 0x112   :  { %4651 = vmatpush3.bf16.msra.mxu1 %v5047_v43  ;;  %v5086_v43 = vld [vmem:[%s6296_s1 + $0x910] sm:$0xff]  }
 0x113   :  { %4652 = vmatprep.subr.bf16.mxu1 %v5049_v45  ;;  %v5088_v45 = vld [vmem:[%s6296_s1 + $0x948] sm:$0xff]  }
 0x114   :  { %4631 = vmatpush3.bf16.msra.mxu0 %v5050_v46  ;;  %v5089_v46 = vld [vmem:[%s6296_s1 + $0x9c8] sm:$0xff]  }
 0x115   :  { %4632 = vmatprep.subr.bf16.mxu0 %v5052_v48  ;;  %v5092_v48 = vld [vmem:[%s6296_s1 + $0x940] sm:$0xff]  }
 0x116   :  { %4653 = vmatpush3.bf16.msra.mxu1 %v5051_v47  ;;  %v5090_v47 = vld [vmem:[%s6296_s1 + $0x908] sm:$0xff]  }
 0x117   :  { %4654 = vmatprep.subr.bf16.mxu1 %v5053_v49  ;;  %v5091_v49 = vld [vmem:[%s6296_s1 + $0x988] sm:$0xff]  }
 0x118   :  { %4633 = vmatpush3.bf16.msra.mxu0 %v5054_v50  ;;  %v5093_v50 = vld [vmem:[%s6296_s1 + $0x9c0] sm:$0xff]  }
 0x119   :  { %4634 = vmatprep.subr.bf16.mxu0 %v5056_v52  ;;  %v5095_v52 = vld [vmem:[%s6296_s1 + $0x980] sm:$0xff]  }
 0x11a   :  { %4655 = vmatpush3.bf16.msra.mxu1 %v5055_v51  ;;  %v5094_v51 = vld [vmem:[%s6296_s1 + $0x900] sm:$0xff]  }
 0x11b   :  { %4656 = vmatprep.subr.bf16.mxu1 %v5057_v53  ;;  %v911_v53 = vrot.slane %v6105_v61, %v5284_v41 }
 0x11c   :  { %4635 = vmatpush3.bf16.msra.mxu0 %v5058_v55 }
 0x11d   :  { %4636 = vmatprep.subr.bf16.mxu0 %v5060_v59  ;;  %v927_v54 = vcombine.high %v911_v53, %v911_v53 }
 0x11e   :  { %4657 = vmatpush3.bf16.msra.mxu1 %v5059_v58 }
 0x11f   :  { %4658 = vmatprep.subr.bf16.mxu1 %v5061_v62 }
 0x120   :  { %4637 = vmatpush3.bf16.msra.mxu0 %v5062_v63 }
 0x121   :  { %4666 = vmatprep.subr.bf16.mxu0 %v5064_v5 }
 0x122   :  { %4659 = vmatpush3.bf16.msra.mxu1 %v5063_v2 }
 0x123   :  { %v4374_v14 = vpop.f32.mrf.mxu0  ;;  %3563 = vmatmul.mubr.bf16.vlgmr.msra.gmra.mxu0 %v904_v4  ;;  %4688 = vmatprep.subr.bf16.mxu1 %v5065_v6 }
 0x124   :  { %4667 = vmatpush3.bf16.msra.mxu0 %v5066_v8  ;;  %3642 = vmatprep.mubr.bf16.mxu0 %v925_v7 }
 0x125   :  { %v4396_v17 = vpop.f32.mrf.mxu1  ;;  %3603 = vmatmul.mubr.bf16.vlgmr.msra.gmra.mxu1 %v926_v10  ;;  %v4375_v18 = vpop.f32.mrf.mxu0  ;;  %4668 = vmatprep.subr.bf16.mxu0 %v5068_v11 }
 0x126   :  { %4689 = vmatpush3.bf16.msra.mxu1 %v5067_v9  ;;  %v4376_v20 = vadd.f32 %v4375_v18, %v4374_v14  ;;  %3682 = vmatprep.mubr.bf16.mxu1 %v929_v13 }
 0x127   :  { %v4397_v22 = vpop.f32.mrf.mxu1  ;;  %v4377_v23 = vpop.f32.mrf.mxu0  ;;  %4690 = vmatprep.subr.bf16.mxu1 %v5069_v12 }
 0x128   :  { %v3085_v25 = vadd.f32 %v4376_v20, %v6050_v38  ;;  %v4398_v26 = vadd.f32 %v4397_v22, %v4396_v17  ;;  %4669 = vmatpush3.bf16.msra.mxu0 %v5070_v15  ;;  %v5082_v38 = vld [vmem:[%s6296_s1 + $0x918] sm:$0xff]  }
 0x129   :  { %v4399_v28 = vpop.f32.mrf.mxu1  ;;  %v4378_v29 = vpop.f32.mrf.mxu0  ;;  %4670 = vmatprep.subr.bf16.mxu0 %v5072_v19 }
 0x12a   :  { %v3125_v31 = vadd.f32 %v4398_v26, %v3085_v25  ;;  %4691 = vmatpush3.bf16.msra.mxu1 %v5071_v16 }
 0x12b   :  { %v4400_v33 = vpop.f32.mrf.mxu1  ;;  %4692 = vmatprep.subr.bf16.mxu1 %v5073_v21 }
 0x12c   :  { %4671 = vmatpush3.bf16.msra.mxu0 %v5074_v24 }
 0x12d   :  { %4672 = vmatprep.subr.bf16.mxu0 %v5076_v30 }
 0x12e   :  { %4693 = vmatpush3.bf16.msra.mxu1 %v5075_v27 }
 0x12f   :  { %4694 = vmatprep.subr.bf16.mxu1 %v5077_v32 }
 0x130   :  { %4673 = vmatpush3.bf16.msra.mxu0 %v5078_v34 }
 0x131   :  { %4674 = vmatprep.subr.bf16.mxu0 %v5080_v36 }
 0x132   :  { %4695 = vmatpush3.bf16.msra.mxu1 %v5079_v35 }
 0x133   :  { %4696 = vmatprep.subr.bf16.mxu1 %v5081_v37 }
 0x134   :  { %4675 = vmatpush3.bf16.msra.mxu0 %v5082_v38 }
 0x135   :  { %4676 = vmatprep.subr.bf16.mxu0 %v5084_v40 }
 0x136   :  { %4697 = vmatpush3.bf16.msra.mxu1 %v5083_v39 }
 0x137   :  { %4698 = vmatprep.subr.bf16.mxu1 %v5085_v42 }
 0x138   :  { %4677 = vmatpush3.bf16.msra.mxu0 %v5086_v43 }
 0x139   :  { %4678 = vmatprep.subr.bf16.mxu0 %v5088_v45 }
 0x13a   :  { %4699 = vmatpush3.bf16.msra.mxu1 %v5087_v44 }
 0x13b   :  { %4700 = vmatprep.subr.bf16.mxu1 %v5089_v46 }
 0x13c   :  { %4679 = vmatpush3.bf16.msra.mxu0 %v5090_v47 }
 0x13d   :  { %4680 = vmatprep.subr.bf16.mxu0 %v5092_v48 }
 0x13e   :  { %4701 = vmatpush3.bf16.msra.mxu1 %v5091_v49 }
 0x13f   :  { %4702 = vmatprep.subr.bf16.mxu1 %v5093_v50 }
 0x140   :  { %4681 = vmatpush3.bf16.msra.mxu0 %v5094_v51 }
 0x141   :  { %12 = vsyncpa [#allocation3], 0  ;;  %v5097_v14 = vld [vmem:[%s6298_s3 + $0x38] sm:$0xff]   ;;  %v5136_v15 = vmov 0.0   ;;  %v5098_v16 = vld [vmem:[%s6298_s3 + $0x30] sm:$0xff]   ;;  %vm5137_vm0 = vmmov 0  }
 0x142   :  { %4703 = vmatpush3.bf16.msra.mxu1 %v5095_v52  ;;  %4728 = vmatprep.subr.bf16.mxu0 %v5136_v15  ;;  %v5099_v17 = vld [vmem:[%s6298_s3 + $0x28] sm:$0xff]   ;;  %v5100_v18 = vld [vmem:[%s6298_s3 + $0x20] sm:$0xff]   ;;  %v5101_v19 = vld [vmem:[%s6298_s3 + $0x18] sm:$0xff]   ;;  %s5138_s28 = smov [#allocation2]  }
 0x143   :  { %v4418_v55 = vpop.f32.mrf.mxu0  ;;  %3643 = vmatmul.mubr.bf16.vlgmr.msra.gmra.mxu0 %v911_v53  ;;  %4748 = vmatprep.subr.bf16.mxu1 %v5136_v15  ;;  %v5102_v23 = vld [vmem:[%s6298_s3 + $0x10] sm:$0xff]   ;;  %v5104_v34 = vld [vmem:[%s6298_s3] sm:$0xff]   ;;  %v5105_v35 = vld [vmem:[%s6300_s5 + $0x38] sm:$0xff]   ;;  %s3923_s29 = sshll.u32 %s5138_s28, 4  ;;  %s3924_s29 = int_to_ptr.vmem [resolvable:$true] %s3923_s29 }
 0x144   :  { %4729 = vmatpush3.bf16.msra.mxu0 %v5097_v14  ;;  %4744 = vmatprep.mubr.msk.bf16.mxu0 %vm5137_vm0, %v5136_v15  ;;  %v5106_v36 = vld [vmem:[%s6300_s5 + $0x30] sm:$0xff]   ;;  %v5107_v37 = vld [vmem:[%s6300_s5 + $0x28] sm:$0xff]   ;;  %v5108_v38 = vld [vmem:[%s6300_s5 + $0x20] sm:$0xff]   ;;  %p5118_p1 = scmp.lt.s32.totalorder %s3924_s29, %s3924_s29 }
 0x145   :  { %v4440_v56 = vpop.f32.mrf.mxu1  ;;  %3683 = vmatmul.mubr.bf16.vlgmr.msra.gmra.mxu1 %v927_v54  ;;  %v4419_v57 = vpop.f32.mrf.mxu0  ;;  %4730 = vmatprep.subr.bf16.mxu0 %v5136_v15  ;;  %v5109_v39 = vld [vmem:[%s6300_s5 + $0x18] sm:$0xff]   ;;  %v5110_v40 = vld [vmem:[%s6300_s5 + $0x10] sm:$0xff]  }
 0x146   :  { %v4420_v58 = vadd.f32 %v4419_v57, %v4418_v55  ;;  %4764 = vmatprep.mubr.msk.bf16.mxu1 %vm5137_vm0, %v5136_v15  ;;  %4749 = vmatpush3.bf16.msra.mxu1 %v5105_v35 }
 0x147   :  { %v4441_v59 = vpop.f32.mrf.mxu1  ;;  %v4421_v60 = vpop.f32.mrf.mxu0  ;;  %4750 = vmatprep.subr.bf16.mxu1 %v5136_v15 }
 0x148   :  { %v3165_v62 = vadd.f32 %v4420_v58, %v3125_v31  ;;  %v4442_v63 = vadd.f32 %v4441_v59, %v4440_v56  ;;  %4731 = vmatpush3.bf16.msra.mxu0 %v5098_v16  ;;  %v5103_v31 = vld [vmem:[%s6298_s3 + $0x8] sm:$0xff]  }
 0x149   :  { %v4443_v0 = vpop.f32.mrf.mxu1  ;;  %v4422_v1 = vpop.f32.mrf.mxu0  ;;  %4732 = vmatprep.subr.bf16.mxu0 %v5136_v15 }
 0x14a   :  { %v3205_v2 = vadd.f32 %v4442_v63, %v3165_v62  ;;  %4751 = vmatpush3.bf16.msra.mxu1 %v5106_v36 }
 0x14b   :  { %v4444_v41 = vpop.f32.mrf.mxu1  ;;  %4752 = vmatprep.subr.bf16.mxu1 %v5136_v15 }
 0x14c   :  { %4733 = vmatpush3.bf16.msra.mxu0 %v5099_v17 }
 0x14d   :  { %4734 = vmatprep.subr.bf16.mxu0 %v5136_v15 }
 0x14e   :  { %4753 = vmatpush3.bf16.msra.mxu1 %v5107_v37 }
 0x14f   :  { %4754 = vmatprep.subr.bf16.mxu1 %v5136_v15 }
 0x150   :  { %4735 = vmatpush3.bf16.msra.mxu0 %v5100_v18 }
 0x151   :  { %4736 = vmatprep.subr.bf16.mxu0 %v5136_v15 }
 0x152   :  { %4755 = vmatpush3.bf16.msra.mxu1 %v5108_v38 }
 0x153   :  { %4756 = vmatprep.subr.bf16.mxu1 %v5136_v15 }
 0x154   :  { %4737 = vmatpush3.bf16.msra.mxu0 %v5101_v19 }
 0x155   :  { %4738 = vmatprep.subr.bf16.mxu0 %v5136_v15 }
 0x156   :  { %4757 = vmatpush3.bf16.msra.mxu1 %v5109_v39 }
 0x157   :  { %4758 = vmatprep.subr.bf16.mxu1 %v5136_v15 }
 0x158   :  { %4739 = vmatpush3.bf16.msra.mxu0 %v5102_v23 }
 0x159   :  { %4740 = vmatprep.subr.bf16.mxu0 %v5136_v15 }
 0x15a   :  { %4759 = vmatpush3.bf16.msra.mxu1 %v5110_v40 }
 0x15b   :  { %4760 = vmatprep.subr.bf16.mxu1 %v5136_v15 }
 0x15c   :  { %4741 = vmatpush3.bf16.msra.mxu0 %v5103_v31 }
 0x15d   :  { %4742 = vmatprep.subr.bf16.mxu0 %v5136_v15 }
 0x160   :  { %4743 = vmatpush3.bf16.msra.mxu0 %v5104_v34 }
 0x163   :  { %v4462_v61 = vpop.f32.mrf.mxu0 }
 0x165   :  { %v4484_v3 = vpop.f32.mrf.mxu1  ;;  %v4463_v4 = vpop.f32.mrf.mxu0 }
 0x166   :  { %v4464_v5 = vadd.f32 %v4463_v4, %v4462_v61 }
 0x167   :  { %v4485_v6 = vpop.f32.mrf.mxu1  ;;  %v4465_v7 = vpop.f32.mrf.mxu0 }
 0x168   :  { %v3245_v8 = vadd.f32 %v4464_v5, %v3205_v2  ;;  %v4486_v9 = vadd.f32 %v4485_v6, %v4484_v3 }
 0x169   :  { %v4487_v10 = vpop.f32.mrf.mxu1  ;;  %v4466_v11 = vpop.f32.mrf.mxu0 }
 0x16a   :  { %v3285_v12 = vadd.f32 %v4486_v9, %v3245_v8 }
 0x16b   :  { %v4488_v13 = vpop.f32.mrf.mxu1 }
 0x183   :  { %v4506_v20 = vpop.f32.mrf.mxu0 }
 0x185   :  { %v4528_v21 = vpop.f32.mrf.mxu1  ;;  %v4507_v22 = vpop.f32.mrf.mxu0 }
 0x186   :  { %v4508_v24 = vadd.f32 %v4507_v22, %v4506_v20 }
 0x187   :  { %v4529_v25 = vpop.f32.mrf.mxu1  ;;  %v4509_v26 = vpop.f32.mrf.mxu0 }
 0x188   :  { %v3325_v27 = vadd.f32 %v4508_v24, %v3285_v12  ;;  %v4530_v28 = vadd.f32 %v4529_v25, %v4528_v21 }
 0x189   :  { %v4531_v29 = vpop.f32.mrf.mxu1  ;;  %v4510_v30 = vpop.f32.mrf.mxu0 }
 0x18a   :  { %v3365_v32 = vadd.f32 %v4530_v28, %v3325_v27  ;;  %v5111_v28 = vld [vmem:[%s6300_s5 + $0x8] sm:$0xff]   ;;  %v5112_v29 = vld [vmem:[%s6300_s5] sm:$0xff]  }
 0x18b   :  { %v4532_v33 = vpop.f32.mrf.mxu1  ;;  %4761 = vmatpush3.bf16.msra.mxu1 %v5111_v28  ;;  %v4252_v30 = vld [vmem:[%s6299_s4] ss:$0 sm:$0xff]  ;;  %s5113_s4 = scalar_lea.vmem %s3924_s29, 32 }
 0x18c   :  { %4762 = vmatprep.subr.bf16.mxu1 %v5136_v15  ;;  %v4261_v15 = vld [vmem:[%s6301_s6] ss:$0 sm:$0xff]  ;;  %p5114_p0 = scmp.ne.s32.totalorder %s3924_s29, %s5113_s4  ;;  %p5119_p2 = scmp.lt.s32.totalorder %s5113_s4, %s5113_s4 }
 0x18e   :  { %p5120_p3 = por %p5119_p2, %p5118_p1 }
 0x18f   :  { %4763 = vmatpush3.bf16.msra.mxu1 %v5112_v29 }
 0x190   :  { %p5121_p4 = pnand %p5120_p3, %p5114_p0 }
 0x1a3   :  { %v4550_v42 = vpop.f32.mrf.mxu0 }
 0x1a5   :  { %v4572_v43 = vpop.f32.mrf.mxu1  ;;  %v4551_v44 = vpop.f32.mrf.mxu0 }
 0x1a6   :  { %v4552_v45 = vadd.f32 %v4551_v44, %v4550_v42 }
 0x1a7   :  { %v4573_v46 = vpop.f32.mrf.mxu1  ;;  %v4553_v47 = vpop.f32.mrf.mxu0 }
 0x1a8   :  { %v3405_v48 = vadd.f32 %v4552_v45, %v3365_v32  ;;  %v4574_v49 = vadd.f32 %v4573_v46, %v4572_v43 }
 0x1a9   :  { %v4575_v50 = vpop.f32.mrf.mxu1  ;;  %v4554_v51 = vpop.f32.mrf.mxu0 }
 0x1aa   :  { %v3445_v52 = vadd.f32 %v4574_v49, %v3405_v48 }
 0x1ab   :  { %v4576_v53 = vpop.f32.mrf.mxu1 }
 0x1c3   :  { %v4594_v54 = vpop.f32.mrf.mxu0 }
 0x1c5   :  { %v4616_v55 = vpop.f32.mrf.mxu1  ;;  %v4595_v56 = vpop.f32.mrf.mxu0 }
 0x1c6   :  { %v4596_v5 = vadd.f32 %v4595_v56, %v4594_v54 }
 0x1c7   :  { %v4617_v57 = vpop.f32.mrf.mxu1  ;;  %v4597_v58 = vpop.f32.mrf.mxu0 }
 0x1c8   :  { %v3485_v6 = vadd.f32 %v4596_v5, %v3445_v52  ;;  %v4618_v7 = vadd.f32 %v4617_v57, %v4616_v55 }
 0x1c9   :  { %v4619_v59 = vpop.f32.mrf.mxu1  ;;  %v4598_v60 = vpop.f32.mrf.mxu0 }
 0x1ca   :  { %v3525_v9 = vadd.f32 %v4618_v7, %v3485_v6 }
 0x1cb   :  { %v4620_v62 = vpop.f32.mrf.mxu1 }
 0x1e3   :  { %v4638_v63 = vpop.f32.mrf.mxu0 }
 0x1e5   :  { %v4660_v0 = vpop.f32.mrf.mxu1  ;;  %v4639_v1 = vpop.f32.mrf.mxu0 }
 0x1e6   :  { %v4640_v8 = vadd.f32 %v4639_v1, %v4638_v63 }
 0x1e7   :  { %v4661_v2 = vpop.f32.mrf.mxu1  ;;  %v4641_v41 = vpop.f32.mrf.mxu0 }
 0x1e8   :  { %v3565_v10 = vadd.f32 %v4640_v8, %v3525_v9  ;;  %v4662_v11 = vadd.f32 %v4661_v2, %v4660_v0 }
 0x1e9   :  { %v4663_v61 = vpop.f32.mrf.mxu1  ;;  %v4642_v3 = vpop.f32.mrf.mxu0 }
 0x1ea   :  { %v3605_v16 = vadd.f32 %v4662_v11, %v3565_v10 }
 0x1eb   :  { %v4664_v4 = vpop.f32.mrf.mxu1 }
 0x203   :  { %v4682_v12 = vpop.f32.mrf.mxu0 }
 0x205   :  { %v4704_v13 = vpop.f32.mrf.mxu1  ;;  %v4683_v14 = vpop.f32.mrf.mxu0 }
 0x206   :  { %v4684_v17 = vadd.f32 %v4683_v14, %v4682_v12 }
 0x207   :  { %v4705_v18 = vpop.f32.mrf.mxu1  ;;  %v4685_v19 = vpop.f32.mrf.mxu0 }
 0x208   :  { %v3645_v20 = vadd.f32 %v4684_v17, %v3605_v16  ;;  %v4706_v21 = vadd.f32 %v4705_v18, %v4704_v13 }
 0x209   :  { %v4707_v22 = vpop.f32.mrf.mxu1  ;;  %v4686_v23 = vpop.f32.mrf.mxu0 }
 0x20a   :  { %v3685_v24 = vadd.f32 %v4706_v21, %v3645_v20 }
 0x20b   :  { %v4708_v25 = vpop.f32.mrf.mxu1 }
 0x20c   :  { %v3690_v26 = vmax.f32 %v3685_v24, 0.0 }
 0x20e   :  { %v3691_v27 = vpack.c.bf16 %v3690_v26, %v3690_v26 }
 0x210   :  { %4745 = vmatmul.mubr.bf16.vlgmr.msra.gmra.mxu0 %v3691_v27 }
 0x2d0   :  { %v3797_v31 = vpop.f32.mrf.mxu0 }
 0x2d1   :  { %v3798_v32 = vadd.f32 %v4252_v30, %v3797_v31 }
 0x2d2   :  { %v4746_v33 = vpop.f32.mrf.mxu0 }
 0x2d3   :  { %v3803_v34 = vmax.f32 %v3798_v32, 0.0 }
 0x2d4   :  { %v3800_v35 = vpop.f32.mrf.mxu0 }
 0x2d5   :  { %v3804_v36 = vpack.c.bf16 %v3803_v34, %v3803_v34 }
 0x2d6   :  { %v4747_v37 = vpop.f32.mrf.mxu0 }
 0x2d7   :  { %4765 = vmatmul.mubr.bf16.vlgmr.msra.gmra.mxu1 %v3804_v36 }
 0x397   :  { %v3910_v38 = vpop.f32.mrf.mxu1 }
 0x398   :  { %v3911_v39 = vadd.f32 %v4261_v15, %v3910_v38 }
 0x399   :  { %v4766_v40 = vpop.f32.mrf.mxu1 }
 0x39a   :  { %3916 = vst [vmem:[#allocation2] sm:$0x3] %v3911_v39 }
 0x39b   :  { %v3913_v42 = vpop.f32.mrf.mxu1 }
 0x39c   :  { %5124 = shalt.err (!%p5121_p4)
}
 0x39d   :  { %3926 = dma.vmem_to_hbm [thread:$0]  %s3924_s29, 32, %s6302_s7, [#allocation3]   ;;  %v4767_v43 = vpop.f32.mrf.mxu1 }
 0x39e   :  { %5133 = dma.done.wait [#allocation3], 32  }
 0x39f   :  { %5134 = vsyncadd [#allocation3], 4294967264 }
 0x3a0   :  { %3930 = vsyncpa [#allocation3], 1 }

// kernel: simple_cnn_forward.4
= control target key start
LH: loop header
LB: loop body
LE: loop exit
PB: predicated region body
PF: predicated region fallthrough
CT: control target
= control target key end

     0   :  { %s10846_s12 = smov 0   ;;  %s13683_s0 = inlined_call_operand.vmem [shape: bf16[2,112,768], index: 0, kind: input, shape index: {}]   ;;  %s13684_s1 = inlined_call_operand.vmem [shape: bf16[10,768,128], index: 1, kind: input, shape index: {}]   ;;  %s13685_s2 = inlined_call_operand.vmem [shape: f32[1,128], index: 2, kind: input, shape index: {}]   ;;  %s13686_s3 = inlined_call_operand.vmem [shape: bf16[2,5,8,128], index: 3, kind: output, shape index: {}]  }
   0x1 LB: > { %s7215_s13 = sadd.s32 4294967295, %s10824_s12   ;;  %p7219_p0 = scmp.ge.s32.totalorder %s10824_s12, 1  ;;  %s10824_s12 = sphi %s10846_s12, %s13_s12  }
   0x2   : > { %p137_p1 = scmp.lt.s32.totalorder %s10824_s12, 3 }
   0x4   : > { %p138_p2 = pnand %p7219_p0, %p137_p1 }
   0x6   : > { %141 = sbr.rel (%p138_p2) target bundleno = 856 (0x358), region = 32 }
   0xb   : > { %v10124_v0 = vld [vmem:[%s13684_s1 + $0x1f8] sm:$0xff]   ;;  %v10128_v4 = vld [vmem:[%s13684_s1 + $0x1f0] sm:$0xff]   ;;  %v10132_v8 = vld [vmem:[%s13684_s1 + $0x1e8] sm:$0xff]   ;;  %p161_p3 = scmp.lt.s32.totalorder %s7215_s13, 1 }
   0xc   : > { %v10125_v1 = vld [vmem:[%s13684_s1 + $0x278] sm:$0xff]   ;;  %8734 = vmatprep.subr.bf16.mxu0 %v10124_v0  ;;  %v10129_v5 = vld [vmem:[%s13684_s1 + $0x270] sm:$0xff]   ;;  %v10133_v9 = vld [vmem:[%s13684_s1 + $0x268] sm:$0xff]  }
   0xd   : > { %v10126_v2 = vld [vmem:[%s13684_s1 + $0x1b8] sm:$0xff]   ;;  %8780 = vmatprep.subr.bf16.mxu1 %v10125_v1  ;;  %v10130_v6 = vld [vmem:[%s13684_s1 + $0x1b0] sm:$0xff]   ;;  %v10134_v10 = vld [vmem:[%s13684_s1 + $0x1a8] sm:$0xff]   ;;  %s13720_s13 = smov (!%p161_p3, %s7215_s13), 1 }
   0xe   : > { %v10127_v3 = vld [vmem:[%s13684_s1 + $0x238] sm:$0xff]   ;;  %8735 = vmatpush3.bf16.msra.mxu0 %v10126_v2  ;;  %v10131_v7 = vld [vmem:[%s13684_s1 + $0x230] sm:$0xff]   ;;  %v10135_v11 = vld [vmem:[%s13684_s1 + $0x228] sm:$0xff]   ;;  %s10114_s16 = smul.u32 336, %s13720_s13 }
   0xf   : > { %8781 = vmatpush3.bf16.msra.mxu1 %v10127_v3  ;;  %8736 = vmatprep.subr.bf16.mxu0 %v10128_v4  ;;  %v10136_v12 = vld [vmem:[%s13684_s1 + $0x1e0] sm:$0xff]   ;;  %v10140_v16 = vld [vmem:[%s13684_s1 + $0x1d8] sm:$0xff]   ;;  %v10144_v20 = vld [vmem:[%s13684_s1 + $0x1d0] sm:$0xff]  }
  0x10   : > { %8782 = vmatprep.subr.bf16.mxu1 %v10129_v5  ;;  %v10137_v13 = vld [vmem:[%s13684_s1 + $0x260] sm:$0xff]   ;;  %v10141_v17 = vld [vmem:[%s13684_s1 + $0x258] sm:$0xff]   ;;  %v10145_v21 = vld [vmem:[%s13684_s1 + $0x250] sm:$0xff]   ;;  %s10954_s27 = scalar_lea.vmem %s13683_s0, %s10114_s16  ;;  %s10115_s16 = smul.u32 20, %s13720_s13 }
  0x11   : > { %v10138_v14 = vld [vmem:[%s13684_s1 + $0x1a0] sm:$0xff]   ;;  %v10142_v18 = vld [vmem:[%s13684_s1 + $0x198] sm:$0xff]   ;;  %v10146_v22 = vld [vmem:[%s13684_s1 + $0x190] sm:$0xff]  }
  0x12   : > { %8737 = vmatpush3.bf16.msra.mxu0 %v10130_v6  ;;  %v10139_v15 = vld [vmem:[%s13684_s1 + $0x220] sm:$0xff]   ;;  %v10143_v19 = vld [vmem:[%s13684_s1 + $0x218] sm:$0xff]   ;;  %v10147_v23 = vld [vmem:[%s13684_s1 + $0x210] sm:$0xff]   ;;  %s13647_s18 = scalar_lea.vmem %s13686_s3, %s10115_s16 }
  0x13   : > { %8783 = vmatpush3.bf16.msra.mxu1 %v10131_v7  ;;  %8738 = vmatprep.subr.bf16.mxu0 %v10132_v8  ;;  %v10148_v24 = vld [vmem:[%s13684_s1 + $0x1c8] sm:$0xff]   ;;  %v10152_v28 = vld [vmem:[%s13684_s1 + $0x1c0] sm:$0xff]   ;;  %v10963_v32 = vld [vmem:[%s10954_s27 + $0x18] sm:$0xff] }
  0x14   : > { %8784 = vmatprep.subr.bf16.mxu1 %v10133_v9  ;;  %v10149_v25 = vld [vmem:[%s13684_s1 + $0x248] sm:$0xff]   ;;  %v10153_v29 = vld [vmem:[%s13684_s1 + $0x240] sm:$0xff]   ;;  %v10966_v33 = vld [vmem:[%s10954_s27 + $0x30] sm:$0xff] }
  0x15   : > { %v10150_v26 = vld [vmem:[%s13684_s1 + $0x188] sm:$0xff]   ;;  %v10154_v30 = vld [vmem:[%s13684_s1 + $0x180] sm:$0xff]   ;;  %v10973_v35 = vcombine.high %v10963_v32, %v10966_v33  ;;  %v179_v36 = vld [vmem:[%s10954_s27 + $0x38] sm:$0xff]  ;;  %v10978_v37 = vcombine.low %v10963_v32, %v10966_v33 }
  0x16   : > { %8739 = vmatpush3.bf16.msra.mxu0 %v10134_v10  ;;  %v10151_v27 = vld [vmem:[%s13684_s1 + $0x208] sm:$0xff]   ;;  %v10155_v31 = vld [vmem:[%s13684_s1 + $0x200] sm:$0xff]   ;;  %v10160_v40 = vld [vmem:[%s13684_s1 + $0x2f8] sm:$0xff]  }
  0x17   : > { %8785 = vmatpush3.bf16.msra.mxu1 %v10135_v11  ;;  %8740 = vmatprep.subr.bf16.mxu0 %v10136_v12  ;;  %v10969_v34 = vld [vmem:[%s10954_s27 + $0x20] sm:$0xff]  ;;  %v10161_v41 = vld [vmem:[%s13684_s1 + $0x2b8] sm:$0xff]   ;;  %v10164_v44 = vld [vmem:[%s13684_s1 + $0x2f0] sm:$0xff]  }
  0x18   : > { %8786 = vmatprep.subr.bf16.mxu1 %v10137_v13  ;;  %v10981_v38 = vcombine.high %v10969_v34, %v179_v36  ;;  %v10984_v39 = vcombine.low %v10969_v34, %v179_v36  ;;  %965 = vmatprep.mubr.bf16.mxu0 %v10973_v35  ;;  %v10162_v42 = vld [vmem:[%s13684_s1 + $0x78] sm:$0xff]   ;;  %v10165_v45 = vld [vmem:[%s13684_s1 + $0x2b0] sm:$0xff]   ;;  %v11009_v46 = vld [vmem:[%s10954_s27 + $0x48] sm:$0xff] }
  0x19   : > { %v10163_v43 = vld [vmem:[%s13684_s1 + $0x38] sm:$0xff]   ;;  %v11012_v47 = vld [vmem:[%s10954_s27 + $0x60] sm:$0xff]  ;;  %v182_v49 = vld [vmem:[%s10954_s27 + $0x50] sm:$0xff] }
  0x1a   : > { %8741 = vmatpush3.bf16.msra.mxu0 %v10138_v14  ;;  %1038 = vmatprep.mubr.bf16.mxu1 %v10981_v38  ;;  %v11016_v48 = vcombine.high %v11009_v46, %v11012_v47  ;;  %v185_v50 = vld [vmem:[%s10954_s27 + $0x68] sm:$0xff]  ;;  %v11022_v51 = vcombine.low %v11009_v46, %v11012_v47  ;;  %v10168_v53 = vld [vmem:[%s13684_s1 + $0x70] sm:$0xff]   ;;  %v11031_v55 = vcombine.high %v179_v36, %v182_v49  ;;  %v11055_v62 = vld [vmem:[%s10954_s27 + $0x78] sm:$0xff] }
  0x1b   : > { %8787 = vmatpush3.bf16.msra.mxu1 %v10139_v15  ;;  %8742 = vmatprep.subr.bf16.mxu0 %v10140_v16  ;;  %v11024_v52 = vcombine.high %v182_v49, %v185_v50  ;;  %v11029_v54 = vcombine.low %v182_v49, %v185_v50  ;;  %v11033_v56 = vcombine.low %v179_v36, %v182_v49  ;;  %v10171_v57 = vld [vmem:[%s13684_s1 + $0x30] sm:$0xff]   ;;  %v10172_v58 = vld [vmem:[%s13684_s1 + $0x2e8] sm:$0xff]   ;;  %v188_v0 = vld [vmem:[%s10954_s27 + $0x80] sm:$0xff] }
  0x1c   : > { %8788 = vmatprep.subr.bf16.mxu1 %v10141_v17  ;;  %v10173_v59 = vld [vmem:[%s13684_s1 + $0x2a8] sm:$0xff]   ;;  %v11058_v63 = vld [vmem:[%s10954_s27 + $0x90] sm:$0xff]  ;;  %v191_v1 = vld [vmem:[%s10954_s27 + $0x98] sm:$0xff]  ;;  %v11080_v8 = vcombine.high %v185_v50, %v188_v0  ;;  %v11082_v9 = vcombine.low %v185_v50, %v188_v0 }
  0x1d   : > { %v10174_v60 = vld [vmem:[%s13684_s1 + $0x68] sm:$0xff]   ;;  %v11064_v2 = vcombine.high %v11055_v62, %v11058_v63  ;;  %v11066_v3 = vcombine.high %v188_v0, %v191_v1  ;;  %v10178_v4 = vld [vmem:[%s13684_s1 + $0x2e0] sm:$0xff]   ;;  %v11073_v5 = vcombine.low %v11055_v62, %v11058_v63  ;;  %v11075_v6 = vcombine.low %v188_v0, %v191_v1  ;;  %v10184_v12 = vld [vmem:[%s13684_s1 + $0x2d8] sm:$0xff]  }
  0x1e   : > { %8743 = vmatpush3.bf16.msra.mxu0 %v10142_v18  ;;  %v10175_v61 = vld [vmem:[%s13684_s1 + $0x28] sm:$0xff]   ;;  %v10181_v7 = vld [vmem:[%s13684_s1 + $0x2a0] sm:$0xff]   ;;  %v10185_v13 = vld [vmem:[%s13684_s1 + $0x298] sm:$0xff]  }
  0x1f   : > { %8789 = vmatpush3.bf16.msra.mxu1 %v10143_v19  ;;  %8744 = vmatprep.subr.bf16.mxu0 %v10144_v20  ;;  %v10182_v10 = vld [vmem:[%s13684_s1 + $0x60] sm:$0xff]   ;;  %v10186_v14 = vld [vmem:[%s13684_s1 + $0x58] sm:$0xff]   ;;  %v11104_v15 = vld [vmem:[%s10954_s27 + $0xa8] sm:$0xff] }
  0x20   : > { %8790 = vmatprep.subr.bf16.mxu1 %v10145_v21  ;;  %v10183_v11 = vld [vmem:[%s13684_s1 + $0x20] sm:$0xff]   ;;  %v194_v17 = vld [vmem:[%s10954_s27 + $0xb0] sm:$0xff]  ;;  %v197_v19 = vld [vmem:[%s10954_s27 + $0xc8] sm:$0xff] }
  0x21   : > { %v11107_v16 = vld [vmem:[%s10954_s27 + $0xc0] sm:$0xff]  ;;  %v11119_v21 = vcombine.high %v194_v17, %v197_v19  ;;  %v395_v36 = vld [vmem:[%s10954_s27 + $0xf0] sm:$0xff] }
  0x22   : > { %8745 = vmatpush3.bf16.msra.mxu0 %v10146_v22  ;;  %v11112_v18 = vcombine.high %v11104_v15, %v11107_v16  ;;  %v11117_v20 = vcombine.low %v11104_v15, %v11107_v16  ;;  %v10189_v22 = vld [vmem:[%s13684_s1 + $0x18] sm:$0xff]   ;;  %v10207_v0 = vld [vmem:[%s13684_s1] sm:$0xff]  }
  0x23   : > { %8791 = vmatpush3.bf16.msra.mxu1 %v10147_v23  ;;  %8746 = vmatprep.subr.bf16.mxu0 %v10148_v24  ;;  %v11124_v23 = vcombine.low %v194_v17, %v197_v19  ;;  %v11126_v24 = vcombine.high %v191_v1, %v194_v17 }
  0x24   : > { %8792 = vmatprep.subr.bf16.mxu1 %v10149_v25  ;;  %v11128_v25 = vcombine.low %v191_v1, %v194_v17  ;;  %v11195_v1 = vld [vmem:[%s10954_s27 + $0x28] sm:$0xff]  ;;  %v10213_v17 = vld [vmem:[%s13684_s1 + $0xb8] sm:$0xff]  }
  0x26   : > { %8747 = vmatpush3.bf16.msra.mxu0 %v10150_v26  ;;  %v10192_v26 = vld [vmem:[%s13684_s1 + $0x2d0] sm:$0xff]  }
  0x27   : > { %8793 = vmatpush3.bf16.msra.mxu1 %v10151_v27  ;;  %8748 = vmatprep.subr.bf16.mxu0 %v10152_v28  ;;  %v10193_v27 = vld [vmem:[%s13684_s1 + $0x290] sm:$0xff]  }
  0x28   : > { %8794 = vmatprep.subr.bf16.mxu1 %v10153_v29  ;;  %v10194_v28 = vld [vmem:[%s13684_s1 + $0x50] sm:$0xff]  }
  0x29   : > { %v10195_v29 = vld [vmem:[%s13684_s1 + $0x10] sm:$0xff]  }
  0x2a   : > { %8749 = vmatpush3.bf16.msra.mxu0 %v10154_v30  ;;  %v10196_v30 = vld [vmem:[%s13684_s1 + $0x2c8] sm:$0xff]  }
  0x2b   : > { %8795 = vmatpush3.bf16.msra.mxu1 %v10155_v31  ;;  %8826 = vmatprep.subr.bf16.mxu0 %v10160_v40  ;;  %v11150_v31 = vld [vmem:[%s10954_s27 + $0xd8] sm:$0xff] }
  0x2c   : > { %8872 = vmatprep.subr.bf16.mxu1 %v10162_v42  ;;  %v11154_v40 = vcombine.high %v11150_v31, %v395_v36  ;;  %v396_v42 = vld [vmem:[%s10954_s27 + $0xf8] sm:$0xff] }
  0x2d   : > { %966 = vmatmul.mubr.bf16.vlgmr.msra.gmra.mxu0 %v10978_v37 }
  0x2e   : > { %1039 = vmatmul.mubr.bf16.vlgmr.msra.gmra.mxu1 %v10984_v39  ;;  %8827 = vmatpush3.bf16.msra.mxu0 %v10161_v41  ;;  %v200_v41 = vld [vmem:[%s10954_s27 + $0xe0] sm:$0xff] }
  0x2f   : > { %8873 = vmatpush3.bf16.msra.mxu1 %v10163_v43  ;;  %8828 = vmatprep.subr.bf16.mxu0 %v10164_v44  ;;  %v11158_v43 = vcombine.high %v200_v41, %v396_v42  ;;  %v10199_v44 = vld [vmem:[%s13684_s1 + $0x288] sm:$0xff]   ;;  %v11166_v49 = vcombine.high %v197_v19, %v200_v41  ;;  %v11168_v50 = vcombine.low %v197_v19, %v200_v41  ;;  %v10214_v19 = vld [vmem:[%s13684_s1 + $0x178] sm:$0xff]  }
  0x30   : > { %973 = vmatprep.mubr.bf16.mxu0 %v11016_v48  ;;  %1046 = vmatprep.mubr.bf16.mxu1 %v11024_v52 }
  0x31   : > { %8874 = vmatprep.subr.bf16.mxu1 %v10168_v53  ;;  %v11171_v53 = vcombine.low %v200_v41, %v396_v42  ;;  %v10223_v42 = vld [vmem:[%s13684_s1 + $0x130] sm:$0xff]  }
  0x32   : > { %8829 = vmatpush3.bf16.msra.mxu0 %v10165_v45  ;;  %v11164_v45 = vcombine.low %v11150_v31, %v395_v36  ;;  %v10220_v36 = vld [vmem:[%s13684_s1 + $0x170] sm:$0xff]  }
  0x33   : > { %8875 = vmatpush3.bf16.msra.mxu1 %v10171_v57  ;;  %8830 = vmatprep.subr.bf16.mxu0 %v10172_v58  ;;  %v10202_v57 = vld [vmem:[%s13684_s1 + $0x48] sm:$0xff]  }
  0x34   : > { %8876 = vmatprep.subr.bf16.mxu1 %v10174_v60  ;;  %v10203_v58 = vld [vmem:[%s13684_s1 + $0x8] sm:$0xff]   ;;  %v10205_v60 = vld [vmem:[%s13684_s1 + $0x280] sm:$0xff]  }
  0x35   : > { %974 = vmatmul.mubr.bf16.gmra.mxu0 %v11022_v51 }
  0x36   : > { %1047 = vmatmul.mubr.bf16.gmra.mxu1 %v11029_v54  ;;  %8831 = vmatpush3.bf16.msra.mxu0 %v10173_v59  ;;  %v10204_v59 = vld [vmem:[%s13684_s1 + $0x2c0] sm:$0xff]  }
  0x37   : > { %8877 = vmatpush3.bf16.msra.mxu1 %v10175_v61  ;;  %981 = vmatprep.mubr.bf16.mxu0 %v11064_v2  ;;  %v10206_v61 = vld [vmem:[%s13684_s1 + $0x40] sm:$0xff]  }
  0x38   : > { %1054 = vmatprep.mubr.bf16.mxu1 %v11066_v3  ;;  %8832 = vmatprep.subr.bf16.mxu0 %v10178_v4  ;;  %v11198_v4 = vld [vmem:[%s10954_s27 + $0x40] sm:$0xff] }
  0x39   : > { %8878 = vmatprep.subr.bf16.mxu1 %v10182_v10  ;;  %v11203_v10 = vcombine.high %v11195_v1, %v11198_v4 }
  0x3a   : > { %8833 = vmatpush3.bf16.msra.mxu0 %v10181_v7  ;;  %v172_v7 = vld [vmem:[%s10954_s27] sm:$0xff] }
  0x3b   : > { %8879 = vmatpush3.bf16.msra.mxu1 %v10183_v11  ;;  %8834 = vmatprep.subr.bf16.mxu0 %v10184_v12  ;;  %v11206_v11 = vcombine.high %v172_v7, %v10963_v32  ;;  %v11210_v12 = vcombine.low %v11195_v1, %v11198_v4 }
  0x3c   : > { %8880 = vmatprep.subr.bf16.mxu1 %v10186_v14  ;;  %v11216_v14 = vcombine.low %v172_v7, %v10963_v32  ;;  %v11231_v32 = vcombine.high %v10966_v33, %v11009_v46  ;;  %v10230_v7 = vld [vmem:[%s13684_s1 + $0xe0] sm:$0xff]  }
  0x3d   : > { %982 = vmatmul.mubr.bf16.gmra.mxu0 %v11073_v5 }
  0x3e   : > { %1055 = vmatmul.mubr.bf16.gmra.mxu1 %v11075_v6  ;;  %8835 = vmatpush3.bf16.msra.mxu0 %v10185_v13  ;;  %v10212_v13 = vld [vmem:[%s13684_s1 + $0xf8] sm:$0xff]  }
  0x3f   : > { %989 = vmatprep.mubr.bf16.mxu0 %v11112_v18  ;;  %1062 = vmatprep.mubr.bf16.mxu1 %v11119_v21 }
  0x40   : > { %8881 = vmatpush3.bf16.msra.mxu1 %v10189_v22  ;;  %8836 = vmatprep.subr.bf16.mxu0 %v10192_v26  ;;  %v10215_v22 = vld [vmem:[%s13684_s1 + $0x138] sm:$0xff]   ;;  %v10216_v26 = vld [vmem:[%s13684_s1 + $0xf0] sm:$0xff]  }
  0x41   : > { %8882 = vmatprep.subr.bf16.mxu1 %v10194_v28  ;;  %v11242_v28 = vld [vmem:[%s10954_s27 + $0x58] sm:$0xff] }
  0x42   : > { %8837 = vmatpush3.bf16.msra.mxu0 %v10193_v27  ;;  %v10217_v27 = vld [vmem:[%s13684_s1 + $0xb0] sm:$0xff]  }
  0x43   : > { %8838 = vmatprep.subr.bf16.mxu0 %v10196_v30 }
  0x44   : > { %8883 = vmatpush3.bf16.msra.mxu1 %v10195_v29  ;;  %v11245_v29 = vld [vmem:[%s10954_s27 + $0x70] sm:$0xff] }
  0x45   : > { %990 = vmatmul.mubr.bf16.gmra.mxu0 %v11117_v20  ;;  %8884 = vmatprep.subr.bf16.mxu1 %v10202_v57  ;;  %v11249_v30 = vcombine.high %v11242_v28, %v11245_v29  ;;  %v11257_v41 = vcombine.low %v11242_v28, %v11245_v29  ;;  %v10224_v57 = vld [vmem:[%s13684_s1 + $0xe8] sm:$0xff]  }
  0x46   : > { %1063 = vmatmul.mubr.bf16.gmra.mxu1 %v11124_v23  ;;  %997 = vmatprep.mubr.bf16.mxu0 %v11154_v40 }
  0x47   : > { %1070 = vmatprep.mubr.bf16.mxu1 %v11158_v43  ;;  %8839 = vmatpush3.bf16.msra.mxu0 %v10199_v44  ;;  %v11265_v44 = vcombine.low %v10966_v33, %v11009_v46  ;;  %v10226_v33 = vld [vmem:[%s13684_s1 + $0x168] sm:$0xff]  }
  0x48   : > { %8885 = vmatpush3.bf16.msra.mxu1 %v10203_v58  ;;  %8840 = vmatprep.subr.bf16.mxu0 %v10204_v59  ;;  %v10225_v58 = vld [vmem:[%s13684_s1 + $0xa8] sm:$0xff]   ;;  %v11275_v59 = vcombine.high %v11012_v47, %v11055_v62 }
  0x49   : > { %8886 = vmatprep.subr.bf16.mxu1 %v10206_v61  ;;  %v10227_v46 = vld [vmem:[%s13684_s1 + $0x128] sm:$0xff]   ;;  %v11288_v61 = vld [vmem:[%s10954_s27 + $0xa0] sm:$0xff] }
  0x4b   : > { %8841 = vmatpush3.bf16.msra.mxu0 %v10205_v60  ;;  %v11285_v60 = vld [vmem:[%s10954_s27 + $0x88] sm:$0xff] }
  0x4c   : > { %8887 = vmatpush3.bf16.msra.mxu1 %v10207_v0  ;;  %8918 = vmatprep.subr.bf16.mxu0 %v10212_v13  ;;  %v11293_v0 = vcombine.high %v11285_v60, %v11288_v61  ;;  %v10233_v13 = vld [vmem:[%s13684_s1 + $0xa0] sm:$0xff]  }
  0x4d   : > { %998 = vmatmul.mubr.bf16.gmra.mxu0 %v11164_v45  ;;  %8964 = vmatprep.subr.bf16.mxu1 %v10214_v19  ;;  %v11308_v19 = vcombine.low %v11285_v60, %v11288_v61 }
  0x4e   : > { %1071 = vmatmul.mubr.bf16.gmra.mxu1 %v11171_v53  ;;  %1111 = vmatprep.mubr.bf16.mxu0 %v11203_v10 }
  0x4f   : > { %1541 = vmatprep.mubr.bf16.mxu1 %v11206_v11 }
  0x55   : > { %1112 = vmatmul.mubr.bf16.vlgmr.msra.gmra.mxu0 %v11210_v12 }
  0x56   : > { %1542 = vmatmul.mubr.bf16.vlgmr.msra.gmra.mxu1 %v11216_v14  ;;  %8919 = vmatpush3.bf16.msra.mxu0 %v10213_v17  ;;  %v10234_v17 = vld [vmem:[%s13684_s1 + $0x160] sm:$0xff]  }
  0x57   : > { %8965 = vmatpush3.bf16.msra.mxu1 %v10215_v22  ;;  %8920 = vmatprep.subr.bf16.mxu0 %v10216_v26  ;;  %v10235_v22 = vld [vmem:[%s13684_s1 + $0x120] sm:$0xff]   ;;  %v11315_v26 = vcombine.low %v11012_v47, %v11055_v62  ;;  %v10238_v47 = vld [vmem:[%s13684_s1 + $0x158] sm:$0xff]  }
  0x58   : > { %1549 = vmatprep.mubr.bf16.mxu1 %v11231_v32  ;;  %1119 = vmatprep.mubr.bf16.mxu0 %v11249_v30  ;;  %v11332_v62 = vld [vmem:[%s10954_s27 + $0xb8] sm:$0xff] }
  0x59   : > { %8966 = vmatprep.subr.bf16.mxu1 %v10220_v36  ;;  %v10237_v36 = vld [vmem:[%s13684_s1 + $0x98] sm:$0xff]  }
  0x5a   : > { %8921 = vmatpush3.bf16.msra.mxu0 %v10217_v27  ;;  %v10236_v27 = vld [vmem:[%s13684_s1 + $0xd8] sm:$0xff]  }
  0x5b   : > { %8967 = vmatpush3.bf16.msra.mxu1 %v10223_v42  ;;  %8922 = vmatprep.subr.bf16.mxu0 %v10224_v57  ;;  %v11325_v42 = vcombine.high %v11058_v63, %v11104_v15  ;;  %v11335_v57 = vld [vmem:[%s10954_s27 + $0xd0] sm:$0xff] }
  0x5c   : > { %8968 = vmatprep.subr.bf16.mxu1 %v10226_v33  ;;  %v10241_v33 = vld [vmem:[%s13684_s1 + $0x118] sm:$0xff]  }
  0x5d   : > { %1120 = vmatmul.mubr.bf16.gmra.mxu0 %v11257_v41 }
  0x5e   : > { %1550 = vmatmul.mubr.bf16.gmra.mxu1 %v11265_v44  ;;  %8923 = vmatpush3.bf16.msra.mxu0 %v10225_v58  ;;  %v11340_v58 = vcombine.high %v11332_v62, %v11335_v57 }
  0x5f   : > { %1557 = vmatprep.mubr.bf16.mxu1 %v11275_v59  ;;  %8969 = vmatpush3.bf16.msra.mxu1 %v10227_v46  ;;  %v10244_v46 = vld [vmem:[%s13684_s1 + $0xd0] sm:$0xff]  }
  0x60   : > { %1127 = vmatprep.mubr.bf16.mxu0 %v11293_v0  ;;  %8924 = vmatprep.subr.bf16.mxu0 %v10230_v7  ;;  %v10245_v7 = vld [vmem:[%s13684_s1 + $0x90] sm:$0xff]  }
  0x61   : > { %8970 = vmatprep.subr.bf16.mxu1 %v10234_v17  ;;  %v10246_v17 = vld [vmem:[%s13684_s1 + $0x150] sm:$0xff]  }
  0x62   : > { %8925 = vmatpush3.bf16.msra.mxu0 %v10233_v13  ;;  %v11355_v13 = vcombine.low %v11332_v62, %v11335_v57 }
  0x63   : > { %8971 = vmatpush3.bf16.msra.mxu1 %v10235_v22  ;;  %8926 = vmatprep.subr.bf16.mxu0 %v10236_v27  ;;  %v11362_v22 = vcombine.low %v11058_v63, %v11104_v15  ;;  %v10247_v27 = vld [vmem:[%s13684_s1 + $0x110] sm:$0xff]   ;;  %v10251_v15 = vld [vmem:[%s13684_s1 + $0x88] sm:$0xff]  }
  0x64   : > { %8972 = vmatprep.subr.bf16.mxu1 %v10238_v47  ;;  %v11371_v47 = vld [vmem:[%s10954_s27 + $0xe8] sm:$0xff] }
  0x65   : > { %1128 = vmatmul.mubr.bf16.gmra.mxu0 %v11308_v19  ;;  %13693 = vst [vmem:[#allocation2_spill] sm:$0xff] %v11362_v22 }
  0x66   : > { %1558 = vmatmul.mubr.bf16.gmra.mxu1 %v11315_v26  ;;  %8927 = vmatpush3.bf16.msra.mxu0 %v10237_v36  ;;  %v10248_v36 = vld [vmem:[%s13684_s1 + $0xc8] sm:$0xff]  }
  0x67   : > { %1565 = vmatprep.mubr.bf16.mxu1 %v11325_v42  ;;  %1135 = vmatprep.mubr.bf16.mxu0 %v11340_v58 }
  0x68   : > { %8973 = vmatpush3.bf16.msra.mxu1 %v10241_v33  ;;  %8928 = vmatprep.subr.bf16.mxu0 %v10244_v46  ;;  %v11375_v33 = vcombine.high %v11107_v16, %v11150_v31  ;;  %v397_v46 = vld [vmem:[%s10954_s27 + $0x100] sm:$0xff] }
  0x69   : > { %8974 = vmatprep.subr.bf16.mxu1 %v10246_v17  ;;  %v11380_v63 = vcombine.high %v11371_v47, %v397_v46  ;;  %v10255_v17 = vld [vmem:[%s13684_s1 + $0x108] sm:$0xff]  }
  0x6a   : > { %8929 = vmatpush3.bf16.msra.mxu0 %v10245_v7  ;;  %13694 = vst [vmem:[#allocation3_spill] sm:$0xff] %v11375_v33  ;;  %v10254_v7 = vld [vmem:[%s13684_s1 + $0x148] sm:$0xff]  }
  0x6b   : > { %8930 = vmatprep.subr.bf16.mxu0 %v10248_v36  ;;  %13695 = vst [vmem:[#allocation4_spill] sm:$0xff] %v11380_v63  ;;  %v11398_v36 = vcombine.low %v11371_v47, %v397_v46  ;;  %v173_v46 = vld [vmem:[%s10954_s27 + $0x8] sm:$0xff] }
  0x6c   : > { %8975 = vmatpush3.bf16.msra.mxu1 %v10247_v27  ;;  %v10256_v27 = vld [vmem:[%s13684_s1 + $0xc0] sm:$0xff]  }
  0x6d   : > { %1136 = vmatmul.mubr.bf16.gmra.mxu0 %v11355_v13  ;;  %8976 = vmatprep.subr.bf16.mxu1 %v10254_v7  ;;  %v10259_v7 = vld [vmem:[%s13684_s1 + $0x100] sm:$0xff]  }
  0x6e   : > { %1566 = vmatmul.mubr.bf16.gmra.mxu1 %v11362_v22  ;;  %1143 = vmatprep.mubr.bf16.mxu0 %v11380_v63  ;;  %v10257_v63 = vld [vmem:[%s13684_s1 + $0x80] sm:$0xff]   ;;  %v174_v22 = vld [vmem:[%s10954_s27 + $0x10] sm:$0xff] }
  0x6f   : > { %1573 = vmatprep.mubr.bf16.mxu1 %v11375_v33  ;;  %8931 = vmatpush3.bf16.msra.mxu0 %v10251_v15  ;;  %v11405_v33 = vcombine.low %v11107_v16, %v11150_v31  ;;  %v10258_v15 = vld [vmem:[%s13684_s1 + $0x140] sm:$0xff]   ;;  %v10264_v16 = vld [vmem:[%s13684_s1 + $0x978] sm:$0xff]   ;;  %v11423_v31 = vcombine.high %v174_v22, %v11195_v1 }
  0x70   : > { %8977 = vmatpush3.bf16.msra.mxu1 %v10255_v17  ;;  %8932 = vmatprep.subr.bf16.mxu0 %v10256_v27  ;;  %v11416_v17 = vcombine.high %v173_v46, %v10969_v34  ;;  %v11432_v27 = vcombine.low %v173_v46, %v10969_v34  ;;  %v10269_v34 = vld [vmem:[%s13684_s1 + $0x930] sm:$0xff]   ;;  %v11451_v46 = vcombine.high %v11198_v4, %v11242_v28 }
  0x71   : > { %8978 = vmatprep.subr.bf16.mxu1 %v10258_v15  ;;  %13697 = vst [vmem:[#allocation6_spill] sm:$0xff] %v11423_v31  ;;  %v10265_v15 = vld [vmem:[%s13684_s1 + $0x938] sm:$0xff]  }
  0x72   : > { %13696 = vst [vmem:[#allocation5_spill] sm:$0xff] %v11416_v17  ;;  %13698 = vst [vmem:[#allocation7_spill] sm:$0xff] %v11451_v46 }
  0x73   : > { %8933 = vmatpush3.bf16.msra.mxu0 %v10257_v63  ;;  %v10266_v63 = vld [vmem:[%s13684_s1 + $0x9f8] sm:$0xff]  }
  0x74   : > { %8979 = vmatpush3.bf16.msra.mxu1 %v10259_v7  ;;  %9010 = vmatprep.subr.bf16.mxu0 %v10264_v16  ;;  %v11438_v7 = vcombine.low %v174_v22, %v11195_v1  ;;  %v10272_v1 = vld [vmem:[%s13684_s1 + $0x9f0] sm:$0xff]   ;;  %v10276_v16 = vld [vmem:[%s13684_s1 + $0x968] sm:$0xff]  }
  0x75   : > { %1144 = vmatmul.mubr.bf16.gmra.mxu0 %v11398_v36  ;;  %9056 = vmatprep.subr.bf16.mxu1 %v10266_v63  ;;  %v10275_v22 = vld [vmem:[%s13684_s1 + $0x9b0] sm:$0xff]   ;;  %v10278_v63 = vld [vmem:[%s13684_s1 + $0x9e8] sm:$0xff]  }
  0x76   : > { %1574 = vmatmul.mubr.bf16.gmra.mxu1 %v11405_v33  ;;  %1614 = vmatprep.mubr.bf16.mxu0 %v11416_v17  ;;  %v10267_v17 = vld [vmem:[%s13684_s1 + $0x9b8] sm:$0xff]  }
  0x77   : > { %1687 = vmatprep.mubr.bf16.mxu1 %v11423_v31  ;;  %v10268_v31 = vld [vmem:[%s13684_s1 + $0x970] sm:$0xff]  }
  0x7d   : > { %1615 = vmatmul.mubr.bf16.vlgmr.msra.gmra.mxu0 %v11432_v27 }
  0x7e   : > { %1688 = vmatmul.mubr.bf16.vlgmr.msra.gmra.mxu1 %v11438_v7  ;;  %9011 = vmatpush3.bf16.msra.mxu0 %v10265_v15  ;;  %v10277_v15 = vld [vmem:[%s13684_s1 + $0x928] sm:$0xff]  }
  0x7f   : > { %9057 = vmatpush3.bf16.msra.mxu1 %v10267_v17  ;;  %9012 = vmatprep.subr.bf16.mxu0 %v10268_v31  ;;  %v11474_v17 = vcombine.low %v11198_v4, %v11242_v28  ;;  %v10279_v31 = vld [vmem:[%s13684_s1 + $0x9a8] sm:$0xff]   ;;  %v10285_v4 = vld [vmem:[%s13684_s1 + $0x920] sm:$0xff]  }
  0x80   : > { %1622 = vmatprep.mubr.bf16.mxu0 %v11031_v55  ;;  %1695 = vmatprep.mubr.bf16.mxu1 %v11451_v46  ;;  %v10282_v46 = vld [vmem:[%s13684_s1 + $0x960] sm:$0xff]  }
  0x81   : > { %9058 = vmatprep.subr.bf16.mxu1 %v10272_v1  ;;  %v11484_v1 = vcombine.high %v11245_v29, %v11285_v60  ;;  %v10286_v28 = vld [vmem:[%s13684_s1 + $0x9e0] sm:$0xff]  }
  0x82   : > { %9013 = vmatpush3.bf16.msra.mxu0 %v10269_v34  ;;  %v10287_v34 = vld [vmem:[%s13684_s1 + $0x9a0] sm:$0xff]  }
  0x83   : > { %9059 = vmatpush3.bf16.msra.mxu1 %v10275_v22  ;;  %9014 = vmatprep.subr.bf16.mxu0 %v10276_v16  ;;  %v10288_v22 = vld [vmem:[%s13684_s1 + $0x958] sm:$0xff]  }
  0x84   : > { %9060 = vmatprep.subr.bf16.mxu1 %v10278_v63  ;;  %v10290_v16 = vld [vmem:[%s13684_s1 + $0x9d8] sm:$0xff]   ;;  %v11507_v63 = vcombine.low %v11245_v29, %v11285_v60  ;;  %v10296_v29 = vld [vmem:[%s13684_s1 + $0x950] sm:$0xff]  }
  0x85   : > { %1623 = vmatmul.mubr.bf16.gmra.mxu0 %v11033_v56  ;;  %v10298_v60 = vld [vmem:[%s13684_s1 + $0x9d0] sm:$0xff]  }
  0x86   : > { %1696 = vmatmul.mubr.bf16.gmra.mxu1 %v11474_v17  ;;  %9015 = vmatpush3.bf16.msra.mxu0 %v10277_v15  ;;  %v10289_v15 = vld [vmem:[%s13684_s1 + $0x918] sm:$0xff]  }
  0x87   : > { %9061 = vmatpush3.bf16.msra.mxu1 %v10279_v31  ;;  %1630 = vmatprep.mubr.bf16.mxu0 %v11080_v8  ;;  %v11514_v31 = vcombine.high %v11288_v61, %v11332_v62 }
  0x88   : > { %1703 = vmatprep.mubr.bf16.mxu1 %v11484_v1  ;;  %9016 = vmatprep.subr.bf16.mxu0 %v10282_v46  ;;  %v10293_v46 = vld [vmem:[%s13684_s1 + $0x998] sm:$0xff]  }
  0x89   : > { %9062 = vmatprep.subr.bf16.mxu1 %v10286_v28  ;;  %v10300_v28 = vld [vmem:[%s13684_s1 + $0x948] sm:$0xff]  }
  0x8a   : > { %9017 = vmatpush3.bf16.msra.mxu0 %v10285_v4  ;;  %v10297_v4 = vld [vmem:[%s13684_s1 + $0x910] sm:$0xff]  }
  0x8b   : > { %9063 = vmatpush3.bf16.msra.mxu1 %v10287_v34  ;;  %9018 = vmatprep.subr.bf16.mxu0 %v10288_v22  ;;  %v10299_v34 = vld [vmem:[%s13684_s1 + $0x990] sm:$0xff]   ;;  %v10306_v22 = vld [vmem:[%s13684_s1 + $0x9c8] sm:$0xff]  }
  0x8c   : > { %9064 = vmatprep.subr.bf16.mxu1 %v10290_v16  ;;  %v11543_v16 = vcombine.low %v11288_v61, %v11332_v62  ;;  %v10308_v61 = vld [vmem:[%s13684_s1 + $0x940] sm:$0xff]  }
  0x8d   : > { %1631 = vmatmul.mubr.bf16.gmra.mxu0 %v11082_v9  ;;  %v10310_v62 = vld [vmem:[%s13684_s1 + $0x9c0] sm:$0xff]  }
  0x8e   : > { %1704 = vmatmul.mubr.bf16.gmra.mxu1 %v11507_v63  ;;  %9019 = vmatpush3.bf16.msra.mxu0 %v10289_v15  ;;  %v10303_v15 = vld [vmem:[%s13684_s1 + $0x908] sm:$0xff]  }
  0x8f   : > { %1638 = vmatprep.mubr.bf16.mxu0 %v11126_v24  ;;  %1711 = vmatprep.mubr.bf16.mxu1 %v11514_v31 }
  0x90   : > { %9065 = vmatpush3.bf16.msra.mxu1 %v10293_v46  ;;  %9020 = vmatprep.subr.bf16.mxu0 %v10296_v29  ;;  %v11550_v46 = vcombine.high %v11335_v57, %v11371_v47  ;;  %v10307_v29 = vld [vmem:[%s13684_s1 + $0x988] sm:$0xff]  }
  0x91   : > { %9066 = vmatprep.subr.bf16.mxu1 %v10298_v60  ;;  %v10309_v60 = vld [vmem:[%s13684_s1 + $0x900] sm:$0xff]  }
  0x92   : > { %9021 = vmatpush3.bf16.msra.mxu0 %v10297_v4  ;;  %v10311_v4 = vld [vmem:[%s13684_s1 + $0x980] sm:$0xff]  }
  0x93   : > { %9022 = vmatprep.subr.bf16.mxu0 %v10300_v28  ;;  %v10312_v28 = vld [vmem:[%s13684_s1 + $0xa78] sm:$0xff]  }
  0x94   : > { %9067 = vmatpush3.bf16.msra.mxu1 %v10299_v34  ;;  %v10314_v34 = vld [vmem:[%s13684_s1 + $0x7f8] sm:$0xff]  }
  0x95   : > { %1639 = vmatmul.mubr.bf16.gmra.mxu0 %v11128_v25  ;;  %9068 = vmatprep.subr.bf16.mxu1 %v10306_v22  ;;  %v11579_v22 = vcombine.low %v11335_v57, %v11371_v47  ;;  %v10315_v57 = vld [vmem:[%s13684_s1 + $0x7b8] sm:$0xff]   ;;  %v10316_v47 = vld [vmem:[%s13684_s1 + $0xa70] sm:$0xff]  }
  0x96   : > { %1712 = vmatmul.mubr.bf16.gmra.mxu1 %v11543_v16  ;;  %1646 = vmatprep.mubr.bf16.mxu0 %v11166_v49 }
  0x97   : > { %1719 = vmatprep.mubr.bf16.mxu1 %v11550_v46  ;;  %9023 = vmatpush3.bf16.msra.mxu0 %v10303_v15  ;;  %v10313_v15 = vld [vmem:[%s13684_s1 + $0xa38] sm:$0xff]  }
  0x98   : > { %9069 = vmatpush3.bf16.msra.mxu1 %v10307_v29  ;;  %9024 = vmatprep.subr.bf16.mxu0 %v10308_v61  ;;  %v10317_v29 = vld [vmem:[%s13684_s1 + $0xa30] sm:$0xff]   ;;  %v10320_v61 = vld [vmem:[%s13684_s1 + $0xa68] sm:$0xff]  }
  0x99   : > { %9070 = vmatprep.subr.bf16.mxu1 %v10310_v62  ;;  %v10323_v62 = vld [vmem:[%s13684_s1 + $0x7a8] sm:$0xff]  }
  0x9b   : > { %9025 = vmatpush3.bf16.msra.mxu0 %v10309_v60  ;;  %v10326_v60 = vld [vmem:[%s13684_s1 + $0x7e0] sm:$0xff]  }
  0x9c   : > { %9071 = vmatpush3.bf16.msra.mxu1 %v10311_v4  ;;  %9102 = vmatprep.subr.bf16.mxu0 %v10312_v28  ;;  %v10327_v4 = vld [vmem:[%s13684_s1 + $0x7a0] sm:$0xff]   ;;  %v10328_v28 = vld [vmem:[%s13684_s1 + $0xa58] sm:$0xff]  }
  0x9d   : > { %1647 = vmatmul.mubr.bf16.gmra.mxu0 %v11168_v50  ;;  %9148 = vmatprep.subr.bf16.mxu1 %v10314_v34  ;;  %v10334_v34 = vld [vmem:[%s13684_s1 + $0x7d0] sm:$0xff]  }
  0x9e   : > { %1720 = vmatmul.mubr.bf16.gmra.mxu1 %v11579_v22  ;;  %2145 = vmatprep.mubr.bf16.mxu0 %v10973_v35  ;;  %v10318_v35 = vld [vmem:[%s13684_s1 + $0x7f0] sm:$0xff]  }
  0x9f   : > { %2218 = vmatprep.mubr.bf16.mxu1 %v10981_v38  ;;  %v10319_v38 = vld [vmem:[%s13684_s1 + $0x7b0] sm:$0xff]  }
  0xa5   : > { %2146 = vmatmul.mubr.bf16.vlgmr.msra.gmra.mxu0 %v10978_v37  ;;  %v10322_v37 = vld [vmem:[%s13684_s1 + $0x7e8] sm:$0xff]  }
  0xa6   : > { %2219 = vmatmul.mubr.bf16.vlgmr.msra.gmra.mxu1 %v10984_v39  ;;  %9103 = vmatpush3.bf16.msra.mxu0 %v10313_v15  ;;  %v10321_v39 = vld [vmem:[%s13684_s1 + $0xa28] sm:$0xff]   ;;  %v10333_v15 = vld [vmem:[%s13684_s1 + $0xa10] sm:$0xff]  }
  0xa7   : > { %9149 = vmatpush3.bf16.msra.mxu1 %v10315_v57  ;;  %9104 = vmatprep.subr.bf16.mxu0 %v10316_v47  ;;  %v10336_v57 = vld [vmem:[%s13684_s1 + $0xa48] sm:$0xff]   ;;  %v10340_v47 = vld [vmem:[%s13684_s1 + $0xa40] sm:$0xff]  }
  0xa8   : > { %2153 = vmatprep.mubr.bf16.mxu0 %v11016_v48  ;;  %2226 = vmatprep.mubr.bf16.mxu1 %v11024_v52  ;;  %v10324_v48 = vld [vmem:[%s13684_s1 + $0xa60] sm:$0xff]  }
  0xa9   : > { %9150 = vmatprep.subr.bf16.mxu1 %v10318_v35  ;;  %v10325_v52 = vld [vmem:[%s13684_s1 + $0xa20] sm:$0xff]  }
  0xaa   : > { %9105 = vmatpush3.bf16.msra.mxu0 %v10317_v29  ;;  %v10342_v29 = vld [vmem:[%s13684_s1 + $0x7c0] sm:$0xff]  }
  0xab   : > { %9151 = vmatpush3.bf16.msra.mxu1 %v10319_v38  ;;  %9106 = vmatprep.subr.bf16.mxu0 %v10320_v61  ;;  %v10341_v35 = vld [vmem:[%s13684_s1 + $0xa00] sm:$0xff]   ;;  %v10344_v38 = vld [vmem:[%s13684_s1 + $0x878] sm:$0xff]   ;;  %v10348_v61 = vld [vmem:[%s13684_s1 + $0x870] sm:$0xff]  }
  0xac   : > { %9152 = vmatprep.subr.bf16.mxu1 %v10322_v37  ;;  %v10355_v37 = vld [vmem:[%s13684_s1 + $0x8a8] sm:$0xff]  }
  0xad   : > { %2154 = vmatmul.mubr.bf16.gmra.mxu0 %v11022_v51  ;;  %v10330_v51 = vld [vmem:[%s13684_s1 + $0x7d8] sm:$0xff]  }
  0xae   : > { %2227 = vmatmul.mubr.bf16.gmra.mxu1 %v11029_v54  ;;  %9107 = vmatpush3.bf16.msra.mxu0 %v10321_v39  ;;  %v10329_v54 = vld [vmem:[%s13684_s1 + $0xa18] sm:$0xff]   ;;  %v10358_v39 = vld [vmem:[%s13684_s1 + $0x8e0] sm:$0xff]  }
  0xaf   : > { %9153 = vmatpush3.bf16.msra.mxu1 %v10323_v62  ;;  %2161 = vmatprep.mubr.bf16.mxu0 %v11064_v2  ;;  %v10331_v2 = vld [vmem:[%s13684_s1 + $0x798] sm:$0xff]   ;;  %v10359_v62 = vld [vmem:[%s13684_s1 + $0x8a0] sm:$0xff]  }
  0xb0   : > { %2234 = vmatprep.mubr.bf16.mxu1 %v11066_v3  ;;  %9108 = vmatprep.subr.bf16.mxu0 %v10324_v48  ;;  %v10332_v3 = vld [vmem:[%s13684_s1 + $0xa50] sm:$0xff]   ;;  %v10360_v48 = vld [vmem:[%s13684_s1 + $0x858] sm:$0xff]  }
  0xb1   : > { %9154 = vmatprep.subr.bf16.mxu1 %v10326_v60  ;;  %v10365_v60 = vld [vmem:[%s13684_s1 + $0x810] sm:$0xff]  }
  0xb2   : > { %9109 = vmatpush3.bf16.msra.mxu0 %v10325_v52  ;;  %v10366_v52 = vld [vmem:[%s13684_s1 + $0x8d0] sm:$0xff]  }
  0xb3   : > { %9155 = vmatpush3.bf16.msra.mxu1 %v10327_v4  ;;  %9110 = vmatprep.subr.bf16.mxu0 %v10328_v28  ;;  %v10368_v4 = vld [vmem:[%s13684_s1 + $0x848] sm:$0xff]   ;;  %v10372_v28 = vld [vmem:[%s13684_s1 + $0x840] sm:$0xff]  }
  0xb4   : > { %9156 = vmatprep.subr.bf16.mxu1 %v10330_v51  ;;  %v10374_v51 = vld [vmem:[%s13684_s1 + $0x8c0] sm:$0xff]  }
  0xb5   : > { %2162 = vmatmul.mubr.bf16.gmra.mxu0 %v11073_v5  ;;  %v10335_v5 = vld [vmem:[%s13684_s1 + $0x790] sm:$0xff]  }
  0xb6   : > { %2235 = vmatmul.mubr.bf16.gmra.mxu1 %v11075_v6  ;;  %9111 = vmatpush3.bf16.msra.mxu0 %v10329_v54  ;;  %v10338_v6 = vld [vmem:[%s13684_s1 + $0x7c8] sm:$0xff]   ;;  %v13699_v54 = vld [vmem:[#allocation2_spill] sm:$0xff] }
  0xb7   : > { %2169 = vmatprep.mubr.bf16.mxu0 %v11112_v18  ;;  %2242 = vmatprep.mubr.bf16.mxu1 %v11119_v21  ;;  %v10337_v18 = vld [vmem:[%s13684_s1 + $0xa08] sm:$0xff]  }
  0xb8   : > { %9157 = vmatpush3.bf16.msra.mxu1 %v10331_v2  ;;  %9112 = vmatprep.subr.bf16.mxu0 %v10332_v3  ;;  %v10339_v21 = vld [vmem:[%s13684_s1 + $0x788] sm:$0xff]   ;;  %v13700_v2 = vld [vmem:[#allocation4_spill] sm:$0xff]  ;;  %v10373_v3 = vld [vmem:[%s13684_s1 + $0x800] sm:$0xff]  }
  0xb9   : > { %9158 = vmatprep.subr.bf16.mxu1 %v10334_v34  ;;  %v13701_v34 = vld [vmem:[#allocation3_spill] sm:$0xff] }
  0xba   : > { %9113 = vmatpush3.bf16.msra.mxu0 %v10333_v15  ;;  %v10376_v15 = vld [vmem:[%s13684_s1 + $0x378] sm:$0xff]  }
  0xbb   : > { %9114 = vmatprep.subr.bf16.mxu0 %v10336_v57  ;;  %v10378_v57 = vld [vmem:[%s13684_s1 + $0x3f8] sm:$0xff]  }
  0xbc   : > { %9159 = vmatpush3.bf16.msra.mxu1 %v10335_v5 }
  0xbd   : > { %2170 = vmatmul.mubr.bf16.gmra.mxu0 %v11117_v20  ;;  %9160 = vmatprep.subr.bf16.mxu1 %v10338_v6  ;;  %v10343_v20 = vld [vmem:[%s13684_s1 + $0x780] sm:$0xff]  }
  0xbe   : > { %2243 = vmatmul.mubr.bf16.gmra.mxu1 %v11124_v23  ;;  %2177 = vmatprep.mubr.bf16.mxu0 %v11154_v40  ;;  %v10346_v23 = vld [vmem:[%s13684_s1 + $0x8f8] sm:$0xff]  }
  0xbf   : > { %2250 = vmatprep.mubr.bf16.mxu1 %v11158_v43  ;;  %9115 = vmatpush3.bf16.msra.mxu0 %v10337_v18  ;;  %v10345_v40 = vld [vmem:[%s13684_s1 + $0x838] sm:$0xff]  }
  0xc0   : > { %9161 = vmatpush3.bf16.msra.mxu1 %v10339_v21  ;;  %9116 = vmatprep.subr.bf16.mxu0 %v10340_v47  ;;  %v10347_v43 = vld [vmem:[%s13684_s1 + $0x8b8] sm:$0xff]   ;;  %v13703_v47 = vld [vmem:[#allocation6_spill] sm:$0xff] }
  0xc1   : > { %9162 = vmatprep.subr.bf16.mxu1 %v10342_v29  ;;  %v13702_v18 = vld [vmem:[#allocation5_spill] sm:$0xff] }
  0xc3   : > { %9117 = vmatpush3.bf16.msra.mxu0 %v10341_v35 }
  0xc4   : > { %9163 = vmatpush3.bf16.msra.mxu1 %v10343_v20  ;;  %9194 = vmatprep.subr.bf16.mxu0 %v10344_v38 }
  0xc5   : > { %2178 = vmatmul.mubr.bf16.gmra.mxu0 %v11164_v45  ;;  %9240 = vmatprep.subr.bf16.mxu1 %v10346_v23  ;;  %v10349_v45 = vld [vmem:[%s13684_s1 + $0x830] sm:$0xff]   ;;  %v10377_v23 = vld [vmem:[%s13684_s1 + $0x338] sm:$0xff]  }
  0xc6   : > { %2251 = vmatmul.mubr.bf16.gmra.mxu1 %v11171_v53  ;;  %2291 = vmatprep.mubr.bf16.mxu0 %v11203_v10  ;;  %v10350_v53 = vld [vmem:[%s13684_s1 + $0x8f0] sm:$0xff]  }
  0xc7   : > { %2652 = vmatprep.mubr.bf16.mxu1 %v11206_v11  ;;  %v10351_v10 = vld [vmem:[%s13684_s1 + $0x8b0] sm:$0xff]   ;;  %v10352_v11 = vld [vmem:[%s13684_s1 + $0x868] sm:$0xff]  }
  0xcd   : > { %2292 = vmatmul.mubr.bf16.vlgmr.msra.gmra.mxu0 %v11210_v12  ;;  %v10354_v12 = vld [vmem:[%s13684_s1 + $0x8e8] sm:$0xff]  }
  0xce   : > { %2653 = vmatmul.mubr.bf16.vlgmr.msra.gmra.mxu1 %v11216_v14  ;;  %9195 = vmatpush3.bf16.msra.mxu0 %v10345_v40  ;;  %v10353_v14 = vld [vmem:[%s13684_s1 + $0x828] sm:$0xff]  }
  0xcf   : > { %9241 = vmatpush3.bf16.msra.mxu1 %v10347_v43  ;;  %9196 = vmatprep.subr.bf16.mxu0 %v10348_v61  ;;  %v10380_v61 = vld [vmem:[%s13684_s1 + $0x370] sm:$0xff]  }
  0xd0   : > { %2299 = vmatprep.mubr.bf16.mxu0 %v11249_v30  ;;  %2660 = vmatprep.mubr.bf16.mxu1 %v11231_v32  ;;  %v10356_v32 = vld [vmem:[%s13684_s1 + $0x860] sm:$0xff]  }
  0xd1   : > { %9242 = vmatprep.subr.bf16.mxu1 %v10350_v53  ;;  %v10357_v30 = vld [vmem:[%s13684_s1 + $0x820] sm:$0xff]  }
  0xd2   : > { %9197 = vmatpush3.bf16.msra.mxu0 %v10349_v45 }
  0xd3   : > { %9243 = vmatpush3.bf16.msra.mxu1 %v10351_v10  ;;  %9198 = vmatprep.subr.bf16.mxu0 %v10352_v11 }
  0xd4   : > { %9244 = vmatprep.subr.bf16.mxu1 %v10354_v12  ;;  %v10382_v12 = vld [vmem:[%s13684_s1 + $0x3f0] sm:$0xff]  }
  0xd5   : > { %2300 = vmatmul.mubr.bf16.gmra.mxu0 %v11257_v41  ;;  %v10362_v41 = vld [vmem:[%s13684_s1 + $0x8d8] sm:$0xff]  }
  0xd6   : > { %2661 = vmatmul.mubr.bf16.gmra.mxu1 %v11265_v44  ;;  %9199 = vmatpush3.bf16.msra.mxu0 %v10353_v14  ;;  %v10361_v44 = vld [vmem:[%s13684_s1 + $0x818] sm:$0xff]  }
  0xd7   : > { %9245 = vmatpush3.bf16.msra.mxu1 %v10355_v37  ;;  %2307 = vmatprep.mubr.bf16.mxu0 %v11293_v0  ;;  %v10363_v0 = vld [vmem:[%s13684_s1 + $0x898] sm:$0xff]   ;;  %v10381_v37 = vld [vmem:[%s13684_s1 + $0x330] sm:$0xff]  }
  0xd8   : > { %2668 = vmatprep.mubr.bf16.mxu1 %v11275_v59  ;;  %9200 = vmatprep.subr.bf16.mxu0 %v10356_v32  ;;  %v10364_v59 = vld [vmem:[%s13684_s1 + $0x850] sm:$0xff]  }
  0xd9   : > { %9246 = vmatprep.subr.bf16.mxu1 %v10358_v39  ;;  %v10383_v32 = vld [vmem:[%s13684_s1 + $0x3b0] sm:$0xff]  }
  0xda   : > { %9201 = vmatpush3.bf16.msra.mxu0 %v10357_v30 }
  0xdb   : > { %9247 = vmatpush3.bf16.msra.mxu1 %v10359_v62  ;;  %9202 = vmatprep.subr.bf16.mxu0 %v10360_v48  ;;  %v13704_v48 = vld [vmem:[#allocation7_spill] sm:$0xff] }
  0xdc   : > { %9248 = vmatprep.subr.bf16.mxu1 %v10362_v41  ;;  %v10386_v41 = vld [vmem:[%s13684_s1 + $0x3e8] sm:$0xff]  }
  0xdd   : > { %2308 = vmatmul.mubr.bf16.gmra.mxu0 %v11308_v19  ;;  %v10367_v19 = vld [vmem:[%s13684_s1 + $0x890] sm:$0xff]  }
  0xde   : > { %2669 = vmatmul.mubr.bf16.gmra.mxu1 %v11315_v26  ;;  %9203 = vmatpush3.bf16.msra.mxu0 %v10361_v44  ;;  %v10370_v26 = vld [vmem:[%s13684_s1 + $0x8c8] sm:$0xff]  }
  0xdf   : > { %2315 = vmatprep.mubr.bf16.mxu0 %v11340_v58  ;;  %2676 = vmatprep.mubr.bf16.mxu1 %v11325_v42  ;;  %v10369_v42 = vld [vmem:[%s13684_s1 + $0x808] sm:$0xff]  }
  0xe0   : > { %9249 = vmatpush3.bf16.msra.mxu1 %v10363_v0  ;;  %9204 = vmatprep.subr.bf16.mxu0 %v10364_v59  ;;  %v10371_v58 = vld [vmem:[%s13684_s1 + $0x888] sm:$0xff]  }
  0xe1   : > { %9250 = vmatprep.subr.bf16.mxu1 %v10366_v52  ;;  %v10385_v52 = vld [vmem:[%s13684_s1 + $0x328] sm:$0xff]  }
  0xe2   : > { %9205 = vmatpush3.bf16.msra.mxu0 %v10365_v60 }
  0xe3   : > { %9206 = vmatprep.subr.bf16.mxu0 %v10368_v4 }
  0xe4   : > { %9251 = vmatpush3.bf16.msra.mxu1 %v10367_v19 }
  0xe5   : > { %2316 = vmatmul.mubr.bf16.gmra.mxu0 %v11355_v13  ;;  %9252 = vmatprep.subr.bf16.mxu1 %v10370_v26  ;;  %v10375_v13 = vld [vmem:[%s13684_s1 + $0x880] sm:$0xff]  }
  0xe6   : > { %2677 = vmatmul.mubr.bf16.gmra.mxu1 %v13699_v54  ;;  %2323 = vmatprep.mubr.bf16.mxu0 %v13700_v2  ;;  %v10390_v54 = vld [vmem:[%s13684_s1 + $0x3e0] sm:$0xff]  }
  0xe7   : > { %2684 = vmatprep.mubr.bf16.mxu1 %v13701_v34  ;;  %9207 = vmatpush3.bf16.msra.mxu0 %v10369_v42  ;;  %v10388_v42 = vld [vmem:[%s13684_s1 + $0x360] sm:$0xff]  }
  0xe8   : > { %9253 = vmatpush3.bf16.msra.mxu1 %v10371_v58  ;;  %9208 = vmatprep.subr.bf16.mxu0 %v10372_v28 }
  0xe9   : > { %9254 = vmatprep.subr.bf16.mxu1 %v10374_v51  ;;  %v10389_v51 = vld [vmem:[%s13684_s1 + $0x320] sm:$0xff]  }
  0xeb   : > { %9209 = vmatpush3.bf16.msra.mxu0 %v10373_v3  ;;  %v10391_v3 = vld [vmem:[%s13684_s1 + $0x3a0] sm:$0xff]  }
  0xec   : > { %9255 = vmatpush3.bf16.msra.mxu1 %v10375_v13  ;;  %9286 = vmatprep.subr.bf16.mxu0 %v10376_v15 }
  0xed   : > { %v8750_v5 = vpop.f32.mrf.mxu0  ;;  %2324 = vmatmul.mubr.bf16.gmra.mxu0 %v11398_v36  ;;  %9332 = vmatprep.subr.bf16.mxu1 %v10378_v57  ;;  %v10379_v36 = vld [vmem:[%s13684_s1 + $0x3b8] sm:$0xff]  }
  0xee   : > { %v8796_v6 = vpop.f32.mrf.mxu1  ;;  %2685 = vmatmul.mubr.bf16.gmra.mxu1 %v11405_v33  ;;  %2725 = vmatprep.mubr.bf16.mxu0 %v13702_v18 }
  0xef   : > { %v8751_v21 = vpop.f32.mrf.mxu0  ;;  %2798 = vmatprep.mubr.bf16.mxu1 %v13703_v47 }
  0xf0   : > { %v8752_v29 = vadd.f32 %v8751_v21, %v8750_v5  ;;  %v8797_v35 = vpop.f32.mrf.mxu1 }
  0xf1   : > { %v8798_v20 = vadd.f32 %v8797_v35, %v8796_v6  ;;  %v8753_v38 = vpop.f32.mrf.mxu0 }
  0xf2   : > { %v8799_v40 = vpop.f32.mrf.mxu1 }
  0xf3   : > { %v11823_v43 = vadd.f32 %v8798_v20, %v8752_v29  ;;  %v8754_v33 = vpop.f32.mrf.mxu0  ;;  %v10396_v20 = vld [vmem:[%s13684_s1 + $0x350] sm:$0xff]  }
  0xf4   : > { %v8755_v45 = vadd.f32 %v8754_v33, %v8753_v38  ;;  %v8800_v53 = vpop.f32.mrf.mxu1  ;;  %v10397_v33 = vld [vmem:[%s13684_s1 + $0x310] sm:$0xff]  }
  0xf5   : > { %v8801_v10 = vadd.f32 %v8800_v53, %v8799_v40  ;;  %v8756_v11 = vpop.f32.mrf.mxu0  ;;  %2726 = vmatmul.mubr.bf16.vlgmr.msra.gmra.mxu0 %v11432_v27  ;;  %v10384_v27 = vld [vmem:[%s13684_s1 + $0x368] sm:$0xff]   ;;  %v10398_v40 = vld [vmem:[%s13684_s1 + $0x3d0] sm:$0xff]  }
  0xf6   : > { %v8802_v14 = vpop.f32.mrf.mxu1  ;;  %2799 = vmatmul.mubr.bf16.vlgmr.msra.gmra.mxu1 %v11438_v7  ;;  %9287 = vmatpush3.bf16.msra.mxu0 %v10377_v23 }
  0xf7   : > { %v11839_v30 = vadd.f32 %v8801_v10, %v8755_v45  ;;  %v8757_v39 = vpop.f32.mrf.mxu0  ;;  %9333 = vmatpush3.bf16.msra.mxu1 %v10379_v36  ;;  %9288 = vmatprep.subr.bf16.mxu0 %v10380_v61 }
  0xf8   : > { %v8758_v62 = vadd.f32 %v8757_v39, %v8756_v11  ;;  %v8803_v7 = vpop.f32.mrf.mxu1  ;;  %2733 = vmatprep.mubr.bf16.mxu0 %v11031_v55  ;;  %2806 = vmatprep.mubr.bf16.mxu1 %v13704_v48  ;;  %v10387_v55 = vld [vmem:[%s13684_s1 + $0x3a8] sm:$0xff]  }
  0xf9   : > { %v8804_v44 = vadd.f32 %v8803_v7, %v8802_v14  ;;  %v8759_v0 = vpop.f32.mrf.mxu0  ;;  %9334 = vmatprep.subr.bf16.mxu1 %v10382_v12  ;;  %v10401_v14 = vld [vmem:[%s13684_s1 + $0x308] sm:$0xff]   ;;  %v10404_v7 = vld [vmem:[%s13684_s1 + $0x340] sm:$0xff]  }
  0xfa   : > { %v8805_v59 = vpop.f32.mrf.mxu1  ;;  %9289 = vmatpush3.bf16.msra.mxu0 %v10381_v37  ;;  %v10403_v39 = vld [vmem:[%s13684_s1 + $0x388] sm:$0xff]  }
  0xfb   : > { %v11852_v60 = vadd.f32 %v8804_v44, %v8758_v62  ;;  %v8760_v4 = vpop.f32.mrf.mxu0  ;;  %9335 = vmatpush3.bf16.msra.mxu1 %v10383_v32  ;;  %9290 = vmatprep.subr.bf16.mxu0 %v10384_v27  ;;  %v10406_v44 = vld [vmem:[%s13684_s1 + $0x3c0] sm:$0xff]  }
  0xfc   : > { %v8761_v19 = vadd.f32 %v8760_v4, %v8759_v0  ;;  %v8806_v26 = vpop.f32.mrf.mxu1  ;;  %9336 = vmatprep.subr.bf16.mxu1 %v10386_v41 }
  0xfd   : > { %v8807_v58 = vadd.f32 %v8806_v26, %v8805_v59  ;;  %v8762_v28 = vpop.f32.mrf.mxu0  ;;  %2734 = vmatmul.mubr.bf16.gmra.mxu0 %v11033_v56  ;;  %v10392_v56 = vld [vmem:[%s13684_s1 + $0x358] sm:$0xff]   ;;  %v10405_v59 = vld [vmem:[%s13684_s1 + $0x300] sm:$0xff]  }
  0xfe   : > { %v8808_v2 = vpop.f32.mrf.mxu1  ;;  %2807 = vmatmul.mubr.bf16.gmra.mxu1 %v11474_v17  ;;  %9291 = vmatpush3.bf16.msra.mxu0 %v10385_v52  ;;  %v10394_v17 = vld [vmem:[%s13684_s1 + $0x3d8] sm:$0xff]  }
  0xff   : > { %v11871_v34 = vadd.f32 %v8807_v58, %v8761_v19  ;;  %v8763_v13 = vpop.f32.mrf.mxu0  ;;  %9337 = vmatpush3.bf16.msra.mxu1 %v10387_v55  ;;  %2741 = vmatprep.mubr.bf16.mxu0 %v11080_v8  ;;  %v10393_v8 = vld [vmem:[%s13684_s1 + $0x318] sm:$0xff]   ;;  %v11946_v58 = vld [vmem:[%s10954_s27 + $0x34] ss:$24 sps:$4 sm:$0xff]  }
 0x100   : > { %v8764_v15 = vadd.f32 %v8763_v13, %v8762_v28  ;;  %v8809_v57 = vpop.f32.mrf.mxu1  ;;  %2814 = vmatprep.mubr.bf16.mxu1 %v11484_v1  ;;  %9292 = vmatprep.subr.bf16.mxu0 %v10388_v42  ;;  %v10395_v1 = vld [vmem:[%s13684_s1 + $0x398] sm:$0xff]  }
 0x101   : > { %v8810_v5 = vadd.f32 %v8809_v57, %v8808_v2  ;;  %v8765_v6 = vpop.f32.mrf.mxu0  ;;  %9338 = vmatprep.subr.bf16.mxu1 %v10390_v54  ;;  %v10413_v54 = vld [vmem:[%s10954_s27 + $0x3c] ss:$24 sps:$4 sm:$0xff]  }
 0x102   : > { %v8811_v18 = vpop.f32.mrf.mxu1  ;;  %9293 = vmatpush3.bf16.msra.mxu0 %v10389_v51 }
 0x103   : > { %v11884_v21 = vadd.f32 %v8810_v5, %v8764_v15  ;;  %v8766_v47 = vpop.f32.mrf.mxu0  ;;  %9339 = vmatpush3.bf16.msra.mxu1 %v10391_v3  ;;  %9294 = vmatprep.subr.bf16.mxu0 %v10392_v56  ;;  %v11957_v5 = vld [vmem:[%s10954_s27 + $0x30] ss:$24 sps:$4 sm:$0xff]  }
 0x104   : > { %v8767_v29 = vadd.f32 %v8766_v47, %v8765_v6  ;;  %v8812_v35 = vpop.f32.mrf.mxu1  ;;  %9340 = vmatprep.subr.bf16.mxu1 %v10394_v17 }
 0x105   : > { %v8813_v38 = vadd.f32 %v8812_v35, %v8811_v18  ;;  %v8768_v23 = vpop.f32.mrf.mxu0  ;;  %2742 = vmatmul.mubr.bf16.gmra.mxu0 %v11082_v9  ;;  %v10400_v9 = vld [vmem:[%s13684_s1 + $0x348] sm:$0xff]  }
 0x106   : > { %v8814_v36 = vpop.f32.mrf.mxu1  ;;  %2815 = vmatmul.mubr.bf16.gmra.mxu1 %v11507_v63  ;;  %9295 = vmatpush3.bf16.msra.mxu0 %v10393_v8  ;;  %v10399_v63 = vld [vmem:[%s13684_s1 + $0x390] sm:$0xff]  }
 0x107   : > { %v11900_v61 = vadd.f32 %v8813_v38, %v8767_v29  ;;  %v8769_v45 = vpop.f32.mrf.mxu0  ;;  %2749 = vmatprep.mubr.bf16.mxu0 %v11126_v24  ;;  %2822 = vmatprep.mubr.bf16.mxu1 %v11514_v31  ;;  %v10402_v24 = vld [vmem:[%s13684_s1 + $0x3c8] sm:$0xff]   ;;  %v10411_v8 = vld [vmem:[%s10954_s27 + $0x38] ss:$24 sps:$4 sm:$0xff]  }
 0x108   : > { %v8770_v53 = vadd.f32 %v8769_v45, %v8768_v23  ;;  %v8815_v10 = vpop.f32.mrf.mxu1  ;;  %9341 = vmatpush3.bf16.msra.mxu1 %v10395_v1  ;;  %9296 = vmatprep.subr.bf16.mxu0 %v10396_v20  ;;  %v10418_v20 = vld [vmem:[%s13684_s1 + $0x470] sm:$0xff]   ;;  %v11971_v23 = vld [vmem:[%s10954_s27 + $0x64] ss:$24 sps:$4 sm:$0xff]  }
 0x109   : > { %v8816_v11 = vadd.f32 %v8815_v10, %v8814_v36  ;;  %v8771_v12 = vpop.f32.mrf.mxu0  ;;  %9342 = vmatprep.subr.bf16.mxu1 %v10398_v40  ;;  %v10419_v45 = vld [vmem:[%s13684_s1 + $0x430] sm:$0xff]  }
 0x10a   : > { %v8817_v31 = vpop.f32.mrf.mxu1  ;;  %9297 = vmatpush3.bf16.msra.mxu0 %v10397_v33  ;;  %v10426_v10 = vld [vmem:[%s13684_s1 + $0xaf0] sm:$0xff]  }
 0x10b   : > { %v11916_v37 = vadd.f32 %v8816_v11, %v8770_v53  ;;  %v8772_v32 = vpop.f32.mrf.mxu0  ;;  %9298 = vmatprep.subr.bf16.mxu0 %v10400_v9  ;;  %v10425_v9 = vld [vmem:[%s10954_s27 + $0x6c] ss:$24 sps:$4 sm:$0xff]  }
 0x10c   : > { %v8773_v27 = vadd.f32 %v8772_v32, %v8771_v12  ;;  %v8818_v62 = vpop.f32.mrf.mxu1  ;;  %9343 = vmatpush3.bf16.msra.mxu1 %v10399_v63  ;;  %v10427_v12 = vld [vmem:[%s13684_s1 + $0xab0] sm:$0xff]  }
 0x10d   : > { %v8819_v48 = vadd.f32 %v8818_v62, %v8817_v31  ;;  %v8774_v41 = vpop.f32.mrf.mxu0  ;;  %2750 = vmatmul.mubr.bf16.gmra.mxu0 %v11128_v25  ;;  %9344 = vmatprep.subr.bf16.mxu1 %v10402_v24  ;;  %v10407_v25 = vld [vmem:[%s13684_s1 + $0x380] sm:$0xff]   ;;  %v10429_v62 = vld [vmem:[%s13684_s1 + $0x428] sm:$0xff]  }
 0x10e   : > { %v8820_v0 = vpop.f32.mrf.mxu1  ;;  %2823 = vmatmul.mubr.bf16.gmra.mxu1 %v11543_v16  ;;  %2757 = vmatprep.mubr.bf16.mxu0 %v11166_v49  ;;  %v10414_v49 = vld [vmem:[%s13684_s1 + $0x478] sm:$0xff]  }
 0x10f   : > { %v11933_v52 = vadd.f32 %v8819_v48, %v8773_v27  ;;  %v8775_v4 = vpop.f32.mrf.mxu0  ;;  %2830 = vmatprep.mubr.bf16.mxu1 %v11550_v46  ;;  %9299 = vmatpush3.bf16.msra.mxu0 %v10401_v14  ;;  %v10416_v46 = vld [vmem:[%s13684_s1 + $0xaf8] sm:$0xff]   ;;  %v10428_v14 = vld [vmem:[%s13684_s1 + $0x468] sm:$0xff]  }
 0x110   : > { %v8776_v55 = vadd.f32 %v8775_v4, %v8774_v41  ;;  %v8821_v16 = vpop.f32.mrf.mxu1  ;;  %9345 = vmatpush3.bf16.msra.mxu1 %v10403_v39  ;;  %9300 = vmatprep.subr.bf16.mxu0 %v10404_v7  ;;  %v11988_v31 = vld [vmem:[%s10954_s27 + $0x60] ss:$24 sps:$4 sm:$0xff]   ;;  %v10430_v7 = vld [vmem:[%s13684_s1 + $0xae8] sm:$0xff]  }
 0x111   : > { %v8822_v19 = vadd.f32 %v8821_v16, %v8820_v0  ;;  %v8777_v26 = vpop.f32.mrf.mxu0  ;;  %9346 = vmatprep.subr.bf16.mxu1 %v10406_v44  ;;  %v10423_v27 = vld [vmem:[%s10954_s27 + $0x68] ss:$24 sps:$4 sm:$0xff]   ;;  %v12008_v4 = vld [vmem:[%s10954_s27 + $0x94] ss:$24 sps:$4 sm:$0xff]  }
 0x112   : > { %v8823_v42 = vpop.f32.mrf.mxu1  ;;  %v10431_v44 = vld [vmem:[%s13684_s1 + $0xaa8] sm:$0xff]   ;;  %v10438_v16 = vld [vmem:[%s13684_s1 + $0x460] sm:$0xff]  }
 0x113   : > { %v11948_v28 = vadd.f32 %v8822_v19, %v8776_v55  ;;  %v8778_v51 = vpop.f32.mrf.mxu0  ;;  %9301 = vmatpush3.bf16.msra.mxu0 %v10405_v59 }
 0x114   : > { %v8779_v2 = vadd.f32 %v8778_v51, %v8777_v26  ;;  %v8824_v3 = vpop.f32.mrf.mxu1  ;;  %9347 = vmatpush3.bf16.msra.mxu1 %v10407_v25  ;;  %9378 = vmatprep.subr.bf16.mxu0 %v10414_v49  ;;  %v10437_v25 = vld [vmem:[%s10954_s27 + $0x9c] ss:$24 sps:$4 sm:$0xff]   ;;  %v10440_v51 = vld [vmem:[%s13684_s1 + $0xae0] sm:$0xff]  }
 0x115   : > { %v8825_v13 = vadd.f32 %v8824_v3, %v8823_v42  ;;  %v8842_v56 = vpop.f32.mrf.mxu0  ;;  %2758 = vmatmul.mubr.bf16.gmra.mxu0 %v11168_v50  ;;  %9424 = vmatprep.subr.bf16.mxu1 %v10416_v46  ;;  %v10415_v50 = vld [vmem:[%s13684_s1 + $0x438] sm:$0xff]   ;;  %v10441_v3 = vld [vmem:[%s13684_s1 + $0xaa0] sm:$0xff]  }
 0x116   : > { %v8888_v15 = vpop.f32.mrf.mxu1  ;;  %2831 = vmatmul.mubr.bf16.gmra.mxu1 %v11579_v22  ;;  %3436 = vmatprep.mubr.bf16.mxu0 %v11946_v58  ;;  %v10417_v22 = vld [vmem:[%s13684_s1 + $0xab8] sm:$0xff]  }
 0x117   : > { %v11954_v57 = vadd.f32 %v8825_v13, %v8779_v2  ;;  %v8843_v17 = vpop.f32.mrf.mxu0  ;;  %3509 = vmatprep.mubr.bf16.mxu1 %v10413_v54 }
 0x118   : > { %v8844_v6 = vadd.f32 %v8843_v17, %v8842_v56  ;;  %v8889_v18 = vpop.f32.mrf.mxu1  ;;  %v12028_v56 = vld [vmem:[%s10954_s27 + $0x90] ss:$24 sps:$4 sm:$0xff]  }
 0x119   : > { %v8890_v47 = vadd.f32 %v8889_v18, %v8888_v15  ;;  %v8845_v1 = vpop.f32.mrf.mxu0  ;;  %v10442_v15 = vld [vmem:[%s13684_s1 + $0x458] sm:$0xff]  }
 0x11a   : > { %v1114_v29 = vadd.f32 %v8844_v6, %v11823_v43  ;;  %v8891_v35 = vpop.f32.mrf.mxu1  ;;  %v10435_v18 = vld [vmem:[%s10954_s27 + $0x98] ss:$24 sps:$4 sm:$0xff]  }
 0x11b   : > { %v8846_v38 = vpop.f32.mrf.mxu0 }
 0x11c   : > { %v11973_v40 = vadd.f32 %v8890_v47, %v1114_v29  ;;  %v8847_v36 = vadd.f32 %v8846_v38, %v8845_v1  ;;  %v8892_v33 = vpop.f32.mrf.mxu1  ;;  %v10450_v29 = vld [vmem:[%s10954_s27 + $0xcc] ss:$24 sps:$4 sm:$0xff]   ;;  %v10451_v38 = vld [vmem:[%s13684_s1 + $0xa98] sm:$0xff]  }
 0x11d   : > { %v8893_v53 = vadd.f32 %v8892_v33, %v8891_v35  ;;  %v8848_v43 = vpop.f32.mrf.mxu0  ;;  %3437 = vmatmul.mubr.bf16.vlgmr.msra.gmra.mxu0 %v11957_v5  ;;  %v10452_v33 = vld [vmem:[%s13684_s1 + $0x450] sm:$0xff]  }
 0x11e   : > { %v1117_v63 = vadd.f32 %v8847_v36, %v11839_v30  ;;  %v8894_v11 = vpop.f32.mrf.mxu1  ;;  %3510 = vmatmul.mubr.bf16.vlgmr.msra.gmra.mxu1 %v10411_v8  ;;  %9379 = vmatpush3.bf16.msra.mxu0 %v10415_v50  ;;  %v10443_v8 = vld [vmem:[%s13684_s1 + $0x418] sm:$0xff]  }
 0x11f   : > { %v8849_v24 = vpop.f32.mrf.mxu0  ;;  %9425 = vmatpush3.bf16.msra.mxu1 %v10417_v22  ;;  %9380 = vmatprep.subr.bf16.mxu0 %v10418_v20  ;;  %v10444_v50 = vld [vmem:[%s13684_s1 + $0xad8] sm:$0xff]  }
 0x120   : > { %v11993_v32 = vadd.f32 %v8893_v53, %v1117_v63  ;;  %v8850_v30 = vadd.f32 %v8849_v24, %v8848_v43  ;;  %v8895_v39 = vpop.f32.mrf.mxu1  ;;  %3444 = vmatprep.mubr.bf16.mxu0 %v11971_v23  ;;  %3517 = vmatprep.mubr.bf16.mxu1 %v10425_v9  ;;  %v12044_v22 = vld [vmem:[%s10954_s27 + $0xc4] ss:$24 sps:$4 sm:$0xff]   ;;  %v10454_v63 = vld [vmem:[%s13684_s1 + $0xad0] sm:$0xff]  }
 0x121   : > { %v8896_v48 = vadd.f32 %v8895_v39, %v8894_v11  ;;  %v8851_v41 = vpop.f32.mrf.mxu0  ;;  %9426 = vmatprep.subr.bf16.mxu1 %v10426_v10  ;;  %v10455_v24 = vld [vmem:[%s13684_s1 + $0xa90] sm:$0xff]   ;;  %v10456_v39 = vld [vmem:[%s13684_s1 + $0x448] sm:$0xff]  }
 0x122   : > { %v1122_v0 = vadd.f32 %v8850_v30, %v11852_v60  ;;  %v8897_v59 = vpop.f32.mrf.mxu1  ;;  %9381 = vmatpush3.bf16.msra.mxu0 %v10419_v45  ;;  %v10439_v60 = vld [vmem:[%s13684_s1 + $0x420] sm:$0xff]  }
 0x123   : > { %v8852_v55 = vpop.f32.mrf.mxu0  ;;  %9427 = vmatpush3.bf16.msra.mxu1 %v10427_v12  ;;  %9382 = vmatprep.subr.bf16.mxu0 %v10428_v14  ;;  %v12068_v30 = vld [vmem:[%s10954_s27 + $0xc0] ss:$24 sps:$4 sm:$0xff]  }
 0x124   : > { %v12014_v49 = vadd.f32 %v8896_v48, %v1122_v0  ;;  %v8853_v19 = vadd.f32 %v8852_v55, %v8851_v41  ;;  %v8898_v26 = vpop.f32.mrf.mxu1  ;;  %9428 = vmatprep.subr.bf16.mxu1 %v10430_v7  ;;  %v10448_v7 = vld [vmem:[%s10954_s27 + $0xc8] ss:$24 sps:$4 sm:$0xff]   ;;  %v12078_v48 = vld [vmem:[%s10954_s27 + $0xf4] ss:$24 sps:$4 sm:$0xff]  }
 0x125   : > { %v8899_v46 = vadd.f32 %v8898_v26, %v8897_v59  ;;  %v8854_v42 = vpop.f32.mrf.mxu0  ;;  %3445 = vmatmul.mubr.bf16.gmra.mxu0 %v11988_v31  ;;  %v10462_v0 = vld [vmem:[%s10954_s27 + $0xfc] ss:$24 sps:$4 sm:$0xff]   ;;  %v10464_v59 = vld [vmem:[%s13684_s1 + $0xac8] sm:$0xff]  }
 0x126   : > { %v1125_v54 = vadd.f32 %v8853_v19, %v11871_v34  ;;  %v8900_v2 = vpop.f32.mrf.mxu1  ;;  %3518 = vmatmul.mubr.bf16.gmra.mxu1 %v10423_v27  ;;  %9383 = vmatpush3.bf16.msra.mxu0 %v10429_v62  ;;  %v10465_v26 = vld [vmem:[%s13684_s1 + $0xa88] sm:$0xff]  }
 0x127   : > { %v8855_v13 = vpop.f32.mrf.mxu0  ;;  %9429 = vmatpush3.bf16.msra.mxu1 %v10431_v44  ;;  %3452 = vmatprep.mubr.bf16.mxu0 %v12008_v4 }
 0x128   : > { %v12034_v34 = vadd.f32 %v8899_v46, %v1125_v54  ;;  %v8856_v17 = vadd.f32 %v8855_v13, %v8854_v42  ;;  %v8901_v6 = vpop.f32.mrf.mxu1  ;;  %3525 = vmatprep.mubr.bf16.mxu1 %v10437_v25  ;;  %9384 = vmatprep.subr.bf16.mxu0 %v10438_v16  ;;  %v10463_v16 = vld [vmem:[%s13684_s1 + $0x408] sm:$0xff]  }
 0x129   : > { %v8902_v47 = vadd.f32 %v8901_v6, %v8900_v2  ;;  %v8857_v1 = vpop.f32.mrf.mxu0  ;;  %9430 = vmatprep.subr.bf16.mxu1 %v10440_v51  ;;  %v10468_v2 = vld [vmem:[%s13684_s1 + $0xac0] sm:$0xff]   ;;  %v12106_v6 = vld [vmem:[%s10954_s27 + $0xf0] ss:$24 sps:$4 sm:$0xff]  }
 0x12a   : > { %v1130_v35 = vadd.f32 %v8856_v17, %v11884_v21  ;;  %v8903_v20 = vpop.f32.mrf.mxu1  ;;  %9385 = vmatpush3.bf16.msra.mxu0 %v10439_v60  ;;  %v10453_v21 = vld [vmem:[%s13684_s1 + $0x410] sm:$0xff]  }
 0x12b   : > { %v8858_v36 = vpop.f32.mrf.mxu0  ;;  %9431 = vmatpush3.bf16.msra.mxu1 %v10441_v3  ;;  %9386 = vmatprep.subr.bf16.mxu0 %v10442_v15  ;;  %v10467_v15 = vld [vmem:[%s13684_s1 + $0x400] sm:$0xff]  }
 0x12c   : > { %v12054_v45 = vadd.f32 %v8902_v47, %v1130_v35  ;;  %v8859_v9 = vadd.f32 %v8858_v36, %v8857_v1  ;;  %v8904_v53 = vpop.f32.mrf.mxu1  ;;  %9432 = vmatprep.subr.bf16.mxu1 %v10444_v50  ;;  %v10473_v47 = vld [vmem:[%s13684_s1 + $0xb78] sm:$0xff]  }
 0x12d   : > { %v8905_v43 = vadd.f32 %v8904_v53, %v8903_v20  ;;  %v8860_v10 = vpop.f32.mrf.mxu0  ;;  %3453 = vmatmul.mubr.bf16.gmra.mxu0 %v12028_v56  ;;  %v12117_v35 = vld [vmem:[%s10954_s27 + $0xf8] ss:$24 sps:$4 sm:$0xff]  }
 0x12e   : > { %v1133_v11 = vadd.f32 %v8859_v9, %v11900_v61  ;;  %v8906_v12 = vpop.f32.mrf.mxu1  ;;  %3526 = vmatmul.mubr.bf16.gmra.mxu1 %v10435_v18  ;;  %9387 = vmatpush3.bf16.msra.mxu0 %v10443_v8  ;;  %v10469_v18 = vld [vmem:[%s13684_s1 + $0xa80] sm:$0xff]   ;;  %v10475_v20 = vld [vmem:[%s13684_s1 + $0xbf8] sm:$0xff]  }
 0x12f   : > { %v8861_v14 = vpop.f32.mrf.mxu0  ;;  %3460 = vmatprep.mubr.bf16.mxu0 %v12044_v22  ;;  %3533 = vmatprep.mubr.bf16.mxu1 %v10450_v29 }
 0x130   : > { %v12074_v61 = vadd.f32 %v8905_v43, %v1133_v11  ;;  %v8862_v27 = vadd.f32 %v8861_v14, %v8860_v10  ;;  %v8907_v62 = vpop.f32.mrf.mxu1  ;;  %9433 = vmatpush3.bf16.msra.mxu1 %v10451_v38  ;;  %9388 = vmatprep.subr.bf16.mxu0 %v10452_v33  ;;  %v12124_v33 = vld [vmem:[%s10954_s27 + $0x44] ss:$24 sps:$4 sm:$0xff]  }
 0x131   : > { %v8908_v41 = vadd.f32 %v8907_v62, %v8906_v12  ;;  %v8863_v44 = vpop.f32.mrf.mxu0  ;;  %9434 = vmatprep.subr.bf16.mxu1 %v10454_v63 }
 0x132   : > { %v1138_v25 = vadd.f32 %v8862_v27, %v11916_v37  ;;  %v8909_v55 = vpop.f32.mrf.mxu1  ;;  %9389 = vmatpush3.bf16.msra.mxu0 %v10453_v21  ;;  %v10466_v37 = vld [vmem:[%s13684_s1 + $0x440] sm:$0xff]  }
 0x133   : > { %v8864_v19 = vpop.f32.mrf.mxu0  ;;  %9390 = vmatprep.subr.bf16.mxu0 %v10456_v39  ;;  %v12136_v27 = vld [vmem:[%s10954_s27 + $0x40] ss:$24 sps:$4 sm:$0xff]  }
 0x134   : > { %v12091_v60 = vadd.f32 %v8908_v41, %v1138_v25  ;;  %v8865_v46 = vadd.f32 %v8864_v19, %v8863_v44  ;;  %v8910_v42 = vpop.f32.mrf.mxu1  ;;  %9435 = vmatpush3.bf16.msra.mxu1 %v10455_v24  ;;  %v10478_v19 = vld [vmem:[%s13684_s1 + $0xb30] sm:$0xff]  }
 0x135   : > { %v8911_v51 = vadd.f32 %v8910_v42, %v8909_v55  ;;  %v8866_v54 = vpop.f32.mrf.mxu0  ;;  %3461 = vmatmul.mubr.bf16.gmra.mxu0 %v12068_v30  ;;  %9436 = vmatprep.subr.bf16.mxu1 %v10464_v59  ;;  %v10477_v59 = vld [vmem:[%s13684_s1 + $0xb70] sm:$0xff]  }
 0x136   : > { %v1141_v3 = vadd.f32 %v8865_v46, %v11933_v52  ;;  %v8912_v13 = vpop.f32.mrf.mxu1  ;;  %3534 = vmatmul.mubr.bf16.gmra.mxu1 %v10448_v7  ;;  %3468 = vmatprep.mubr.bf16.mxu0 %v12078_v48  ;;  %v10482_v42 = vld [vmem:[%s13684_s1 + $0xbf0] sm:$0xff]  }
 0x137   : > { %v8867_v17 = vpop.f32.mrf.mxu0  ;;  %3541 = vmatprep.mubr.bf16.mxu1 %v10462_v0  ;;  %9391 = vmatpush3.bf16.msra.mxu0 %v10463_v16 }
 0x138   : > { %v12111_v52 = vadd.f32 %v8911_v51, %v1141_v3  ;;  %v8868_v8 = vadd.f32 %v8867_v17, %v8866_v54  ;;  %v8913_v50 = vpop.f32.mrf.mxu1  ;;  %9437 = vmatpush3.bf16.msra.mxu1 %v10465_v26  ;;  %9392 = vmatprep.subr.bf16.mxu0 %v10466_v37  ;;  %v10483_v54 = vld [vmem:[%s13684_s1 + $0xbb0] sm:$0xff]  }
 0x139   : > { %v8914_v1 = vadd.f32 %v8913_v50, %v8912_v13  ;;  %v8869_v29 = vpop.f32.mrf.mxu0  ;;  %9438 = vmatprep.subr.bf16.mxu1 %v10468_v2  ;;  %v12166_v3 = vld [vmem:[%s10954_s27 + $0x70] ss:$24 sps:$4 sm:$0xff]  }
 0x13a   : > { %v1146_v38 = vadd.f32 %v8868_v8, %v11948_v28  ;;  %v8915_v36 = vpop.f32.mrf.mxu1  ;;  %v10484_v13 = vld [vmem:[%s13684_s1 + $0xb68] sm:$0xff]  }
 0x13b   : > { %v8870_v9 = vpop.f32.mrf.mxu0  ;;  %9393 = vmatpush3.bf16.msra.mxu0 %v10467_v15 }
 0x13c   : > { %v12126_v53 = vadd.f32 %v8914_v1, %v1146_v38  ;;  %v8871_v21 = vadd.f32 %v8870_v9, %v8869_v29  ;;  %v8916_v43 = vpop.f32.mrf.mxu1  ;;  %9439 = vmatpush3.bf16.msra.mxu1 %v10469_v18  ;;  %9470 = vmatprep.subr.bf16.mxu0 %v10473_v47  ;;  %v10486_v18 = vld [vmem:[%s13684_s1 + $0xbe8] sm:$0xff]   ;;  %v10491_v38 = vld [vmem:[%s13684_s1 + $0xb60] sm:$0xff]  }
 0x13d   : > { %v8917_v10 = vadd.f32 %v8916_v43, %v8915_v36  ;;  %v8934_v63 = vpop.f32.mrf.mxu0  ;;  %3469 = vmatmul.mubr.bf16.gmra.mxu0 %v12106_v6  ;;  %9516 = vmatprep.subr.bf16.mxu1 %v10475_v20  ;;  %v10487_v47 = vld [vmem:[%s13684_s1 + $0xba8] sm:$0xff]  }
 0x13e   : > { %v1149_v11 = vadd.f32 %v8871_v21, %v11954_v57  ;;  %v8980_v28 = vpop.f32.mrf.mxu1  ;;  %3542 = vmatmul.mubr.bf16.gmra.mxu1 %v12117_v35  ;;  %3582 = vmatprep.mubr.bf16.mxu0 %v12124_v33  ;;  %v10474_v57 = vld [vmem:[%s13684_s1 + $0xb38] sm:$0xff]  }
 0x13f   : > { %v8935_v12 = vpop.f32.mrf.mxu0  ;;  %4050 = vmatprep.mubr.bf16.mxu1 %v11946_v58  ;;  %v10476_v58 = vld [vmem:[%s13684_s1 + $0xbb8] sm:$0xff]  }
 0x140   : > { %v12133_v24 = vadd.f32 %v8917_v10, %v1149_v11  ;;  %v8936_v14 = vadd.f32 %v8935_v12, %v8934_v63  ;;  %v8981_v39 = vpop.f32.mrf.mxu1  ;;  %v10493_v63 = vld [vmem:[%s13684_s1 + $0xbe0] sm:$0xff]  }
 0x141   : > { %v8982_v62 = vadd.f32 %v8981_v39, %v8980_v28  ;;  %v8937_v7 = vpop.f32.mrf.mxu0  ;;  %v10494_v12 = vld [vmem:[%s13684_s1 + $0xba0] sm:$0xff]  }
 0x142   : > { %v1617_v41 = vadd.f32 %v8936_v14, %v11973_v40  ;;  %v8983_v44 = vpop.f32.mrf.mxu1  ;;  %v12154_v40 = vld [vmem:[%s10954_s27 + $0x74] ss:$24 sps:$4 sm:$0xff]   ;;  %v12206_v39 = vld [vmem:[%s10954_s27 + $0xa0] ss:$24 sps:$4 sm:$0xff]  }
 0x143   : > { %v8938_v0 = vpop.f32.mrf.mxu0 }
 0x144   : > { %v12148_v25 = vadd.f32 %v8982_v62, %v1617_v41  ;;  %v8939_v55 = vadd.f32 %v8938_v0, %v8937_v7  ;;  %v8984_v16 = vpop.f32.mrf.mxu1  ;;  %v10495_v62 = vld [vmem:[%s13684_s1 + $0xb58] sm:$0xff]   ;;  %v12222_v0 = vld [vmem:[%s10954_s27 + $0xd4] ss:$24 sps:$4 sm:$0xff]  }
 0x145   : > { %v8985_v26 = vadd.f32 %v8984_v16, %v8983_v44  ;;  %v8940_v46 = vpop.f32.mrf.mxu0  ;;  %3583 = vmatmul.mubr.bf16.vlgmr.msra.gmra.mxu0 %v12136_v27  ;;  %v10497_v41 = vld [vmem:[%s13684_s1 + $0xbd8] sm:$0xff]  }
 0x146   : > { %v1620_v37 = vadd.f32 %v8939_v55, %v11993_v32  ;;  %v8986_v51 = vpop.f32.mrf.mxu1  ;;  %4051 = vmatmul.mubr.bf16.vlgmr.msra.gmra.mxu1 %v11957_v5  ;;  %9471 = vmatpush3.bf16.msra.mxu0 %v10474_v57  ;;  %v10485_v5 = vld [vmem:[%s13684_s1 + $0xb28] sm:$0xff]   ;;  %v10496_v57 = vld [vmem:[%s13684_s1 + $0xb18] sm:$0xff]  }
 0x147   : > { %v8941_v2 = vpop.f32.mrf.mxu0  ;;  %9517 = vmatpush3.bf16.msra.mxu1 %v10476_v58  ;;  %9472 = vmatprep.subr.bf16.mxu0 %v10477_v59 }
 0x148   : > { %v12171_v15 = vadd.f32 %v8985_v26, %v1620_v37  ;;  %v8942_v32 = vadd.f32 %v8941_v2, %v8940_v46  ;;  %v8987_v17 = vpop.f32.mrf.mxu1  ;;  %3590 = vmatprep.mubr.bf16.mxu0 %v12154_v40  ;;  %4058 = vmatprep.mubr.bf16.mxu1 %v11971_v23  ;;  %v12186_v23 = vld [vmem:[%s10954_s27 + $0xa4] ss:$24 sps:$4 sm:$0xff]  }
 0x149   : > { %v8988_v8 = vadd.f32 %v8987_v17, %v8986_v51  ;;  %v8943_v50 = vpop.f32.mrf.mxu0  ;;  %9518 = vmatprep.subr.bf16.mxu1 %v10482_v42 }
 0x14a   : > { %v1625_v1 = vadd.f32 %v8942_v32, %v12014_v49  ;;  %v8989_v29 = vpop.f32.mrf.mxu1  ;;  %9473 = vmatpush3.bf16.msra.mxu0 %v10478_v19  ;;  %v10492_v49 = vld [vmem:[%s13684_s1 + $0xb20] sm:$0xff]   ;;  %v10502_v19 = vld [vmem:[%s13684_s1 + $0xb50] sm:$0xff]  }
 0x14b   : > { %v8944_v20 = vpop.f32.mrf.mxu0  ;;  %9519 = vmatpush3.bf16.msra.mxu1 %v10483_v54  ;;  %9474 = vmatprep.subr.bf16.mxu0 %v10484_v13  ;;  %v10504_v54 = vld [vmem:[%s13684_s1 + $0xbd0] sm:$0xff]  }
 0x14c   : > { %v12191_v36 = vadd.f32 %v8988_v8, %v1625_v1  ;;  %v8945_v9 = vadd.f32 %v8944_v20, %v8943_v50  ;;  %v8990_v21 = vpop.f32.mrf.mxu1  ;;  %9520 = vmatprep.subr.bf16.mxu1 %v10486_v18  ;;  %v10505_v32 = vld [vmem:[%s13684_s1 + $0xb90] sm:$0xff]   ;;  %v10506_v18 = vld [vmem:[%s13684_s1 + $0xb48] sm:$0xff]   ;;  %v12256_v50 = vld [vmem:[%s10954_s27 + $0x104] ss:$24 sps:$4 sm:$0xff]  }
 0x14d   : > { %v8991_v43 = vadd.f32 %v8990_v21, %v8989_v29  ;;  %v8946_v10 = vpop.f32.mrf.mxu0  ;;  %3591 = vmatmul.mubr.bf16.gmra.mxu0 %v12166_v3  ;;  %v10511_v29 = vld [vmem:[%s13684_s1 + $0xbc8] sm:$0xff]  }
 0x14e   : > { %v1628_v11 = vadd.f32 %v8945_v9, %v12034_v34  ;;  %v8992_v28 = vpop.f32.mrf.mxu1  ;;  %4059 = vmatmul.mubr.bf16.gmra.mxu1 %v11988_v31  ;;  %9475 = vmatpush3.bf16.msra.mxu0 %v10485_v5  ;;  %v12246_v5 = vld [vmem:[%s10954_s27 + $0xd0] ss:$24 sps:$4 sm:$0xff]  }
 0x14f   : > { %v8947_v14 = vpop.f32.mrf.mxu0  ;;  %9521 = vmatpush3.bf16.msra.mxu1 %v10487_v47  ;;  %3598 = vmatprep.mubr.bf16.mxu0 %v12186_v23  ;;  %v10512_v21 = vld [vmem:[%s13684_s1 + $0xb88] sm:$0xff]  }
 0x150   : > { %v12212_v34 = vadd.f32 %v8991_v43, %v1628_v11  ;;  %v8948_v7 = vadd.f32 %v8947_v14, %v8946_v10  ;;  %v8993_v31 = vpop.f32.mrf.mxu1  ;;  %4066 = vmatprep.mubr.bf16.mxu1 %v12008_v4  ;;  %9476 = vmatprep.subr.bf16.mxu0 %v10491_v38  ;;  %v10501_v4 = vld [vmem:[%s13684_s1 + $0xb98] sm:$0xff]   ;;  %v10510_v38 = vld [vmem:[%s13684_s1 + $0xb08] sm:$0xff]  }
 0x151   : > { %v8994_v44 = vadd.f32 %v8993_v31, %v8992_v28  ;;  %v8949_v58 = vpop.f32.mrf.mxu0  ;;  %9522 = vmatprep.subr.bf16.mxu1 %v10493_v63  ;;  %v10515_v28 = vld [vmem:[%s13684_s1 + $0xbc0] sm:$0xff]  }
 0x152   : > { %v1633_v59 = vadd.f32 %v8948_v7, %v12054_v45  ;;  %v8995_v55 = vpop.f32.mrf.mxu1  ;;  %9477 = vmatpush3.bf16.msra.mxu0 %v10492_v49  ;;  %v10503_v45 = vld [vmem:[%s13684_s1 + $0xb10] sm:$0xff]   ;;  %v12284_v31 = vld [vmem:[%s10954_s27 + $0x100] ss:$24 sps:$4 sm:$0xff]  }
 0x153   : > { %v8950_v16 = vpop.f32.mrf.mxu0  ;;  %9523 = vmatpush3.bf16.msra.mxu1 %v10494_v12  ;;  %9478 = vmatprep.subr.bf16.mxu0 %v10495_v62  ;;  %v10514_v62 = vld [vmem:[%s13684_s1 + $0xb00] sm:$0xff]  }
 0x154   : > { %v12231_v26 = vadd.f32 %v8994_v44, %v1633_v59  ;;  %v8951_v46 = vadd.f32 %v8950_v16, %v8949_v58  ;;  %v8996_v42 = vpop.f32.mrf.mxu1  ;;  %9524 = vmatprep.subr.bf16.mxu1 %v10497_v41  ;;  %v10517_v44 = vld [vmem:[%s13684_s1 + $0x4f8] sm:$0xff]  }
 0x155   : > { %v8997_v37 = vadd.f32 %v8996_v42, %v8995_v55  ;;  %v8952_v51 = vpop.f32.mrf.mxu0  ;;  %3599 = vmatmul.mubr.bf16.gmra.mxu0 %v12206_v39 }
 0x156   : > { %v1636_v2 = vadd.f32 %v8951_v46, %v12074_v61  ;;  %v8998_v13 = vpop.f32.mrf.mxu1  ;;  %4067 = vmatmul.mubr.bf16.gmra.mxu1 %v12028_v56  ;;  %9479 = vmatpush3.bf16.msra.mxu0 %v10496_v57  ;;  %v10516_v57 = vld [vmem:[%s13684_s1 + $0xb80] sm:$0xff]  }
 0x157   : > { %v8953_v17 = vpop.f32.mrf.mxu0  ;;  %3606 = vmatprep.mubr.bf16.mxu0 %v12222_v0  ;;  %4074 = vmatprep.mubr.bf16.mxu1 %v12044_v22 }
 0x158   : > { %v12253_v61 = vadd.f32 %v8997_v37, %v1636_v2  ;;  %v8954_v8 = vadd.f32 %v8953_v17, %v8952_v51  ;;  %v8999_v56 = vpop.f32.mrf.mxu1  ;;  %9525 = vmatpush3.bf16.msra.mxu1 %v10501_v4  ;;  %9480 = vmatprep.subr.bf16.mxu0 %v10502_v19 }
 0x159   : > { %v9000_v47 = vadd.f32 %v8999_v56, %v8998_v13  ;;  %v8955_v1 = vpop.f32.mrf.mxu0  ;;  %9526 = vmatprep.subr.bf16.mxu1 %v10504_v54 }
 0x15a   : > { %v1641_v22 = vadd.f32 %v8954_v8, %v12091_v60  ;;  %v9001_v20 = vpop.f32.mrf.mxu1  ;;  %9481 = vmatpush3.bf16.msra.mxu0 %v10503_v45  ;;  %v10513_v60 = vld [vmem:[%s13684_s1 + $0xb40] sm:$0xff]  }
 0x15b   : > { %v8956_v9 = vpop.f32.mrf.mxu0  ;;  %9482 = vmatprep.subr.bf16.mxu0 %v10506_v18 }
 0x15c   : > { %v12268_v49 = vadd.f32 %v9000_v47, %v1641_v22  ;;  %v8957_v43 = vadd.f32 %v8956_v9, %v8955_v1  ;;  %v9002_v10 = vpop.f32.mrf.mxu1  ;;  %9527 = vmatpush3.bf16.msra.mxu1 %v10505_v32 }
 0x15d   : > { %v9003_v63 = vadd.f32 %v9002_v10, %v9001_v20  ;;  %v8958_v11 = vpop.f32.mrf.mxu0  ;;  %3607 = vmatmul.mubr.bf16.gmra.mxu0 %v12246_v5  ;;  %9528 = vmatprep.subr.bf16.mxu1 %v10511_v29  ;;  %v10522_v20 = vld [vmem:[%s13684_s1 + $0x4b0] sm:$0xff]  }
 0x15e   : > { %v1644_v12 = vadd.f32 %v8957_v43, %v12111_v52  ;;  %v9004_v14 = vpop.f32.mrf.mxu1  ;;  %4075 = vmatmul.mubr.bf16.gmra.mxu1 %v12068_v30  ;;  %3614 = vmatprep.mubr.bf16.mxu0 %v12256_v50  ;;  %v10523_v43 = vld [vmem:[%s13684_s1 + $0x570] sm:$0xff]  }
 0x15f   : > { %v8959_v7 = vpop.f32.mrf.mxu0  ;;  %4082 = vmatprep.mubr.bf16.mxu1 %v12078_v48  ;;  %9483 = vmatpush3.bf16.msra.mxu0 %v10510_v38  ;;  %v10519_v48 = vld [vmem:[%s13684_s1 + $0x578] sm:$0xff]  }
 0x160   : > { %v12290_v52 = vadd.f32 %v9003_v63, %v1644_v12  ;;  %v8960_v41 = vadd.f32 %v8959_v7, %v8958_v11  ;;  %v9005_v30 = vpop.f32.mrf.mxu1  ;;  %9529 = vmatpush3.bf16.msra.mxu1 %v10512_v21  ;;  %9484 = vmatprep.subr.bf16.mxu0 %v10513_v60  ;;  %v10800_v21 = vld [vmem:[%s10954_s27 + $0x38] ss:$24 sps:$4 sm:$0xff]  }
 0x161   : > { %v9006_v58 = vadd.f32 %v9005_v30, %v9004_v14  ;;  %v8961_v59 = vpop.f32.mrf.mxu0  ;;  %9530 = vmatprep.subr.bf16.mxu1 %v10515_v28  ;;  %v10524_v60 = vld [vmem:[%s13684_s1 + $0x530] sm:$0xff]   ;;  %v10525_v28 = vld [vmem:[%s13684_s1 + $0x4e8] sm:$0xff]  }
 0x162   : > { %v1649_v55 = vadd.f32 %v8960_v41, %v12126_v53  ;;  %v9007_v4 = vpop.f32.mrf.mxu1  ;;  %v10799_v53 = vld [vmem:[%s10954_s27 + $0x3c] ss:$24 sps:$4 sm:$0xff]   ;;  %v10526_v41 = vld [vmem:[%s13684_s1 + $0x4a8] sm:$0xff]  }
 0x163   : > { %v8962_v16 = vpop.f32.mrf.mxu0  ;;  %9485 = vmatpush3.bf16.msra.mxu0 %v10514_v62  ;;  %v10801_v62 = vld [vmem:[%s10954_s27 + $0x6c] ss:$24 sps:$4 sm:$0xff]  }
 0x164   : > { %v12299_v19 = vadd.f32 %v9006_v58, %v1649_v55  ;;  %v8963_v46 = vadd.f32 %v8962_v16, %v8961_v59  ;;  %v9008_v42 = vpop.f32.mrf.mxu1  ;;  %9531 = vmatpush3.bf16.msra.mxu1 %v10516_v57  ;;  %9562 = vmatprep.subr.bf16.mxu0 %v10517_v44  ;;  %v10528_v44 = vld [vmem:[%s13684_s1 + $0x528] sm:$0xff]   ;;  %v10529_v59 = vld [vmem:[%s13684_s1 + $0x4e0] sm:$0xff]  }
 0x165   : > { %v9009_v45 = vadd.f32 %v9008_v42, %v9007_v4  ;;  %v9026_v37 = vpop.f32.mrf.mxu0  ;;  %3615 = vmatmul.mubr.bf16.gmra.mxu0 %v12284_v31  ;;  %9608 = vmatprep.subr.bf16.mxu1 %v10519_v48  ;;  %v10530_v4 = vld [vmem:[%s13684_s1 + $0x4a0] sm:$0xff]  }
 0x166   : > { %v1652_v51 = vadd.f32 %v8963_v46, %v12133_v24  ;;  %v9072_v54 = vpop.f32.mrf.mxu1  ;;  %4083 = vmatmul.mubr.bf16.gmra.mxu1 %v12106_v6  ;;  %4123 = vmatprep.mubr.bf16.mxu0 %v10799_v53  ;;  %v10518_v24 = vld [vmem:[%s13684_s1 + $0x4b8] sm:$0xff]   ;;  %v10802_v42 = vld [vmem:[%s10954_s27 + $0x68] ss:$24 sps:$4 sm:$0xff]  }
 0x167   : > { %v9027_v2 = vpop.f32.mrf.mxu0  ;;  %4196 = vmatprep.mubr.bf16.mxu1 %v12124_v33  ;;  %v10520_v6 = vld [vmem:[%s13684_s1 + $0x538] sm:$0xff]   ;;  %v10521_v33 = vld [vmem:[%s13684_s1 + $0x4f0] sm:$0xff]  }
 0x168   : > { %v12306_v13 = vadd.f32 %v9009_v45, %v1652_v51  ;;  %v9028_v32 = vadd.f32 %v9027_v2, %v9026_v37  ;;  %v9073_v17 = vpop.f32.mrf.mxu1  ;;  %v10531_v45 = vld [vmem:[%s13684_s1 + $0x560] sm:$0xff]   ;;  %v10803_v2 = vld [vmem:[%s10954_s27 + $0x9c] ss:$24 sps:$4 sm:$0xff]  }
 0x169   : > { %v9074_v18 = vadd.f32 %v9073_v17, %v9072_v54  ;;  %v9029_v8 = vpop.f32.mrf.mxu0  ;;  %v10532_v51 = vld [vmem:[%s13684_s1 + $0x520] sm:$0xff]  }
 0x16a   : > { %v9075_v56 = vpop.f32.mrf.mxu1 }
 0x16b   : > { %v12314_v47 = vadd.f32 %v9074_v18, %v9028_v32  ;;  %v9030_v1 = vpop.f32.mrf.mxu0  ;;  %v10533_v32 = vld [vmem:[%s13684_s1 + $0x4d8] sm:$0xff]  }
 0x16c   : > { %v9031_v29 = vadd.f32 %v9030_v1, %v9029_v8  ;;  %v9076_v22 = vpop.f32.mrf.mxu1 }
 0x16d   : > { %v9077_v38 = vadd.f32 %v9076_v22, %v9075_v56  ;;  %v9032_v9 = vpop.f32.mrf.mxu0  ;;  %4124 = vmatmul.mubr.bf16.vlgmr.msra.gmra.mxu0 %v10800_v21  ;;  %v10804_v21 = vld [vmem:[%s10954_s27 + $0x98] ss:$24 sps:$4 sm:$0xff]  }
 0x16e   : > { %v9078_v10 = vpop.f32.mrf.mxu1  ;;  %4197 = vmatmul.mubr.bf16.vlgmr.msra.gmra.mxu1 %v12136_v27  ;;  %9563 = vmatpush3.bf16.msra.mxu0 %v10518_v24  ;;  %v10527_v27 = vld [vmem:[%s13684_s1 + $0x568] sm:$0xff]  }
 0x16f   : > { %v12330_v63 = vadd.f32 %v9077_v38, %v9031_v29  ;;  %v9033_v11 = vpop.f32.mrf.mxu0  ;;  %9609 = vmatpush3.bf16.msra.mxu1 %v10520_v6  ;;  %9564 = vmatprep.subr.bf16.mxu0 %v10521_v33  ;;  %v10534_v6 = vld [vmem:[%s13684_s1 + $0x498] sm:$0xff]  }
 0x170   : > { %v9034_v12 = vadd.f32 %v9033_v11, %v9032_v9  ;;  %v9079_v14 = vpop.f32.mrf.mxu1  ;;  %4131 = vmatprep.mubr.bf16.mxu0 %v10801_v62  ;;  %4204 = vmatprep.mubr.bf16.mxu1 %v12154_v40 }
 0x171   : > { %v9080_v7 = vadd.f32 %v9079_v14, %v9078_v10  ;;  %v9035_v57 = vpop.f32.mrf.mxu0  ;;  %9610 = vmatprep.subr.bf16.mxu1 %v10523_v43  ;;  %v10539_v43 = vld [vmem:[%s13684_s1 + $0x550] sm:$0xff]   ;;  %v10541_v14 = vld [vmem:[%s13684_s1 + $0x4c8] sm:$0xff]  }
 0x172   : > { %v9081_v30 = vpop.f32.mrf.mxu1  ;;  %9565 = vmatpush3.bf16.msra.mxu0 %v10522_v20  ;;  %v10537_v20 = vld [vmem:[%s13684_s1 + $0x4d0] sm:$0xff]  }
 0x173   : > { %v12346_v58 = vadd.f32 %v9080_v7, %v9034_v12  ;;  %v9036_v40 = vpop.f32.mrf.mxu0  ;;  %9611 = vmatpush3.bf16.msra.mxu1 %v10524_v60  ;;  %9566 = vmatprep.subr.bf16.mxu0 %v10525_v28  ;;  %v10538_v60 = vld [vmem:[%s13684_s1 + $0x490] sm:$0xff]   ;;  %v10805_v12 = vld [vmem:[%s10954_s27 + $0xcc] ss:$24 sps:$4 sm:$0xff]  }
 0x174   : > { %v9037_v48 = vadd.f32 %v9036_v40, %v9035_v57  ;;  %v9082_v55 = vpop.f32.mrf.mxu1  ;;  %9612 = vmatprep.subr.bf16.mxu1 %v10527_v27 }
 0x175   : > { %v9083_v16 = vadd.f32 %v9082_v55, %v9081_v30  ;;  %v9038_v46 = vpop.f32.mrf.mxu0  ;;  %4132 = vmatmul.mubr.bf16.gmra.mxu0 %v10802_v42  ;;  %v10542_v30 = vld [vmem:[%s13684_s1 + $0x488] sm:$0xff]  }
 0x176   : > { %v9084_v37 = vpop.f32.mrf.mxu1  ;;  %4205 = vmatmul.mubr.bf16.gmra.mxu1 %v12166_v3  ;;  %9567 = vmatpush3.bf16.msra.mxu0 %v10526_v41  ;;  %v10535_v3 = vld [vmem:[%s13684_s1 + $0x558] sm:$0xff]   ;;  %v10806_v42 = vld [vmem:[%s10954_s27 + $0xc8] ss:$24 sps:$4 sm:$0xff]  }
 0x177   : > { %v12362_v54 = vadd.f32 %v9083_v16, %v9037_v48  ;;  %v9039_v53 = vpop.f32.mrf.mxu0  ;;  %9613 = vmatpush3.bf16.msra.mxu1 %v10528_v44  ;;  %4139 = vmatprep.mubr.bf16.mxu0 %v10803_v2 }
 0x178   : > { %v9040_v17 = vadd.f32 %v9039_v53, %v9038_v46  ;;  %v9085_v18 = vpop.f32.mrf.mxu1  ;;  %4212 = vmatprep.mubr.bf16.mxu1 %v12186_v23  ;;  %9568 = vmatprep.subr.bf16.mxu0 %v10529_v59  ;;  %v10536_v23 = vld [vmem:[%s13684_s1 + $0x518] sm:$0xff]   ;;  %v10544_v59 = vld [vmem:[%s13684_s1 + $0x508] sm:$0xff]   ;;  %v10546_v53 = vld [vmem:[%s13684_s1 + $0x480] sm:$0xff]  }
 0x179   : > { %v9086_v8 = vadd.f32 %v9085_v18, %v9084_v37  ;;  %v9041_v56 = vpop.f32.mrf.mxu0  ;;  %9614 = vmatprep.subr.bf16.mxu1 %v10531_v45  ;;  %v10547_v45 = vld [vmem:[%s13684_s1 + $0x540] sm:$0xff]  }
 0x17a   : > { %v9087_v24 = vpop.f32.mrf.mxu1  ;;  %9569 = vmatpush3.bf16.msra.mxu0 %v10530_v4  ;;  %v10545_v4 = vld [vmem:[%s13684_s1 + $0x4c0] sm:$0xff]  }
 0x17b   : > { %v12375_v1 = vadd.f32 %v9086_v8, %v9040_v17  ;;  %v9042_v33 = vpop.f32.mrf.mxu0  ;;  %9615 = vmatpush3.bf16.msra.mxu1 %v10532_v51  ;;  %9570 = vmatprep.subr.bf16.mxu0 %v10533_v32  ;;  %v10807_v51 = vld [vmem:[%s10954_s27 + $0xfc] ss:$24 sps:$4 sm:$0xff]   ;;  %v10548_v17 = vld [vmem:[%s13684_s1 + $0x500] sm:$0xff]  }
 0x17c   : > { %v9043_v29 = vadd.f32 %v9042_v33, %v9041_v56  ;;  %v9088_v22 = vpop.f32.mrf.mxu1  ;;  %9616 = vmatprep.subr.bf16.mxu1 %v10535_v3  ;;  %v10555_v3 = vld [vmem:[%s13684_s1 + $0x5f8] sm:$0xff]  }
 0x17d   : > { %v9089_v38 = vadd.f32 %v9088_v22, %v9087_v24  ;;  %v9044_v9 = vpop.f32.mrf.mxu0  ;;  %4140 = vmatmul.mubr.bf16.gmra.mxu0 %v10804_v21 }
 0x17e   : > { %v9090_v10 = vpop.f32.mrf.mxu1  ;;  %4213 = vmatmul.mubr.bf16.gmra.mxu1 %v12206_v39  ;;  %9571 = vmatpush3.bf16.msra.mxu0 %v10534_v6  ;;  %v10540_v39 = vld [vmem:[%s13684_s1 + $0x510] sm:$0xff]   ;;  %v12437_v6 = vld [vmem:[%s10954_s27 + $0x4c] ss:$24 sps:$4 sm:$0xff]  }
 0x17f   : > { %v12391_v11 = vadd.f32 %v9089_v38, %v9043_v29  ;;  %v9045_v28 = vpop.f32.mrf.mxu0  ;;  %4147 = vmatprep.mubr.bf16.mxu0 %v10805_v12  ;;  %4220 = vmatprep.mubr.bf16.mxu1 %v12222_v0  ;;  %v10543_v0 = vld [vmem:[%s13684_s1 + $0x548] sm:$0xff]  }
 0x180   : > { %v9046_v62 = vadd.f32 %v9045_v28, %v9044_v9  ;;  %v9091_v27 = vpop.f32.mrf.mxu1  ;;  %9617 = vmatpush3.bf16.msra.mxu1 %v10536_v23  ;;  %9572 = vmatprep.subr.bf16.mxu0 %v10537_v20  ;;  %v10554_v29 = vld [vmem:[%s10954_s27 + $0x54] ss:$24 sps:$4 sm:$0xff]  }
 0x181   : > { %v9092_v7 = vadd.f32 %v9091_v27, %v9090_v10  ;;  %v9047_v57 = vpop.f32.mrf.mxu0  ;;  %9618 = vmatprep.subr.bf16.mxu1 %v10539_v43 }
 0x182   : > { %v9093_v41 = vpop.f32.mrf.mxu1  ;;  %9573 = vmatpush3.bf16.msra.mxu0 %v10538_v60  ;;  %v12448_v60 = vld [vmem:[%s10954_s27 + $0x48] ss:$24 sps:$4 sm:$0xff]  }
 0x183   : > { %v12407_v44 = vadd.f32 %v9092_v7, %v9046_v62  ;;  %v9048_v40 = vpop.f32.mrf.mxu0  ;;  %9574 = vmatprep.subr.bf16.mxu0 %v10541_v14  ;;  %v10552_v14 = vld [vmem:[%s10954_s27 + $0x50] ss:$24 sps:$4 sm:$0xff]  }
 0x184   : > { %v9049_v48 = vadd.f32 %v9048_v40, %v9047_v57  ;;  %v9094_v55 = vpop.f32.mrf.mxu1  ;;  %9619 = vmatpush3.bf16.msra.mxu1 %v10540_v39  ;;  %v10559_v57 = vld [vmem:[%s13684_s1 + $0x5f0] sm:$0xff]  }
 0x185   : > { %v9095_v16 = vadd.f32 %v9094_v55, %v9093_v41  ;;  %v9050_v46 = vpop.f32.mrf.mxu0  ;;  %4148 = vmatmul.mubr.bf16.gmra.mxu0 %v10806_v42  ;;  %9620 = vmatprep.subr.bf16.mxu1 %v10543_v0  ;;  %v12462_v41 = vld [vmem:[%s10954_s27 + $0x7c] ss:$24 sps:$4 sm:$0xff]  }
 0x186   : > { %v9096_v37 = vpop.f32.mrf.mxu1  ;;  %4221 = vmatmul.mubr.bf16.gmra.mxu1 %v12246_v5  ;;  %4155 = vmatprep.mubr.bf16.mxu0 %v10807_v51  ;;  %v10560_v42 = vld [vmem:[%s13684_s1 + $0x5b0] sm:$0xff]  }
 0x187   : > { %v12424_v2 = vadd.f32 %v9095_v16, %v9049_v48  ;;  %v9051_v32 = vpop.f32.mrf.mxu0  ;;  %4228 = vmatprep.mubr.bf16.mxu1 %v12256_v50  ;;  %9575 = vmatpush3.bf16.msra.mxu0 %v10542_v30  ;;  %v10557_v50 = vld [vmem:[%s13684_s1 + $0xc78] sm:$0xff]  }
 0x188   : > { %v9052_v18 = vadd.f32 %v9051_v32, %v9050_v46  ;;  %v9097_v5 = vpop.f32.mrf.mxu1  ;;  %9621 = vmatpush3.bf16.msra.mxu1 %v10544_v59  ;;  %9576 = vmatprep.subr.bf16.mxu0 %v10545_v4  ;;  %v10566_v48 = vld [vmem:[%s10954_s27 + $0x84] ss:$24 sps:$4 sm:$0xff]   ;;  %v12479_v51 = vld [vmem:[%s10954_s27 + $0x78] ss:$24 sps:$4 sm:$0xff]  }
 0x189   : > { %v9098_v8 = vadd.f32 %v9097_v5, %v9096_v37  ;;  %v9053_v56 = vpop.f32.mrf.mxu0  ;;  %9622 = vmatprep.subr.bf16.mxu1 %v10547_v45  ;;  %v10568_v45 = vld [vmem:[%s13684_s1 + $0xc30] sm:$0xff]   ;;  %v10570_v5 = vld [vmem:[%s13684_s1 + $0x5a8] sm:$0xff]  }
 0x18a   : > { %v9099_v24 = vpop.f32.mrf.mxu1 }
 0x18b   : > { %v12439_v33 = vadd.f32 %v9098_v8, %v9052_v18  ;;  %v9054_v23 = vpop.f32.mrf.mxu0  ;;  %9577 = vmatpush3.bf16.msra.mxu0 %v10546_v53  ;;  %v10564_v18 = vld [vmem:[%s10954_s27 + $0x80] ss:$24 sps:$4 sm:$0xff]  }
 0x18c   : > { %v9055_v22 = vadd.f32 %v9054_v23, %v9053_v56  ;;  %v9100_v20 = vpop.f32.mrf.mxu1  ;;  %9623 = vmatpush3.bf16.msra.mxu1 %v10548_v17  ;;  %9654 = vmatprep.subr.bf16.mxu0 %v10555_v3  ;;  %v10571_v3 = vld [vmem:[%s13684_s1 + $0xc68] sm:$0xff]  }
 0x18d   : > { %v9101_v38 = vadd.f32 %v9100_v20, %v9099_v24  ;;  %v9118_v9 = vpop.f32.mrf.mxu0  ;;  %4156 = vmatmul.mubr.bf16.gmra.mxu0 %v12117_v35  ;;  %9700 = vmatprep.subr.bf16.mxu1 %v10557_v50  ;;  %v10556_v35 = vld [vmem:[%s13684_s1 + $0x5b8] sm:$0xff]   ;;  %v10572_v50 = vld [vmem:[%s13684_s1 + $0xc28] sm:$0xff]  }
 0x18e   : > { %v9164_v21 = vpop.f32.mrf.mxu1  ;;  %4229 = vmatmul.mubr.bf16.gmra.mxu1 %v12284_v31  ;;  %4844 = vmatprep.mubr.bf16.mxu0 %v12437_v6  ;;  %v10558_v31 = vld [vmem:[%s13684_s1 + $0xc38] sm:$0xff]   ;;  %v10578_v20 = vld [vmem:[%s10954_s27 + $0xb4] ss:$24 sps:$4 sm:$0xff]  }
 0x18f   : > { %v12445_v43 = vadd.f32 %v9101_v38, %v9055_v22  ;;  %v9119_v10 = vpop.f32.mrf.mxu0  ;;  %4917 = vmatprep.mubr.bf16.mxu1 %v10554_v29  ;;  %v12499_v29 = vld [vmem:[%s10954_s27 + $0xac] ss:$24 sps:$4 sm:$0xff]  }
 0x190   : > { %v9120_v28 = vadd.f32 %v9119_v10, %v9118_v9  ;;  %v9165_v12 = vpop.f32.mrf.mxu1  ;;  %v10579_v10 = vld [vmem:[%s13684_s1 + $0x5e0] sm:$0xff]  }
 0x191   : > { %v9166_v62 = vadd.f32 %v9165_v12, %v9164_v21  ;;  %v9121_v27 = vpop.f32.mrf.mxu0  ;;  %v10580_v12 = vld [vmem:[%s13684_s1 + $0x5a0] sm:$0xff]  }
 0x192   : > { %v2294_v39 = vadd.f32 %v9120_v28, %v12314_v47  ;;  %v9167_v7 = vpop.f32.mrf.mxu1  ;;  %v10567_v47 = vld [vmem:[%s13684_s1 + $0xc70] sm:$0xff]  }
 0x193   : > { %v9122_v0 = vpop.f32.mrf.mxu0 }
 0x194   : > { %v12464_v30 = vadd.f32 %v9166_v62, %v2294_v39  ;;  %v9123_v40 = vadd.f32 %v9122_v0, %v9121_v27  ;;  %v9168_v59 = vpop.f32.mrf.mxu1  ;;  %v10582_v27 = vld [vmem:[%s13684_s1 + $0xc20] sm:$0xff]  }
 0x195   : > { %v9169_v55 = vadd.f32 %v9168_v59, %v9167_v7  ;;  %v9124_v4 = vpop.f32.mrf.mxu0  ;;  %4845 = vmatmul.mubr.bf16.vlgmr.msra.gmra.mxu0 %v12448_v60  ;;  %v12519_v39 = vld [vmem:[%s10954_s27 + $0xa8] ss:$24 sps:$4 sm:$0xff]   ;;  %v10583_v7 = vld [vmem:[%s13684_s1 + $0x5d8] sm:$0xff]  }
 0x196   : > { %v2297_v16 = vadd.f32 %v9123_v40, %v12330_v63  ;;  %v9170_v46 = vpop.f32.mrf.mxu1  ;;  %4918 = vmatmul.mubr.bf16.vlgmr.msra.gmra.mxu1 %v10552_v14  ;;  %9655 = vmatpush3.bf16.msra.mxu0 %v10556_v35  ;;  %v10569_v63 = vld [vmem:[%s13684_s1 + $0x5e8] sm:$0xff]   ;;  %v10581_v14 = vld [vmem:[%s13684_s1 + $0xc60] sm:$0xff]   ;;  %v10584_v59 = vld [vmem:[%s13684_s1 + $0x598] sm:$0xff]  }
 0x197   : > { %v9125_v37 = vpop.f32.mrf.mxu0  ;;  %9701 = vmatpush3.bf16.msra.mxu1 %v10558_v31  ;;  %9656 = vmatprep.subr.bf16.mxu0 %v10559_v57  ;;  %v10576_v40 = vld [vmem:[%s10954_s27 + $0xb0] ss:$24 sps:$4 sm:$0xff]  }
 0x198   : > { %v12484_v53 = vadd.f32 %v9169_v55, %v2297_v16  ;;  %v9126_v32 = vadd.f32 %v9125_v37, %v9124_v4  ;;  %v9171_v17 = vpop.f32.mrf.mxu1  ;;  %4852 = vmatprep.mubr.bf16.mxu0 %v12462_v41  ;;  %4925 = vmatprep.mubr.bf16.mxu1 %v10566_v48  ;;  %v10585_v48 = vld [vmem:[%s13684_s1 + $0xc58] sm:$0xff]  }
 0x199   : > { %v9172_v8 = vadd.f32 %v9171_v17, %v9170_v46  ;;  %v9127_v56 = vpop.f32.mrf.mxu0  ;;  %9702 = vmatprep.subr.bf16.mxu1 %v10567_v47  ;;  %v12535_v47 = vld [vmem:[%s10954_s27 + $0xdc] ss:$24 sps:$4 sm:$0xff]  }
 0x19a   : > { %v2302_v24 = vadd.f32 %v9126_v32, %v12346_v58  ;;  %v9173_v23 = vpop.f32.mrf.mxu1  ;;  %9657 = vmatpush3.bf16.msra.mxu0 %v10560_v42  ;;  %v10591_v16 = vld [vmem:[%s10954_s27 + $0xe4] ss:$24 sps:$4 sm:$0xff]  }
 0x19b   : > { %v9128_v22 = vpop.f32.mrf.mxu0  ;;  %9703 = vmatpush3.bf16.msra.mxu1 %v10568_v45  ;;  %9658 = vmatprep.subr.bf16.mxu0 %v10569_v63  ;;  %v10592_v45 = vld [vmem:[%s13684_s1 + $0xc18] sm:$0xff]   ;;  %v10593_v63 = vld [vmem:[%s13684_s1 + $0x5d0] sm:$0xff]  }
 0x19c   : > { %v12502_v38 = vadd.f32 %v9172_v8, %v2302_v24  ;;  %v9129_v9 = vadd.f32 %v9128_v22, %v9127_v56  ;;  %v9174_v21 = vpop.f32.mrf.mxu1  ;;  %9704 = vmatprep.subr.bf16.mxu1 %v10571_v3  ;;  %v10595_v8 = vld [vmem:[%s13684_s1 + $0xc50] sm:$0xff]  }
 0x19d   : > { %v9175_v28 = vadd.f32 %v9174_v21, %v9173_v23  ;;  %v9130_v58 = vpop.f32.mrf.mxu0  ;;  %4853 = vmatmul.mubr.bf16.gmra.mxu0 %v12479_v51  ;;  %v10596_v24 = vld [vmem:[%s13684_s1 + $0xc10] sm:$0xff]  }
 0x19e   : > { %v2305_v35 = vadd.f32 %v9129_v9, %v12362_v54  ;;  %v9176_v62 = vpop.f32.mrf.mxu1  ;;  %4926 = vmatmul.mubr.bf16.gmra.mxu1 %v10564_v18  ;;  %9659 = vmatpush3.bf16.msra.mxu0 %v10570_v5  ;;  %v12559_v22 = vld [vmem:[%s10954_s27 + $0xd8] ss:$24 sps:$4 sm:$0xff]  }
 0x19f   : > { %v9131_v31 = vpop.f32.mrf.mxu0  ;;  %9705 = vmatpush3.bf16.msra.mxu1 %v10572_v50  ;;  %4860 = vmatprep.mubr.bf16.mxu0 %v12499_v29 }
 0x1a0   : > { %v12525_v54 = vadd.f32 %v9175_v28, %v2305_v35  ;;  %v9132_v57 = vadd.f32 %v9131_v31, %v9130_v58  ;;  %v9177_v0 = vpop.f32.mrf.mxu1  ;;  %4933 = vmatprep.mubr.bf16.mxu1 %v10578_v20  ;;  %9660 = vmatprep.subr.bf16.mxu0 %v10579_v10  ;;  %v10597_v20 = vld [vmem:[%s13684_s1 + $0x5c8] sm:$0xff]   ;;  %v10589_v10 = vld [vmem:[%s10954_s27 + $0xe0] ss:$24 sps:$4 sm:$0xff]  }
 0x1a1   : > { %v9178_v55 = vadd.f32 %v9177_v0, %v9176_v62  ;;  %v9133_v4 = vpop.f32.mrf.mxu0  ;;  %9706 = vmatprep.subr.bf16.mxu1 %v10581_v14  ;;  %v12569_v28 = vld [vmem:[%s10954_s27 + $0x10c] ss:$24 sps:$4 sm:$0xff]  }
 0x1a2   : > { %v2310_v46 = vadd.f32 %v9132_v57, %v12375_v1  ;;  %v9179_v42 = vpop.f32.mrf.mxu1  ;;  %9661 = vmatpush3.bf16.msra.mxu0 %v10580_v12  ;;  %v10594_v1 = vld [vmem:[%s13684_s1 + $0x590] sm:$0xff]   ;;  %v10605_v35 = vld [vmem:[%s13684_s1 + $0xc48] sm:$0xff]  }
 0x1a3   : > { %v9134_v37 = vpop.f32.mrf.mxu0  ;;  %9707 = vmatpush3.bf16.msra.mxu1 %v10582_v27  ;;  %9662 = vmatprep.subr.bf16.mxu0 %v10583_v7  ;;  %v10603_v14 = vld [vmem:[%s10954_s27 + $0x114] ss:$24 sps:$4 sm:$0xff]  }
 0x1a4   : > { %v12545_v32 = vadd.f32 %v9178_v55, %v2310_v46  ;;  %v9135_v17 = vadd.f32 %v9134_v37, %v9133_v4  ;;  %v9180_v18 = vpop.f32.mrf.mxu1  ;;  %9708 = vmatprep.subr.bf16.mxu1 %v10585_v48  ;;  %v10604_v31 = vld [vmem:[%s13684_s1 + $0x588] sm:$0xff]   ;;  %v10609_v4 = vld [vmem:[%s13684_s1 + $0xc40] sm:$0xff]  }
 0x1a5   : > { %v9181_v5 = vadd.f32 %v9180_v18, %v9179_v42  ;;  %v9136_v3 = vpop.f32.mrf.mxu0  ;;  %4861 = vmatmul.mubr.bf16.gmra.mxu0 %v12519_v39  ;;  %v10606_v57 = vld [vmem:[%s13684_s1 + $0xc08] sm:$0xff]   ;;  %v10608_v42 = vld [vmem:[%s13684_s1 + $0x580] sm:$0xff]  }
 0x1a6   : > { %v2313_v56 = vadd.f32 %v9135_v17, %v12391_v11  ;;  %v9182_v50 = vpop.f32.mrf.mxu1  ;;  %4934 = vmatmul.mubr.bf16.gmra.mxu1 %v10576_v40  ;;  %9663 = vmatpush3.bf16.msra.mxu0 %v10584_v59  ;;  %v12597_v37 = vld [vmem:[%s10954_s27 + $0x108] ss:$24 sps:$4 sm:$0xff]  }
 0x1a7   : > { %v9137_v23 = vpop.f32.mrf.mxu0  ;;  %4868 = vmatprep.mubr.bf16.mxu0 %v12535_v47  ;;  %4941 = vmatprep.mubr.bf16.mxu1 %v10591_v16 }
 0x1a8   : > { %v12565_v11 = vadd.f32 %v9181_v5, %v2313_v56  ;;  %v9138_v9 = vadd.f32 %v9137_v23, %v9136_v3  ;;  %v9183_v21 = vpop.f32.mrf.mxu1  ;;  %9709 = vmatpush3.bf16.msra.mxu1 %v10592_v45  ;;  %9664 = vmatprep.subr.bf16.mxu0 %v10593_v63  ;;  %v10610_v63 = vld [vmem:[%s13684_s1 + $0xc00] sm:$0xff]   ;;  %v10614_v5 = vld [vmem:[%s13684_s1 + $0xcf8] sm:$0xff]  }
 0x1a9   : > { %v9184_v58 = vadd.f32 %v9183_v21, %v9182_v50  ;;  %v9139_v12 = vpop.f32.mrf.mxu0  ;;  %9710 = vmatprep.subr.bf16.mxu1 %v10595_v8  ;;  %v10616_v56 = vld [vmem:[%s13684_s1 + $0xd78] sm:$0xff]  }
 0x1aa   : > { %v2318_v62 = vadd.f32 %v9138_v9, %v12407_v44  ;;  %v9185_v27 = vpop.f32.mrf.mxu1  ;;  %9665 = vmatpush3.bf16.msra.mxu0 %v10594_v1  ;;  %v10607_v44 = vld [vmem:[%s13684_s1 + $0x5c0] sm:$0xff]   ;;  %v10601_v1 = vld [vmem:[%s10954_s27 + $0x110] ss:$24 sps:$4 sm:$0xff]   ;;  %v12613_v23 = vld [vmem:[%s10954_s27 + $0x5c] ss:$24 sps:$4 sm:$0xff]  }
 0x1ab   : > { %v9140_v7 = vpop.f32.mrf.mxu0  ;;  %9666 = vmatprep.subr.bf16.mxu0 %v10597_v20 }
 0x1ac   : > { %v12582_v0 = vadd.f32 %v9184_v58, %v2318_v62  ;;  %v9141_v40 = vadd.f32 %v9140_v7, %v9139_v12  ;;  %v9186_v59 = vpop.f32.mrf.mxu1  ;;  %9711 = vmatpush3.bf16.msra.mxu1 %v10596_v24  ;;  %v12624_v7 = vld [vmem:[%s10954_s27 + $0x58] ss:$24 sps:$4 sm:$0xff]  }
 0x1ad   : > { %v9187_v48 = vadd.f32 %v9186_v59, %v9185_v27  ;;  %v9142_v55 = vpop.f32.mrf.mxu0  ;;  %4869 = vmatmul.mubr.bf16.gmra.mxu0 %v12559_v22  ;;  %9712 = vmatprep.subr.bf16.mxu1 %v10605_v35 }
 0x1ae   : > { %v2321_v16 = vadd.f32 %v9141_v40, %v12424_v2  ;;  %v9188_v46 = vpop.f32.mrf.mxu1  ;;  %4942 = vmatmul.mubr.bf16.gmra.mxu1 %v10589_v10  ;;  %4876 = vmatprep.mubr.bf16.mxu0 %v12569_v28 }
 0x1af   : > { %v9143_v45 = vpop.f32.mrf.mxu0  ;;  %4949 = vmatprep.mubr.bf16.mxu1 %v10603_v14  ;;  %9667 = vmatpush3.bf16.msra.mxu0 %v10604_v31 }
 0x1b0   : > { %v12602_v17 = vadd.f32 %v9187_v48, %v2321_v16  ;;  %v9144_v2 = vadd.f32 %v9143_v45, %v9142_v55  ;;  %v9189_v18 = vpop.f32.mrf.mxu1  ;;  %9713 = vmatpush3.bf16.msra.mxu1 %v10606_v57  ;;  %9668 = vmatprep.subr.bf16.mxu0 %v10607_v44  ;;  %v10618_v55 = vld [vmem:[%s13684_s1 + $0xcf0] sm:$0xff]  }
 0x1b1   : > { %v9190_v3 = vadd.f32 %v9189_v18, %v9188_v46  ;;  %v9145_v8 = vpop.f32.mrf.mxu0  ;;  %9714 = vmatprep.subr.bf16.mxu1 %v10609_v4 }
 0x1b2   : > { %v2326_v50 = vadd.f32 %v9144_v2, %v12439_v33  ;;  %v9191_v24 = vpop.f32.mrf.mxu1  ;;  %v10623_v2 = vld [vmem:[%s13684_s1 + $0xd70] sm:$0xff]  }
 0x1b3   : > { %v9146_v20 = vpop.f32.mrf.mxu0  ;;  %9669 = vmatpush3.bf16.msra.mxu0 %v10608_v42  ;;  %v10619_v42 = vld [vmem:[%s13684_s1 + $0xcb0] sm:$0xff]  }
 0x1b4   : > { %v12615_v9 = vadd.f32 %v9190_v3, %v2326_v50  ;;  %v9147_v21 = vadd.f32 %v9146_v20, %v9145_v8  ;;  %v9192_v10 = vpop.f32.mrf.mxu1  ;;  %9715 = vmatpush3.bf16.msra.mxu1 %v10610_v63  ;;  %9746 = vmatprep.subr.bf16.mxu0 %v10614_v5  ;;  %v10624_v5 = vld [vmem:[%s13684_s1 + $0xd30] sm:$0xff]   ;;  %v12654_v8 = vld [vmem:[%s10954_s27 + $0x88] ss:$24 sps:$4 sm:$0xff]  }
 0x1b5   : > { %v9193_v58 = vadd.f32 %v9192_v10, %v9191_v24  ;;  %v9210_v12 = vpop.f32.mrf.mxu0  ;;  %4877 = vmatmul.mubr.bf16.gmra.mxu0 %v12597_v37  ;;  %9792 = vmatprep.subr.bf16.mxu1 %v10616_v56  ;;  %v10625_v56 = vld [vmem:[%s13684_s1 + $0xce8] sm:$0xff]  }
 0x1b6   : > { %v2329_v14 = vadd.f32 %v9147_v21, %v12445_v43  ;;  %v9256_v33 = vpop.f32.mrf.mxu1  ;;  %4950 = vmatmul.mubr.bf16.gmra.mxu1 %v10601_v1  ;;  %4990 = vmatprep.mubr.bf16.mxu0 %v12613_v23  ;;  %v10615_v43 = vld [vmem:[%s13684_s1 + $0xcb8] sm:$0xff]   ;;  %v10627_v20 = vld [vmem:[%s13684_s1 + $0xd68] sm:$0xff]  }
 0x1b7   : > { %v9211_v35 = vpop.f32.mrf.mxu0  ;;  %5458 = vmatprep.mubr.bf16.mxu1 %v12437_v6  ;;  %v10617_v6 = vld [vmem:[%s13684_s1 + $0xd38] sm:$0xff]  }
 0x1b8   : > { %v12621_v62 = vadd.f32 %v9193_v58, %v2329_v14  ;;  %v9212_v27 = vadd.f32 %v9211_v35, %v9210_v12  ;;  %v9257_v31 = vpop.f32.mrf.mxu1  ;;  %v10628_v58 = vld [vmem:[%s13684_s1 + $0xd28] sm:$0xff]   ;;  %v10632_v35 = vld [vmem:[%s13684_s1 + $0xce0] sm:$0xff]  }
 0x1b9   : > { %v9258_v57 = vadd.f32 %v9257_v31, %v9256_v33  ;;  %v9213_v40 = vpop.f32.mrf.mxu0 }
 0x1ba   : > { %v2728_v59 = vadd.f32 %v9212_v27, %v12464_v30  ;;  %v9259_v44 = vpop.f32.mrf.mxu1  ;;  %v12642_v30 = vld [vmem:[%s10954_s27 + $0x8c] ss:$24 sps:$4 sm:$0xff]  }
 0x1bb   : > { %v9214_v48 = vpop.f32.mrf.mxu0 }
 0x1bc   : > { %v12636_v4 = vadd.f32 %v9258_v57, %v2728_v59  ;;  %v9215_v16 = vadd.f32 %v9214_v48, %v9213_v40  ;;  %v9260_v46 = vpop.f32.mrf.mxu1  ;;  %v10634_v59 = vld [vmem:[%s13684_s1 + $0xd60] sm:$0xff]  }
 0x1bd   : > { %v9261_v45 = vadd.f32 %v9260_v46, %v9259_v44  ;;  %v9216_v63 = vpop.f32.mrf.mxu0  ;;  %4991 = vmatmul.mubr.bf16.vlgmr.msra.gmra.mxu0 %v12624_v7  ;;  %v10635_v48 = vld [vmem:[%s13684_s1 + $0xd20] sm:$0xff]   ;;  %v10636_v46 = vld [vmem:[%s13684_s1 + $0xcd8] sm:$0xff]  }
 0x1be   : > { %v2731_v18 = vadd.f32 %v9215_v16, %v12484_v53  ;;  %v9262_v1 = vpop.f32.mrf.mxu1  ;;  %5459 = vmatmul.mubr.bf16.vlgmr.msra.gmra.mxu1 %v12448_v60  ;;  %9747 = vmatpush3.bf16.msra.mxu0 %v10615_v43  ;;  %v10626_v60 = vld [vmem:[%s13684_s1 + $0xca8] sm:$0xff]   ;;  %v12694_v16 = vld [vmem:[%s10954_s27 + $0xb8] ss:$24 sps:$4 sm:$0xff]  }
 0x1bf   : > { %v9217_v3 = vpop.f32.mrf.mxu0  ;;  %9793 = vmatpush3.bf16.msra.mxu1 %v10617_v6  ;;  %9748 = vmatprep.subr.bf16.mxu0 %v10618_v55 }
 0x1c0   : > { %v12659_v50 = vadd.f32 %v9261_v45, %v2731_v18  ;;  %v9218_v53 = vadd.f32 %v9217_v3, %v9216_v63  ;;  %v9263_v24 = vpop.f32.mrf.mxu1  ;;  %4998 = vmatprep.mubr.bf16.mxu0 %v12642_v30  ;;  %5466 = vmatprep.mubr.bf16.mxu1 %v12462_v41  ;;  %v12674_v41 = vld [vmem:[%s10954_s27 + $0xbc] ss:$24 sps:$4 sm:$0xff]  }
 0x1c1   : > { %v9264_v21 = vadd.f32 %v9263_v24, %v9262_v1  ;;  %v9219_v10 = vpop.f32.mrf.mxu0  ;;  %9794 = vmatprep.subr.bf16.mxu1 %v10623_v2  ;;  %v10637_v45 = vld [vmem:[%s13684_s1 + $0xc98] sm:$0xff]   ;;  %v12710_v1 = vld [vmem:[%s10954_s27 + $0xec] ss:$24 sps:$4 sm:$0xff]  }
 0x1c2   : > { %v2736_v12 = vadd.f32 %v9218_v53, %v12502_v38  ;;  %v9265_v14 = vpop.f32.mrf.mxu1  ;;  %9749 = vmatpush3.bf16.msra.mxu0 %v10619_v42  ;;  %v10633_v38 = vld [vmem:[%s13684_s1 + $0xca0] sm:$0xff]   ;;  %v10638_v63 = vld [vmem:[%s13684_s1 + $0xd58] sm:$0xff]   ;;  %v10643_v53 = vld [vmem:[%s13684_s1 + $0xcd0] sm:$0xff]  }
 0x1c3   : > { %v9220_v33 = vpop.f32.mrf.mxu0  ;;  %9795 = vmatpush3.bf16.msra.mxu1 %v10624_v5  ;;  %9750 = vmatprep.subr.bf16.mxu0 %v10625_v56 }
 0x1c4   : > { %v12679_v27 = vadd.f32 %v9264_v21, %v2736_v12  ;;  %v9221_v31 = vadd.f32 %v9220_v33, %v9219_v10  ;;  %v9266_v57 = vpop.f32.mrf.mxu1  ;;  %9796 = vmatprep.subr.bf16.mxu1 %v10627_v20  ;;  %v10646_v33 = vld [vmem:[%s13684_s1 + $0xd10] sm:$0xff]  }
 0x1c5   : > { %v9267_v40 = vadd.f32 %v9266_v57, %v9265_v14  ;;  %v9222_v43 = vpop.f32.mrf.mxu0  ;;  %4999 = vmatmul.mubr.bf16.gmra.mxu0 %v12654_v8  ;;  %v10647_v57 = vld [vmem:[%s13684_s1 + $0xcc8] sm:$0xff]  }
 0x1c6   : > { %v2739_v44 = vadd.f32 %v9221_v31, %v12525_v54  ;;  %v9268_v6 = vpop.f32.mrf.mxu1  ;;  %5467 = vmatmul.mubr.bf16.gmra.mxu1 %v12479_v51  ;;  %9751 = vmatpush3.bf16.msra.mxu0 %v10626_v60  ;;  %v12734_v31 = vld [vmem:[%s10954_s27 + $0xe8] ss:$24 sps:$4 sm:$0xff]  }
 0x1c7   : > { %v9223_v55 = vpop.f32.mrf.mxu0  ;;  %9797 = vmatpush3.bf16.msra.mxu1 %v10628_v58  ;;  %5006 = vmatprep.mubr.bf16.mxu0 %v12674_v41  ;;  %v10645_v58 = vld [vmem:[%s13684_s1 + $0xd50] sm:$0xff]  }
 0x1c8   : > { %v12700_v54 = vadd.f32 %v9267_v40, %v2739_v44  ;;  %v9224_v42 = vadd.f32 %v9223_v55, %v9222_v43  ;;  %v9269_v51 = vpop.f32.mrf.mxu1  ;;  %5474 = vmatprep.mubr.bf16.mxu1 %v12499_v29  ;;  %9752 = vmatprep.subr.bf16.mxu0 %v10632_v35  ;;  %v10642_v29 = vld [vmem:[%s13684_s1 + $0xd18] sm:$0xff]   ;;  %v10652_v44 = vld [vmem:[%s13684_s1 + $0xd48] sm:$0xff]  }
 0x1c9   : > { %v9270_v2 = vadd.f32 %v9269_v51, %v9268_v6  ;;  %v9225_v18 = vpop.f32.mrf.mxu0  ;;  %9798 = vmatprep.subr.bf16.mxu1 %v10634_v59  ;;  %v12744_v40 = vld [vmem:[%s10954_s27 + $0x11c] ss:$24 sps:$4 sm:$0xff]  }
 0x1ca   : > { %v2744_v5 = vadd.f32 %v9224_v42, %v12545_v32  ;;  %v9271_v3 = vpop.f32.mrf.mxu1  ;;  %9753 = vmatpush3.bf16.msra.mxu0 %v10633_v38  ;;  %v10644_v32 = vld [vmem:[%s13684_s1 + $0xc90] sm:$0xff]  }
 0x1cb   : > { %v9226_v56 = vpop.f32.mrf.mxu0  ;;  %9799 = vmatpush3.bf16.msra.mxu1 %v10635_v48  ;;  %9754 = vmatprep.subr.bf16.mxu0 %v10636_v46  ;;  %v10651_v48 = vld [vmem:[%s13684_s1 + $0xc88] sm:$0xff]  }
 0x1cc   : > { %v12719_v24 = vadd.f32 %v9270_v2, %v2744_v5  ;;  %v9227_v60 = vadd.f32 %v9226_v56, %v9225_v18  ;;  %v9272_v20 = vpop.f32.mrf.mxu1  ;;  %9800 = vmatprep.subr.bf16.mxu1 %v10638_v63  ;;  %v10653_v46 = vld [vmem:[%s13684_s1 + $0xd08] sm:$0xff]   ;;  %v10656_v18 = vld [vmem:[%s13684_s1 + $0xd40] sm:$0xff]  }
 0x1cd   : > { %v9273_v21 = vadd.f32 %v9272_v20, %v9271_v3  ;;  %v9228_v10 = vpop.f32.mrf.mxu0  ;;  %5007 = vmatmul.mubr.bf16.gmra.mxu0 %v12694_v16 }
 0x1ce   : > { %v2747_v12 = vadd.f32 %v9227_v60, %v12565_v11  ;;  %v9274_v14 = vpop.f32.mrf.mxu1  ;;  %5475 = vmatmul.mubr.bf16.gmra.mxu1 %v12519_v39  ;;  %9755 = vmatpush3.bf16.msra.mxu0 %v10637_v45  ;;  %v10657_v60 = vld [vmem:[%s13684_s1 + $0xd00] sm:$0xff]  }
 0x1cf   : > { %v9229_v35 = vpop.f32.mrf.mxu0  ;;  %5014 = vmatprep.mubr.bf16.mxu0 %v12710_v1  ;;  %5482 = vmatprep.mubr.bf16.mxu1 %v12535_v47 }
 0x1d0   : > { %v12741_v11 = vadd.f32 %v9273_v21, %v2747_v12  ;;  %v9230_v38 = vadd.f32 %v9229_v35, %v9228_v10  ;;  %v9275_v39 = vpop.f32.mrf.mxu1  ;;  %9801 = vmatpush3.bf16.msra.mxu1 %v10642_v29  ;;  %9756 = vmatprep.subr.bf16.mxu0 %v10643_v53  ;;  %v10655_v29 = vld [vmem:[%s13684_s1 + $0xc80] sm:$0xff]   ;;  %v12772_v53 = vld [vmem:[%s10954_s27 + $0x118] ss:$24 sps:$4 sm:$0xff]  }
 0x1d1   : > { %v9276_v43 = vadd.f32 %v9275_v39, %v9274_v14  ;;  %v9231_v59 = vpop.f32.mrf.mxu0  ;;  %9802 = vmatprep.subr.bf16.mxu1 %v10645_v58 }
 0x1d2   : > { %v2752_v47 = vadd.f32 %v9230_v38, %v12582_v0  ;;  %v9277_v6 = vpop.f32.mrf.mxu1  ;;  %9757 = vmatpush3.bf16.msra.mxu0 %v10644_v32  ;;  %v10654_v0 = vld [vmem:[%s13684_s1 + $0xcc0] sm:$0xff]   ;;  %v10658_v32 = vld [vmem:[%s13684_s1 + $0x678] sm:$0xff]  }
 0x1d3   : > { %v9232_v55 = vpop.f32.mrf.mxu0  ;;  %9758 = vmatprep.subr.bf16.mxu0 %v10647_v57 }
 0x1d4   : > { %v12756_v42 = vadd.f32 %v9276_v43, %v2752_v47  ;;  %v9233_v51 = vadd.f32 %v9232_v55, %v9231_v59  ;;  %v9278_v45 = vpop.f32.mrf.mxu1  ;;  %9803 = vmatpush3.bf16.msra.mxu1 %v10646_v33 }
 0x1d5   : > { %v9279_v63 = vadd.f32 %v9278_v45, %v9277_v6  ;;  %v9234_v2 = vpop.f32.mrf.mxu0  ;;  %5015 = vmatmul.mubr.bf16.gmra.mxu0 %v12734_v31  ;;  %9804 = vmatprep.subr.bf16.mxu1 %v10652_v44 }
 0x1d6   : > { %v2755_v5 = vadd.f32 %v9233_v51, %v12602_v17  ;;  %v9280_v3 = vpop.f32.mrf.mxu1  ;;  %5483 = vmatmul.mubr.bf16.gmra.mxu1 %v12559_v22  ;;  %5022 = vmatprep.mubr.bf16.mxu0 %v12744_v40  ;;  %v10659_v51 = vld [vmem:[%s13684_s1 + $0x638] sm:$0xff]  }
 0x1d7   : > { %v9235_v56 = vpop.f32.mrf.mxu0  ;;  %5490 = vmatprep.mubr.bf16.mxu1 %v12569_v28  ;;  %9759 = vmatpush3.bf16.msra.mxu0 %v10651_v48  ;;  %v10660_v28 = vld [vmem:[%s13684_s1 + $0x6f8] sm:$0xff]  }
 0x1d8   : > { %v12778_v17 = vadd.f32 %v9279_v63, %v2755_v5  ;;  %v9236_v20 = vadd.f32 %v9235_v56, %v9234_v2  ;;  %v9281_v22 = vpop.f32.mrf.mxu1  ;;  %9805 = vmatpush3.bf16.msra.mxu1 %v10653_v46  ;;  %9760 = vmatprep.subr.bf16.mxu0 %v10654_v0  ;;  %v10664_v56 = vld [vmem:[%s13684_s1 + $0x6f0] sm:$0xff]  }
 0x1d9   : > { %v9282_v21 = vadd.f32 %v9281_v22, %v9280_v3  ;;  %v9237_v10 = vpop.f32.mrf.mxu0  ;;  %9806 = vmatprep.subr.bf16.mxu1 %v10656_v18  ;;  %v10809_v3 = vld [vmem:[%s10954_s27 + $0x50] ss:$24 sps:$4 sm:$0xff]  }
 0x1da   : > { %v2760_v58 = vadd.f32 %v9236_v20, %v12615_v9  ;;  %v9283_v12 = vpop.f32.mrf.mxu1  ;;  %v10808_v9 = vld [vmem:[%s10954_s27 + $0x54] ss:$24 sps:$4 sm:$0xff]  }
 0x1db   : > { %v9238_v14 = vpop.f32.mrf.mxu0  ;;  %9761 = vmatpush3.bf16.msra.mxu0 %v10655_v29  ;;  %v10663_v29 = vld [vmem:[%s13684_s1 + $0x630] sm:$0xff]  }
 0x1dc   : > { %v12787_v33 = vadd.f32 %v9282_v21, %v2760_v58  ;;  %v9239_v35 = vadd.f32 %v9238_v14, %v9237_v10  ;;  %v9284_v57 = vpop.f32.mrf.mxu1  ;;  %9807 = vmatpush3.bf16.msra.mxu1 %v10657_v60  ;;  %9838 = vmatprep.subr.bf16.mxu0 %v10658_v32  ;;  %v10665_v20 = vld [vmem:[%s13684_s1 + $0x6b0] sm:$0xff]   ;;  %v10666_v21 = vld [vmem:[%s13684_s1 + $0x668] sm:$0xff]   ;;  %v10810_v58 = vld [vmem:[%s10954_s27 + $0x84] ss:$24 sps:$4 sm:$0xff]  }
 0x1dd   : > { %v9285_v38 = vadd.f32 %v9284_v57, %v9283_v12  ;;  %v9302_v39 = vpop.f32.mrf.mxu0  ;;  %5023 = vmatmul.mubr.bf16.gmra.mxu0 %v12772_v53  ;;  %9884 = vmatprep.subr.bf16.mxu1 %v10660_v28  ;;  %v10667_v57 = vld [vmem:[%s13684_s1 + $0x628] sm:$0xff]  }
 0x1de   : > { %v2763_v43 = vadd.f32 %v9239_v35, %v12621_v62  ;;  %v9348_v59 = vpop.f32.mrf.mxu1  ;;  %5491 = vmatmul.mubr.bf16.gmra.mxu1 %v12597_v37  ;;  %5531 = vmatprep.mubr.bf16.mxu0 %v10808_v9  ;;  %v10661_v37 = vld [vmem:[%s13684_s1 + $0x6b8] sm:$0xff]   ;;  %v10670_v9 = vld [vmem:[%s13684_s1 + $0x660] sm:$0xff]  }
 0x1df   : > { %v9303_v44 = vpop.f32.mrf.mxu0  ;;  %5604 = vmatprep.mubr.bf16.mxu1 %v12613_v23  ;;  %v10662_v23 = vld [vmem:[%s13684_s1 + $0x670] sm:$0xff]  }
 0x1e0   : > { %v12794_v47 = vadd.f32 %v9285_v38, %v2763_v43  ;;  %v9304_v6 = vadd.f32 %v9303_v44, %v9302_v39  ;;  %v9349_v48 = vpop.f32.mrf.mxu1 }
 0x1e1   : > { %v9350_v55 = vadd.f32 %v9349_v48, %v9348_v59  ;;  %v9305_v46 = vpop.f32.mrf.mxu0  ;;  %v10811_v48 = vld [vmem:[%s10954_s27 + $0x80] ss:$24 sps:$4 sm:$0xff]  }
 0x1e2   : > { %v9351_v62 = vpop.f32.mrf.mxu1 }
 0x1e3   : > { %v12802_v45 = vadd.f32 %v9350_v55, %v9304_v6  ;;  %v9306_v0 = vpop.f32.mrf.mxu0  ;;  %v10672_v55 = vld [vmem:[%s13684_s1 + $0x6e0] sm:$0xff]  }
 0x1e4   : > { %v9307_v63 = vadd.f32 %v9306_v0, %v9305_v46  ;;  %v9352_v2 = vpop.f32.mrf.mxu1  ;;  %v10812_v0 = vld [vmem:[%s10954_s27 + $0xb4] ss:$24 sps:$4 sm:$0xff]  }
 0x1e5   : > { %v9353_v18 = vadd.f32 %v9352_v2, %v9351_v62  ;;  %v9308_v5 = vpop.f32.mrf.mxu0  ;;  %5532 = vmatmul.mubr.bf16.vlgmr.msra.gmra.mxu0 %v10809_v3 }
 0x1e6   : > { %v9354_v60 = vpop.f32.mrf.mxu1  ;;  %5605 = vmatmul.mubr.bf16.vlgmr.msra.gmra.mxu1 %v12624_v7  ;;  %9839 = vmatpush3.bf16.msra.mxu0 %v10659_v51  ;;  %v10668_v7 = vld [vmem:[%s13684_s1 + $0x6e8] sm:$0xff]   ;;  %v10671_v51 = vld [vmem:[%s13684_s1 + $0x620] sm:$0xff]  }
 0x1e7   : > { %v12818_v22 = vadd.f32 %v9353_v18, %v9307_v63  ;;  %v9309_v32 = vpop.f32.mrf.mxu0  ;;  %9885 = vmatpush3.bf16.msra.mxu1 %v10661_v37  ;;  %9840 = vmatprep.subr.bf16.mxu0 %v10662_v23  ;;  %v10673_v23 = vld [vmem:[%s13684_s1 + $0x6a0] sm:$0xff]   ;;  %v10674_v63 = vld [vmem:[%s13684_s1 + $0x658] sm:$0xff]  }
 0x1e8   : > { %v9310_v10 = vadd.f32 %v9309_v32, %v9308_v5  ;;  %v9355_v28 = vpop.f32.mrf.mxu1  ;;  %5539 = vmatprep.mubr.bf16.mxu0 %v10810_v58  ;;  %5612 = vmatprep.mubr.bf16.mxu1 %v12642_v30  ;;  %v10669_v30 = vld [vmem:[%s13684_s1 + $0x6a8] sm:$0xff]   ;;  %v10676_v18 = vld [vmem:[%s13684_s1 + $0x6d8] sm:$0xff]  }
 0x1e9   : > { %v9356_v12 = vadd.f32 %v9355_v28, %v9354_v60  ;;  %v9311_v14 = vpop.f32.mrf.mxu0  ;;  %9886 = vmatprep.subr.bf16.mxu1 %v10664_v56  ;;  %v10675_v56 = vld [vmem:[%s13684_s1 + $0x618] sm:$0xff]  }
 0x1ea   : > { %v9357_v35 = vpop.f32.mrf.mxu1  ;;  %9841 = vmatpush3.bf16.msra.mxu0 %v10663_v29 }
 0x1eb   : > { %v12831_v38 = vadd.f32 %v9356_v12, %v9310_v10  ;;  %v9312_v39 = vpop.f32.mrf.mxu0  ;;  %9887 = vmatpush3.bf16.msra.mxu1 %v10665_v20  ;;  %9842 = vmatprep.subr.bf16.mxu0 %v10666_v21  ;;  %v10678_v10 = vld [vmem:[%s13684_s1 + $0x650] sm:$0xff]  }
 0x1ec   : > { %v9313_v43 = vadd.f32 %v9312_v39, %v9311_v14  ;;  %v9358_v59 = vpop.f32.mrf.mxu1  ;;  %9888 = vmatprep.subr.bf16.mxu1 %v10668_v7  ;;  %v10813_v7 = vld [vmem:[%s10954_s27 + $0xb0] ss:$24 sps:$4 sm:$0xff]  }
 0x1ed   : > { %v9359_v44 = vadd.f32 %v9358_v59, %v9357_v35  ;;  %v9314_v6 = vpop.f32.mrf.mxu0  ;;  %5540 = vmatmul.mubr.bf16.gmra.mxu0 %v10811_v48  ;;  %v10680_v12 = vld [vmem:[%s13684_s1 + $0x6d0] sm:$0xff]  }
 0x1ee   : > { %v9360_v46 = vpop.f32.mrf.mxu1  ;;  %5613 = vmatmul.mubr.bf16.gmra.mxu1 %v12654_v8  ;;  %9843 = vmatpush3.bf16.msra.mxu0 %v10667_v57  ;;  %v10679_v35 = vld [vmem:[%s13684_s1 + $0x610] sm:$0xff]  }
 0x1ef   : > { %v12847_v62 = vadd.f32 %v9359_v44, %v9313_v43  ;;  %v9315_v37 = vpop.f32.mrf.mxu0  ;;  %9889 = vmatpush3.bf16.msra.mxu1 %v10669_v30  ;;  %5547 = vmatprep.mubr.bf16.mxu0 %v10812_v0  ;;  %v10814_v30 = vld [vmem:[%s10954_s27 + $0xe4] ss:$24 sps:$4 sm:$0xff]   ;;  %v10682_v43 = vld [vmem:[%s13684_s1 + $0x648] sm:$0xff]  }
 0x1f0   : > { %v9316_v8 = vadd.f32 %v9315_v37, %v9314_v6  ;;  %v9361_v2 = vpop.f32.mrf.mxu1  ;;  %5620 = vmatprep.mubr.bf16.mxu1 %v12674_v41  ;;  %9844 = vmatprep.subr.bf16.mxu0 %v10670_v9  ;;  %v10677_v41 = vld [vmem:[%s13684_s1 + $0x698] sm:$0xff]   ;;  %v10685_v37 = vld [vmem:[%s13684_s1 + $0x688] sm:$0xff]  }
 0x1f1   : > { %v9362_v5 = vadd.f32 %v9361_v2, %v9360_v46  ;;  %v9317_v3 = vpop.f32.mrf.mxu0  ;;  %9890 = vmatprep.subr.bf16.mxu1 %v10672_v55  ;;  %v10683_v55 = vld [vmem:[%s13684_s1 + $0x608] sm:$0xff]  }
 0x1f2   : > { %v9363_v29 = vpop.f32.mrf.mxu1  ;;  %9845 = vmatpush3.bf16.msra.mxu0 %v10671_v51 }
 0x1f3   : > { %v12863_v60 = vadd.f32 %v9362_v5, %v9316_v8  ;;  %v9318_v20 = vpop.f32.mrf.mxu0  ;;  %9891 = vmatpush3.bf16.msra.mxu1 %v10673_v23  ;;  %9846 = vmatprep.subr.bf16.mxu0 %v10674_v63  ;;  %v10686_v63 = vld [vmem:[%s13684_s1 + $0x640] sm:$0xff]  }
 0x1f4   : > { %v9319_v32 = vadd.f32 %v9318_v20, %v9317_v3  ;;  %v9364_v21 = vpop.f32.mrf.mxu1  ;;  %9892 = vmatprep.subr.bf16.mxu1 %v10676_v18  ;;  %v10815_v18 = vld [vmem:[%s10954_s27 + $0xe0] ss:$24 sps:$4 sm:$0xff]  }
 0x1f5   : > { %v9365_v28 = vadd.f32 %v9364_v21, %v9363_v29  ;;  %v9320_v58 = vpop.f32.mrf.mxu0  ;;  %5548 = vmatmul.mubr.bf16.gmra.mxu0 %v10813_v7  ;;  %v10688_v5 = vld [vmem:[%s13684_s1 + $0x6c0] sm:$0xff]   ;;  %v10816_v29 = vld [vmem:[%s10954_s27 + $0x114] ss:$24 sps:$4 sm:$0xff]  }
 0x1f6   : > { %v9366_v14 = vpop.f32.mrf.mxu1  ;;  %5621 = vmatmul.mubr.bf16.gmra.mxu1 %v12694_v16  ;;  %9847 = vmatpush3.bf16.msra.mxu0 %v10675_v56  ;;  %v10681_v16 = vld [vmem:[%s13684_s1 + $0x690] sm:$0xff]  }
 0x1f7   : > { %v12879_v57 = vadd.f32 %v9365_v28, %v9319_v32  ;;  %v9321_v39 = vpop.f32.mrf.mxu0  ;;  %5555 = vmatprep.mubr.bf16.mxu0 %v10814_v30  ;;  %5628 = vmatprep.mubr.bf16.mxu1 %v12710_v1  ;;  %v10684_v1 = vld [vmem:[%s13684_s1 + $0x6c8] sm:$0xff]  }
 0x1f8   : > { %v9322_v59 = vadd.f32 %v9321_v39, %v9320_v58  ;;  %v9367_v9 = vpop.f32.mrf.mxu1  ;;  %9893 = vmatpush3.bf16.msra.mxu1 %v10677_v41  ;;  %9848 = vmatprep.subr.bf16.mxu0 %v10678_v10  ;;  %v10687_v41 = vld [vmem:[%s13684_s1 + $0x600] sm:$0xff]   ;;  %v10696_v10 = vld [vmem:[%s13684_s1 + $0x778] sm:$0xff]  }
 0x1f9   : > { %v9368_v44 = vadd.f32 %v9367_v9, %v9366_v14  ;;  %v9323_v6 = vpop.f32.mrf.mxu0  ;;  %9894 = vmatprep.subr.bf16.mxu1 %v10680_v12  ;;  %v10698_v58 = vld [vmem:[%s13684_s1 + $0xdf8] sm:$0xff]   ;;  %v12930_v39 = vld [vmem:[%s10954_s27 + $0x6c] ss:$24 sps:$4 sm:$0xff]  }
 0x1fa   : > { %v9369_v48 = vpop.f32.mrf.mxu1  ;;  %9849 = vmatpush3.bf16.msra.mxu0 %v10679_v35  ;;  %v12925_v12 = vld [vmem:[%s10954_s27 + $0x64] ss:$24 sps:$4 sm:$0xff]  }
 0x1fb   : > { %v12895_v46 = vadd.f32 %v9368_v44, %v9322_v59  ;;  %v9324_v51 = vpop.f32.mrf.mxu0  ;;  %9850 = vmatprep.subr.bf16.mxu0 %v10682_v43 }
 0x1fc   : > { %v9325_v0 = vadd.f32 %v9324_v51, %v9323_v6  ;;  %v9370_v23 = vpop.f32.mrf.mxu1  ;;  %9895 = vmatpush3.bf16.msra.mxu1 %v10681_v16  ;;  %v10817_v16 = vld [vmem:[%s10954_s27 + $0x110] ss:$24 sps:$4 sm:$0xff]  }
 0x1fd   : > { %v9371_v8 = vadd.f32 %v9370_v23, %v9369_v48  ;;  %v9326_v2 = vpop.f32.mrf.mxu0  ;;  %5556 = vmatmul.mubr.bf16.gmra.mxu0 %v10815_v18  ;;  %9896 = vmatprep.subr.bf16.mxu1 %v10684_v1  ;;  %v12938_v48 = vld [vmem:[%s10954_s27 + $0x60] ss:$24 sps:$4 sm:$0xff]   ;;  %v10700_v18 = vld [vmem:[%s13684_s1 + $0x770] sm:$0xff]  }
 0x1fe   : > { %v9372_v3 = vpop.f32.mrf.mxu1  ;;  %5629 = vmatmul.mubr.bf16.gmra.mxu1 %v12734_v31  ;;  %5563 = vmatprep.mubr.bf16.mxu0 %v10816_v29  ;;  %v10689_v31 = vld [vmem:[%s13684_s1 + $0x680] sm:$0xff]  }
 0x1ff   : > { %v12909_v56 = vadd.f32 %v9371_v8, %v9325_v0  ;;  %v9327_v20 = vpop.f32.mrf.mxu0  ;;  %5636 = vmatprep.mubr.bf16.mxu1 %v12744_v40  ;;  %9851 = vmatpush3.bf16.msra.mxu0 %v10683_v55 }
 0x200   : > { %v9328_v32 = vadd.f32 %v9327_v20, %v9326_v2  ;;  %v9373_v21 = vpop.f32.mrf.mxu1  ;;  %9897 = vmatpush3.bf16.msra.mxu1 %v10685_v37  ;;  %9852 = vmatprep.subr.bf16.mxu0 %v10686_v63  ;;  %v12942_v37 = vld [vmem:[%s10954_s27 + $0x68] ss:$24 sps:$4 sm:$0xff]   ;;  %v10699_v2 = vld [vmem:[%s13684_s1 + $0xdb8] sm:$0xff]  }
 0x201   : > { %v9374_v28 = vadd.f32 %v9373_v21, %v9372_v3  ;;  %v9329_v40 = vpop.f32.mrf.mxu0  ;;  %9898 = vmatprep.subr.bf16.mxu1 %v10688_v5  ;;  %v12957_v3 = vld [vmem:[%s10954_s27 + $0x94] ss:$24 sps:$4 sm:$0xff]  }
 0x202   : > { %v9375_v7 = vpop.f32.mrf.mxu1 }
 0x203   : > { %v12927_v14 = vadd.f32 %v9374_v28, %v9328_v32  ;;  %v9330_v35 = vpop.f32.mrf.mxu0  ;;  %9853 = vmatpush3.bf16.msra.mxu0 %v10687_v41  ;;  %v12966_v32 = vld [vmem:[%s10954_s27 + $0x9c] ss:$24 sps:$4 sm:$0xff]  }
 0x204   : > { %v9331_v30 = vadd.f32 %v9330_v35, %v9329_v40  ;;  %v9376_v43 = vpop.f32.mrf.mxu1  ;;  %9899 = vmatpush3.bf16.msra.mxu1 %v10689_v31  ;;  %9930 = vmatprep.subr.bf16.mxu0 %v10696_v10  ;;  %v10709_v40 = vld [vmem:[%s13684_s1 + $0xdb0] sm:$0xff]   ;;  %v10710_v35 = vld [vmem:[%s13684_s1 + $0x768] sm:$0xff]  }
 0x205   : > { %v9377_v59 = vadd.f32 %v9376_v43, %v9375_v7  ;;  %v9394_v9 = vpop.f32.mrf.mxu0  ;;  %5564 = vmatmul.mubr.bf16.gmra.mxu0 %v10817_v16  ;;  %9976 = vmatprep.subr.bf16.mxu1 %v10698_v58  ;;  %v12980_v7 = vld [vmem:[%s10954_s27 + $0x90] ss:$24 sps:$4 sm:$0xff]  }
 0x206   : > { %v9440_v44 = vpop.f32.mrf.mxu1  ;;  %5637 = vmatmul.mubr.bf16.gmra.mxu1 %v12772_v53  ;;  %6252 = vmatprep.mubr.bf16.mxu0 %v12925_v12  ;;  %v10697_v53 = vld [vmem:[%s13684_s1 + $0x738] sm:$0xff]   ;;  %v10712_v16 = vld [vmem:[%s13684_s1 + $0xde8] sm:$0xff]  }
 0x207   : > { %v12935_v6 = vadd.f32 %v9377_v59, %v9331_v30  ;;  %v9395_v1 = vpop.f32.mrf.mxu0  ;;  %6325 = vmatprep.mubr.bf16.mxu1 %v12930_v39  ;;  %v12990_v59 = vld [vmem:[%s10954_s27 + $0x98] ss:$24 sps:$4 sm:$0xff]  }
 0x208   : > { %v9396_v55 = vadd.f32 %v9395_v1, %v9394_v9  ;;  %v9441_v51 = vpop.f32.mrf.mxu1  ;;  %v10711_v9 = vld [vmem:[%s13684_s1 + $0x728] sm:$0xff]  }
 0x209   : > { %v12944_v0 = vadd.f32 %v9441_v51, %v9440_v44  ;;  %v9397_v23 = vpop.f32.mrf.mxu0  ;;  %v10713_v1 = vld [vmem:[%s13684_s1 + $0xda8] sm:$0xff]  }
 0x20a   : > { %v3585_v63 = vadd.f32 %v9396_v55, %v12802_v45  ;;  %v9443_v8 = vpop.f32.mrf.mxu1  ;;  %v10701_v45 = vld [vmem:[%s13684_s1 + $0x730] sm:$0xff]   ;;  %v13005_v55 = vld [vmem:[%s10954_s27 + $0xc4] ss:$24 sps:$4 sm:$0xff]  }
 0x20b   : > { %v9398_v5 = vpop.f32.mrf.mxu0 }
 0x20c   : > { %v12960_v29 = vadd.f32 %v3585_v63, %v12148_v25  ;;  %v9399_v20 = vadd.f32 %v9398_v5, %v9397_v23  ;;  %v9444_v41 = vpop.f32.mrf.mxu1  ;;  %v10708_v25 = vld [vmem:[%s13684_s1 + $0xdf0] sm:$0xff]  }
 0x20d   : > { %v12968_v21 = vadd.f32 %v9444_v41, %v9443_v8  ;;  %v9400_v31 = vpop.f32.mrf.mxu0  ;;  %6253 = vmatmul.mubr.bf16.vlgmr.msra.gmra.mxu0 %v12938_v48  ;;  %v10720_v8 = vld [vmem:[%s13684_s1 + $0x760] sm:$0xff]  }
 0x20e   : > { %v3588_v10 = vadd.f32 %v9399_v20, %v12818_v22  ;;  %v9446_v28 = vpop.f32.mrf.mxu1  ;;  %6326 = vmatmul.mubr.bf16.vlgmr.msra.gmra.mxu1 %v12942_v37  ;;  %9931 = vmatpush3.bf16.msra.mxu0 %v10697_v53  ;;  %v13009_v53 = vld [vmem:[%s10954_s27 + $0xcc] ss:$24 sps:$4 sm:$0xff]  }
 0x20f   : > { %v9401_v58 = vpop.f32.mrf.mxu0  ;;  %9977 = vmatpush3.bf16.msra.mxu1 %v10699_v2  ;;  %9932 = vmatprep.subr.bf16.mxu0 %v10700_v18 }
 0x210   : > { %v12986_v22 = vadd.f32 %v3588_v10, %v12171_v15  ;;  %v9402_v30 = vadd.f32 %v9401_v58, %v9400_v31  ;;  %v9447_v43 = vpop.f32.mrf.mxu1  ;;  %6260 = vmatprep.mubr.bf16.mxu0 %v12957_v3  ;;  %6333 = vmatprep.mubr.bf16.mxu1 %v12966_v32 }
 0x211   : > { %v12999_v44 = vadd.f32 %v9447_v43, %v9446_v28  ;;  %v9403_v15 = vpop.f32.mrf.mxu0  ;;  %9978 = vmatprep.subr.bf16.mxu1 %v10708_v25  ;;  %v10723_v25 = vld [vmem:[%s13684_s1 + $0xda0] sm:$0xff]   ;;  %v10725_v43 = vld [vmem:[%s13684_s1 + $0x718] sm:$0xff]  }
 0x212   : > { %v3593_v51 = vadd.f32 %v9402_v30, %v12831_v38  ;;  %v9449_v23 = vpop.f32.mrf.mxu1  ;;  %9933 = vmatpush3.bf16.msra.mxu0 %v10701_v45  ;;  %v10721_v38 = vld [vmem:[%s13684_s1 + $0x720] sm:$0xff]  }
 0x213   : > { %v9404_v63 = vpop.f32.mrf.mxu0  ;;  %9979 = vmatpush3.bf16.msra.mxu1 %v10709_v40  ;;  %9934 = vmatprep.subr.bf16.mxu0 %v10710_v35  ;;  %v10722_v45 = vld [vmem:[%s13684_s1 + $0xde0] sm:$0xff]  }
 0x214   : > { %v13015_v2 = vadd.f32 %v3593_v51, %v12191_v36  ;;  %v9405_v18 = vadd.f32 %v9404_v63, %v9403_v15  ;;  %v9450_v5 = vpop.f32.mrf.mxu1  ;;  %9980 = vmatprep.subr.bf16.mxu1 %v10712_v16  ;;  %v13032_v28 = vld [vmem:[%s10954_s27 + $0xc0] ss:$24 sps:$4 sm:$0xff]  }
 0x215   : > { %v13020_v20 = vadd.f32 %v9450_v5, %v9449_v23  ;;  %v9406_v41 = vpop.f32.mrf.mxu0  ;;  %6261 = vmatmul.mubr.bf16.gmra.mxu0 %v12980_v7  ;;  %v13042_v30 = vld [vmem:[%s10954_s27 + $0xc8] ss:$24 sps:$4 sm:$0xff]   ;;  %v10733_v63 = vld [vmem:[%s13684_s1 + $0xd98] sm:$0xff]  }
 0x216   : > { %v3596_v36 = vadd.f32 %v9405_v18, %v12847_v62  ;;  %v9452_v31 = vpop.f32.mrf.mxu1  ;;  %6334 = vmatmul.mubr.bf16.gmra.mxu1 %v12990_v59  ;;  %9935 = vmatpush3.bf16.msra.mxu0 %v10711_v9  ;;  %v10724_v62 = vld [vmem:[%s13684_s1 + $0x758] sm:$0xff]   ;;  %v10734_v18 = vld [vmem:[%s13684_s1 + $0x750] sm:$0xff]  }
 0x217   : > { %v9407_v10 = vpop.f32.mrf.mxu0  ;;  %9981 = vmatpush3.bf16.msra.mxu1 %v10713_v1  ;;  %6268 = vmatprep.mubr.bf16.mxu0 %v13005_v55  ;;  %v10726_v9 = vld [vmem:[%s13684_s1 + $0xdd8] sm:$0xff]  }
 0x218   : > { %v13039_v40 = vadd.f32 %v3596_v36, %v12212_v34  ;;  %v9408_v58 = vadd.f32 %v9407_v10, %v9406_v41  ;;  %v9453_v35 = vpop.f32.mrf.mxu1  ;;  %6341 = vmatprep.mubr.bf16.mxu1 %v13009_v53  ;;  %9936 = vmatprep.subr.bf16.mxu0 %v10720_v8  ;;  %v13054_v34 = vld [vmem:[%s10954_s27 + $0xf4] ss:$24 sps:$4 sm:$0xff]  }
 0x219   : > { %v13051_v16 = vadd.f32 %v9453_v35, %v9452_v31  ;;  %v9409_v15 = vpop.f32.mrf.mxu0  ;;  %9982 = vmatprep.subr.bf16.mxu1 %v10722_v45  ;;  %v13057_v1 = vld [vmem:[%s10954_s27 + $0xfc] ss:$24 sps:$4 sm:$0xff]  }
 0x21a   : > { %v3601_v51 = vadd.f32 %v9408_v58, %v12863_v60  ;;  %v9455_v23 = vpop.f32.mrf.mxu1  ;;  %9937 = vmatpush3.bf16.msra.mxu0 %v10721_v38  ;;  %v10735_v60 = vld [vmem:[%s13684_s1 + $0x710] sm:$0xff]  }
 0x21b   : > { %v9410_v8 = vpop.f32.mrf.mxu0  ;;  %9983 = vmatpush3.bf16.msra.mxu1 %v10723_v25  ;;  %9938 = vmatprep.subr.bf16.mxu0 %v10724_v62  ;;  %v10736_v31 = vld [vmem:[%s13684_s1 + $0xdd0] sm:$0xff]  }
 0x21c   : > { %v13067_v5 = vadd.f32 %v3601_v51, %v12231_v26  ;;  %v9411_v41 = vadd.f32 %v9410_v8, %v9409_v15  ;;  %v9456_v45 = vpop.f32.mrf.mxu1  ;;  %9984 = vmatprep.subr.bf16.mxu1 %v10726_v9  ;;  %v10737_v10 = vld [vmem:[%s13684_s1 + $0xd90] sm:$0xff]   ;;  %v13098_v51 = vld [vmem:[%s10954_s27 + $0x124] ss:$24 sps:$4 sm:$0xff]  }
 0x21d   : > { %v13072_v38 = vadd.f32 %v9456_v45, %v9455_v23  ;;  %v9412_v36 = vpop.f32.mrf.mxu0  ;;  %6269 = vmatmul.mubr.bf16.gmra.mxu0 %v13032_v28  ;;  %v13084_v58 = vld [vmem:[%s10954_s27 + $0xf0] ss:$24 sps:$4 sm:$0xff]  }
 0x21e   : > { %v3604_v26 = vadd.f32 %v9411_v41, %v12879_v57  ;;  %v9458_v25 = vpop.f32.mrf.mxu1  ;;  %6342 = vmatmul.mubr.bf16.gmra.mxu1 %v13042_v30  ;;  %9939 = vmatpush3.bf16.msra.mxu0 %v10725_v43  ;;  %v10738_v57 = vld [vmem:[%s13684_s1 + $0x748] sm:$0xff]   ;;  %v13095_v15 = vld [vmem:[%s10954_s27 + $0xf8] ss:$24 sps:$4 sm:$0xff]  }
 0x21f   : > { %v9413_v62 = vpop.f32.mrf.mxu0  ;;  %6276 = vmatprep.mubr.bf16.mxu0 %v13054_v34  ;;  %6349 = vmatprep.mubr.bf16.mxu1 %v13057_v1  ;;  %v13103_v41 = vld [vmem:[%s10954_s27 + $0x12c] ss:$24 sps:$4 sm:$0xff]  }
 0x220   : > { %v13092_v35 = vadd.f32 %v3604_v26, %v12253_v61  ;;  %v9414_v43 = vadd.f32 %v9413_v62, %v9412_v36  ;;  %v9459_v9 = vpop.f32.mrf.mxu1  ;;  %9985 = vmatpush3.bf16.msra.mxu1 %v10733_v63  ;;  %9940 = vmatprep.subr.bf16.mxu0 %v10734_v18  ;;  %v10746_v45 = vld [vmem:[%s13684_s1 + $0xdc8] sm:$0xff]  }
 0x221   : > { %v13100_v23 = vadd.f32 %v9459_v9, %v9458_v25  ;;  %v9415_v8 = vpop.f32.mrf.mxu0  ;;  %9986 = vmatprep.subr.bf16.mxu1 %v10736_v31  ;;  %v10745_v63 = vld [vmem:[%s13684_s1 + $0x708] sm:$0xff]  }
 0x222   : > { %13705 = vst [vmem:[#allocation2_spill] sm:$0xff] %v13092_v35  ;;  %v3609_v61 = vadd.f32 %v9414_v43, %v12895_v46  ;;  %v9461_v36 = vpop.f32.mrf.mxu1  ;;  %9941 = vmatpush3.bf16.msra.mxu0 %v10735_v60  ;;  %v10747_v31 = vld [vmem:[%s13684_s1 + $0xd88] sm:$0xff]   ;;  %v10748_v46 = vld [vmem:[%s13684_s1 + $0x740] sm:$0xff]  }
 0x223   : > { %v9416_v18 = vpop.f32.mrf.mxu0  ;;  %9942 = vmatprep.subr.bf16.mxu0 %v10738_v57  ;;  %v10750_v57 = vld [vmem:[%s13684_s1 + $0xdc0] sm:$0xff]  }
 0x224   : > { %v13116_v26 = vadd.f32 %v3609_v61, %v12268_v49  ;;  %v9417_v25 = vadd.f32 %v9416_v18, %v9415_v8  ;;  %v9462_v62 = vpop.f32.mrf.mxu1  ;;  %9987 = vmatpush3.bf16.msra.mxu1 %v10737_v10  ;;  %v13131_v8 = vld [vmem:[%s10954_s27 + $0x120] ss:$24 sps:$4 sm:$0xff]  }
 0x225   : > { %v13121_v60 = vadd.f32 %v9462_v62, %v9461_v36  ;;  %v9418_v43 = vpop.f32.mrf.mxu0  ;;  %6277 = vmatmul.mubr.bf16.gmra.mxu0 %v13084_v58  ;;  %9988 = vmatprep.subr.bf16.mxu1 %v10746_v45  ;;  %v10749_v45 = vld [vmem:[%s13684_s1 + $0x700] sm:$0xff]  }
 0x226   : > { %13706 = vst [vmem:[#allocation4_spill] sm:$0xff] %v13116_v26  ;;  %v3612_v49 = vadd.f32 %v9417_v25, %v12909_v56  ;;  %v9464_v9 = vpop.f32.mrf.mxu1  ;;  %6350 = vmatmul.mubr.bf16.gmra.mxu1 %v13095_v15  ;;  %6284 = vmatprep.mubr.bf16.mxu0 %v13098_v51  ;;  %v13141_v18 = vld [vmem:[%s10954_s27 + $0x128] ss:$24 sps:$4 sm:$0xff]  }
 0x227   : > { %v9419_v10 = vpop.f32.mrf.mxu0  ;;  %6357 = vmatprep.mubr.bf16.mxu1 %v13103_v41  ;;  %9943 = vmatpush3.bf16.msra.mxu0 %v10745_v63  ;;  %v10751_v25 = vld [vmem:[%s13684_s1 + $0xd80] sm:$0xff]   ;;  %v10755_v63 = vld [vmem:[%s13684_s1 + $0xe78] sm:$0xff]  }
 0x228   : > { %v13138_v61 = vadd.f32 %v3612_v49, %v12290_v52  ;;  %v9420_v56 = vadd.f32 %v9419_v10, %v9418_v43  ;;  %v9465_v36 = vpop.f32.mrf.mxu1  ;;  %9989 = vmatpush3.bf16.msra.mxu1 %v10747_v31  ;;  %9944 = vmatprep.subr.bf16.mxu0 %v10748_v46  ;;  %v10757_v52 = vld [vmem:[%s13684_s1 + $0xef8] sm:$0xff]   ;;  %v13156_v46 = vld [vmem:[%s10954_s27 + $0x74] ss:$24 sps:$4 sm:$0xff]  }
 0x229   : > { %v13149_v62 = vadd.f32 %v9465_v36, %v9464_v9  ;;  %v9421_v26 = vpop.f32.mrf.mxu0  ;;  %9990 = vmatprep.subr.bf16.mxu1 %v10750_v57 }
 0x22a   : > { %13707 = vst [vmem:[#allocation3_spill] sm:$0xff] %v13138_v61  ;;  %v3617_v43 = vadd.f32 %v9420_v56, %v12927_v14  ;;  %v9467_v31 = vpop.f32.mrf.mxu1 }
 0x22b   : > { %v9422_v49 = vpop.f32.mrf.mxu0  ;;  %9945 = vmatpush3.bf16.msra.mxu0 %v10749_v45 }
 0x22c   : > { %v13159_v10 = vadd.f32 %v3617_v43, %v12299_v19  ;;  %v9423_v61 = vadd.f32 %v9422_v49, %v9421_v26  ;;  %v9468_v35 = vpop.f32.mrf.mxu1  ;;  %9991 = vmatpush3.bf16.msra.mxu1 %v10751_v25  ;;  %10022 = vmatprep.subr.bf16.mxu0 %v10755_v63  ;;  %v13172_v63 = vld [vmem:[%s10954_s27 + $0x70] ss:$24 sps:$4 sm:$0xff]  }
 0x22d   : > { %v13161_v57 = vadd.f32 %v9468_v35, %v9467_v31  ;;  %v9486_v9 = vpop.f32.mrf.mxu0  ;;  %6285 = vmatmul.mubr.bf16.gmra.mxu0 %v13131_v8  ;;  %10068 = vmatprep.subr.bf16.mxu1 %v10757_v52  ;;  %v10756_v52 = vld [vmem:[%s13684_s1 + $0xe38] sm:$0xff]  }
 0x22e   : > { %v3620_v14 = vadd.f32 %v9423_v61, %v12935_v6  ;;  %v9532_v56 = vpop.f32.mrf.mxu1  ;;  %6358 = vmatmul.mubr.bf16.gmra.mxu1 %v13141_v18  ;;  %6398 = vmatprep.mubr.bf16.mxu0 %v13156_v46 }
 0x22f   : > { %v9487_v19 = vpop.f32.mrf.mxu0  ;;  %6866 = vmatprep.mubr.bf16.mxu1 %v12925_v12  ;;  %v10758_v12 = vld [vmem:[%s13684_s1 + $0xeb8] sm:$0xff]  }
 0x230   : > { %v13169_v26 = vadd.f32 %v3620_v14, %v12306_v13  ;;  %v9488_v35 = vadd.f32 %v9487_v19, %v9486_v9  ;;  %v9533_v45 = vpop.f32.mrf.mxu1  ;;  %v10759_v13 = vld [vmem:[%s13684_s1 + $0xe70] sm:$0xff]   ;;  %v13185_v14 = vld [vmem:[%s10954_s27 + $0xa4] ss:$24 sps:$4 sm:$0xff]  }
 0x231   : > { %v9534_v36 = vadd.f32 %v9533_v45, %v9532_v56  ;;  %v9489_v25 = vpop.f32.mrf.mxu0  ;;  %v10764_v19 = vld [vmem:[%s13684_s1 + $0xef0] sm:$0xff]  }
 0x232   : > { %13708 = vst [vmem:[#allocation5_spill] sm:$0xff] %v13169_v26  ;;  %v4126_v6 = vadd.f32 %v9488_v35, %v12944_v0  ;;  %v9535_v61 = vpop.f32.mrf.mxu1 }
 0x233   : > { %v9490_v43 = vpop.f32.mrf.mxu0 }
 0x234   : > { %v4199_v31 = vadd.f32 %v9534_v36, %v4126_v6  ;;  %v9491_v49 = vadd.f32 %v9490_v43, %v9489_v25  ;;  %v9536_v9 = vpop.f32.mrf.mxu1  ;;  %v10760_v36 = vld [vmem:[%s13684_s1 + $0xe30] sm:$0xff]  }
 0x235   : > { %v9537_v0 = vadd.f32 %v9536_v9, %v9535_v61  ;;  %v9492_v56 = vpop.f32.mrf.mxu0  ;;  %6399 = vmatmul.mubr.bf16.vlgmr.msra.gmra.mxu0 %v13172_v63  ;;  %v10765_v6 = vld [vmem:[%s13684_s1 + $0xeb0] sm:$0xff]  }
 0x236   : > { %v13192_v35 = vadd.f32 %v4199_v31, %v12636_v4  ;;  %v4129_v45 = vadd.f32 %v9491_v49, %v12968_v21  ;;  %v9538_v26 = vpop.f32.mrf.mxu1  ;;  %6867 = vmatmul.mubr.bf16.vlgmr.msra.gmra.mxu1 %v12938_v48  ;;  %10023 = vmatpush3.bf16.msra.mxu0 %v10756_v52  ;;  %v10766_v4 = vld [vmem:[%s13684_s1 + $0xe68] sm:$0xff]  }
 0x237   : > { %v9493_v25 = vpop.f32.mrf.mxu0  ;;  %10069 = vmatpush3.bf16.msra.mxu1 %v10758_v12  ;;  %10024 = vmatprep.subr.bf16.mxu0 %v10759_v13  ;;  %v10768_v52 = vld [vmem:[%s13684_s1 + $0xee8] sm:$0xff]   ;;  %v13211_v13 = vld [vmem:[%s10954_s27 + $0xa0] ss:$24 sps:$4 sm:$0xff]  }
 0x238   : > { %v4202_v21 = vadd.f32 %v9537_v0, %v4129_v45  ;;  %v9494_v61 = vadd.f32 %v9493_v25, %v9492_v56  ;;  %v9539_v48 = vpop.f32.mrf.mxu1  ;;  %6406 = vmatprep.mubr.bf16.mxu0 %v13185_v14  ;;  %6874 = vmatprep.mubr.bf16.mxu1 %v12957_v3  ;;  %v10767_v3 = vld [vmem:[%s13684_s1 + $0xe28] sm:$0xff]  }
 0x239   : > { %v9540_v43 = vadd.f32 %v9539_v48, %v9538_v26  ;;  %v9495_v12 = vpop.f32.mrf.mxu0  ;;  %10070 = vmatprep.subr.bf16.mxu1 %v10764_v19  ;;  %v10769_v26 = vld [vmem:[%s13684_s1 + $0xea8] sm:$0xff]   ;;  %v10774_v48 = vld [vmem:[%s13684_s1 + $0xe20] sm:$0xff]  }
 0x23a   : > { %v13214_v31 = vadd.f32 %v4202_v21, %v12659_v50  ;;  %v4134_v49 = vadd.f32 %v9494_v61, %v12999_v44  ;;  %v9541_v9 = vpop.f32.mrf.mxu1  ;;  %10025 = vmatpush3.bf16.msra.mxu0 %v10760_v36  ;;  %v13224_v56 = vld [vmem:[%s10954_s27 + $0xd4] ss:$24 sps:$4 sm:$0xff]   ;;  %v10773_v44 = vld [vmem:[%s13684_s1 + $0xe60] sm:$0xff]  }
 0x23b   : > { %v9496_v0 = vpop.f32.mrf.mxu0  ;;  %10071 = vmatpush3.bf16.msra.mxu1 %v10765_v6  ;;  %10026 = vmatprep.subr.bf16.mxu0 %v10766_v4  ;;  %v10775_v6 = vld [vmem:[%s13684_s1 + $0xee0] sm:$0xff]  }
 0x23c   : > { %v4207_v19 = vadd.f32 %v9540_v43, %v4134_v49  ;;  %v9497_v50 = vadd.f32 %v9496_v0, %v9495_v12  ;;  %v9542_v45 = vpop.f32.mrf.mxu1  ;;  %10072 = vmatprep.subr.bf16.mxu1 %v10768_v52  ;;  %v10779_v49 = vld [vmem:[%s13684_s1 + $0xed8] sm:$0xff]   ;;  %v13253_v0 = vld [vmem:[%s10954_s27 + $0xd0] ss:$24 sps:$4 sm:$0xff]  }
 0x23d   : > { %v9543_v36 = vadd.f32 %v9542_v45, %v9541_v9  ;;  %v9498_v25 = vpop.f32.mrf.mxu0  ;;  %6407 = vmatmul.mubr.bf16.gmra.mxu0 %v13211_v13 }
 0x23e   : > { %v13234_v4 = vadd.f32 %v4207_v19, %v12679_v27  ;;  %v4137_v21 = vadd.f32 %v9497_v50, %v13020_v20  ;;  %v9544_v61 = vpop.f32.mrf.mxu1  ;;  %6875 = vmatmul.mubr.bf16.gmra.mxu1 %v12980_v7  ;;  %10027 = vmatpush3.bf16.msra.mxu0 %v10767_v3  ;;  %v10776_v27 = vld [vmem:[%s13684_s1 + $0xea0] sm:$0xff]   ;;  %v10777_v20 = vld [vmem:[%s13684_s1 + $0xe58] sm:$0xff]  }
 0x23f   : > { %v9499_v52 = vpop.f32.mrf.mxu0  ;;  %10073 = vmatpush3.bf16.msra.mxu1 %v10769_v26  ;;  %6414 = vmatprep.mubr.bf16.mxu0 %v13224_v56 }
 0x240   : > { %v4210_v43 = vadd.f32 %v9543_v36, %v4137_v21  ;;  %v9500_v7 = vadd.f32 %v9499_v52, %v9498_v25  ;;  %v9545_v12 = vpop.f32.mrf.mxu1  ;;  %6882 = vmatprep.mubr.bf16.mxu1 %v13005_v55  ;;  %10028 = vmatprep.subr.bf16.mxu0 %v10773_v44  ;;  %v10778_v55 = vld [vmem:[%s13684_s1 + $0xe18] sm:$0xff]  }
 0x241   : > { %v9546_v9 = vadd.f32 %v9545_v12, %v9544_v61  ;;  %v9501_v3 = vpop.f32.mrf.mxu0  ;;  %10074 = vmatprep.subr.bf16.mxu1 %v10775_v6  ;;  %v13263_v44 = vld [vmem:[%s10954_s27 + $0x104] ss:$24 sps:$4 sm:$0xff]  }
 0x242   : > { %v13256_v26 = vadd.f32 %v4210_v43, %v12700_v54  ;;  %v4142_v19 = vadd.f32 %v9500_v7, %v13051_v16  ;;  %v9547_v50 = vpop.f32.mrf.mxu1  ;;  %10029 = vmatpush3.bf16.msra.mxu0 %v10774_v48  ;;  %v10783_v54 = vld [vmem:[%s13684_s1 + $0xe98] sm:$0xff]   ;;  %v10784_v16 = vld [vmem:[%s13684_s1 + $0xe50] sm:$0xff]  }
 0x243   : > { %v9502_v45 = vpop.f32.mrf.mxu0  ;;  %10075 = vmatpush3.bf16.msra.mxu1 %v10776_v27  ;;  %10030 = vmatprep.subr.bf16.mxu0 %v10777_v20  ;;  %v10786_v48 = vld [vmem:[%s13684_s1 + $0xed0] sm:$0xff]  }
 0x244   : > { %v4215_v36 = vadd.f32 %v9546_v9, %v4142_v19  ;;  %v9503_v25 = vadd.f32 %v9502_v45, %v9501_v3  ;;  %v9548_v21 = vpop.f32.mrf.mxu1  ;;  %10076 = vmatprep.subr.bf16.mxu1 %v10779_v49  ;;  %v10785_v43 = vld [vmem:[%s13684_s1 + $0xe10] sm:$0xff]   ;;  %v13292_v19 = vld [vmem:[%s10954_s27 + $0x100] ss:$24 sps:$4 sm:$0xff]  }
 0x245   : > { %v9549_v6 = vadd.f32 %v9548_v21, %v9547_v50  ;;  %v9504_v61 = vpop.f32.mrf.mxu0  ;;  %6415 = vmatmul.mubr.bf16.gmra.mxu0 %v13253_v0  ;;  %v10792_v21 = vld [vmem:[%s13684_s1 + $0xe08] sm:$0xff]  }
 0x246   : > { %v13276_v52 = vadd.f32 %v4215_v36, %v12719_v24  ;;  %v4145_v27 = vadd.f32 %v9503_v25, %v13072_v38  ;;  %v9550_v20 = vpop.f32.mrf.mxu1  ;;  %6883 = vmatmul.mubr.bf16.gmra.mxu1 %v13032_v28  ;;  %10031 = vmatpush3.bf16.msra.mxu0 %v10778_v55  ;;  %v10788_v24 = vld [vmem:[%s13684_s1 + $0xe48] sm:$0xff]   ;;  %v10787_v28 = vld [vmem:[%s13684_s1 + $0xe90] sm:$0xff]  }
 0x247   : > { %v9505_v7 = vpop.f32.mrf.mxu0  ;;  %6422 = vmatprep.mubr.bf16.mxu0 %v13263_v44  ;;  %6890 = vmatprep.mubr.bf16.mxu1 %v13054_v34  ;;  %v10793_v34 = vld [vmem:[%s13684_s1 + $0xec8] sm:$0xff]  }
 0x248   : > { %v4218_v38 = vadd.f32 %v9549_v6, %v4145_v27  ;;  %v9506_v12 = vadd.f32 %v9505_v7, %v9504_v61  ;;  %v9551_v49 = vpop.f32.mrf.mxu1  ;;  %10077 = vmatpush3.bf16.msra.mxu1 %v10783_v54  ;;  %10032 = vmatprep.subr.bf16.mxu0 %v10784_v16  ;;  %v13302_v36 = vld [vmem:[%s10954_s27 + $0x134] ss:$24 sps:$4 sm:$0xff]   ;;  %v10797_v27 = vld [vmem:[%s13684_s1 + $0xec0] sm:$0xff]  }
 0x249   : > { %v9552_v9 = vadd.f32 %v9551_v49, %v9550_v20  ;;  %v9507_v3 = vpop.f32.mrf.mxu0  ;;  %10078 = vmatprep.subr.bf16.mxu1 %v10786_v48 }
 0x24a   : > { %v13298_v50 = vadd.f32 %v4218_v38, %v12741_v11  ;;  %v4150_v55 = vadd.f32 %v9506_v12, %v13100_v23  ;;  %v9553_v45 = vpop.f32.mrf.mxu1  ;;  %10033 = vmatpush3.bf16.msra.mxu0 %v10785_v43  ;;  %v10794_v11 = vld [vmem:[%s13684_s1 + $0xe88] sm:$0xff]   ;;  %v10795_v23 = vld [vmem:[%s13684_s1 + $0xe40] sm:$0xff]  }
 0x24b   : > { %v9508_v25 = vpop.f32.mrf.mxu0  ;;  %10034 = vmatprep.subr.bf16.mxu0 %v10788_v24  ;;  %v10796_v38 = vld [vmem:[%s13684_s1 + $0xe00] sm:$0xff]  }
 0x24c   : > { %v4223_v54 = vadd.f32 %v9552_v9, %v4150_v55  ;;  %v9509_v16 = vadd.f32 %v9508_v25, %v9507_v3  ;;  %v9554_v6 = vpop.f32.mrf.mxu1  ;;  %10079 = vmatpush3.bf16.msra.mxu1 %v10787_v28  ;;  %v13331_v9 = vld [vmem:[%s10954_s27 + $0x130] ss:$24 sps:$4 sm:$0xff]  }
 0x24d   : > { %v9555_v61 = vadd.f32 %v9554_v6, %v9553_v45  ;;  %v9510_v48 = vpop.f32.mrf.mxu0  ;;  %6423 = vmatmul.mubr.bf16.gmra.mxu0 %v13292_v19  ;;  %10080 = vmatprep.subr.bf16.mxu1 %v10793_v34 }
 0x24e   : > { %v13318_v20 = vadd.f32 %v4223_v54, %v12756_v42  ;;  %v4153_v43 = vadd.f32 %v9509_v16, %v13121_v60  ;;  %v9556_v7 = vpop.f32.mrf.mxu1  ;;  %6891 = vmatmul.mubr.bf16.gmra.mxu1 %v13084_v58  ;;  %6430 = vmatprep.mubr.bf16.mxu0 %v13302_v36  ;;  %v10798_v60 = vld [vmem:[%s13684_s1 + $0xe80] sm:$0xff]  }
 0x24f   : > { %v9511_v24 = vpop.f32.mrf.mxu0  ;;  %6898 = vmatprep.mubr.bf16.mxu1 %v13098_v51  ;;  %10035 = vmatpush3.bf16.msra.mxu0 %v10792_v21 }
 0x250   : > { %v4226_v12 = vadd.f32 %v9555_v61, %v4153_v43  ;;  %v9512_v49 = vadd.f32 %v9511_v24, %v9510_v48  ;;  %v9557_v42 = vpop.f32.mrf.mxu1  ;;  %10081 = vmatpush3.bf16.msra.mxu1 %v10794_v11  ;;  %10036 = vmatprep.subr.bf16.mxu0 %v10795_v23 }
 0x251   : > { %v9558_v58 = vadd.f32 %v9557_v42, %v9556_v7  ;;  %v9513_v28 = vpop.f32.mrf.mxu0  ;;  %10082 = vmatprep.subr.bf16.mxu1 %v10797_v27 }
 0x252   : > { %v13334_v51 = vadd.f32 %v4226_v12, %v12778_v17  ;;  %v4158_v3 = vadd.f32 %v9512_v49, %v13149_v62  ;;  %v9559_v34 = vpop.f32.mrf.mxu1 }
 0x253   : > { %v9514_v55 = vpop.f32.mrf.mxu0  ;;  %10037 = vmatpush3.bf16.msra.mxu0 %v10796_v38 }
 0x254   : > { %v4231_v45 = vadd.f32 %v9558_v58, %v4158_v3  ;;  %v9515_v25 = vadd.f32 %v9514_v55, %v9513_v28  ;;  %v9560_v21 = vpop.f32.mrf.mxu1  ;;  %10083 = vmatpush3.bf16.msra.mxu1 %v10798_v60 }
 0x255   : > { %v9561_v54 = vadd.f32 %v9560_v21, %v9559_v34  ;;  %v9578_v16 = vpop.f32.mrf.mxu0  ;;  %6431 = vmatmul.mubr.bf16.gmra.mxu0 %v13331_v9 }
 0x256   : > { %v13339_v6 = vadd.f32 %v4231_v45, %v12787_v33  ;;  %v4161_v11 = vadd.f32 %v9515_v25, %v13161_v57  ;;  %v9624_v17 = vpop.f32.mrf.mxu1  ;;  %6899 = vmatmul.mubr.bf16.gmra.mxu1 %v13131_v8  ;;  %6939 = vmatprep.mubr.bf16.mxu0 %v12930_v39 }
 0x257   : > { %v9579_v62 = vpop.f32.mrf.mxu0  ;;  %7012 = vmatprep.mubr.bf16.mxu1 %v13156_v46 }
 0x258   : > { %v4234_v23 = vadd.f32 %v9561_v54, %v4161_v11  ;;  %v9580_v61 = vadd.f32 %v9579_v62, %v9578_v16  ;;  %v9625_v48 = vpop.f32.mrf.mxu1 }
 0x259   : > { %v9626_v27 = vadd.f32 %v9625_v48, %v9624_v17  ;;  %v9581_v43 = vpop.f32.mrf.mxu0 }
 0x25a   : > { %v13346_v7 = vadd.f32 %v4234_v23, %v12794_v47  ;;  %v9627_v33 = vpop.f32.mrf.mxu1 }
 0x25b   : > { %v13348_v24 = vadd.f32 %v9626_v27, %v9580_v61  ;;  %v9582_v57 = vpop.f32.mrf.mxu0 }
 0x25c   : > { %v9583_v38 = vadd.f32 %v9582_v57, %v9581_v43  ;;  %v9628_v12 = vpop.f32.mrf.mxu1 }
 0x25d   : > { %v9629_v8 = vadd.f32 %v9628_v12, %v9627_v33  ;;  %v9584_v49 = vpop.f32.mrf.mxu0  ;;  %6940 = vmatmul.mubr.bf16.vlgmr.msra.gmra.mxu0 %v12942_v37 }
 0x25e   : > { %v9630_v39 = vpop.f32.mrf.mxu1  ;;  %7013 = vmatmul.mubr.bf16.vlgmr.msra.gmra.mxu1 %v13172_v63  ;;  %6947 = vmatprep.mubr.bf16.mxu0 %v12966_v32 }
 0x25f   : > { %v13353_v46 = vadd.f32 %v9629_v8, %v9583_v38  ;;  %v9585_v42 = vpop.f32.mrf.mxu0  ;;  %7020 = vmatprep.mubr.bf16.mxu1 %v13185_v14 }
 0x260   : > { %v9586_v47 = vadd.f32 %v9585_v42, %v9584_v49  ;;  %v9631_v60 = vpop.f32.mrf.mxu1 }
 0x261   : > { %v9632_v58 = vadd.f32 %v9631_v60, %v9630_v39  ;;  %v9587_v28 = vpop.f32.mrf.mxu0 }
 0x262   : > { %v9633_v3 = vpop.f32.mrf.mxu1 }
 0x263   : > { %v13356_v34 = vadd.f32 %v9632_v58, %v9586_v47  ;;  %v9588_v55 = vpop.f32.mrf.mxu0 }
 0x264   : > { %v9589_v45 = vadd.f32 %v9588_v55, %v9587_v28  ;;  %v9634_v37 = vpop.f32.mrf.mxu1 }
 0x265   : > { %v9635_v25 = vadd.f32 %v9634_v37, %v9633_v3  ;;  %v9590_v21 = vpop.f32.mrf.mxu0  ;;  %6948 = vmatmul.mubr.bf16.gmra.mxu0 %v12990_v59 }
 0x266   : > { %v9636_v32 = vpop.f32.mrf.mxu1  ;;  %7021 = vmatmul.mubr.bf16.gmra.mxu1 %v13211_v13  ;;  %6955 = vmatprep.mubr.bf16.mxu0 %v13009_v53 }
 0x267   : > { %v13361_v63 = vadd.f32 %v9635_v25, %v9589_v45  ;;  %v9591_v14 = vpop.f32.mrf.mxu0  ;;  %7028 = vmatprep.mubr.bf16.mxu1 %v13224_v56 }
 0x268   : > { %v9592_v54 = vadd.f32 %v9591_v14, %v9590_v21  ;;  %v9637_v16 = vpop.f32.mrf.mxu1 }
 0x269   : > { %v9638_v11 = vadd.f32 %v9637_v16, %v9636_v32  ;;  %v9593_v17 = vpop.f32.mrf.mxu0 }
 0x26a   : > { %v9639_v62 = vpop.f32.mrf.mxu1 }
 0x26b   : > { %v13364_v23 = vadd.f32 %v9638_v11, %v9592_v54  ;;  %v9594_v61 = vpop.f32.mrf.mxu0 }
 0x26c   : > { %v9595_v48 = vadd.f32 %v9594_v61, %v9593_v17  ;;  %v9640_v59 = vpop.f32.mrf.mxu1 }
 0x26d   : > { %v9641_v27 = vadd.f32 %v9640_v59, %v9639_v62  ;;  %v9596_v43 = vpop.f32.mrf.mxu0  ;;  %6956 = vmatmul.mubr.bf16.gmra.mxu0 %v13042_v30 }
 0x26e   : > { %v9642_v53 = vpop.f32.mrf.mxu1  ;;  %7029 = vmatmul.mubr.bf16.gmra.mxu1 %v13253_v0  ;;  %6963 = vmatprep.mubr.bf16.mxu0 %v13057_v1 }
 0x26f   : > { %v13369_v13 = vadd.f32 %v9641_v27, %v9595_v48  ;;  %v9597_v56 = vpop.f32.mrf.mxu0  ;;  %7036 = vmatprep.mubr.bf16.mxu1 %v13263_v44 }
 0x270   : > { %v9598_v33 = vadd.f32 %v9597_v56, %v9596_v43  ;;  %v9643_v57 = vpop.f32.mrf.mxu1 }
 0x271   : > { %v9644_v38 = vadd.f32 %v9643_v57, %v9642_v53  ;;  %v9599_v12 = vpop.f32.mrf.mxu0 }
 0x272   : > { %v9645_v8 = vpop.f32.mrf.mxu1 }
 0x273   : > { %v13372_v49 = vadd.f32 %v9644_v38, %v9598_v33  ;;  %v9600_v39 = vpop.f32.mrf.mxu0 }
 0x274   : > { %v9601_v42 = vadd.f32 %v9600_v39, %v9599_v12  ;;  %v9646_v30 = vpop.f32.mrf.mxu1 }
 0x275   : > { %v9647_v47 = vadd.f32 %v9646_v30, %v9645_v8  ;;  %v9602_v60 = vpop.f32.mrf.mxu0  ;;  %6964 = vmatmul.mubr.bf16.gmra.mxu0 %v13095_v15 }
 0x276   : > { %v9648_v1 = vpop.f32.mrf.mxu1  ;;  %7037 = vmatmul.mubr.bf16.gmra.mxu1 %v13292_v19  ;;  %6971 = vmatprep.mubr.bf16.mxu0 %v13103_v41 }
 0x277   : > { %v13377_v0 = vadd.f32 %v9647_v47, %v9601_v42  ;;  %v9603_v44 = vpop.f32.mrf.mxu0  ;;  %7044 = vmatprep.mubr.bf16.mxu1 %v13302_v36 }
 0x278   : > { %v9604_v58 = vadd.f32 %v9603_v44, %v9602_v60  ;;  %v9649_v28 = vpop.f32.mrf.mxu1 }
 0x279   : > { %v9650_v3 = vadd.f32 %v9649_v28, %v9648_v1  ;;  %v9605_v55 = vpop.f32.mrf.mxu0 }
 0x27a   : > { %v9651_v45 = vpop.f32.mrf.mxu1 }
 0x27b   : > { %v13380_v37 = vadd.f32 %v9650_v3, %v9604_v58  ;;  %v9606_v25 = vpop.f32.mrf.mxu0 }
 0x27c   : > { %v9607_v21 = vadd.f32 %v9606_v25, %v9605_v55  ;;  %v9652_v15 = vpop.f32.mrf.mxu1 }
 0x27d   : > { %v9653_v32 = vadd.f32 %v9652_v15, %v9651_v45  ;;  %v9670_v14 = vpop.f32.mrf.mxu0  ;;  %6972 = vmatmul.mubr.bf16.gmra.mxu0 %v13141_v18 }
 0x27e   : > { %v9716_v41 = vpop.f32.mrf.mxu1  ;;  %7045 = vmatmul.mubr.bf16.gmra.mxu1 %v13331_v9 }
 0x27f   : > { %v13384_v19 = vadd.f32 %v9653_v32, %v9607_v21  ;;  %v9671_v36 = vpop.f32.mrf.mxu0 }
 0x280   : > { %v9672_v54 = vadd.f32 %v9671_v36, %v9670_v14  ;;  %v9717_v16 = vpop.f32.mrf.mxu1 }
 0x281   : > { %v13386_v11 = vadd.f32 %v9717_v16, %v9716_v41  ;;  %v9673_v17 = vpop.f32.mrf.mxu0  ;;  %v13709_v16 = vld [vmem:[#allocation2_spill] sm:$0xff] }
 0x282   : > { %v4993_v62 = vadd.f32 %v9672_v54, %v13348_v24  ;;  %v9719_v61 = vpop.f32.mrf.mxu1 }
 0x283   : > { %v9674_v48 = vpop.f32.mrf.mxu0 }
 0x284   : > { %v13390_v59 = vadd.f32 %v4993_v62, %v12960_v29  ;;  %v9675_v27 = vadd.f32 %v9674_v48, %v9673_v17  ;;  %v9720_v18 = vpop.f32.mrf.mxu1 }
 0x285   : > { %v13392_v43 = vadd.f32 %v9720_v18, %v9719_v61  ;;  %v9676_v9 = vpop.f32.mrf.mxu0 }
 0x286   : > { %v4996_v53 = vadd.f32 %v9675_v27, %v13353_v46  ;;  %v9722_v56 = vpop.f32.mrf.mxu1 }
 0x287   : > { %v9677_v33 = vpop.f32.mrf.mxu0 }
 0x288   : > { %v13396_v57 = vadd.f32 %v4996_v53, %v12986_v22  ;;  %v9678_v38 = vadd.f32 %v9677_v33, %v9676_v9  ;;  %v9723_v12 = vpop.f32.mrf.mxu1  ;;  %v13710_v9 = vld [vmem:[#allocation4_spill] sm:$0xff] }
 0x289   : > { %v13398_v24 = vadd.f32 %v9723_v12, %v9722_v56  ;;  %v9679_v8 = vpop.f32.mrf.mxu0 }
 0x28a   : > { %v5001_v29 = vadd.f32 %v9678_v38, %v13356_v34  ;;  %v9725_v39 = vpop.f32.mrf.mxu1 }
 0x28b   : > { %v9680_v42 = vpop.f32.mrf.mxu0 }
 0x28c   : > { %v13402_v30 = vadd.f32 %v5001_v29, %v13015_v2  ;;  %v9681_v47 = vadd.f32 %v9680_v42, %v9679_v8  ;;  %v9726_v60 = vpop.f32.mrf.mxu1 }
 0x28d   : > { %v13404_v46 = vadd.f32 %v9726_v60, %v9725_v39  ;;  %v9682_v1 = vpop.f32.mrf.mxu0  ;;  %v13711_v39 = vld [vmem:[#allocation3_spill] sm:$0xff] }
 0x28e   : > { %v5004_v22 = vadd.f32 %v9681_v47, %v13361_v63  ;;  %v9728_v44 = vpop.f32.mrf.mxu1 }
 0x28f   : > { %v9683_v58 = vpop.f32.mrf.mxu0 }
 0x290   : > { %v13408_v28 = vadd.f32 %v5004_v22, %v13039_v40  ;;  %v9684_v3 = vadd.f32 %v9683_v58, %v9682_v1  ;;  %v9729_v55 = vpop.f32.mrf.mxu1 }
 0x291   : > { %v13410_v34 = vadd.f32 %v9729_v55, %v9728_v44  ;;  %v9685_v45 = vpop.f32.mrf.mxu0 }
 0x292   : > { %v5009_v2 = vadd.f32 %v9684_v3, %v13364_v23  ;;  %v9731_v25 = vpop.f32.mrf.mxu1 }
 0x293   : > { %v9686_v21 = vpop.f32.mrf.mxu0 }
 0x294   : > { %v13414_v15 = vadd.f32 %v5009_v2, %v13067_v5  ;;  %v9687_v32 = vadd.f32 %v9686_v21, %v9685_v45  ;;  %v9732_v14 = vpop.f32.mrf.mxu1 }
 0x295   : > { %v13416_v63 = vadd.f32 %v9732_v14, %v9731_v25  ;;  %v9688_v41 = vpop.f32.mrf.mxu0  ;;  %v13712_v14 = vld [vmem:[#allocation5_spill] sm:$0xff] }
 0x296   : > { %v5012_v40 = vadd.f32 %v9687_v32, %v13369_v13  ;;  %v9734_v36 = vpop.f32.mrf.mxu1 }
 0x297   : > { %v9689_v54 = vpop.f32.mrf.mxu0 }
 0x298   : > { %v13420_v17 = vadd.f32 %v5012_v40, %v13709_v16  ;;  %v9690_v62 = vadd.f32 %v9689_v54, %v9688_v41  ;;  %v9735_v61 = vpop.f32.mrf.mxu1 }
 0x299   : > { %v13422_v23 = vadd.f32 %v9735_v61, %v9734_v36  ;;  %v9691_v48 = vpop.f32.mrf.mxu0 }
 0x29a   : > { %v5017_v5 = vadd.f32 %v9690_v62, %v13372_v49  ;;  %v9737_v27 = vpop.f32.mrf.mxu1 }
 0x29b   : > { %v9692_v18 = vpop.f32.mrf.mxu0 }
 0x29c   : > { %v13426_v53 = vadd.f32 %v5017_v5, %v13710_v9  ;;  %v9693_v56 = vadd.f32 %v9692_v18, %v9691_v48  ;;  %v9738_v33 = vpop.f32.mrf.mxu1 }
 0x29d   : > { %v13428_v13 = vadd.f32 %v9738_v33, %v9737_v27  ;;  %v9694_v38 = vpop.f32.mrf.mxu0 }
 0x29e   : > { %v5020_v12 = vadd.f32 %v9693_v56, %v13377_v0  ;;  %v9740_v8 = vpop.f32.mrf.mxu1 }
 0x29f   : > { %v9695_v29 = vpop.f32.mrf.mxu0 }
 0x2a0   : > { %v13432_v42 = vadd.f32 %v5020_v12, %v13711_v39  ;;  %v9696_v47 = vadd.f32 %v9695_v29, %v9694_v38  ;;  %v9741_v60 = vpop.f32.mrf.mxu1 }
 0x2a1   : > { %v13434_v49 = vadd.f32 %v9741_v60, %v9740_v8  ;;  %v9697_v1 = vpop.f32.mrf.mxu0 }
 0x2a2   : > { %v5025_v22 = vadd.f32 %v9696_v47, %v13380_v37  ;;  %v9743_v44 = vpop.f32.mrf.mxu1 }
 0x2a3   : > { %v9698_v58 = vpop.f32.mrf.mxu0 }
 0x2a4   : > { %v13438_v3 = vadd.f32 %v5025_v22, %v13159_v10  ;;  %v9699_v55 = vadd.f32 %v9698_v58, %v9697_v1  ;;  %v9744_v45 = vpop.f32.mrf.mxu1 }
 0x2a5   : > { %v13440_v0 = vadd.f32 %v9744_v45, %v9743_v44  ;;  %v9762_v2 = vpop.f32.mrf.mxu0 }
 0x2a6   : > { %v5028_v25 = vadd.f32 %v9699_v55, %v13384_v19  ;;  %v9808_v21 = vpop.f32.mrf.mxu1 }
 0x2a7   : > { %v9763_v32 = vpop.f32.mrf.mxu0 }
 0x2a8   : > { %v13444_v41 = vadd.f32 %v5028_v25, %v13712_v14  ;;  %v9764_v40 = vadd.f32 %v9763_v32, %v9762_v2  ;;  %v9809_v36 = vpop.f32.mrf.mxu1 }
 0x2a9   : > { %v9810_v37 = vadd.f32 %v9809_v36, %v9808_v21  ;;  %v9765_v54 = vpop.f32.mrf.mxu0 }
 0x2aa   : > { %v5534_v16 = vadd.f32 %v9764_v40, %v13386_v11  ;;  %v9811_v10 = vpop.f32.mrf.mxu1 }
 0x2ab   : > { %v9766_v62 = vpop.f32.mrf.mxu0 }
 0x2ac   : > { %v5607_v61 = vadd.f32 %v9810_v37, %v5534_v16  ;;  %v9767_v48 = vadd.f32 %v9766_v62, %v9765_v54  ;;  %v9812_v5 = vpop.f32.mrf.mxu1 }
 0x2ad   : > { %v9813_v27 = vadd.f32 %v9812_v5, %v9811_v10  ;;  %v9768_v18 = vpop.f32.mrf.mxu0 }
 0x2ae   : > { %v13448_v19 = vadd.f32 %v5607_v61, %v13192_v35  ;;  %v5537_v9 = vadd.f32 %v9767_v48, %v13392_v43  ;;  %v9814_v56 = vpop.f32.mrf.mxu1 }
 0x2af   : > { %v9769_v33 = vpop.f32.mrf.mxu0 }
 0x2b0   : > { %v5610_v38 = vadd.f32 %v9813_v27, %v5537_v9  ;;  %v9770_v12 = vadd.f32 %v9769_v33, %v9768_v18  ;;  %v9815_v8 = vpop.f32.mrf.mxu1 }
 0x2b1   : > { %v9816_v29 = vadd.f32 %v9815_v8, %v9814_v56  ;;  %v9771_v39 = vpop.f32.mrf.mxu0 }
 0x2b2   : > { %v13452_v11 = vadd.f32 %v5610_v38, %v13214_v31  ;;  %v5542_v47 = vadd.f32 %v9770_v12, %v13398_v24  ;;  %v9817_v60 = vpop.f32.mrf.mxu1 }
 0x2b3   : > { %v9772_v1 = vpop.f32.mrf.mxu0 }
 0x2b4   : > { %v5615_v22 = vadd.f32 %v9816_v29, %v5542_v47  ;;  %v9773_v44 = vadd.f32 %v9772_v1, %v9771_v39  ;;  %v9818_v35 = vpop.f32.mrf.mxu1 }
 0x2b5   : > { %v9819_v58 = vadd.f32 %v9818_v35, %v9817_v60  ;;  %v9774_v55 = vpop.f32.mrf.mxu0 }
 0x2b6   : > { %v13456_v43 = vadd.f32 %v5615_v22, %v13234_v4  ;;  %v5545_v45 = vadd.f32 %v9773_v44, %v13404_v46  ;;  %v9820_v2 = vpop.f32.mrf.mxu1 }
 0x2b7   : > { %v9775_v25 = vpop.f32.mrf.mxu0 }
 0x2b8   : > { %v5618_v21 = vadd.f32 %v9819_v58, %v5545_v45  ;;  %v9776_v32 = vadd.f32 %v9775_v25, %v9774_v55  ;;  %v9821_v31 = vpop.f32.mrf.mxu1 }
 0x2b9   : > { %v9822_v14 = vadd.f32 %v9821_v31, %v9820_v2  ;;  %v9777_v40 = vpop.f32.mrf.mxu0 }
 0x2ba   : > { %v13460_v24 = vadd.f32 %v5618_v21, %v13256_v26  ;;  %v5550_v36 = vadd.f32 %v9776_v32, %v13410_v34  ;;  %v9823_v37 = vpop.f32.mrf.mxu1 }
 0x2bb   : > { %v9778_v54 = vpop.f32.mrf.mxu0 }
 0x2bc   : > { %v5623_v16 = vadd.f32 %v9822_v14, %v5550_v36  ;;  %v9779_v10 = vadd.f32 %v9778_v54, %v9777_v40  ;;  %v9824_v4 = vpop.f32.mrf.mxu1 }
 0x2bd   : > { %v9825_v62 = vadd.f32 %v9824_v4, %v9823_v37  ;;  %v9780_v61 = vpop.f32.mrf.mxu0 }
 0x2be   : > { %v13464_v46 = vadd.f32 %v5623_v16, %v13276_v52  ;;  %v5553_v48 = vadd.f32 %v9779_v10, %v13416_v63  ;;  %v9826_v5 = vpop.f32.mrf.mxu1 }
 0x2bf   : > { %v9781_v27 = vpop.f32.mrf.mxu0 }
 0x2c0   : > { %v5626_v18 = vadd.f32 %v9825_v62, %v5553_v48  ;;  %v9782_v9 = vadd.f32 %v9781_v27, %v9780_v61  ;;  %v9827_v26 = vpop.f32.mrf.mxu1 }
 0x2c1   : > { %v9828_v56 = vadd.f32 %v9827_v26, %v9826_v5  ;;  %v9783_v33 = vpop.f32.mrf.mxu0 }
 0x2c2   : > { %v13468_v34 = vadd.f32 %v5626_v18, %v13298_v50  ;;  %v5558_v38 = vadd.f32 %v9782_v9, %v13422_v23  ;;  %v9829_v12 = vpop.f32.mrf.mxu1 }
 0x2c3   : > { %v9784_v8 = vpop.f32.mrf.mxu0 }
 0x2c4   : > { %v5631_v29 = vadd.f32 %v9828_v56, %v5558_v38  ;;  %v9785_v39 = vadd.f32 %v9784_v8, %v9783_v33  ;;  %v9830_v52 = vpop.f32.mrf.mxu1 }
 0x2c5   : > { %v9831_v47 = vadd.f32 %v9830_v52, %v9829_v12  ;;  %v9786_v60 = vpop.f32.mrf.mxu0 }
 0x2c6   : > { %v13472_v63 = vadd.f32 %v5631_v29, %v13318_v20  ;;  %v5561_v1 = vadd.f32 %v9785_v39, %v13428_v13  ;;  %v9832_v22 = vpop.f32.mrf.mxu1 }
 0x2c7   : > { %v9787_v44 = vpop.f32.mrf.mxu0 }
 0x2c8   : > { %v5634_v35 = vadd.f32 %v9831_v47, %v5561_v1  ;;  %v9788_v58 = vadd.f32 %v9787_v44, %v9786_v60  ;;  %v9833_v50 = vpop.f32.mrf.mxu1 }
 0x2c9   : > { %v9834_v55 = vadd.f32 %v9833_v50, %v9832_v22  ;;  %v9789_v45 = vpop.f32.mrf.mxu0 }
 0x2ca   : > { %v13476_v23 = vadd.f32 %v5634_v35, %v13334_v51  ;;  %v5566_v2 = vadd.f32 %v9788_v58, %v13434_v49  ;;  %v9835_v25 = vpop.f32.mrf.mxu1 }
 0x2cb   : > { %v9790_v21 = vpop.f32.mrf.mxu0 }
 0x2cc   : > { %v5639_v32 = vadd.f32 %v9834_v55, %v5566_v2  ;;  %v9791_v31 = vadd.f32 %v9790_v21, %v9789_v45  ;;  %v9836_v20 = vpop.f32.mrf.mxu1 }
 0x2cd   : > { %v9837_v14 = vadd.f32 %v9836_v20, %v9835_v25  ;;  %v9854_v40 = vpop.f32.mrf.mxu0 }
 0x2ce   : > { %v13480_v13 = vadd.f32 %v5639_v32, %v13339_v6  ;;  %v5569_v36 = vadd.f32 %v9791_v31, %v13440_v0  ;;  %v9900_v37 = vpop.f32.mrf.mxu1 }
 0x2cf   : > { %v9855_v54 = vpop.f32.mrf.mxu0 }
 0x2d0   : > { %v5642_v16 = vadd.f32 %v9837_v14, %v5569_v36  ;;  %v9856_v10 = vadd.f32 %v9855_v54, %v9854_v40  ;;  %v9901_v51 = vpop.f32.mrf.mxu1 }
 0x2d1   : > { %v9902_v4 = vadd.f32 %v9901_v51, %v9900_v37  ;;  %v9857_v62 = vpop.f32.mrf.mxu0 }
 0x2d2   : > { %v13484_v49 = vadd.f32 %v5642_v16, %v13346_v7  ;;  %v9903_v61 = vpop.f32.mrf.mxu1 }
 0x2d3   : > { %v13486_v48 = vadd.f32 %v9902_v4, %v9856_v10  ;;  %v9858_v5 = vpop.f32.mrf.mxu0 }
 0x2d4   : > { %v9859_v27 = vadd.f32 %v9858_v5, %v9857_v62  ;;  %v9904_v18 = vpop.f32.mrf.mxu1 }
 0x2d5   : > { %v9905_v6 = vadd.f32 %v9904_v18, %v9903_v61  ;;  %v9860_v9 = vpop.f32.mrf.mxu0 }
 0x2d6   : > { %v9906_v26 = vpop.f32.mrf.mxu1 }
 0x2d7   : > { %v13488_v0 = vadd.f32 %v9905_v6, %v9859_v27  ;;  %v9861_v56 = vpop.f32.mrf.mxu0 }
 0x2d8   : > { %v9862_v33 = vadd.f32 %v9861_v56, %v9860_v9  ;;  %v9907_v38 = vpop.f32.mrf.mxu1 }
 0x2d9   : > { %v9908_v12 = vadd.f32 %v9907_v38, %v9906_v26  ;;  %v9863_v8 = vpop.f32.mrf.mxu0 }
 0x2da   : > { %v9909_v29 = vpop.f32.mrf.mxu1 }
 0x2db   : > { %v13490_v39 = vadd.f32 %v9908_v12, %v9862_v33  ;;  %v9864_v7 = vpop.f32.mrf.mxu0 }
 0x2dc   : > { %v9865_v52 = vadd.f32 %v9864_v7, %v9863_v8  ;;  %v9910_v47 = vpop.f32.mrf.mxu1 }
 0x2dd   : > { %v9911_v60 = vadd.f32 %v9910_v47, %v9909_v29  ;;  %v9866_v1 = vpop.f32.mrf.mxu0 }
 0x2de   : > { %v9912_v22 = vpop.f32.mrf.mxu1 }
 0x2df   : > { %v13492_v44 = vadd.f32 %v9911_v60, %v9865_v52  ;;  %v9867_v35 = vpop.f32.mrf.mxu0 }
 0x2e0   : > { %v9868_v58 = vadd.f32 %v9867_v35, %v9866_v1  ;;  %v9913_v50 = vpop.f32.mrf.mxu1 }
 0x2e1   : > { %v9914_v55 = vadd.f32 %v9913_v50, %v9912_v22  ;;  %v9869_v45 = vpop.f32.mrf.mxu0 }
 0x2e2   : > { %v9915_v2 = vpop.f32.mrf.mxu1 }
 0x2e3   : > { %v13494_v25 = vadd.f32 %v9914_v55, %v9868_v58  ;;  %v9870_v21 = vpop.f32.mrf.mxu0 }
 0x2e4   : > { %v9871_v32 = vadd.f32 %v9870_v21, %v9869_v45  ;;  %v9916_v31 = vpop.f32.mrf.mxu1 }
 0x2e5   : > { %v9917_v20 = vadd.f32 %v9916_v31, %v9915_v2  ;;  %v9872_v14 = vpop.f32.mrf.mxu0 }
 0x2e6   : > { %v9918_v40 = vpop.f32.mrf.mxu1 }
 0x2e7   : > { %v13496_v36 = vadd.f32 %v9917_v20, %v9871_v32  ;;  %v9873_v37 = vpop.f32.mrf.mxu0 }
 0x2e8   : > { %v9874_v54 = vadd.f32 %v9873_v37, %v9872_v14  ;;  %v9919_v16 = vpop.f32.mrf.mxu1 }
 0x2e9   : > { %v9920_v10 = vadd.f32 %v9919_v16, %v9918_v40  ;;  %v9875_v51 = vpop.f32.mrf.mxu0 }
 0x2ea   : > { %v9921_v4 = vpop.f32.mrf.mxu1 }
 0x2eb   : > { %v13498_v62 = vadd.f32 %v9920_v10, %v9874_v54  ;;  %v9876_v61 = vpop.f32.mrf.mxu0 }
 0x2ec   : > { %v9877_v5 = vadd.f32 %v9876_v61, %v9875_v51  ;;  %v9922_v27 = vpop.f32.mrf.mxu1 }
 0x2ed   : > { %v9923_v18 = vadd.f32 %v9922_v27, %v9921_v4  ;;  %v9878_v6 = vpop.f32.mrf.mxu0 }
 0x2ee   : > { %v9924_v9 = vpop.f32.mrf.mxu1 }
 0x2ef   : > { %v13500_v26 = vadd.f32 %v9923_v18, %v9877_v5  ;;  %v9879_v56 = vpop.f32.mrf.mxu0 }
 0x2f0   : > { %v9880_v33 = vadd.f32 %v9879_v56, %v9878_v6  ;;  %v9925_v38 = vpop.f32.mrf.mxu1 }
 0x2f1   : > { %v9926_v12 = vadd.f32 %v9925_v38, %v9924_v9  ;;  %v9881_v8 = vpop.f32.mrf.mxu0 }
 0x2f2   : > { %v9927_v29 = vpop.f32.mrf.mxu1 }
 0x2f3   : > { %v13502_v7 = vadd.f32 %v9926_v12, %v9880_v33  ;;  %v9882_v52 = vpop.f32.mrf.mxu0 }
 0x2f4   : > { %v9883_v47 = vadd.f32 %v9882_v52, %v9881_v8  ;;  %v9928_v60 = vpop.f32.mrf.mxu1 }
 0x2f5   : > { %v9929_v1 = vadd.f32 %v9928_v60, %v9927_v29  ;;  %v9946_v22 = vpop.f32.mrf.mxu0 }
 0x2f6   : > { %v13504_v35 = vpop.f32.mrf.mxu1 }
 0x2f7   : > { %v13506_v58 = vadd.f32 %v9929_v1, %v9883_v47  ;;  %v9947_v50 = vpop.f32.mrf.mxu0 }
 0x2f8   : > { %v9948_v55 = vadd.f32 %v9947_v50, %v9946_v22  ;;  %v13508_v45 = vpop.f32.mrf.mxu1 }
 0x2f9   : > { %v9949_v2 = vpop.f32.mrf.mxu0 }
 0x2fa   : > { %v6401_v21 = vadd.f32 %v9948_v55, %v13486_v48  ;;  %v13511_v32 = vpop.f32.mrf.mxu1 }
 0x2fb   : > { %v9950_v31 = vpop.f32.mrf.mxu0 }
 0x2fc   : > { %v13514_v20 = vadd.f32 %v6401_v21, %v13390_v59  ;;  %v9951_v14 = vadd.f32 %v9950_v31, %v9949_v2  ;;  %v13516_v40 = vpop.f32.mrf.mxu1 }
 0x2fd   : > { %v9952_v37 = vpop.f32.mrf.mxu0 }
 0x2fe   : > { %v6404_v54 = vadd.f32 %v9951_v14, %v13488_v0  ;;  %v13519_v16 = vpop.f32.mrf.mxu1 }
 0x2ff   : > { %v9953_v10 = vpop.f32.mrf.mxu0 }
 0x300   : > { %v13522_v51 = vadd.f32 %v6404_v54, %v13396_v57  ;;  %v9954_v4 = vadd.f32 %v9953_v10, %v9952_v37  ;;  %v13524_v48 = vpop.f32.mrf.mxu1 }
 0x301   : > { %v9955_v61 = vpop.f32.mrf.mxu0 }
 0x302   : > { %v6409_v5 = vadd.f32 %v9954_v4, %v13490_v39  ;;  %v13527_v59 = vpop.f32.mrf.mxu1 }
 0x303   : > { %v9956_v27 = vpop.f32.mrf.mxu0 }
 0x304   : > { %v13530_v18 = vadd.f32 %v6409_v5, %v13402_v30  ;;  %v9957_v6 = vadd.f32 %v9956_v27, %v9955_v61  ;;  %v13532_v0 = vpop.f32.mrf.mxu1 }
 0x305   : > { %v9958_v9 = vpop.f32.mrf.mxu0 }
 0x306   : > { %v6412_v56 = vadd.f32 %v9957_v6, %v13492_v44  ;;  %v13535_v57 = vpop.f32.mrf.mxu1 }
 0x307   : > { %v9959_v33 = vpop.f32.mrf.mxu0 }
 0x308   : > { %v13538_v38 = vadd.f32 %v6412_v56, %v13408_v28  ;;  %v9960_v12 = vadd.f32 %v9959_v33, %v9958_v9  ;;  %v13540_v39 = vpop.f32.mrf.mxu1 }
 0x309   : > { %v9961_v8 = vpop.f32.mrf.mxu0 }
 0x30a   : > { %v6417_v29 = vadd.f32 %v9960_v12, %v13494_v25  ;;  %v13543_v30 = vpop.f32.mrf.mxu1 }
 0x30b   : > { %v9962_v52 = vpop.f32.mrf.mxu0 }
 0x30c   : > { %v13546_v47 = vadd.f32 %v6417_v29, %v13414_v15  ;;  %v9963_v60 = vadd.f32 %v9962_v52, %v9961_v8  ;;  %v13548_v44 = vpop.f32.mrf.mxu1 }
 0x30d   : > { %v9964_v1 = vpop.f32.mrf.mxu0 }
 0x30e   : > { %v6420_v22 = vadd.f32 %v9963_v60, %v13496_v36  ;;  %v13551_v28 = vpop.f32.mrf.mxu1  ;;  %v9994_v60 = vadd.f32 %v13508_v45, %v13504_v35 }
 0x30f   : > { %v9965_v50 = vpop.f32.mrf.mxu0 }
 0x310   : > { %v13554_v55 = vadd.f32 %v6420_v22, %v13420_v17  ;;  %v9966_v2 = vadd.f32 %v9965_v50, %v9964_v1  ;;  %v13556_v25 = vpop.f32.mrf.mxu1  ;;  %v7100_v50 = vlaneseq }
 0x311   : > { %v9967_v21 = vpop.f32.mrf.mxu0 }
 0x312   : > { %v6425_v31 = vadd.f32 %v9966_v2, %v13498_v62  ;;  %v13559_v15 = vpop.f32.mrf.mxu1 }
 0x313   : > { %v9968_v14 = vpop.f32.mrf.mxu0 }
 0x314   : > { %v13562_v37 = vadd.f32 %v6425_v31, %v13426_v53  ;;  %v9969_v54 = vadd.f32 %v9968_v14, %v9967_v21  ;;  %v13564_v36 = vpop.f32.mrf.mxu1 }
 0x315   : > { %v9970_v10 = vpop.f32.mrf.mxu0 }
 0x316   : > { %v6428_v4 = vadd.f32 %v9969_v54, %v13500_v26  ;;  %v13567_v17 = vpop.f32.mrf.mxu1  ;;  %v9997_v54 = vadd.f32 %v13516_v40, %v13511_v32  ;;  %v10000_v32 = vadd.f32 %v13524_v48, %v13519_v16  ;;  %v10003_v16 = vadd.f32 %v13532_v0, %v13527_v59 }
 0x317   : > { %v9971_v61 = vpop.f32.mrf.mxu0 }
 0x318   : > { %v13570_v5 = vadd.f32 %v6428_v4, %v13432_v42  ;;  %v9972_v27 = vadd.f32 %v9971_v61, %v9970_v10  ;;  %v13572_v62 = vpop.f32.mrf.mxu1  ;;  %v13590_v61 = vshrl.u32 %v7100_v50, 7 }
 0x319   : > { %v9973_v6 = vpop.f32.mrf.mxu0 }
 0x31a   : > { %v6433_v9 = vadd.f32 %v9972_v27, %v13502_v7  ;;  %v13575_v53 = vpop.f32.mrf.mxu1  ;;  %v7104_v0 = vadd.s32 24, %v13590_v61 }
 0x31b   : > { %v9974_v56 = vpop.f32.mrf.mxu0 }
 0x31c   : > { %v13578_v33 = vadd.f32 %v6433_v9, %v13438_v3  ;;  %v9975_v12 = vadd.f32 %v9974_v56, %v9973_v6  ;;  %v13580_v26 = vpop.f32.mrf.mxu1  ;;  %v13596_v9 = vld [vmem:[%s13685_s2] ss:$0 sm:$0xff]  ;;  %v7102_v56 = vadd.s32 8, %v13590_v61 }
 0x31d   : > { %v10038_v8 = vpop.f32.mrf.mxu0 }
 0x31e   : > { %v6436_v29 = vadd.f32 %v9975_v12, %v13506_v58  ;;  %v10084_v42 = vpop.f32.mrf.mxu1 }
 0x31f   : > { %v10039_v52 = vpop.f32.mrf.mxu0 }
 0x320   : > { %v13586_v1 = vadd.f32 %v6436_v29, %v13444_v41  ;;  %v10040_v7 = vadd.f32 %v10039_v52, %v10038_v8  ;;  %v10085_v22 = vpop.f32.mrf.mxu1 }
 0x321   : > { %v10041_v2 = vpop.f32.mrf.mxu0  ;;  %v10086_v21 = vadd.f32 %v10085_v22, %v10084_v42 }
 0x322   : > { %v6942_v3 = vadd.f32 %v10040_v7, %v9994_v60  ;;  %v10087_v31 = vpop.f32.mrf.mxu1 }
 0x323   : > { %v10042_v14 = vpop.f32.mrf.mxu0 }
 0x324   : > { %v7015_v58 = vadd.f32 %v10086_v21, %v6942_v3  ;;  %v10043_v10 = vadd.f32 %v10042_v14, %v10041_v2  ;;  %v10088_v4 = vpop.f32.mrf.mxu1  ;;  %v7112_v3 = vand.u32 7, %v7102_v56 }
 0x325   : > { %v10044_v35 = vpop.f32.mrf.mxu0  ;;  %v10089_v27 = vadd.f32 %v10088_v4, %v10087_v31 }
 0x326   : > { %v7053_v41 = vadd.f32 %v7015_v58, %v13448_v19  ;;  %v6945_v45 = vadd.f32 %v10043_v10, %v9997_v54  ;;  %v10090_v6 = vpop.f32.mrf.mxu1  ;;  %v7111_v19 = vand.u32 7, %v13590_v61  ;;  %vm7122_vm1 = vcmp.lt.s32.totalorder %v7112_v3, 5 }
 0x327   : > { %v10045_v12 = vpop.f32.mrf.mxu0 }
 0x328   : > { %v7063_v40 = vmax.f32 %v13514_v20, %v7053_v41  ;;  %v7018_v8 = vadd.f32 %v10089_v27, %v6945_v45  ;;  %v10046_v29 = vadd.f32 %v10045_v12, %v10044_v35  ;;  %v10091_v42 = vpop.f32.mrf.mxu1  ;;  %vm13608_vm0 = vcmp.lt.s32.totalorder %v7111_v19, 5 }
 0x329   : > { %v10047_v52 = vpop.f32.mrf.mxu0  ;;  %v10092_v50 = vadd.f32 %v10091_v42, %v10090_v6 }
 0x32a   : > { %v7080_v60 = vadd.f32 %v13596_v9, %v7063_v40  ;;  %v7054_v7 = vadd.f32 %v7018_v8, %v13452_v11  ;;  %v6950_v22 = vadd.f32 %v10046_v29, %v10000_v32  ;;  %v10093_v2 = vpop.f32.mrf.mxu1  ;;  %v7103_v11 = vadd.s32 16, %v13590_v61 }
 0x32b   : > { %v10048_v21 = vpop.f32.mrf.mxu0 }
 0x32c   : > { %v7064_v20 = vmax.f32 %v13522_v51, %v7054_v7  ;;  %v7023_v48 = vadd.f32 %v10092_v50, %v6950_v22  ;;  %v10049_v31 = vadd.f32 %v10048_v21, %v10047_v52  ;;  %v10094_v14 = vpop.f32.mrf.mxu1  ;;  %v7090_v54 = vmax.f32 %v7080_v60, 0.0 }
 0x32d   : > { %v10050_v10 = vpop.f32.mrf.mxu0  ;;  %v10095_v45 = vadd.f32 %v10094_v14, %v10093_v2  ;;  %v10006_v51 = vadd.f32 %v13540_v39, %v13535_v57  ;;  %v7114_v22 = vand.u32 7, %v7104_v0 }
 0x32e   : > { %v7081_v4 = vadd.f32 %v13596_v9, %v7064_v20  ;;  %v7055_v35 = vadd.f32 %v7023_v48, %v13456_v43  ;;  %v6953_v41 = vadd.f32 %v10049_v31, %v10003_v16  ;;  %v10096_v59 = vpop.f32.mrf.mxu1  ;;  %v7131_v8 = vsel %vm13608_vm0, %v7090_v54, 0.0 }
 0x32f   : > { %v10051_v27 = vpop.f32.mrf.mxu0  ;;  %v7113_v43 = vand.u32 7, %v7103_v11  ;;  %vm7124_vm3 = vcmp.lt.s32.totalorder %v7114_v22, 5  ;;  %v7106_v11 = vadd.s32 40, %v13590_v61 }
 0x330   : > { %v7091_v6 = vmax.f32 %v7081_v4, 0.0  ;;  %v7065_v56 = vmax.f32 %v13530_v18, %v7055_v35  ;;  %v7026_v12 = vadd.f32 %v10095_v45, %v6953_v41  ;;  %v10052_v32 = vadd.f32 %v10051_v27, %v10050_v10  ;;  %v10097_v40 = vpop.f32.mrf.mxu1 }
 0x331   : > { %v10098_v29 = vadd.f32 %v10097_v40, %v10096_v59  ;;  %v10053_v42 = vpop.f32.mrf.mxu0  ;;  %v10009_v18 = vadd.f32 %v13548_v44, %v13543_v30  ;;  %vm13626_vm2 = vcmp.lt.s32.totalorder %v7113_v43, 5  ;;  %v7116_v40 = vand.u32 7, %v7106_v11 }
 0x332   : > { %v7132_v19 = vsel %vm7122_vm1, %v7091_v6, 0.0  ;;  %v7082_v52 = vadd.f32 %v13596_v9, %v7065_v56  ;;  %v7056_v57 = vadd.f32 %v7026_v12, %v13460_v24  ;;  %v6958_v39 = vadd.f32 %v10052_v32, %v10006_v51  ;;  %v10099_v60 = vpop.f32.mrf.mxu1 }
 0x333   : > { %v7141_v7 = vmax.f32 %v7131_v8, %v7132_v19  ;;  %v10054_v50 = vpop.f32.mrf.mxu0  ;;  %v7105_v24 = vadd.s32 32, %v13590_v61  ;;  %vm7126_vm5 = vcmp.lt.s32.totalorder %v7116_v40, 5 }
 0x334   : > { %v7066_v2 = vmax.f32 %v13538_v38, %v7056_v57  ;;  %v7031_v3 = vadd.f32 %v10098_v29, %v6958_v39  ;;  %v10055_v21 = vadd.f32 %v10054_v50, %v10053_v42  ;;  %v10100_v16 = vpop.f32.mrf.mxu1  ;;  %v7092_v20 = vmax.f32 %v7082_v52, 0.0 }
 0x335   : > { %v10056_v31 = vpop.f32.mrf.mxu0  ;;  %v10101_v30 = vadd.f32 %v10100_v16, %v10099_v60  ;;  %v10012_v38 = vadd.f32 %v13556_v25, %v13551_v28  ;;  %v7115_v51 = vand.u32 7, %v7105_v24 }
 0x336   : > { %v7083_v14 = vadd.f32 %v13596_v9, %v7066_v2  ;;  %v7057_v54 = vadd.f32 %v7031_v3, %v13464_v46  ;;  %v6961_v58 = vadd.f32 %v10055_v21, %v10009_v18  ;;  %v10102_v44 = vpop.f32.mrf.mxu1  ;;  %v7133_v46 = vsel %vm13626_vm2, %v7092_v20, 0.0 }
 0x337   : > { %v10057_v10 = vpop.f32.mrf.mxu0  ;;  %vm13650_vm4 = vcmp.lt.s32.totalorder %v7115_v51, 5  ;;  %v7108_v18 = vadd.s32 56, %v13590_v61 }
 0x338   : > { %v7093_v4 = vmax.f32 %v7083_v14, 0.0  ;;  %v7067_v35 = vmax.f32 %v13546_v47, %v7057_v54  ;;  %v7034_v41 = vadd.f32 %v10101_v30, %v6961_v58  ;;  %v10058_v45 = vadd.f32 %v10057_v10, %v10056_v31  ;;  %v10103_v59 = vpop.f32.mrf.mxu1 }
 0x339   : > { %v10104_v0 = vadd.f32 %v10103_v59, %v10102_v44  ;;  %v10059_v27 = vpop.f32.mrf.mxu0  ;;  %v10015_v47 = vadd.f32 %v13564_v36, %v13559_v15 }
 0x33a   : > { %v7134_v6 = vsel %vm7124_vm3, %v7093_v4, 0.0  ;;  %v7084_v28 = vadd.f32 %v13596_v9, %v7067_v35  ;;  %v7058_v25 = vadd.f32 %v7034_v41, %v13468_v34  ;;  %v6966_v56 = vadd.f32 %v10058_v45, %v10012_v38  ;;  %v10105_v12 = vpop.f32.mrf.mxu1 }
 0x33b   : > { %v7144_v32 = vmax.f32 %v7133_v46, %v7134_v6  ;;  %v10060_v8 = vpop.f32.mrf.mxu0  ;;  %v7118_v38 = vand.u32 7, %v7108_v18 }
 0x33c   : > { %v7068_v43 = vmax.f32 %v13554_v55, %v7058_v25  ;;  %v7039_v29 = vadd.f32 %v10104_v0, %v6966_v56  ;;  %v10061_v42 = vadd.f32 %v10060_v8, %v10059_v27  ;;  %v10106_v19 = vpop.f32.mrf.mxu1  ;;  %v7094_v52 = vmax.f32 %v7084_v28, 0.0 }
 0x33d   : > { %v8726_v34 = vpack.c.bf16 %v7144_v32, %v7141_v7  ;;  %v10062_v39 = vpop.f32.mrf.mxu0  ;;  %v10107_v22 = vadd.f32 %v10106_v19, %v10105_v12  ;;  %v10018_v55 = vadd.f32 %v13572_v62, %v13567_v17  ;;  %v7107_v7 = vadd.s32 48, %v13590_v61 }
 0x33e   : > { %v7085_v15 = vadd.f32 %v13596_v9, %v7068_v43  ;;  %v7059_v36 = vadd.f32 %v7039_v29, %v13472_v63  ;;  %v6969_v60 = vadd.f32 %v10061_v42, %v10015_v47  ;;  %v10108_v50 = vpop.f32.mrf.mxu1  ;;  %v7135_v63 = vsel %vm13650_vm4, %v7094_v52, 0.0 }
 0x33f   : > { %8727 = vst [vmem:[%s13647_s18] sm:$0xff] %v8726_v34   ;;  %v10063_v2 = vpop.f32.mrf.mxu0  ;;  %v7117_v44 = vand.u32 7, %v7107_v7  ;;  %vm7128_vm7 = vcmp.lt.s32.totalorder %v7118_v38, 5  ;;  %v7109_v0 = vadd.s32 64, %v13590_v61  ;;  %v7110_v27 = vadd.s32 72, %v13590_v61 }
 0x340   : > { %v7095_v3 = vmax.f32 %v7085_v15, 0.0  ;;  %v7069_v21 = vmax.f32 %v13562_v37, %v7059_v36  ;;  %v7042_v16 = vadd.f32 %v10107_v22, %v6969_v60  ;;  %v10064_v20 = vadd.f32 %v10063_v2, %v10062_v39  ;;  %v10109_v48 = vpop.f32.mrf.mxu1 }
 0x341   : > { %v10110_v24 = vadd.f32 %v10109_v48, %v10108_v50  ;;  %v10065_v31 = vpop.f32.mrf.mxu0  ;;  %v10021_v37 = vadd.f32 %v13580_v26, %v13575_v53  ;;  %vm7127_vm6 = vcmp.lt.s32.totalorder %v7117_v44, 5  ;;  %v7119_v12 = vand.u32 7, %v7109_v0 }
 0x342   : > { %v7136_v14 = vsel %vm7126_vm5, %v7095_v3, 0.0  ;;  %v7086_v17 = vadd.f32 %v13596_v9, %v7069_v21  ;;  %v7060_v62 = vadd.f32 %v7042_v16, %v13476_v23  ;;  %v6974_v54 = vadd.f32 %v10064_v20, %v10018_v55  ;;  %v10111_v58 = vpop.f32.mrf.mxu1 }
 0x343   : > { %v7148_v30 = vmax.f32 %v7135_v63, %v7136_v14  ;;  %v10066_v11 = vpop.f32.mrf.mxu0  ;;  %v7120_v32 = vand.u32 7, %v7110_v27  ;;  %vm7129_vm8 = vcmp.lt.s32.totalorder %v7119_v12, 5 }
 0x344   : > { %v7070_v10 = vmax.f32 %v13570_v5, %v7060_v62  ;;  %v7047_v4 = vadd.f32 %v10110_v24, %v6974_v54  ;;  %v10067_v35 = vadd.f32 %v10066_v11, %v10065_v31  ;;  %v10112_v41 = vpop.f32.mrf.mxu1  ;;  %v7096_v45 = vmax.f32 %v7086_v17, 0.0 }
 0x345   : > { %v10113_v51 = vadd.f32 %v10112_v41, %v10111_v58  ;;  %vm7130_vm9 = vcmp.lt.s32.totalorder %v7120_v32, 5 }
 0x346   : > { %v7087_v59 = vadd.f32 %v13596_v9, %v7070_v10  ;;  %v7061_v46 = vadd.f32 %v7047_v4, %v13480_v13  ;;  %v6977_v23 = vadd.f32 %v10067_v35, %v10021_v37  ;;  %v7137_v6 = vsel %vm7127_vm6, %v7096_v45, 0.0 }
 0x348   : > { %v7097_v53 = vmax.f32 %v7087_v59, 0.0  ;;  %v7071_v5 = vmax.f32 %v13578_v33, %v7061_v46  ;;  %v7050_v26 = vadd.f32 %v10113_v51, %v6977_v23 }
 0x34a   : > { %v7138_v28 = vsel %vm7128_vm7, %v7097_v53, 0.0  ;;  %v7088_v25 = vadd.f32 %v13596_v9, %v7071_v5  ;;  %v7062_v56 = vadd.f32 %v7050_v26, %v13484_v49 }
 0x34b   : > { %v7152_v13 = vmax.f32 %v7137_v6, %v7138_v28 }
 0x34c   : > { %v7072_v40 = vmax.f32 %v13586_v1, %v7062_v56  ;;  %v7098_v47 = vmax.f32 %v7088_v25, 0.0 }
 0x34d   : > { %v8731_v8 = vpack.c.bf16 %v7152_v13, %v7148_v30 }
 0x34e   : > { %v7089_v61 = vadd.f32 %v13596_v9, %v7072_v40  ;;  %v7139_v43 = vsel %vm7129_vm8, %v7098_v47, 0.0 }
 0x34f   : > { %8733 = vst [vmem:[%s13647_s18 + $0x8] sm:$0xff] %v8731_v8  }
 0x350   : > { %v7099_v33 = vmax.f32 %v7089_v61, 0.0 }
 0x352   : > { %v7140_v29 = vsel %vm7130_vm9, %v7099_v33, 0.0 }
 0x353   : > { %v7156_v42 = vmax.f32 %v7139_v43, %v7140_v29 }
 0x355   : > { %v7157_v19 = vpack.c.bf16 %v7156_v42, %v7156_v42 }
 0x357   : > { %8720 = vst [vmem:[%s13647_s18 + $0x10] sm:$0xf] %v7157_v19 }
 0x358 PF: > { %s13_s12 = sadd.s32 1, %s10824_s12  }
 0x359   : > { %p10_p4 = scmp.ge.s32.totalorder %s13_s12, 4  }
 0x35b   :  { %12 = sbr.rel (!%p10_p4) target bundleno = 1 (0x1), region = 75 }

</bundles_post_ra>
